<compile_context>
chip_gen: v6e
topology: v6e:2x2x1
jax: 0.10.0
libtpu: 0.0.40
codegen_flags: <defaults>
</compile_context>

<pallas_src>
import math

import jax
import jax.numpy as jnp
from jax.experimental import pallas as pl
from jax.experimental.pallas import tpu as pltpu


def _ru(x, m):
    return ((x + m - 1) // m) * m


_VMEM_LIMIT = 48 * 1024 * 1024   # <= v7x 64 MiB physical; plenty on v5e/v6e


# -----------------------------------------------------------------------------
# Pallas kernels
# -----------------------------------------------------------------------------

def _gemm_bn_act_kernel(a_ref, b_ref, s_ref, t_ref, al_ref, o_ref, acc_ref):
    """Tiled GEMM, fused (y*scale + shift) + PReLU(alpha) epilogue, bf16 out."""
    k = pl.program_id(2)

    @pl.when(k == 0)
    def _init():
        acc_ref[...] = jnp.zeros_like(acc_ref)

    acc_ref[...] += jnp.dot(a_ref[...], b_ref[...],
                            preferred_element_type=jnp.float32)

    @pl.when(k == pl.num_programs(2) - 1)
    def _fin():
        y = acc_ref[...] * s_ref[...] + t_ref[...]
        o_ref[...] = jnp.where(y >= 0.0, y, al_ref[...] * y).astype(o_ref.dtype)


def _gemm_res_bn_act_kernel(a_ref, b_ref, r_ref, s_ref, t_ref, al_ref,
                            o_ref, acc_ref):
    """Same as above plus a fused residual add BEFORE the BN affine."""
    k = pl.program_id(2)

    @pl.when(k == 0)
    def _init():
        acc_ref[...] = jnp.zeros_like(acc_ref)

    acc_ref[...] += jnp.dot(a_ref[...], b_ref[...],
                            preferred_element_type=jnp.float32)

    @pl.when(k == pl.num_programs(2) - 1)
    def _fin():
        y = (acc_ref[...] + r_ref[...].astype(jnp.float32)) * s_ref[...] + t_ref[...]
        o_ref[...] = jnp.where(y >= 0.0, y, al_ref[...] * y).astype(o_ref.dtype)


def _pam_kernel(gamma_ref, q_ref, k_ref, v_ref, w1d_ref, b1d_ref, x_ref, o_ref):
    # bf16 MXU operands, f32 accumulation / epilogue.
    q = q_ref[0].astype(jnp.bfloat16)            # [HW, C//8] (raw-view order)
    kk = k_ref[0].astype(jnp.bfloat16)           # [C//8, HW]
    v = v_ref[0].astype(jnp.bfloat16)            # [C, HW]
    x = x_ref[0]                                 # [C, HW] f32
    energy = jnp.dot(q, kk, preferred_element_type=jnp.float32)        # [HW, HW]
    att = jnp.where(energy >= 0.0, energy, 0.01 * energy)              # LeakyReLU
    # Conv1d(HW, HW, 1): out[o, l] = sum_i W[o, i] * att[i, l] + b[o]
    att = jnp.dot(w1d_ref[...].astype(jnp.bfloat16), att.astype(jnp.bfloat16),
                  preferred_element_type=jnp.float32) + b1d_ref[...]
    # Reference: out = bmm(proj_value, attention)  (attention NOT transposed).
    out = jnp.dot(v, att.astype(jnp.bfloat16), preferred_element_type=jnp.float32)
    o_ref[0] = gamma_ref[...] * out + x


def _cam_kernel(gamma_ref, x_ref, o_ref):
    x = x_ref[0]                                 # [C, HW] f32
    xb = x.astype(jnp.bfloat16)
    energy = jax.lax.dot_general(
        xb, xb, (((1,), (1,)), ((), ())), preferred_element_type=jnp.float32)
    e_new = jnp.max(energy, axis=-1, keepdims=True) - energy
    att = jnp.where(e_new >= 0.0, e_new, 0.01 * e_new)                 # LeakyReLU
    out = jnp.dot(att.astype(jnp.bfloat16), xb, preferred_element_type=jnp.float32)
    o_ref[0] = gamma_ref[...] * out + x


# -----------------------------------------------------------------------------
# Fused GEMM wrapper
# -----------------------------------------------------------------------------

def _gemm_tiles(M, K, N):
    # N (lane) tiling: lane-dense, 256-wide when the layer is wider than 128.
    if N <= 128:
        Npad, tn = 128, 128
    else:
        Npad = _ru(N, 256)
        tn = 256
    # M (sublane) tiling.
    if M <= 512:
        Mpad = _ru(M, 16)
        tm = Mpad
    else:
        tm = 256
        Mpad = _ru(M, tm)
    # K tiling: exact divisor of Kpad, <= 768.
    Kpad = _ru(K, 128)
    if Kpad <= 768:
        tk = Kpad
    else:
        tk = 128
        for cand in range(768, 0, -128):
            if Kpad % cand == 0:
                tk = cand
                break
    return Mpad, Kpad, Npad, tm, tk, tn


def fused_gemm(a, b, scale, shift, alpha, residual=None):
    """bf16 out = PReLU_alpha(((a @ b) [+ residual]) * scale + shift)."""
    M, K = a.shape
    _, N = b.shape
    Mpad, Kpad, Npad, tm, tk, tn = _gemm_tiles(M, K, N)

    a_p = jnp.pad(a.astype(jnp.bfloat16), ((0, Mpad - M), (0, Kpad - K)))
    b_p = jnp.pad(b.astype(jnp.bfloat16), ((0, Kpad - K), (0, Npad - N)))
    s_p = jnp.pad(scale.reshape(1, N).astype(jnp.float32),
                  ((0, 0), (0, Npad - N)), constant_values=1.0)
    t_p = jnp.pad(shift.reshape(1, N).astype(jnp.float32),
                  ((0, 0), (0, Npad - N)))
    al_p = jnp.pad(alpha.reshape(1, N).astype(jnp.float32),
                   ((0, 0), (0, Npad - N)), constant_values=1.0)

    in_specs = [
        pl.BlockSpec((tm, tk), lambda i, j, k: (i, k)),
        pl.BlockSpec((tk, tn), lambda i, j, k: (k, j)),
    ]
    args = [a_p, b_p]
    if residual is not None:
        r_p = jnp.pad(residual.astype(jnp.bfloat16),
                      ((0, Mpad - M), (0, Npad - N)))
        in_specs.append(pl.BlockSpec((tm, tn), lambda i, j, k: (i, j)))
        args.append(r_p)
        kernel = _gemm_res_bn_act_kernel
    else:
        kernel = _gemm_bn_act_kernel
    in_specs += [pl.BlockSpec((1, tn), lambda i, j, k: (0, j))] * 3
    args += [s_p, t_p, al_p]

    out = pl.pallas_call(
        kernel,
        out_shape=jax.ShapeDtypeStruct((Mpad, Npad), jnp.bfloat16),
        grid_spec=pltpu.PrefetchScalarGridSpec(
            num_scalar_prefetch=0,
            grid=(Mpad // tm, Npad // tn, Kpad // tk),
            in_specs=in_specs,
            out_specs=pl.BlockSpec((tm, tn), lambda i, j, k: (i, j)),
            scratch_shapes=[pltpu.VMEM((tm, tn), jnp.float32)],
        ),
        compiler_params=pltpu.CompilerParams(
            dimension_semantics=("parallel", "parallel", "arbitrary"),
            vmem_limit_bytes=_VMEM_LIMIT),
    )(*args)
    return out[:M, :N]


# -----------------------------------------------------------------------------
# Conv lowering (static-slice im2col in bf16 + fused Pallas GEMM)
# -----------------------------------------------------------------------------

# TODO(synk): im2col patch slabs are still materialized in HBM (bf16 now); an
# implicit-im2col Pallas conv kernel would cut the 9x/45x input traffic.
def _im2col(x, kh, kw, stride, dilation, padding):
    """NHWC -> bf16 patch slab [B*Ho*Wo, kh*kw*C] via static strided slices."""
    B, H, W, C = x.shape
    x = x.astype(jnp.bfloat16)
    xp = jnp.pad(x, ((0, 0), (padding, padding), (padding, padding), (0, 0)))
    Ho = (H + 2 * padding - dilation * (kh - 1) - 1) // stride + 1
    Wo = (W + 2 * padding - dilation * (kw - 1) - 1) // stride + 1
    taps = []
    for ih in range(kh):
        for iw in range(kw):
            h0, w0 = ih * dilation, iw * dilation
            taps.append(jax.lax.slice(
                xp, (0, h0, w0, 0),
                (B, h0 + (Ho - 1) * stride + 1, w0 + (Wo - 1) * stride + 1, C),
                (1, stride, stride, 1)))
    patches = jnp.concatenate(taps, axis=-1)            # [B, Ho, Wo, kh*kw*C]
    return patches.reshape(B * Ho * Wo, kh * kw * C), Ho, Wo


def conv_gemm(x, w, scale, shift, alpha, *, stride=1, dilation=1, padding=0):
    """x: NHWC, w: [Cout, Cin, kh, kw]; fused conv + (scale,shift) + PReLU."""
    B, H, W, Cin = x.shape
    Cout, _, kh, kw = w.shape
    if kh == 1 and kw == 1 and stride == 1 and padding == 0:
        patches, Ho, Wo = x.astype(jnp.bfloat16).reshape(B * H * W, Cin), H, W
    else:
        patches, Ho, Wo = _im2col(x, kh, kw, stride, dilation, padding)
    wmat = jnp.transpose(w, (2, 3, 1, 0)).reshape(kh * kw * Cin, Cout)
    out = fused_gemm(patches, wmat, scale, shift, alpha)
    return out.reshape(B, Ho, Wo, Cout)


def conv_plain(x, w, *, stride=1, dilation=1, padding=0, bias=None):
    """Plain conv (class C): identity epilogue (scale=1, shift=bias, alpha=1)."""
    Cout = w.shape[0]
    ones = jnp.ones((Cout,), jnp.float32)
    shift = jnp.zeros((Cout,), jnp.float32) if bias is None else bias
    return conv_gemm(x, w, ones, shift, ones,
                     stride=stride, dilation=dilation, padding=padding)


def avgpool_3x3_s2(x):
    """AvgPool2d(3, stride=2, padding=1), count_include_pad=True (NHWC)."""
    s = jax.lax.reduce_window(x, 0.0, jax.lax.add,
                              window_dimensions=(1, 3, 3, 1),
                              window_strides=(1, 2, 2, 1),
                              padding=((0, 0), (1, 1), (1, 1), (0, 0)))
    return s / 9.0


# -----------------------------------------------------------------------------
# ESP block: 5 dilated branches + running sums + concat + residual + BN + PReLU
# all folded into a single block-structured fused GEMM.
# -----------------------------------------------------------------------------

def _esp_weight(ws):
    """Block-structured weight computing [d1, d2, d2+d4, d2+d4+d8, d2+..+d16]
    from the K-concatenated per-dilation im2col patches in ONE GEMM."""
    w1, w2, w4, w8, w16 = ws
    n = w2.shape[0]
    n1 = w1.shape[0]
    K1 = 9 * n

    def wmat(w):
        return (jnp.transpose(w, (2, 3, 1, 0))
                .reshape(K1, w.shape[0]).astype(jnp.float32))

    m1, m2, m4, m8, m16 = (wmat(w) for w in ws)
    z1 = jnp.zeros((K1, n1), jnp.float32)
    zn = jnp.zeros((K1, n), jnp.float32)
    rows = [
        jnp.concatenate([m1, zn, zn, zn, zn], axis=1),   # patches (dil 1)
        jnp.concatenate([z1, m2, m2, m2, m2], axis=1),   # patches (dil 2)
        jnp.concatenate([z1, zn, m4, m4, m4], axis=1),   # patches (dil 4)
        jnp.concatenate([z1, zn, zn, m8, m8], axis=1),   # patches (dil 8)
        jnp.concatenate([z1, zn, zn, zn, m16], axis=1),  # patches (dil 16)
    ]
    return jnp.concatenate(rows, axis=0)                 # [45n, n1+4n]


def esp_transform(ws, o1, scale, shift, alpha, residual=None):
    """ws=(d1,d2,d4,d8,d16) conv weights; o1 NHWC; one fused Pallas GEMM."""
    B, H, W, _ = o1.shape
    slabs = [_im2col(o1, 3, 3, 1, d, d)[0] for d in (1, 2, 4, 8, 16)]
    A = jnp.concatenate(slabs, axis=-1)                  # [M, 45n] bf16
    Wc = _esp_weight(ws)                                 # [45n, nout]
    nout = Wc.shape[1]
    r = None if residual is None else residual.reshape(B * H * W, nout)
    out = fused_gemm(A, Wc, scale, shift, alpha, residual=r)
    return out.reshape(B, H, W, nout)


# -----------------------------------------------------------------------------
# Deterministic parameter construction
# -----------------------------------------------------------------------------

class KeyGen:
    def __init__(self, key):
        self.key = key

    def __call__(self):
        self.key, k = jax.random.split(self.key)
        return k


def conv_w(kg, cout, cin, k):
    fan = cin * k * k
    return (jax.random.normal(kg(), (cout, cin, k, k), jnp.float32)
            / math.sqrt(fan)).astype(jnp.float32)


def bn_params(kg, c):
    return dict(
        g=1.0 + 0.1 * jax.random.normal(kg(), (c,), jnp.float32),
        b=0.1 * jax.random.normal(kg(), (c,), jnp.float32),
        m=jnp.zeros((c,), jnp.float32),
        v=jnp.ones((c,), jnp.float32),
    )


def cbr_params(kg, cin, cout, k):
    return dict(w=conv_w(kg, cout, cin, k), bn=bn_params(kg, cout),
                a=jnp.full((cout,), 0.25, jnp.float32))


def br_params(kg, c):
    return dict(bn=bn_params(kg, c), a=jnp.full((c,), 0.25, jnp.float32))


def downsampler_params(kg, nin, nout):
    n = nout // 5
    n1 = nout - 4 * n
    return dict(
        c1=conv_w(kg, n, nin, 3),
        d1=conv_w(kg, n1, n, 3), d2=conv_w(kg, n, n, 3), d4=conv_w(kg, n, n, 3),
        d8=conv_w(kg, n, n, 3), d16=conv_w(kg, n, n, 3),
        bn=bn_params(kg, nout), a=jnp.full((nout,), 0.25, jnp.float32),
    )


def dilated_block_params(kg, nin, nout):
    n = max(nout // 5, 1)
    n1 = max(nout - 4 * n, 1)
    return dict(
        c1=conv_w(kg, n, nin, 1),
        d1=conv_w(kg, n1, n, 3), d2=conv_w(kg, n, n, 3), d4=conv_w(kg, n, n, 3),
        d8=conv_w(kg, n, n, 3), d16=conv_w(kg, n, n, 3),
        br=br_params(kg, nout),
    )


def pam_params(kg, c, hw):
    c8 = c // 8
    return dict(
        wq=conv_w(kg, c8, c, 1), bq=0.1 * jax.random.normal(kg(), (c8,), jnp.float32),
        wk=conv_w(kg, c8, c, 1), bk=0.1 * jax.random.normal(kg(), (c8,), jnp.float32),
        wv=conv_w(kg, c, c, 1), bv=0.1 * jax.random.normal(kg(), (c,), jnp.float32),
        w1d=jax.random.normal(kg(), (hw, hw), jnp.float32) / math.sqrt(hw),
        b1d=0.1 * jax.random.normal(kg(), (hw, 1), jnp.float32),
        gamma=0.1 * jax.random.normal(kg(), (1, 1), jnp.float32),
    )


def cam_params(kg):
    return dict(gamma=0.1 * jax.random.normal(kg(), (1, 1), jnp.float32))


def init_espnet_params(key, p=5, q=3, hw_attn=16):
    kg = KeyGen(key)
    return dict(
        level1=cbr_params(kg, 3, 16, 3),
        b1=cbr_params(kg, 16 + 3, 19, 3),
        level2_0=downsampler_params(kg, 16 + 3, 64),
        level2=[dilated_block_params(kg, 64, 64) for _ in range(p)],
        b2=cbr_params(kg, 128 + 3, 131, 3),
        level3_0=downsampler_params(kg, 128 + 3, 128),
        level3=[dilated_block_params(kg, 128, 128) for _ in range(q)],
        b3=cbr_params(kg, 256, 32, 3),
        sa=pam_params(kg, 32, hw_attn),
        sc=cam_params(kg),
        conv_sa=cbr_params(kg, 32, 32, 3),
        conv_sc=cbr_params(kg, 32, 32, 3),
        classifier=cbr_params(kg, 32, 32, 1),
    )


# -----------------------------------------------------------------------------
# Module forward functions (NHWC, bf16 activations internally)
# -----------------------------------------------------------------------------

def bn_scale_shift(bn, eps=1e-3):
    inv = jax.lax.rsqrt(bn['v'] + eps)
    scale = bn['g'] * inv
    shift = bn['b'] - bn['m'] * scale
    return scale, shift


def apply_cbr(p, x, stride=1):
    k = p['w'].shape[-1]           # static
    pad = (k - 1) // 2
    scale, shift = bn_scale_shift(p['bn'])
    return conv_gemm(x, p['w'], scale, shift, p['a'], stride=stride, padding=pad)


def apply_downsampler(p, x):
    o1 = conv_plain(x, p['c1'], stride=2, padding=1)
    scale, shift = bn_scale_shift(p['bn'])
    return esp_transform((p['d1'], p['d2'], p['d4'], p['d8'], p['d16']),
                         o1, scale, shift, p['a'])


def apply_dilated_block(p, x):
    o1 = conv_plain(x, p['c1'], padding=0)                 # 1x1 reduce
    scale, shift = bn_scale_shift(p['br']['bn'])
    return esp_transform((p['d1'], p['d2'], p['d4'], p['d8'], p['d16']),
                         o1, scale, shift, p['br']['a'], residual=x)


def apply_pam(p, x):
    B, H, W, C = x.shape
    HW = H * W
    C8 = C // 8
    # Fused q/k/v 1x1 projections -> one GEMM on the [B*HW, C] slab.
    wq = p['wq'].reshape(C8, C).T
    wk = p['wk'].reshape(C8, C).T
    wv = p['wv'].reshape(C, C).T
    Wqkv = jnp.concatenate([wq, wk, wv], axis=1)            # [C, 2*C8 + C]
    bqkv = jnp.concatenate([p['bq'], p['bk'], p['bv']])
    ones = jnp.ones((Wqkv.shape[1],), jnp.float32)
    qkv = fused_gemm(x.reshape(B * HW, C), Wqkv, ones, bqkv, ones)
    q = qkv[:, :C8].reshape(B, H, W, C8)
    k = qkv[:, C8:2 * C8].reshape(B, H, W, C8)
    v = qkv[:, 2 * C8:].reshape(B, H, W, C)

    # Reproduce PyTorch's raw .view() flattenings of NCHW tensors exactly:
    #   proj_query = query_conv(x).view(B, -1, C//8)  (raw reinterpretation)
    #   proj_key   = key_conv(x).view(B, C//8, HW)
    #   proj_value = value_conv(x).view(B, C, HW)
    q_nchw = jnp.transpose(q, (0, 3, 1, 2)).astype(jnp.float32)
    k_nchw = jnp.transpose(k, (0, 3, 1, 2)).astype(jnp.float32)
    v_nchw = jnp.transpose(v, (0, 3, 1, 2)).astype(jnp.float32)
    x_nchw = jnp.transpose(x, (0, 3, 1, 2)).astype(jnp.float32)
    proj_q = q_nchw.reshape(B, HW, C8)        # raw view (matches torch .view)
    proj_k = k_nchw.reshape(B, C8, HW)
    proj_v = v_nchw.reshape(B, C, HW)
    xf = x_nchw.reshape(B, C, HW)

    # TODO(synk): flash-tile over query rows (stream k / w1d in K blocks) before
    # using real resolutions; the whole-(HW,HW) blocks only fit VMEM for toy HW.
    out = pl.pallas_call(
        _pam_kernel,
        out_shape=jax.ShapeDtypeStruct((B, C, HW), jnp.float32),
        grid=(B,),
        in_specs=[
            pl.BlockSpec((1, 1), lambda b: (0, 0)),
            pl.BlockSpec((1, HW, C8), lambda b: (b, 0, 0)),
            pl.BlockSpec((1, C8, HW), lambda b: (b, 0, 0)),
            pl.BlockSpec((1, C, HW), lambda b: (b, 0, 0)),
            pl.BlockSpec((HW, HW), lambda b: (0, 0)),
            pl.BlockSpec((HW, 1), lambda b: (0, 0)),
            pl.BlockSpec((1, C, HW), lambda b: (b, 0, 0)),
        ],
        out_specs=pl.BlockSpec((1, C, HW), lambda b: (b, 0, 0)),
        compiler_params=pltpu.CompilerParams(
            dimension_semantics=("parallel",)),
    )(p['gamma'], proj_q, proj_k, proj_v, p['w1d'], p['b1d'], xf)
    return jnp.transpose(out.reshape(B, C, H, W), (0, 2, 3, 1))


def apply_cam(p, x):
    B, H, W, C = x.shape
    HW = H * W
    xf = jnp.transpose(x, (0, 3, 1, 2)).reshape(B, C, HW).astype(jnp.float32)
    out = pl.pallas_call(
        _cam_kernel,
        out_shape=jax.ShapeDtypeStruct((B, C, HW), jnp.float32),
        grid=(B,),
        in_specs=[
            pl.BlockSpec((1, 1), lambda b: (0, 0)),
            pl.BlockSpec((1, C, HW), lambda b: (b, 0, 0)),
        ],
        out_specs=pl.BlockSpec((1, C, HW), lambda b: (b, 0, 0)),
        compiler_params=pltpu.CompilerParams(
            dimension_semantics=("parallel",)),
    )(p['gamma'], xf)
    return jnp.transpose(out.reshape(B, C, H, W), (0, 2, 3, 1))


def espnet_encoder_forward(params, x_nchw):
    x = jnp.transpose(x_nchw, (0, 2, 3, 1)).astype(jnp.float32)   # -> NHWC

    output0 = apply_cbr(params['level1'], x, stride=2)            # bf16
    inp1 = avgpool_3x3_s2(x)
    inp2 = avgpool_3x3_s2(inp1)

    output0_cat = apply_cbr(
        params['b1'],
        jnp.concatenate([output0, inp1.astype(jnp.bfloat16)], axis=-1))
    output1_0 = apply_downsampler(params['level2_0'], output0_cat)

    output1 = output1_0
    for i, bp in enumerate(params['level2']):
        output1 = apply_dilated_block(bp, output1_0 if i == 0 else output1)

    output1_cat = apply_cbr(
        params['b2'],
        jnp.concatenate([output1, output1_0, inp2.astype(jnp.bfloat16)],
                        axis=-1))
    output2_0 = apply_downsampler(params['level3_0'], output1_cat)

    output2 = output2_0
    for i, bp in enumerate(params['level3']):
        output2 = apply_dilated_block(bp, output2_0 if i == 0 else output2)

    cat_ = jnp.concatenate([output2_0, output2], axis=-1)
    output2_cat = apply_cbr(params['b3'], cat_)

    out_sa = apply_cbr(params['conv_sa'], apply_pam(params['sa'], output2_cat))
    out_sc = apply_cbr(params['conv_sc'], apply_cam(params['sc'], output2_cat))
    out_s = out_sa + out_sc
    out = apply_cbr(params['classifier'], out_s)
    return jnp.transpose(out, (0, 3, 1, 2)).astype(jnp.float32)   # -> NCHW f32


# -----------------------------------------------------------------------------
# Main
# -----------------------------------------------------------------------------

if __name__ == "__main__":
    key = jax.random.PRNGKey(0)
    k_in, k_params = jax.random.split(key)

    # Input: batch=2, RGB, 32x32. At 1/8 resolution H*W = 4*4 = 16, which sizes
    # the PAM conv1d (the PyTorch module hardcodes 3600 for 480x480 inputs).
    B, H, W = 2, 32, 32
    x = jax.random.normal(k_in, (B, 3, H, W), jnp.float32)

    hw_attn = (H // 8) * (W // 8)
    params = init_espnet_params(k_params, p=5, q=3, hw_attn=hw_attn)

    fwd = jax.jit(espnet_encoder_forward)
    out = jax.block_until_ready(fwd(params, x))

    assert out.shape == (B, 32, H // 8, W // 8), out.shape
    assert bool(jnp.all(jnp.isfinite(out)))
    print("KERNEL_OK")
</pallas_src>

<mosaic_0001>
module attributes {stable_mosaic.version = 11 : i64} {
  func.func @_gemm_bn_act_kernel(%arg0: i32, %arg1: i32, %arg2: i32, %arg3: memref<512x128xbf16, #tpu.memory_space<vmem>>, %arg4: memref<128x128xbf16, #tpu.memory_space<vmem>>, %arg5: memref<1x128xf32, #tpu.memory_space<vmem>>, %arg6: memref<1x128xf32, #tpu.memory_space<vmem>>, %arg7: memref<1x128xf32, #tpu.memory_space<vmem>>, %arg8: memref<512x128xbf16, #tpu.memory_space<vmem>>, %arg9: memref<512x128xf32, #tpu.memory_space<vmem>>) attributes {dimension_semantics = [#tpu.dimension_semantics<parallel>, #tpu.dimension_semantics<parallel>, #tpu.dimension_semantics<arbitrary>], iteration_bounds = array<i64: 1, 1, 1>, scalar_prefetch = 0 : i64, scratch_operands = 1 : i64, tpu.core_type = #tpu.core_type<tc>, window_params = [{transform_indices = @transform_0, window_bounds = array<i64: 512, 128>}, {transform_indices = @transform_1, window_bounds = array<i64: 128, 128>}, {transform_indices = @transform_2, window_bounds = array<i64: 1, 128>}, {transform_indices = @transform_3, window_bounds = array<i64: 1, 128>}, {transform_indices = @transform_4, window_bounds = array<i64: 1, 128>}, {transform_indices = @transform_5, window_bounds = array<i64: 512, 128>}]} {
    %c0_i32 = arith.constant 0 : i32
    %0 = arith.cmpi eq, %arg2, %c0_i32 : i32
    %1 = arith.extui %0 : i1 to i32
    %c0_i32_0 = arith.constant 0 : i32
    %2 = arith.cmpi ne, %1, %c0_i32_0 : i32
    scf.if %2 {
      %cst_10 = arith.constant 0.000000e+00 : f32
      %12 = vector.broadcast %cst_10 : f32 to vector<512x128xf32>
      %c0_11 = arith.constant 0 : index
      %c0_12 = arith.constant 0 : index
      %13 = vector.load %arg9[%c0_11, %c0_12] : memref<512x128xf32, #tpu.memory_space<vmem>>, vector<512x128xf32>
      tpu.vector_store %arg9[%c0_11, %c0_12], %12 {strides = array<i32>} : memref<512x128xf32, #tpu.memory_space<vmem>>, vector<512x128xf32>,
    } else {
    }
    %c0 = arith.constant 0 : index
    %c0_1 = arith.constant 0 : index
    %3 = vector.load %arg9[%c0, %c0_1] : memref<512x128xf32, #tpu.memory_space<vmem>>, vector<512x128xf32>
    %c0_2 = arith.constant 0 : index
    %c0_3 = arith.constant 0 : index
    %4 = vector.load %arg3[%c0_2, %c0_3] : memref<512x128xbf16, #tpu.memory_space<vmem>>, vector<512x128xbf16>
    %c0_4 = arith.constant 0 : index
    %c0_5 = arith.constant 0 : index
    %5 = vector.load %arg4[%c0_4, %c0_5] : memref<128x128xbf16, #tpu.memory_space<vmem>>, vector<128x128xbf16>
    %cst = arith.constant dense<0.000000e+00> : vector<512x128xf32>
    %6 = tpu.matmul %4, %5, %cst {dimension_numbers = #tpu.dot_dimension_numbers<[1], [0], [0], [1], [0, 0, 1, 1], [], []>} : vector<512x128xbf16>, vector<128x128xbf16>, vector<512x128xf32> -> vector<512x128xf32>
    %7 = arith.addf %3, %6 : vector<512x128xf32>
    %c0_6 = arith.constant 0 : index
    %c0_7 = arith.constant 0 : index
    %8 = vector.load %arg9[%c0_6, %c0_7] : memref<512x128xf32, #tpu.memory_space<vmem>>, vector<512x128xf32>
    tpu.vector_store %arg9[%c0_6, %c0_7], %7 {strides = array<i32>} : memref<512x128xf32, #tpu.memory_space<vmem>>, vector<512x128xf32>,
    %c0_i32_8 = arith.constant 0 : i32
    %9 = arith.cmpi eq, %arg2, %c0_i32_8 : i32
    %10 = arith.extui %9 : i1 to i32
    %c0_i32_9 = arith.constant 0 : i32
    %11 = arith.cmpi ne, %10, %c0_i32_9 : i32
    scf.if %11 {
      %c0_10 = arith.constant 0 : index
      %c0_11 = arith.constant 0 : index
      %12 = vector.load %arg9[%c0_10, %c0_11] : memref<512x128xf32, #tpu.memory_space<vmem>>, vector<512x128xf32>
      %c0_12 = arith.constant 0 : index
      %c0_13 = arith.constant 0 : index
      %13 = vector.load %arg5[%c0_12, %c0_13] : memref<1x128xf32, #tpu.memory_space<vmem>>, vector<1x128xf32>
      %14 = vector.broadcast %13 : vector<1x128xf32> to vector<512x128xf32>
      %15 = arith.mulf %12, %14 : vector<512x128xf32>
      %c0_14 = arith.constant 0 : index
      %c0_15 = arith.constant 0 : index
      %16 = vector.load %arg6[%c0_14, %c0_15] : memref<1x128xf32, #tpu.memory_space<vmem>>, vector<1x128xf32>
      %17 = vector.broadcast %16 : vector<1x128xf32> to vector<512x128xf32>
      %18 = arith.addf %15, %17 : vector<512x128xf32>
      %cst_16 = arith.constant 0.000000e+00 : f32
      %19 = vector.broadcast %cst_16 : f32 to vector<512x128xf32>
      %20 = arith.cmpf oge, %18, %19 : vector<512x128xf32>
      %c0_17 = arith.constant 0 : index
      %c0_18 = arith.constant 0 : index
      %21 = vector.load %arg7[%c0_17, %c0_18] : memref<1x128xf32, #tpu.memory_space<vmem>>, vector<1x128xf32>
      %22 = vector.broadcast %21 : vector<1x128xf32> to vector<512x128xf32>
      %23 = arith.mulf %22, %18 : vector<512x128xf32>
      %24 = arith.select %20, %18, %23 : vector<512x128xi1>, vector<512x128xf32>
      %25 = arith.truncf %24 : vector<512x128xf32> to vector<512x128xbf16>
      %c0_19 = arith.constant 0 : index
      %c0_20 = arith.constant 0 : index
      %26 = vector.load %arg8[%c0_19, %c0_20] : memref<512x128xbf16, #tpu.memory_space<vmem>>, vector<512x128xbf16>
      tpu.vector_store %arg8[%c0_19, %c0_20], %25 {strides = array<i32>} : memref<512x128xbf16, #tpu.memory_space<vmem>>, vector<512x128xbf16>,
    } else {
    }
    return
  }
  func.func @transform_0(%arg0: i32, %arg1: i32, %arg2: i32) -> (i32, i32) {
    %c0_i32 = arith.constant 0 : i32
    return %arg0, %arg2 : i32, i32
  }
  func.func @transform_1(%arg0: i32, %arg1: i32, %arg2: i32) -> (i32, i32) {
    %c0_i32 = arith.constant 0 : i32
    return %arg2, %arg1 : i32, i32
  }
  func.func @transform_2(%arg0: i32, %arg1: i32, %arg2: i32) -> (i32, i32) {
    %c0_i32 = arith.constant 0 : i32
    %c0_i32_0 = arith.constant 0 : i32
    return %c0_i32, %arg1 : i32, i32
  }
  func.func @transform_3(%arg0: i32, %arg1: i32, %arg2: i32) -> (i32, i32) {
    %c0_i32 = arith.constant 0 : i32
    %c0_i32_0 = arith.constant 0 : i32
    return %c0_i32, %arg1 : i32, i32
  }
  func.func @transform_4(%arg0: i32, %arg1: i32, %arg2: i32) -> (i32, i32) {
    %c0_i32 = arith.constant 0 : i32
    %c0_i32_0 = arith.constant 0 : i32
    return %c0_i32, %arg1 : i32, i32
  }
  func.func @transform_5(%arg0: i32, %arg1: i32, %arg2: i32) -> (i32, i32) {
    %c0_i32 = arith.constant 0 : i32
    return %arg0, %arg1 : i32, i32
  }
}

module attributes {stable_mosaic.version = 11 : i64} {
  func.func @_gemm_bn_act_kernel(%arg0: i32, %arg1: i32, %arg2: i32, %arg3: memref<512x256xbf16, #tpu.memory_space<vmem>>, %arg4: memref<256x128xbf16, #tpu.memory_space<vmem>>, %arg5: memref<1x128xf32, #tpu.memory_space<vmem>>, %arg6: memref<1x128xf32, #tpu.memory_space<vmem>>, %arg7: memref<1x128xf32, #tpu.memory_space<vmem>>, %arg8: memref<512x128xbf16, #tpu.memory_space<vmem>>, %arg9: memref<512x128xf32, #tpu.memory_space<vmem>>) attributes {dimension_semantics = [#tpu.dimension_semantics<parallel>, #tpu.dimension_semantics<parallel>, #tpu.dimension_semantics<arbitrary>], iteration_bounds = array<i64: 1, 1, 1>, scalar_prefetch = 0 : i64, scratch_operands = 1 : i64, tpu.core_type = #tpu.core_type<tc>, window_params = [{transform_indices = @transform_0, window_bounds = array<i64: 512, 256>}, {transform_indices = @transform_1, window_bounds = array<i64: 256, 128>}, {transform_indices = @transform_2, window_bounds = array<i64: 1, 128>}, {transform_indices = @transform_3, window_bounds = array<i64: 1, 128>}, {transform_indices = @transform_4, window_bounds = array<i64: 1, 128>}, {transform_indices = @transform_5, window_bounds = array<i64: 512, 128>}]} {
    %c0_i32 = arith.constant 0 : i32
    %0 = arith.cmpi eq, %arg2, %c0_i32 : i32
    %1 = arith.extui %0 : i1 to i32
    %c0_i32_0 = arith.constant 0 : i32
    %2 = arith.cmpi ne, %1, %c0_i32_0 : i32
    scf.if %2 {
      %cst_10 = arith.constant 0.000000e+00 : f32
      %12 = vector.broadcast %cst_10 : f32 to vector<512x128xf32>
      %c0_11 = arith.constant 0 : index
      %c0_12 = arith.constant 0 : index
      %13 = vector.load %arg9[%c0_11, %c0_12] : memref<512x128xf32, #tpu.memory_space<vmem>>, vector<512x128xf32>
      tpu.vector_store %arg9[%c0_11, %c0_12], %12 {strides = array<i32>} : memref<512x128xf32, #tpu.memory_space<vmem>>, vector<512x128xf32>,
    } else {
    }
    %c0 = arith.constant 0 : index
    %c0_1 = arith.constant 0 : index
    %3 = vector.load %arg9[%c0, %c0_1] : memref<512x128xf32, #tpu.memory_space<vmem>>, vector<512x128xf32>
    %c0_2 = arith.constant 0 : index
    %c0_3 = arith.constant 0 : index
    %4 = vector.load %arg3[%c0_2, %c0_3] : memref<512x256xbf16, #tpu.memory_space<vmem>>, vector<512x256xbf16>
    %c0_4 = arith.constant 0 : index
    %c0_5 = arith.constant 0 : index
    %5 = vector.load %arg4[%c0_4, %c0_5] : memref<256x128xbf16, #tpu.memory_space<vmem>>, vector<256x128xbf16>
    %cst = arith.constant dense<0.000000e+00> : vector<512x128xf32>
    %6 = tpu.matmul %4, %5, %cst {dimension_numbers = #tpu.dot_dimension_numbers<[1], [0], [0], [1], [0, 0, 1, 1], [], []>} : vector<512x256xbf16>, vector<256x128xbf16>, vector<512x128xf32> -> vector<512x128xf32>
    %7 = arith.addf %3, %6 : vector<512x128xf32>
    %c0_6 = arith.constant 0 : index
    %c0_7 = arith.constant 0 : index
    %8 = vector.load %arg9[%c0_6, %c0_7] : memref<512x128xf32, #tpu.memory_space<vmem>>, vector<512x128xf32>
    tpu.vector_store %arg9[%c0_6, %c0_7], %7 {strides = array<i32>} : memref<512x128xf32, #tpu.memory_space<vmem>>, vector<512x128xf32>,
    %c0_i32_8 = arith.constant 0 : i32
    %9 = arith.cmpi eq, %arg2, %c0_i32_8 : i32
    %10 = arith.extui %9 : i1 to i32
    %c0_i32_9 = arith.constant 0 : i32
    %11 = arith.cmpi ne, %10, %c0_i32_9 : i32
    scf.if %11 {
      %c0_10 = arith.constant 0 : index
      %c0_11 = arith.constant 0 : index
      %12 = vector.load %arg9[%c0_10, %c0_11] : memref<512x128xf32, #tpu.memory_space<vmem>>, vector<512x128xf32>
      %c0_12 = arith.constant 0 : index
      %c0_13 = arith.constant 0 : index
      %13 = vector.load %arg5[%c0_12, %c0_13] : memref<1x128xf32, #tpu.memory_space<vmem>>, vector<1x128xf32>
      %14 = vector.broadcast %13 : vector<1x128xf32> to vector<512x128xf32>
      %15 = arith.mulf %12, %14 : vector<512x128xf32>
      %c0_14 = arith.constant 0 : index
      %c0_15 = arith.constant 0 : index
      %16 = vector.load %arg6[%c0_14, %c0_15] : memref<1x128xf32, #tpu.memory_space<vmem>>, vector<1x128xf32>
      %17 = vector.broadcast %16 : vector<1x128xf32> to vector<512x128xf32>
      %18 = arith.addf %15, %17 : vector<512x128xf32>
      %cst_16 = arith.constant 0.000000e+00 : f32
      %19 = vector.broadcast %cst_16 : f32 to vector<512x128xf32>
      %20 = arith.cmpf oge, %18, %19 : vector<512x128xf32>
      %c0_17 = arith.constant 0 : index
      %c0_18 = arith.constant 0 : index
      %21 = vector.load %arg7[%c0_17, %c0_18] : memref<1x128xf32, #tpu.memory_space<vmem>>, vector<1x128xf32>
      %22 = vector.broadcast %21 : vector<1x128xf32> to vector<512x128xf32>
      %23 = arith.mulf %22, %18 : vector<512x128xf32>
      %24 = arith.select %20, %18, %23 : vector<512x128xi1>, vector<512x128xf32>
      %25 = arith.truncf %24 : vector<512x128xf32> to vector<512x128xbf16>
      %c0_19 = arith.constant 0 : index
      %c0_20 = arith.constant 0 : index
      %26 = vector.load %arg8[%c0_19, %c0_20] : memref<512x128xbf16, #tpu.memory_space<vmem>>, vector<512x128xbf16>
      tpu.vector_store %arg8[%c0_19, %c0_20], %25 {strides = array<i32>} : memref<512x128xbf16, #tpu.memory_space<vmem>>, vector<512x128xbf16>,
    } else {
    }
    return
  }
  func.func @transform_0(%arg0: i32, %arg1: i32, %arg2: i32) -> (i32, i32) {
    %c0_i32 = arith.constant 0 : i32
    return %arg0, %arg2 : i32, i32
  }
  func.func @transform_1(%arg0: i32, %arg1: i32, %arg2: i32) -> (i32, i32) {
    %c0_i32 = arith.constant 0 : i32
    return %arg2, %arg1 : i32, i32
  }
  func.func @transform_2(%arg0: i32, %arg1: i32, %arg2: i32) -> (i32, i32) {
    %c0_i32 = arith.constant 0 : i32
    %c0_i32_0 = arith.constant 0 : i32
    return %c0_i32, %arg1 : i32, i32
  }
  func.func @transform_3(%arg0: i32, %arg1: i32, %arg2: i32) -> (i32, i32) {
    %c0_i32 = arith.constant 0 : i32
    %c0_i32_0 = arith.constant 0 : i32
    return %c0_i32, %arg1 : i32, i32
  }
  func.func @transform_4(%arg0: i32, %arg1: i32, %arg2: i32) -> (i32, i32) {
    %c0_i32 = arith.constant 0 : i32
    %c0_i32_0 = arith.constant 0 : i32
    return %c0_i32, %arg1 : i32, i32
  }
  func.func @transform_5(%arg0: i32, %arg1: i32, %arg2: i32) -> (i32, i32) {
    %c0_i32 = arith.constant 0 : i32
    return %arg0, %arg1 : i32, i32
  }
}

module attributes {stable_mosaic.version = 11 : i64} {
  func.func @_gemm_bn_act_kernel(%arg0: i32, %arg1: i32, %arg2: i32, %arg3: memref<128x256xbf16, #tpu.memory_space<vmem>>, %arg4: memref<256x128xbf16, #tpu.memory_space<vmem>>, %arg5: memref<1x128xf32, #tpu.memory_space<vmem>>, %arg6: memref<1x128xf32, #tpu.memory_space<vmem>>, %arg7: memref<1x128xf32, #tpu.memory_space<vmem>>, %arg8: memref<128x128xbf16, #tpu.memory_space<vmem>>, %arg9: memref<128x128xf32, #tpu.memory_space<vmem>>) attributes {dimension_semantics = [#tpu.dimension_semantics<parallel>, #tpu.dimension_semantics<parallel>, #tpu.dimension_semantics<arbitrary>], iteration_bounds = array<i64: 1, 1, 1>, scalar_prefetch = 0 : i64, scratch_operands = 1 : i64, tpu.core_type = #tpu.core_type<tc>, window_params = [{transform_indices = @transform_0, window_bounds = array<i64: 128, 256>}, {transform_indices = @transform_1, window_bounds = array<i64: 256, 128>}, {transform_indices = @transform_2, window_bounds = array<i64: 1, 128>}, {transform_indices = @transform_3, window_bounds = array<i64: 1, 128>}, {transform_indices = @transform_4, window_bounds = array<i64: 1, 128>}, {transform_indices = @transform_5, window_bounds = array<i64: 128, 128>}]} {
    %c0_i32 = arith.constant 0 : i32
    %0 = arith.cmpi eq, %arg2, %c0_i32 : i32
    %1 = arith.extui %0 : i1 to i32
    %c0_i32_0 = arith.constant 0 : i32
    %2 = arith.cmpi ne, %1, %c0_i32_0 : i32
    scf.if %2 {
      %cst_10 = arith.constant 0.000000e+00 : f32
      %12 = vector.broadcast %cst_10 : f32 to vector<128x128xf32>
      %c0_11 = arith.constant 0 : index
      %c0_12 = arith.constant 0 : index
      %13 = vector.load %arg9[%c0_11, %c0_12] : memref<128x128xf32, #tpu.memory_space<vmem>>, vector<128x128xf32>
      tpu.vector_store %arg9[%c0_11, %c0_12], %12 {strides = array<i32>} : memref<128x128xf32, #tpu.memory_space<vmem>>, vector<128x128xf32>,
    } else {
    }
    %c0 = arith.constant 0 : index
    %c0_1 = arith.constant 0 : index
    %3 = vector.load %arg9[%c0, %c0_1] : memref<128x128xf32, #tpu.memory_space<vmem>>, vector<128x128xf32>
    %c0_2 = arith.constant 0 : index
    %c0_3 = arith.constant 0 : index
    %4 = vector.load %arg3[%c0_2, %c0_3] : memref<128x256xbf16, #tpu.memory_space<vmem>>, vector<128x256xbf16>
    %c0_4 = arith.constant 0 : index
    %c0_5 = arith.constant 0 : index
    %5 = vector.load %arg4[%c0_4, %c0_5] : memref<256x128xbf16, #tpu.memory_space<vmem>>, vector<256x128xbf16>
    %cst = arith.constant dense<0.000000e+00> : vector<128x128xf32>
    %6 = tpu.matmul %4, %5, %cst {dimension_numbers = #tpu.dot_dimension_numbers<[1], [0], [0], [1], [0, 0, 1, 1], [], []>} : vector<128x256xbf16>, vector<256x128xbf16>, vector<128x128xf32> -> vector<128x128xf32>
    %7 = arith.addf %3, %6 : vector<128x128xf32>
    %c0_6 = arith.constant 0 : index
    %c0_7 = arith.constant 0 : index
    %8 = vector.load %arg9[%c0_6, %c0_7] : memref<128x128xf32, #tpu.memory_space<vmem>>, vector<128x128xf32>
    tpu.vector_store %arg9[%c0_6, %c0_7], %7 {strides = array<i32>} : memref<128x128xf32, #tpu.memory_space<vmem>>, vector<128x128xf32>,
    %c0_i32_8 = arith.constant 0 : i32
    %9 = arith.cmpi eq, %arg2, %c0_i32_8 : i32
    %10 = arith.extui %9 : i1 to i32
    %c0_i32_9 = arith.constant 0 : i32
    %11 = arith.cmpi ne, %10, %c0_i32_9 : i32
    scf.if %11 {
      %c0_10 = arith.constant 0 : index
      %c0_11 = arith.constant 0 : index
      %12 = vector.load %arg9[%c0_10, %c0_11] : memref<128x128xf32, #tpu.memory_space<vmem>>, vector<128x128xf32>
      %c0_12 = arith.constant 0 : index
      %c0_13 = arith.constant 0 : index
      %13 = vector.load %arg5[%c0_12, %c0_13] : memref<1x128xf32, #tpu.memory_space<vmem>>, vector<1x128xf32>
      %14 = vector.broadcast %13 : vector<1x128xf32> to vector<128x128xf32>
      %15 = arith.mulf %12, %14 : vector<128x128xf32>
      %c0_14 = arith.constant 0 : index
      %c0_15 = arith.constant 0 : index
      %16 = vector.load %arg6[%c0_14, %c0_15] : memref<1x128xf32, #tpu.memory_space<vmem>>, vector<1x128xf32>
      %17 = vector.broadcast %16 : vector<1x128xf32> to vector<128x128xf32>
      %18 = arith.addf %15, %17 : vector<128x128xf32>
      %cst_16 = arith.constant 0.000000e+00 : f32
      %19 = vector.broadcast %cst_16 : f32 to vector<128x128xf32>
      %20 = arith.cmpf oge, %18, %19 : vector<128x128xf32>
      %c0_17 = arith.constant 0 : index
      %c0_18 = arith.constant 0 : index
      %21 = vector.load %arg7[%c0_17, %c0_18] : memref<1x128xf32, #tpu.memory_space<vmem>>, vector<1x128xf32>
      %22 = vector.broadcast %21 : vector<1x128xf32> to vector<128x128xf32>
      %23 = arith.mulf %22, %18 : vector<128x128xf32>
      %24 = arith.select %20, %18, %23 : vector<128x128xi1>, vector<128x128xf32>
      %25 = arith.truncf %24 : vector<128x128xf32> to vector<128x128xbf16>
      %c0_19 = arith.constant 0 : index
      %c0_20 = arith.constant 0 : index
      %26 = vector.load %arg8[%c0_19, %c0_20] : memref<128x128xbf16, #tpu.memory_space<vmem>>, vector<128x128xbf16>
      tpu.vector_store %arg8[%c0_19, %c0_20], %25 {strides = array<i32>} : memref<128x128xbf16, #tpu.memory_space<vmem>>, vector<128x128xbf16>,
    } else {
    }
    return
  }
  func.func @transform_0(%arg0: i32, %arg1: i32, %arg2: i32) -> (i32, i32) {
    %c0_i32 = arith.constant 0 : i32
    return %arg0, %arg2 : i32, i32
  }
  func.func @transform_1(%arg0: i32, %arg1: i32, %arg2: i32) -> (i32, i32) {
    %c0_i32 = arith.constant 0 : i32
    return %arg2, %arg1 : i32, i32
  }
  func.func @transform_2(%arg0: i32, %arg1: i32, %arg2: i32) -> (i32, i32) {
    %c0_i32 = arith.constant 0 : i32
    %c0_i32_0 = arith.constant 0 : i32
    return %c0_i32, %arg1 : i32, i32
  }
  func.func @transform_3(%arg0: i32, %arg1: i32, %arg2: i32) -> (i32, i32) {
    %c0_i32 = arith.constant 0 : i32
    %c0_i32_0 = arith.constant 0 : i32
    return %c0_i32, %arg1 : i32, i32
  }
  func.func @transform_4(%arg0: i32, %arg1: i32, %arg2: i32) -> (i32, i32) {
    %c0_i32 = arith.constant 0 : i32
    %c0_i32_0 = arith.constant 0 : i32
    return %c0_i32, %arg1 : i32, i32
  }
  func.func @transform_5(%arg0: i32, %arg1: i32, %arg2: i32) -> (i32, i32) {
    %c0_i32 = arith.constant 0 : i32
    return %arg0, %arg1 : i32, i32
  }
}

module attributes {stable_mosaic.version = 11 : i64} {
  func.func @_gemm_bn_act_kernel(%arg0: i32, %arg1: i32, %arg2: i32, %arg3: memref<128x640xbf16, #tpu.memory_space<vmem>>, %arg4: memref<640x128xbf16, #tpu.memory_space<vmem>>, %arg5: memref<1x128xf32, #tpu.memory_space<vmem>>, %arg6: memref<1x128xf32, #tpu.memory_space<vmem>>, %arg7: memref<1x128xf32, #tpu.memory_space<vmem>>, %arg8: memref<128x128xbf16, #tpu.memory_space<vmem>>, %arg9: memref<128x128xf32, #tpu.memory_space<vmem>>) attributes {dimension_semantics = [#tpu.dimension_semantics<parallel>, #tpu.dimension_semantics<parallel>, #tpu.dimension_semantics<arbitrary>], iteration_bounds = array<i64: 1, 1, 1>, scalar_prefetch = 0 : i64, scratch_operands = 1 : i64, tpu.core_type = #tpu.core_type<tc>, window_params = [{transform_indices = @transform_0, window_bounds = array<i64: 128, 640>}, {transform_indices = @transform_1, window_bounds = array<i64: 640, 128>}, {transform_indices = @transform_2, window_bounds = array<i64: 1, 128>}, {transform_indices = @transform_3, window_bounds = array<i64: 1, 128>}, {transform_indices = @transform_4, window_bounds = array<i64: 1, 128>}, {transform_indices = @transform_5, window_bounds = array<i64: 128, 128>}]} {
    %c0_i32 = arith.constant 0 : i32
    %0 = arith.cmpi eq, %arg2, %c0_i32 : i32
    %1 = arith.extui %0 : i1 to i32
    %c0_i32_0 = arith.constant 0 : i32
    %2 = arith.cmpi ne, %1, %c0_i32_0 : i32
    scf.if %2 {
      %cst_10 = arith.constant 0.000000e+00 : f32
      %12 = vector.broadcast %cst_10 : f32 to vector<128x128xf32>
      %c0_11 = arith.constant 0 : index
      %c0_12 = arith.constant 0 : index
      %13 = vector.load %arg9[%c0_11, %c0_12] : memref<128x128xf32, #tpu.memory_space<vmem>>, vector<128x128xf32>
      tpu.vector_store %arg9[%c0_11, %c0_12], %12 {strides = array<i32>} : memref<128x128xf32, #tpu.memory_space<vmem>>, vector<128x128xf32>,
    } else {
    }
    %c0 = arith.constant 0 : index
    %c0_1 = arith.constant 0 : index
    %3 = vector.load %arg9[%c0, %c0_1] : memref<128x128xf32, #tpu.memory_space<vmem>>, vector<128x128xf32>
    %c0_2 = arith.constant 0 : index
    %c0_3 = arith.constant 0 : index
    %4 = vector.load %arg3[%c0_2, %c0_3] : memref<128x640xbf16, #tpu.memory_space<vmem>>, vector<128x640xbf16>
    %c0_4 = arith.constant 0 : index
    %c0_5 = arith.constant 0 : index
    %5 = vector.load %arg4[%c0_4, %c0_5] : memref<640x128xbf16, #tpu.memory_space<vmem>>, vector<640x128xbf16>
    %cst = arith.constant dense<0.000000e+00> : vector<128x128xf32>
    %6 = tpu.matmul %4, %5, %cst {dimension_numbers = #tpu.dot_dimension_numbers<[1], [0], [0], [1], [0, 0, 1, 1], [], []>} : vector<128x640xbf16>, vector<640x128xbf16>, vector<128x128xf32> -> vector<128x128xf32>
    %7 = arith.addf %3, %6 : vector<128x128xf32>
    %c0_6 = arith.constant 0 : index
    %c0_7 = arith.constant 0 : index
    %8 = vector.load %arg9[%c0_6, %c0_7] : memref<128x128xf32, #tpu.memory_space<vmem>>, vector<128x128xf32>
    tpu.vector_store %arg9[%c0_6, %c0_7], %7 {strides = array<i32>} : memref<128x128xf32, #tpu.memory_space<vmem>>, vector<128x128xf32>,
    %c0_i32_8 = arith.constant 0 : i32
    %9 = arith.cmpi eq, %arg2, %c0_i32_8 : i32
    %10 = arith.extui %9 : i1 to i32
    %c0_i32_9 = arith.constant 0 : i32
    %11 = arith.cmpi ne, %10, %c0_i32_9 : i32
    scf.if %11 {
      %c0_10 = arith.constant 0 : index
      %c0_11 = arith.constant 0 : index
      %12 = vector.load %arg9[%c0_10, %c0_11] : memref<128x128xf32, #tpu.memory_space<vmem>>, vector<128x128xf32>
      %c0_12 = arith.constant 0 : index
      %c0_13 = arith.constant 0 : index
      %13 = vector.load %arg5[%c0_12, %c0_13] : memref<1x128xf32, #tpu.memory_space<vmem>>, vector<1x128xf32>
      %14 = vector.broadcast %13 : vector<1x128xf32> to vector<128x128xf32>
      %15 = arith.mulf %12, %14 : vector<128x128xf32>
      %c0_14 = arith.constant 0 : index
      %c0_15 = arith.constant 0 : index
      %16 = vector.load %arg6[%c0_14, %c0_15] : memref<1x128xf32, #tpu.memory_space<vmem>>, vector<1x128xf32>
      %17 = vector.broadcast %16 : vector<1x128xf32> to vector<128x128xf32>
      %18 = arith.addf %15, %17 : vector<128x128xf32>
      %cst_16 = arith.constant 0.000000e+00 : f32
      %19 = vector.broadcast %cst_16 : f32 to vector<128x128xf32>
      %20 = arith.cmpf oge, %18, %19 : vector<128x128xf32>
      %c0_17 = arith.constant 0 : index
      %c0_18 = arith.constant 0 : index
      %21 = vector.load %arg7[%c0_17, %c0_18] : memref<1x128xf32, #tpu.memory_space<vmem>>, vector<1x128xf32>
      %22 = vector.broadcast %21 : vector<1x128xf32> to vector<128x128xf32>
      %23 = arith.mulf %22, %18 : vector<128x128xf32>
      %24 = arith.select %20, %18, %23 : vector<128x128xi1>, vector<128x128xf32>
      %25 = arith.truncf %24 : vector<128x128xf32> to vector<128x128xbf16>
      %c0_19 = arith.constant 0 : index
      %c0_20 = arith.constant 0 : index
      %26 = vector.load %arg8[%c0_19, %c0_20] : memref<128x128xbf16, #tpu.memory_space<vmem>>, vector<128x128xbf16>
      tpu.vector_store %arg8[%c0_19, %c0_20], %25 {strides = array<i32>} : memref<128x128xbf16, #tpu.memory_space<vmem>>, vector<128x128xbf16>,
    } else {
    }
    return
  }
  func.func @transform_0(%arg0: i32, %arg1: i32, %arg2: i32) -> (i32, i32) {
    %c0_i32 = arith.constant 0 : i32
    return %arg0, %arg2 : i32, i32
  }
  func.func @transform_1(%arg0: i32, %arg1: i32, %arg2: i32) -> (i32, i32) {
    %c0_i32 = arith.constant 0 : i32
    return %arg2, %arg1 : i32, i32
  }
  func.func @transform_2(%arg0: i32, %arg1: i32, %arg2: i32) -> (i32, i32) {
    %c0_i32 = arith.constant 0 : i32
    %c0_i32_0 = arith.constant 0 : i32
    return %c0_i32, %arg1 : i32, i32
  }
  func.func @transform_3(%arg0: i32, %arg1: i32, %arg2: i32) -> (i32, i32) {
    %c0_i32 = arith.constant 0 : i32
    %c0_i32_0 = arith.constant 0 : i32
    return %c0_i32, %arg1 : i32, i32
  }
  func.func @transform_4(%arg0: i32, %arg1: i32, %arg2: i32) -> (i32, i32) {
    %c0_i32 = arith.constant 0 : i32
    %c0_i32_0 = arith.constant 0 : i32
    return %c0_i32, %arg1 : i32, i32
  }
  func.func @transform_5(%arg0: i32, %arg1: i32, %arg2: i32) -> (i32, i32) {
    %c0_i32 = arith.constant 0 : i32
    return %arg0, %arg1 : i32, i32
  }
}

module attributes {stable_mosaic.version = 11 : i64} {
  func.func @_gemm_bn_act_kernel(%arg0: i32, %arg1: i32, %arg2: i32, %arg3: memref<128x128xbf16, #tpu.memory_space<vmem>>, %arg4: memref<128x128xbf16, #tpu.memory_space<vmem>>, %arg5: memref<1x128xf32, #tpu.memory_space<vmem>>, %arg6: memref<1x128xf32, #tpu.memory_space<vmem>>, %arg7: memref<1x128xf32, #tpu.memory_space<vmem>>, %arg8: memref<128x128xbf16, #tpu.memory_space<vmem>>, %arg9: memref<128x128xf32, #tpu.memory_space<vmem>>) attributes {dimension_semantics = [#tpu.dimension_semantics<parallel>, #tpu.dimension_semantics<parallel>, #tpu.dimension_semantics<arbitrary>], iteration_bounds = array<i64: 1, 1, 1>, scalar_prefetch = 0 : i64, scratch_operands = 1 : i64, tpu.core_type = #tpu.core_type<tc>, window_params = [{transform_indices = @transform_0, window_bounds = array<i64: 128, 128>}, {transform_indices = @transform_1, window_bounds = array<i64: 128, 128>}, {transform_indices = @transform_2, window_bounds = array<i64: 1, 128>}, {transform_indices = @transform_3, window_bounds = array<i64: 1, 128>}, {transform_indices = @transform_4, window_bounds = array<i64: 1, 128>}, {transform_indices = @transform_5, window_bounds = array<i64: 128, 128>}]} {
    %c0_i32 = arith.constant 0 : i32
    %0 = arith.cmpi eq, %arg2, %c0_i32 : i32
    %1 = arith.extui %0 : i1 to i32
    %c0_i32_0 = arith.constant 0 : i32
    %2 = arith.cmpi ne, %1, %c0_i32_0 : i32
    scf.if %2 {
      %cst_10 = arith.constant 0.000000e+00 : f32
      %12 = vector.broadcast %cst_10 : f32 to vector<128x128xf32>
      %c0_11 = arith.constant 0 : index
      %c0_12 = arith.constant 0 : index
      %13 = vector.load %arg9[%c0_11, %c0_12] : memref<128x128xf32, #tpu.memory_space<vmem>>, vector<128x128xf32>
      tpu.vector_store %arg9[%c0_11, %c0_12], %12 {strides = array<i32>} : memref<128x128xf32, #tpu.memory_space<vmem>>, vector<128x128xf32>,
    } else {
    }
    %c0 = arith.constant 0 : index
    %c0_1 = arith.constant 0 : index
    %3 = vector.load %arg9[%c0, %c0_1] : memref<128x128xf32, #tpu.memory_space<vmem>>, vector<128x128xf32>
    %c0_2 = arith.constant 0 : index
    %c0_3 = arith.constant 0 : index
    %4 = vector.load %arg3[%c0_2, %c0_3] : memref<128x128xbf16, #tpu.memory_space<vmem>>, vector<128x128xbf16>
    %c0_4 = arith.constant 0 : index
    %c0_5 = arith.constant 0 : index
    %5 = vector.load %arg4[%c0_4, %c0_5] : memref<128x128xbf16, #tpu.memory_space<vmem>>, vector<128x128xbf16>
    %cst = arith.constant dense<0.000000e+00> : vector<128x128xf32>
    %6 = tpu.matmul %4, %5, %cst {dimension_numbers = #tpu.dot_dimension_numbers<[1], [0], [0], [1], [0, 0, 1, 1], [], []>} : vector<128x128xbf16>, vector<128x128xbf16>, vector<128x128xf32> -> vector<128x128xf32>
    %7 = arith.addf %3, %6 : vector<128x128xf32>
    %c0_6 = arith.constant 0 : index
    %c0_7 = arith.constant 0 : index
    %8 = vector.load %arg9[%c0_6, %c0_7] : memref<128x128xf32, #tpu.memory_space<vmem>>, vector<128x128xf32>
    tpu.vector_store %arg9[%c0_6, %c0_7], %7 {strides = array<i32>} : memref<128x128xf32, #tpu.memory_space<vmem>>, vector<128x128xf32>,
    %c0_i32_8 = arith.constant 0 : i32
    %9 = arith.cmpi eq, %arg2, %c0_i32_8 : i32
    %10 = arith.extui %9 : i1 to i32
    %c0_i32_9 = arith.constant 0 : i32
    %11 = arith.cmpi ne, %10, %c0_i32_9 : i32
    scf.if %11 {
      %c0_10 = arith.constant 0 : index
      %c0_11 = arith.constant 0 : index
      %12 = vector.load %arg9[%c0_10, %c0_11] : memref<128x128xf32, #tpu.memory_space<vmem>>, vector<128x128xf32>
      %c0_12 = arith.constant 0 : index
      %c0_13 = arith.constant 0 : index
      %13 = vector.load %arg5[%c0_12, %c0_13] : memref<1x128xf32, #tpu.memory_space<vmem>>, vector<1x128xf32>
      %14 = vector.broadcast %13 : vector<1x128xf32> to vector<128x128xf32>
      %15 = arith.mulf %12, %14 : vector<128x128xf32>
      %c0_14 = arith.constant 0 : index
      %c0_15 = arith.constant 0 : index
      %16 = vector.load %arg6[%c0_14, %c0_15] : memref<1x128xf32, #tpu.memory_space<vmem>>, vector<1x128xf32>
      %17 = vector.broadcast %16 : vector<1x128xf32> to vector<128x128xf32>
      %18 = arith.addf %15, %17 : vector<128x128xf32>
      %cst_16 = arith.constant 0.000000e+00 : f32
      %19 = vector.broadcast %cst_16 : f32 to vector<128x128xf32>
      %20 = arith.cmpf oge, %18, %19 : vector<128x128xf32>
      %c0_17 = arith.constant 0 : index
      %c0_18 = arith.constant 0 : index
      %21 = vector.load %arg7[%c0_17, %c0_18] : memref<1x128xf32, #tpu.memory_space<vmem>>, vector<1x128xf32>
      %22 = vector.broadcast %21 : vector<1x128xf32> to vector<128x128xf32>
      %23 = arith.mulf %22, %18 : vector<128x128xf32>
      %24 = arith.select %20, %18, %23 : vector<128x128xi1>, vector<128x128xf32>
      %25 = arith.truncf %24 : vector<128x128xf32> to vector<128x128xbf16>
      %c0_19 = arith.constant 0 : index
      %c0_20 = arith.constant 0 : index
      %26 = vector.load %arg8[%c0_19, %c0_20] : memref<128x128xbf16, #tpu.memory_space<vmem>>, vector<128x128xbf16>
      tpu.vector_store %arg8[%c0_19, %c0_20], %25 {strides = array<i32>} : memref<128x128xbf16, #tpu.memory_space<vmem>>, vector<128x128xbf16>,
    } else {
    }
    return
  }
  func.func @transform_0(%arg0: i32, %arg1: i32, %arg2: i32) -> (i32, i32) {
    %c0_i32 = arith.constant 0 : i32
    return %arg0, %arg2 : i32, i32
  }
  func.func @transform_1(%arg0: i32, %arg1: i32, %arg2: i32) -> (i32, i32) {
    %c0_i32 = arith.constant 0 : i32
    return %arg2, %arg1 : i32, i32
  }
  func.func @transform_2(%arg0: i32, %arg1: i32, %arg2: i32) -> (i32, i32) {
    %c0_i32 = arith.constant 0 : i32
    %c0_i32_0 = arith.constant 0 : i32
    return %c0_i32, %arg1 : i32, i32
  }
  func.func @transform_3(%arg0: i32, %arg1: i32, %arg2: i32) -> (i32, i32) {
    %c0_i32 = arith.constant 0 : i32
    %c0_i32_0 = arith.constant 0 : i32
    return %c0_i32, %arg1 : i32, i32
  }
  func.func @transform_4(%arg0: i32, %arg1: i32, %arg2: i32) -> (i32, i32) {
    %c0_i32 = arith.constant 0 : i32
    %c0_i32_0 = arith.constant 0 : i32
    return %c0_i32, %arg1 : i32, i32
  }
  func.func @transform_5(%arg0: i32, %arg1: i32, %arg2: i32) -> (i32, i32) {
    %c0_i32 = arith.constant 0 : i32
    return %arg0, %arg1 : i32, i32
  }
}

module attributes {stable_mosaic.version = 11 : i64} {
  func.func @_gemm_res_bn_act_kernel(%arg0: i32, %arg1: i32, %arg2: i32, %arg3: memref<128x640xbf16, #tpu.memory_space<vmem>>, %arg4: memref<640x128xbf16, #tpu.memory_space<vmem>>, %arg5: memref<128x128xbf16, #tpu.memory_space<vmem>>, %arg6: memref<1x128xf32, #tpu.memory_space<vmem>>, %arg7: memref<1x128xf32, #tpu.memory_space<vmem>>, %arg8: memref<1x128xf32, #tpu.memory_space<vmem>>, %arg9: memref<128x128xbf16, #tpu.memory_space<vmem>>, %arg10: memref<128x128xf32, #tpu.memory_space<vmem>>) attributes {dimension_semantics = [#tpu.dimension_semantics<parallel>, #tpu.dimension_semantics<parallel>, #tpu.dimension_semantics<arbitrary>], iteration_bounds = array<i64: 1, 1, 1>, scalar_prefetch = 0 : i64, scratch_operands = 1 : i64, tpu.core_type = #tpu.core_type<tc>, window_params = [{transform_indices = @transform_0, window_bounds = array<i64: 128, 640>}, {transform_indices = @transform_1, window_bounds = array<i64: 640, 128>}, {transform_indices = @transform_2, window_bounds = array<i64: 128, 128>}, {transform_indices = @transform_3, window_bounds = array<i64: 1, 128>}, {transform_indices = @transform_4, window_bounds = array<i64: 1, 128>}, {transform_indices = @transform_5, window_bounds = array<i64: 1, 128>}, {transform_indices = @transform_6, window_bounds = array<i64: 128, 128>}]} {
    %c0_i32 = arith.constant 0 : i32
    %0 = arith.cmpi eq, %arg2, %c0_i32 : i32
    %1 = arith.extui %0 : i1 to i32
    %c0_i32_0 = arith.constant 0 : i32
    %2 = arith.cmpi ne, %1, %c0_i32_0 : i32
    scf.if %2 {
      %cst_10 = arith.constant 0.000000e+00 : f32
      %12 = vector.broadcast %cst_10 : f32 to vector<128x128xf32>
      %c0_11 = arith.constant 0 : index
      %c0_12 = arith.constant 0 : index
      %13 = vector.load %arg10[%c0_11, %c0_12] : memref<128x128xf32, #tpu.memory_space<vmem>>, vector<128x128xf32>
      tpu.vector_store %arg10[%c0_11, %c0_12], %12 {strides = array<i32>} : memref<128x128xf32, #tpu.memory_space<vmem>>, vector<128x128xf32>,
    } else {
    }
    %c0 = arith.constant 0 : index
    %c0_1 = arith.constant 0 : index
    %3 = vector.load %arg10[%c0, %c0_1] : memref<128x128xf32, #tpu.memory_space<vmem>>, vector<128x128xf32>
    %c0_2 = arith.constant 0 : index
    %c0_3 = arith.constant 0 : index
    %4 = vector.load %arg3[%c0_2, %c0_3] : memref<128x640xbf16, #tpu.memory_space<vmem>>, vector<128x640xbf16>
    %c0_4 = arith.constant 0 : index
    %c0_5 = arith.constant 0 : index
    %5 = vector.load %arg4[%c0_4, %c0_5] : memref<640x128xbf16, #tpu.memory_space<vmem>>, vector<640x128xbf16>
    %cst = arith.constant dense<0.000000e+00> : vector<128x128xf32>
    %6 = tpu.matmul %4, %5, %cst {dimension_numbers = #tpu.dot_dimension_numbers<[1], [0], [0], [1], [0, 0, 1, 1], [], []>} : vector<128x640xbf16>, vector<640x128xbf16>, vector<128x128xf32> -> vector<128x128xf32>
    %7 = arith.addf %3, %6 : vector<128x128xf32>
    %c0_6 = arith.constant 0 : index
    %c0_7 = arith.constant 0 : index
    %8 = vector.load %arg10[%c0_6, %c0_7] : memref<128x128xf32, #tpu.memory_space<vmem>>, vector<128x128xf32>
    tpu.vector_store %arg10[%c0_6, %c0_7], %7 {strides = array<i32>} : memref<128x128xf32, #tpu.memory_space<vmem>>, vector<128x128xf32>,
    %c0_i32_8 = arith.constant 0 : i32
    %9 = arith.cmpi eq, %arg2, %c0_i32_8 : i32
    %10 = arith.extui %9 : i1 to i32
    %c0_i32_9 = arith.constant 0 : i32
    %11 = arith.cmpi ne, %10, %c0_i32_9 : i32
    scf.if %11 {
      %c0_10 = arith.constant 0 : index
      %c0_11 = arith.constant 0 : index
      %12 = vector.load %arg10[%c0_10, %c0_11] : memref<128x128xf32, #tpu.memory_space<vmem>>, vector<128x128xf32>
      %c0_12 = arith.constant 0 : index
      %c0_13 = arith.constant 0 : index
      %13 = vector.load %arg5[%c0_12, %c0_13] : memref<128x128xbf16, #tpu.memory_space<vmem>>, vector<128x128xbf16>
      %14 = arith.extf %13 : vector<128x128xbf16> to vector<128x128xf32>
      %15 = arith.addf %12, %14 : vector<128x128xf32>
      %c0_14 = arith.constant 0 : index
      %c0_15 = arith.constant 0 : index
      %16 = vector.load %arg6[%c0_14, %c0_15] : memref<1x128xf32, #tpu.memory_space<vmem>>, vector<1x128xf32>
      %17 = vector.broadcast %16 : vector<1x128xf32> to vector<128x128xf32>
      %18 = arith.mulf %15, %17 : vector<128x128xf32>
      %c0_16 = arith.constant 0 : index
      %c0_17 = arith.constant 0 : index
      %19 = vector.load %arg7[%c0_16, %c0_17] : memref<1x128xf32, #tpu.memory_space<vmem>>, vector<1x128xf32>
      %20 = vector.broadcast %19 : vector<1x128xf32> to vector<128x128xf32>
      %21 = arith.addf %18, %20 : vector<128x128xf32>
      %cst_18 = arith.constant 0.000000e+00 : f32
      %22 = vector.broadcast %cst_18 : f32 to vector<128x128xf32>
      %23 = arith.cmpf oge, %21, %22 : vector<128x128xf32>
      %c0_19 = arith.constant 0 : index
      %c0_20 = arith.constant 0 : index
      %24 = vector.load %arg8[%c0_19, %c0_20] : memref<1x128xf32, #tpu.memory_space<vmem>>, vector<1x128xf32>
      %25 = vector.broadcast %24 : vector<1x128xf32> to vector<128x128xf32>
      %26 = arith.mulf %25, %21 : vector<128x128xf32>
      %27 = arith.select %23, %21, %26 : vector<128x128xi1>, vector<128x128xf32>
      %28 = arith.truncf %27 : vector<128x128xf32> to vector<128x128xbf16>
      %c0_21 = arith.constant 0 : index
      %c0_22 = arith.constant 0 : index
      %29 = vector.load %arg9[%c0_21, %c0_22] : memref<128x128xbf16, #tpu.memory_space<vmem>>, vector<128x128xbf16>
      tpu.vector_store %arg9[%c0_21, %c0_22], %28 {strides = array<i32>} : memref<128x128xbf16, #tpu.memory_space<vmem>>, vector<128x128xbf16>,
    } else {
    }
    return
  }
  func.func @transform_0(%arg0: i32, %arg1: i32, %arg2: i32) -> (i32, i32) {
    %c0_i32 = arith.constant 0 : i32
    return %arg0, %arg2 : i32, i32
  }
  func.func @transform_1(%arg0: i32, %arg1: i32, %arg2: i32) -> (i32, i32) {
    %c0_i32 = arith.constant 0 : i32
    return %arg2, %arg1 : i32, i32
  }
  func.func @transform_2(%arg0: i32, %arg1: i32, %arg2: i32) -> (i32, i32) {
    %c0_i32 = arith.constant 0 : i32
    return %arg0, %arg1 : i32, i32
  }
  func.func @transform_3(%arg0: i32, %arg1: i32, %arg2: i32) -> (i32, i32) {
    %c0_i32 = arith.constant 0 : i32
    %c0_i32_0 = arith.constant 0 : i32
    return %c0_i32, %arg1 : i32, i32
  }
  func.func @transform_4(%arg0: i32, %arg1: i32, %arg2: i32) -> (i32, i32) {
    %c0_i32 = arith.constant 0 : i32
    %c0_i32_0 = arith.constant 0 : i32
    return %c0_i32, %arg1 : i32, i32
  }
  func.func @transform_5(%arg0: i32, %arg1: i32, %arg2: i32) -> (i32, i32) {
    %c0_i32 = arith.constant 0 : i32
    %c0_i32_0 = arith.constant 0 : i32
    return %c0_i32, %arg1 : i32, i32
  }
  func.func @transform_6(%arg0: i32, %arg1: i32, %arg2: i32) -> (i32, i32) {
    %c0_i32 = arith.constant 0 : i32
    return %arg0, %arg1 : i32, i32
  }
}

module attributes {stable_mosaic.version = 11 : i64} {
  func.func @_gemm_bn_act_kernel(%arg0: i32, %arg1: i32, %arg2: i32, %arg3: memref<128x640xbf16, #tpu.memory_space<vmem>>, %arg4: memref<640x256xbf16, #tpu.memory_space<vmem>>, %arg5: memref<1x256xf32, #tpu.memory_space<vmem>>, %arg6: memref<1x256xf32, #tpu.memory_space<vmem>>, %arg7: memref<1x256xf32, #tpu.memory_space<vmem>>, %arg8: memref<128x256xbf16, #tpu.memory_space<vmem>>, %arg9: memref<128x256xf32, #tpu.memory_space<vmem>>) attributes {dimension_semantics = [#tpu.dimension_semantics<parallel>, #tpu.dimension_semantics<parallel>, #tpu.dimension_semantics<arbitrary>], iteration_bounds = array<i64: 1, 1, 2>, scalar_prefetch = 0 : i64, scratch_operands = 1 : i64, tpu.core_type = #tpu.core_type<tc>, window_params = [{transform_indices = @transform_0, window_bounds = array<i64: 128, 640>}, {transform_indices = @transform_1, window_bounds = array<i64: 640, 256>}, {transform_indices = @transform_2, window_bounds = array<i64: 1, 256>}, {transform_indices = @transform_3, window_bounds = array<i64: 1, 256>}, {transform_indices = @transform_4, window_bounds = array<i64: 1, 256>}, {transform_indices = @transform_5, window_bounds = array<i64: 128, 256>}]} {
    %c0_i32 = arith.constant 0 : i32
    %0 = arith.cmpi eq, %arg2, %c0_i32 : i32
    %1 = arith.extui %0 : i1 to i32
    %c0_i32_0 = arith.constant 0 : i32
    %2 = arith.cmpi ne, %1, %c0_i32_0 : i32
    scf.if %2 {
      %cst_9 = arith.constant 0.000000e+00 : f32
      %12 = vector.broadcast %cst_9 : f32 to vector<128x256xf32>
      %c0_10 = arith.constant 0 : index
      %c0_11 = arith.constant 0 : index
      %13 = vector.load %arg9[%c0_10, %c0_11] : memref<128x256xf32, #tpu.memory_space<vmem>>, vector<128x256xf32>
      tpu.vector_store %arg9[%c0_10, %c0_11], %12 {strides = array<i32>} : memref<128x256xf32, #tpu.memory_space<vmem>>, vector<128x256xf32>,
    } else {
    }
    %c0 = arith.constant 0 : index
    %c0_1 = arith.constant 0 : index
    %3 = vector.load %arg9[%c0, %c0_1] : memref<128x256xf32, #tpu.memory_space<vmem>>, vector<128x256xf32>
    %c0_2 = arith.constant 0 : index
    %c0_3 = arith.constant 0 : index
    %4 = vector.load %arg3[%c0_2, %c0_3] : memref<128x640xbf16, #tpu.memory_space<vmem>>, vector<128x640xbf16>
    %c0_4 = arith.constant 0 : index
    %c0_5 = arith.constant 0 : index
    %5 = vector.load %arg4[%c0_4, %c0_5] : memref<640x256xbf16, #tpu.memory_space<vmem>>, vector<640x256xbf16>
    %cst = arith.constant dense<0.000000e+00> : vector<128x256xf32>
    %6 = tpu.matmul %4, %5, %cst {dimension_numbers = #tpu.dot_dimension_numbers<[1], [0], [0], [1], [0, 0, 1, 1], [], []>} : vector<128x640xbf16>, vector<640x256xbf16>, vector<128x256xf32> -> vector<128x256xf32>
    %7 = arith.addf %3, %6 : vector<128x256xf32>
    %c0_6 = arith.constant 0 : index
    %c0_7 = arith.constant 0 : index
    %8 = vector.load %arg9[%c0_6, %c0_7] : memref<128x256xf32, #tpu.memory_space<vmem>>, vector<128x256xf32>
    tpu.vector_store %arg9[%c0_6, %c0_7], %7 {strides = array<i32>} : memref<128x256xf32, #tpu.memory_space<vmem>>, vector<128x256xf32>,
    %c1_i32 = arith.constant 1 : i32
    %9 = arith.cmpi eq, %arg2, %c1_i32 : i32
    %10 = arith.extui %9 : i1 to i32
    %c0_i32_8 = arith.constant 0 : i32
    %11 = arith.cmpi ne, %10, %c0_i32_8 : i32
    scf.if %11 {
      %c0_9 = arith.constant 0 : index
      %c0_10 = arith.constant 0 : index
      %12 = vector.load %arg9[%c0_9, %c0_10] : memref<128x256xf32, #tpu.memory_space<vmem>>, vector<128x256xf32>
      %c0_11 = arith.constant 0 : index
      %c0_12 = arith.constant 0 : index
      %13 = vector.load %arg5[%c0_11, %c0_12] : memref<1x256xf32, #tpu.memory_space<vmem>>, vector<1x256xf32>
      %14 = vector.broadcast %13 : vector<1x256xf32> to vector<128x256xf32>
      %15 = arith.mulf %12, %14 : vector<128x256xf32>
      %c0_13 = arith.constant 0 : index
      %c0_14 = arith.constant 0 : index
      %16 = vector.load %arg6[%c0_13, %c0_14] : memref<1x256xf32, #tpu.memory_space<vmem>>, vector<1x256xf32>
      %17 = vector.broadcast %16 : vector<1x256xf32> to vector<128x256xf32>
      %18 = arith.addf %15, %17 : vector<128x256xf32>
      %cst_15 = arith.constant 0.000000e+00 : f32
      %19 = vector.broadcast %cst_15 : f32 to vector<128x256xf32>
      %20 = arith.cmpf oge, %18, %19 : vector<128x256xf32>
      %c0_16 = arith.constant 0 : index
      %c0_17 = arith.constant 0 : index
      %21 = vector.load %arg7[%c0_16, %c0_17] : memref<1x256xf32, #tpu.memory_space<vmem>>, vector<1x256xf32>
      %22 = vector.broadcast %21 : vector<1x256xf32> to vector<128x256xf32>
      %23 = arith.mulf %22, %18 : vector<128x256xf32>
      %24 = arith.select %20, %18, %23 : vector<128x256xi1>, vector<128x256xf32>
      %25 = arith.truncf %24 : vector<128x256xf32> to vector<128x256xbf16>
      %c0_18 = arith.constant 0 : index
      %c0_19 = arith.constant 0 : index
      %26 = vector.load %arg8[%c0_18, %c0_19] : memref<128x256xbf16, #tpu.memory_space<vmem>>, vector<128x256xbf16>
      tpu.vector_store %arg8[%c0_18, %c0_19], %25 {strides = array<i32>} : memref<128x256xbf16, #tpu.memory_space<vmem>>, vector<128x256xbf16>,
    } else {
    }
    return
  }
  func.func @transform_0(%arg0: i32, %arg1: i32, %arg2: i32) -> (i32, i32) {
    %c0_i32 = arith.constant 0 : i32
    return %arg0, %arg2 : i32, i32
  }
  func.func @transform_1(%arg0: i32, %arg1: i32, %arg2: i32) -> (i32, i32) {
    %c0_i32 = arith.constant 0 : i32
    return %arg2, %arg1 : i32, i32
  }
  func.func @transform_2(%arg0: i32, %arg1: i32, %arg2: i32) -> (i32, i32) {
    %c0_i32 = arith.constant 0 : i32
    %c0_i32_0 = arith.constant 0 : i32
    return %c0_i32, %arg1 : i32, i32
  }
  func.func @transform_3(%arg0: i32, %arg1: i32, %arg2: i32) -> (i32, i32) {
    %c0_i32 = arith.constant 0 : i32
    %c0_i32_0 = arith.constant 0 : i32
    return %c0_i32, %arg1 : i32, i32
  }
  func.func @transform_4(%arg0: i32, %arg1: i32, %arg2: i32) -> (i32, i32) {
    %c0_i32 = arith.constant 0 : i32
    %c0_i32_0 = arith.constant 0 : i32
    return %c0_i32, %arg1 : i32, i32
  }
  func.func @transform_5(%arg0: i32, %arg1: i32, %arg2: i32) -> (i32, i32) {
    %c0_i32 = arith.constant 0 : i32
    return %arg0, %arg1 : i32, i32
  }
}

module attributes {stable_mosaic.version = 11 : i64} {
  func.func @_gemm_bn_act_kernel(%arg0: i32, %arg1: i32, %arg2: i32, %arg3: memref<32x640xbf16, #tpu.memory_space<vmem>>, %arg4: memref<640x128xbf16, #tpu.memory_space<vmem>>, %arg5: memref<1x128xf32, #tpu.memory_space<vmem>>, %arg6: memref<1x128xf32, #tpu.memory_space<vmem>>, %arg7: memref<1x128xf32, #tpu.memory_space<vmem>>, %arg8: memref<32x128xbf16, #tpu.memory_space<vmem>>, %arg9: memref<32x128xf32, #tpu.memory_space<vmem>>) attributes {dimension_semantics = [#tpu.dimension_semantics<parallel>, #tpu.dimension_semantics<parallel>, #tpu.dimension_semantics<arbitrary>], iteration_bounds = array<i64: 1, 1, 2>, scalar_prefetch = 0 : i64, scratch_operands = 1 : i64, tpu.core_type = #tpu.core_type<tc>, window_params = [{transform_indices = @transform_0, window_bounds = array<i64: 32, 640>}, {transform_indices = @transform_1, window_bounds = array<i64: 640, 128>}, {transform_indices = @transform_2, window_bounds = array<i64: 1, 128>}, {transform_indices = @transform_3, window_bounds = array<i64: 1, 128>}, {transform_indices = @transform_4, window_bounds = array<i64: 1, 128>}, {transform_indices = @transform_5, window_bounds = array<i64: 32, 128>}]} {
    %c0_i32 = arith.constant 0 : i32
    %0 = arith.cmpi eq, %arg2, %c0_i32 : i32
    %1 = arith.extui %0 : i1 to i32
    %c0_i32_0 = arith.constant 0 : i32
    %2 = arith.cmpi ne, %1, %c0_i32_0 : i32
    scf.if %2 {
      %cst_9 = arith.constant 0.000000e+00 : f32
      %12 = vector.broadcast %cst_9 : f32 to vector<32x128xf32>
      %c0_10 = arith.constant 0 : index
      %c0_11 = arith.constant 0 : index
      %13 = vector.load %arg9[%c0_10, %c0_11] : memref<32x128xf32, #tpu.memory_space<vmem>>, vector<32x128xf32>
      tpu.vector_store %arg9[%c0_10, %c0_11], %12 {strides = array<i32>} : memref<32x128xf32, #tpu.memory_space<vmem>>, vector<32x128xf32>,
    } else {
    }
    %c0 = arith.constant 0 : index
    %c0_1 = arith.constant 0 : index
    %3 = vector.load %arg9[%c0, %c0_1] : memref<32x128xf32, #tpu.memory_space<vmem>>, vector<32x128xf32>
    %c0_2 = arith.constant 0 : index
    %c0_3 = arith.constant 0 : index
    %4 = vector.load %arg3[%c0_2, %c0_3] : memref<32x640xbf16, #tpu.memory_space<vmem>>, vector<32x640xbf16>
    %c0_4 = arith.constant 0 : index
    %c0_5 = arith.constant 0 : index
    %5 = vector.load %arg4[%c0_4, %c0_5] : memref<640x128xbf16, #tpu.memory_space<vmem>>, vector<640x128xbf16>
    %cst = arith.constant dense<0.000000e+00> : vector<32x128xf32>
    %6 = tpu.matmul %4, %5, %cst {dimension_numbers = #tpu.dot_dimension_numbers<[1], [0], [0], [1], [0, 0, 1, 1], [], []>} : vector<32x640xbf16>, vector<640x128xbf16>, vector<32x128xf32> -> vector<32x128xf32>
    %7 = arith.addf %3, %6 : vector<32x128xf32>
    %c0_6 = arith.constant 0 : index
    %c0_7 = arith.constant 0 : index
    %8 = vector.load %arg9[%c0_6, %c0_7] : memref<32x128xf32, #tpu.memory_space<vmem>>, vector<32x128xf32>
    tpu.vector_store %arg9[%c0_6, %c0_7], %7 {strides = array<i32>} : memref<32x128xf32, #tpu.memory_space<vmem>>, vector<32x128xf32>,
    %c1_i32 = arith.constant 1 : i32
    %9 = arith.cmpi eq, %arg2, %c1_i32 : i32
    %10 = arith.extui %9 : i1 to i32
    %c0_i32_8 = arith.constant 0 : i32
    %11 = arith.cmpi ne, %10, %c0_i32_8 : i32
    scf.if %11 {
      %c0_9 = arith.constant 0 : index
      %c0_10 = arith.constant 0 : index
      %12 = vector.load %arg9[%c0_9, %c0_10] : memref<32x128xf32, #tpu.memory_space<vmem>>, vector<32x128xf32>
      %c0_11 = arith.constant 0 : index
      %c0_12 = arith.constant 0 : index
      %13 = vector.load %arg5[%c0_11, %c0_12] : memref<1x128xf32, #tpu.memory_space<vmem>>, vector<1x128xf32>
      %14 = vector.broadcast %13 : vector<1x128xf32> to vector<32x128xf32>
      %15 = arith.mulf %12, %14 : vector<32x128xf32>
      %c0_13 = arith.constant 0 : index
      %c0_14 = arith.constant 0 : index
      %16 = vector.load %arg6[%c0_13, %c0_14] : memref<1x128xf32, #tpu.memory_space<vmem>>, vector<1x128xf32>
      %17 = vector.broadcast %16 : vector<1x128xf32> to vector<32x128xf32>
      %18 = arith.addf %15, %17 : vector<32x128xf32>
      %cst_15 = arith.constant 0.000000e+00 : f32
      %19 = vector.broadcast %cst_15 : f32 to vector<32x128xf32>
      %20 = arith.cmpf oge, %18, %19 : vector<32x128xf32>
      %c0_16 = arith.constant 0 : index
      %c0_17 = arith.constant 0 : index
      %21 = vector.load %arg7[%c0_16, %c0_17] : memref<1x128xf32, #tpu.memory_space<vmem>>, vector<1x128xf32>
      %22 = vector.broadcast %21 : vector<1x128xf32> to vector<32x128xf32>
      %23 = arith.mulf %22, %18 : vector<32x128xf32>
      %24 = arith.select %20, %18, %23 : vector<32x128xi1>, vector<32x128xf32>
      %25 = arith.truncf %24 : vector<32x128xf32> to vector<32x128xbf16>
      %c0_18 = arith.constant 0 : index
      %c0_19 = arith.constant 0 : index
      %26 = vector.load %arg8[%c0_18, %c0_19] : memref<32x128xbf16, #tpu.memory_space<vmem>>, vector<32x128xbf16>
      tpu.vector_store %arg8[%c0_18, %c0_19], %25 {strides = array<i32>} : memref<32x128xbf16, #tpu.memory_space<vmem>>, vector<32x128xbf16>,
    } else {
    }
    return
  }
  func.func @transform_0(%arg0: i32, %arg1: i32, %arg2: i32) -> (i32, i32) {
    %c0_i32 = arith.constant 0 : i32
    return %arg0, %arg2 : i32, i32
  }
  func.func @transform_1(%arg0: i32, %arg1: i32, %arg2: i32) -> (i32, i32) {
    %c0_i32 = arith.constant 0 : i32
    return %arg2, %arg1 : i32, i32
  }
  func.func @transform_2(%arg0: i32, %arg1: i32, %arg2: i32) -> (i32, i32) {
    %c0_i32 = arith.constant 0 : i32
    %c0_i32_0 = arith.constant 0 : i32
    return %c0_i32, %arg1 : i32, i32
  }
  func.func @transform_3(%arg0: i32, %arg1: i32, %arg2: i32) -> (i32, i32) {
    %c0_i32 = arith.constant 0 : i32
    %c0_i32_0 = arith.constant 0 : i32
    return %c0_i32, %arg1 : i32, i32
  }
  func.func @transform_4(%arg0: i32, %arg1: i32, %arg2: i32) -> (i32, i32) {
    %c0_i32 = arith.constant 0 : i32
    %c0_i32_0 = arith.constant 0 : i32
    return %c0_i32, %arg1 : i32, i32
  }
  func.func @transform_5(%arg0: i32, %arg1: i32, %arg2: i32) -> (i32, i32) {
    %c0_i32 = arith.constant 0 : i32
    return %arg0, %arg1 : i32, i32
  }
}

module attributes {stable_mosaic.version = 11 : i64} {
  func.func @_gemm_bn_act_kernel(%arg0: i32, %arg1: i32, %arg2: i32, %arg3: memref<32x384xbf16, #tpu.memory_space<vmem>>, %arg4: memref<384x128xbf16, #tpu.memory_space<vmem>>, %arg5: memref<1x128xf32, #tpu.memory_space<vmem>>, %arg6: memref<1x128xf32, #tpu.memory_space<vmem>>, %arg7: memref<1x128xf32, #tpu.memory_space<vmem>>, %arg8: memref<32x128xbf16, #tpu.memory_space<vmem>>, %arg9: memref<32x128xf32, #tpu.memory_space<vmem>>) attributes {dimension_semantics = [#tpu.dimension_semantics<parallel>, #tpu.dimension_semantics<parallel>, #tpu.dimension_semantics<arbitrary>], iteration_bounds = array<i64: 1, 1, 3>, scalar_prefetch = 0 : i64, scratch_operands = 1 : i64, tpu.core_type = #tpu.core_type<tc>, window_params = [{transform_indices = @transform_0, window_bounds = array<i64: 32, 384>}, {transform_indices = @transform_1, window_bounds = array<i64: 384, 128>}, {transform_indices = @transform_2, window_bounds = array<i64: 1, 128>}, {transform_indices = @transform_3, window_bounds = array<i64: 1, 128>}, {transform_indices = @transform_4, window_bounds = array<i64: 1, 128>}, {transform_indices = @transform_5, window_bounds = array<i64: 32, 128>}]} {
    %c0_i32 = arith.constant 0 : i32
    %0 = arith.cmpi eq, %arg2, %c0_i32 : i32
    %1 = arith.extui %0 : i1 to i32
    %c0_i32_0 = arith.constant 0 : i32
    %2 = arith.cmpi ne, %1, %c0_i32_0 : i32
    scf.if %2 {
      %cst_9 = arith.constant 0.000000e+00 : f32
      %12 = vector.broadcast %cst_9 : f32 to vector<32x128xf32>
      %c0_10 = arith.constant 0 : index
      %c0_11 = arith.constant 0 : index
      %13 = vector.load %arg9[%c0_10, %c0_11] : memref<32x128xf32, #tpu.memory_space<vmem>>, vector<32x128xf32>
      tpu.vector_store %arg9[%c0_10, %c0_11], %12 {strides = array<i32>} : memref<32x128xf32, #tpu.memory_space<vmem>>, vector<32x128xf32>,
    } else {
    }
    %c0 = arith.constant 0 : index
    %c0_1 = arith.constant 0 : index
    %3 = vector.load %arg9[%c0, %c0_1] : memref<32x128xf32, #tpu.memory_space<vmem>>, vector<32x128xf32>
    %c0_2 = arith.constant 0 : index
    %c0_3 = arith.constant 0 : index
    %4 = vector.load %arg3[%c0_2, %c0_3] : memref<32x384xbf16, #tpu.memory_space<vmem>>, vector<32x384xbf16>
    %c0_4 = arith.constant 0 : index
    %c0_5 = arith.constant 0 : index
    %5 = vector.load %arg4[%c0_4, %c0_5] : memref<384x128xbf16, #tpu.memory_space<vmem>>, vector<384x128xbf16>
    %cst = arith.constant dense<0.000000e+00> : vector<32x128xf32>
    %6 = tpu.matmul %4, %5, %cst {dimension_numbers = #tpu.dot_dimension_numbers<[1], [0], [0], [1], [0, 0, 1, 1], [], []>} : vector<32x384xbf16>, vector<384x128xbf16>, vector<32x128xf32> -> vector<32x128xf32>
    %7 = arith.addf %3, %6 : vector<32x128xf32>
    %c0_6 = arith.constant 0 : index
    %c0_7 = arith.constant 0 : index
    %8 = vector.load %arg9[%c0_6, %c0_7] : memref<32x128xf32, #tpu.memory_space<vmem>>, vector<32x128xf32>
    tpu.vector_store %arg9[%c0_6, %c0_7], %7 {strides = array<i32>} : memref<32x128xf32, #tpu.memory_space<vmem>>, vector<32x128xf32>,
    %c2_i32 = arith.constant 2 : i32
    %9 = arith.cmpi eq, %arg2, %c2_i32 : i32
    %10 = arith.extui %9 : i1 to i32
    %c0_i32_8 = arith.constant 0 : i32
    %11 = arith.cmpi ne, %10, %c0_i32_8 : i32
    scf.if %11 {
      %c0_9 = arith.constant 0 : index
      %c0_10 = arith.constant 0 : index
      %12 = vector.load %arg9[%c0_9, %c0_10] : memref<32x128xf32, #tpu.memory_space<vmem>>, vector<32x128xf32>
      %c0_11 = arith.constant 0 : index
      %c0_12 = arith.constant 0 : index
      %13 = vector.load %arg5[%c0_11, %c0_12] : memref<1x128xf32, #tpu.memory_space<vmem>>, vector<1x128xf32>
      %14 = vector.broadcast %13 : vector<1x128xf32> to vector<32x128xf32>
      %15 = arith.mulf %12, %14 : vector<32x128xf32>
      %c0_13 = arith.constant 0 : index
      %c0_14 = arith.constant 0 : index
      %16 = vector.load %arg6[%c0_13, %c0_14] : memref<1x128xf32, #tpu.memory_space<vmem>>, vector<1x128xf32>
      %17 = vector.broadcast %16 : vector<1x128xf32> to vector<32x128xf32>
      %18 = arith.addf %15, %17 : vector<32x128xf32>
      %cst_15 = arith.constant 0.000000e+00 : f32
      %19 = vector.broadcast %cst_15 : f32 to vector<32x128xf32>
      %20 = arith.cmpf oge, %18, %19 : vector<32x128xf32>
      %c0_16 = arith.constant 0 : index
      %c0_17 = arith.constant 0 : index
      %21 = vector.load %arg7[%c0_16, %c0_17] : memref<1x128xf32, #tpu.memory_space<vmem>>, vector<1x128xf32>
      %22 = vector.broadcast %21 : vector<1x128xf32> to vector<32x128xf32>
      %23 = arith.mulf %22, %18 : vector<32x128xf32>
      %24 = arith.select %20, %18, %23 : vector<32x128xi1>, vector<32x128xf32>
      %25 = arith.truncf %24 : vector<32x128xf32> to vector<32x128xbf16>
      %c0_18 = arith.constant 0 : index
      %c0_19 = arith.constant 0 : index
      %26 = vector.load %arg8[%c0_18, %c0_19] : memref<32x128xbf16, #tpu.memory_space<vmem>>, vector<32x128xbf16>
      tpu.vector_store %arg8[%c0_18, %c0_19], %25 {strides = array<i32>} : memref<32x128xbf16, #tpu.memory_space<vmem>>, vector<32x128xbf16>,
    } else {
    }
    return
  }
  func.func @transform_0(%arg0: i32, %arg1: i32, %arg2: i32) -> (i32, i32) {
    %c0_i32 = arith.constant 0 : i32
    return %arg0, %arg2 : i32, i32
  }
  func.func @transform_1(%arg0: i32, %arg1: i32, %arg2: i32) -> (i32, i32) {
    %c0_i32 = arith.constant 0 : i32
    return %arg2, %arg1 : i32, i32
  }
  func.func @transform_2(%arg0: i32, %arg1: i32, %arg2: i32) -> (i32, i32) {
    %c0_i32 = arith.constant 0 : i32
    %c0_i32_0 = arith.constant 0 : i32
    return %c0_i32, %arg1 : i32, i32
  }
  func.func @transform_3(%arg0: i32, %arg1: i32, %arg2: i32) -> (i32, i32) {
    %c0_i32 = arith.constant 0 : i32
    %c0_i32_0 = arith.constant 0 : i32
    return %c0_i32, %arg1 : i32, i32
  }
  func.func @transform_4(%arg0: i32, %arg1: i32, %arg2: i32) -> (i32, i32) {
    %c0_i32 = arith.constant 0 : i32
    %c0_i32_0 = arith.constant 0 : i32
    return %c0_i32, %arg1 : i32, i32
  }
  func.func @transform_5(%arg0: i32, %arg1: i32, %arg2: i32) -> (i32, i32) {
    %c0_i32 = arith.constant 0 : i32
    return %arg0, %arg1 : i32, i32
  }
}

module attributes {stable_mosaic.version = 11 : i64} {
  func.func @_gemm_bn_act_kernel(%arg0: i32, %arg1: i32, %arg2: i32, %arg3: memref<32x128xbf16, #tpu.memory_space<vmem>>, %arg4: memref<128x128xbf16, #tpu.memory_space<vmem>>, %arg5: memref<1x128xf32, #tpu.memory_space<vmem>>, %arg6: memref<1x128xf32, #tpu.memory_space<vmem>>, %arg7: memref<1x128xf32, #tpu.memory_space<vmem>>, %arg8: memref<32x128xbf16, #tpu.memory_space<vmem>>, %arg9: memref<32x128xf32, #tpu.memory_space<vmem>>) attributes {dimension_semantics = [#tpu.dimension_semantics<parallel>, #tpu.dimension_semantics<parallel>, #tpu.dimension_semantics<arbitrary>], iteration_bounds = array<i64: 1, 1, 1>, scalar_prefetch = 0 : i64, scratch_operands = 1 : i64, tpu.core_type = #tpu.core_type<tc>, window_params = [{transform_indices = @transform_0, window_bounds = array<i64: 32, 128>}, {transform_indices = @transform_1, window_bounds = array<i64: 128, 128>}, {transform_indices = @transform_2, window_bounds = array<i64: 1, 128>}, {transform_indices = @transform_3, window_bounds = array<i64: 1, 128>}, {transform_indices = @transform_4, window_bounds = array<i64: 1, 128>}, {transform_indices = @transform_5, window_bounds = array<i64: 32, 128>}]} {
    %c0_i32 = arith.constant 0 : i32
    %0 = arith.cmpi eq, %arg2, %c0_i32 : i32
    %1 = arith.extui %0 : i1 to i32
    %c0_i32_0 = arith.constant 0 : i32
    %2 = arith.cmpi ne, %1, %c0_i32_0 : i32
    scf.if %2 {
      %cst_10 = arith.constant 0.000000e+00 : f32
      %12 = vector.broadcast %cst_10 : f32 to vector<32x128xf32>
      %c0_11 = arith.constant 0 : index
      %c0_12 = arith.constant 0 : index
      %13 = vector.load %arg9[%c0_11, %c0_12] : memref<32x128xf32, #tpu.memory_space<vmem>>, vector<32x128xf32>
      tpu.vector_store %arg9[%c0_11, %c0_12], %12 {strides = array<i32>} : memref<32x128xf32, #tpu.memory_space<vmem>>, vector<32x128xf32>,
    } else {
    }
    %c0 = arith.constant 0 : index
    %c0_1 = arith.constant 0 : index
    %3 = vector.load %arg9[%c0, %c0_1] : memref<32x128xf32, #tpu.memory_space<vmem>>, vector<32x128xf32>
    %c0_2 = arith.constant 0 : index
    %c0_3 = arith.constant 0 : index
    %4 = vector.load %arg3[%c0_2, %c0_3] : memref<32x128xbf16, #tpu.memory_space<vmem>>, vector<32x128xbf16>
    %c0_4 = arith.constant 0 : index
    %c0_5 = arith.constant 0 : index
    %5 = vector.load %arg4[%c0_4, %c0_5] : memref<128x128xbf16, #tpu.memory_space<vmem>>, vector<128x128xbf16>
    %cst = arith.constant dense<0.000000e+00> : vector<32x128xf32>
    %6 = tpu.matmul %4, %5, %cst {dimension_numbers = #tpu.dot_dimension_numbers<[1], [0], [0], [1], [0, 0, 1, 1], [], []>} : vector<32x128xbf16>, vector<128x128xbf16>, vector<32x128xf32> -> vector<32x128xf32>
    %7 = arith.addf %3, %6 : vector<32x128xf32>
    %c0_6 = arith.constant 0 : index
    %c0_7 = arith.constant 0 : index
    %8 = vector.load %arg9[%c0_6, %c0_7] : memref<32x128xf32, #tpu.memory_space<vmem>>, vector<32x128xf32>
    tpu.vector_store %arg9[%c0_6, %c0_7], %7 {strides = array<i32>} : memref<32x128xf32, #tpu.memory_space<vmem>>, vector<32x128xf32>,
    %c0_i32_8 = arith.constant 0 : i32
    %9 = arith.cmpi eq, %arg2, %c0_i32_8 : i32
    %10 = arith.extui %9 : i1 to i32
    %c0_i32_9 = arith.constant 0 : i32
    %11 = arith.cmpi ne, %10, %c0_i32_9 : i32
    scf.if %11 {
      %c0_10 = arith.constant 0 : index
      %c0_11 = arith.constant 0 : index
      %12 = vector.load %arg9[%c0_10, %c0_11] : memref<32x128xf32, #tpu.memory_space<vmem>>, vector<32x128xf32>
      %c0_12 = arith.constant 0 : index
      %c0_13 = arith.constant 0 : index
      %13 = vector.load %arg5[%c0_12, %c0_13] : memref<1x128xf32, #tpu.memory_space<vmem>>, vector<1x128xf32>
      %14 = vector.broadcast %13 : vector<1x128xf32> to vector<32x128xf32>
      %15 = arith.mulf %12, %14 : vector<32x128xf32>
      %c0_14 = arith.constant 0 : index
      %c0_15 = arith.constant 0 : index
      %16 = vector.load %arg6[%c0_14, %c0_15] : memref<1x128xf32, #tpu.memory_space<vmem>>, vector<1x128xf32>
      %17 = vector.broadcast %16 : vector<1x128xf32> to vector<32x128xf32>
      %18 = arith.addf %15, %17 : vector<32x128xf32>
      %cst_16 = arith.constant 0.000000e+00 : f32
      %19 = vector.broadcast %cst_16 : f32 to vector<32x128xf32>
      %20 = arith.cmpf oge, %18, %19 : vector<32x128xf32>
      %c0_17 = arith.constant 0 : index
      %c0_18 = arith.constant 0 : index
      %21 = vector.load %arg7[%c0_17, %c0_18] : memref<1x128xf32, #tpu.memory_space<vmem>>, vector<1x128xf32>
      %22 = vector.broadcast %21 : vector<1x128xf32> to vector<32x128xf32>
      %23 = arith.mulf %22, %18 : vector<32x128xf32>
      %24 = arith.select %20, %18, %23 : vector<32x128xi1>, vector<32x128xf32>
      %25 = arith.truncf %24 : vector<32x128xf32> to vector<32x128xbf16>
      %c0_19 = arith.constant 0 : index
      %c0_20 = arith.constant 0 : index
      %26 = vector.load %arg8[%c0_19, %c0_20] : memref<32x128xbf16, #tpu.memory_space<vmem>>, vector<32x128xbf16>
      tpu.vector_store %arg8[%c0_19, %c0_20], %25 {strides = array<i32>} : memref<32x128xbf16, #tpu.memory_space<vmem>>, vector<32x128xbf16>,
    } else {
    }
    return
  }
  func.func @transform_0(%arg0: i32, %arg1: i32, %arg2: i32) -> (i32, i32) {
    %c0_i32 = arith.constant 0 : i32
    return %arg0, %arg2 : i32, i32
  }
  func.func @transform_1(%arg0: i32, %arg1: i32, %arg2: i32) -> (i32, i32) {
    %c0_i32 = arith.constant 0 : i32
    return %arg2, %arg1 : i32, i32
  }
  func.func @transform_2(%arg0: i32, %arg1: i32, %arg2: i32) -> (i32, i32) {
    %c0_i32 = arith.constant 0 : i32
    %c0_i32_0 = arith.constant 0 : i32
    return %c0_i32, %arg1 : i32, i32
  }
  func.func @transform_3(%arg0: i32, %arg1: i32, %arg2: i32) -> (i32, i32) {
    %c0_i32 = arith.constant 0 : i32
    %c0_i32_0 = arith.constant 0 : i32
    return %c0_i32, %arg1 : i32, i32
  }
  func.func @transform_4(%arg0: i32, %arg1: i32, %arg2: i32) -> (i32, i32) {
    %c0_i32 = arith.constant 0 : i32
    %c0_i32_0 = arith.constant 0 : i32
    return %c0_i32, %arg1 : i32, i32
  }
  func.func @transform_5(%arg0: i32, %arg1: i32, %arg2: i32) -> (i32, i32) {
    %c0_i32 = arith.constant 0 : i32
    return %arg0, %arg1 : i32, i32
  }
}

module attributes {stable_mosaic.version = 11 : i64} {
  func.func @_gemm_res_bn_act_kernel(%arg0: i32, %arg1: i32, %arg2: i32, %arg3: memref<32x384xbf16, #tpu.memory_space<vmem>>, %arg4: memref<384x128xbf16, #tpu.memory_space<vmem>>, %arg5: memref<32x128xbf16, #tpu.memory_space<vmem>>, %arg6: memref<1x128xf32, #tpu.memory_space<vmem>>, %arg7: memref<1x128xf32, #tpu.memory_space<vmem>>, %arg8: memref<1x128xf32, #tpu.memory_space<vmem>>, %arg9: memref<32x128xbf16, #tpu.memory_space<vmem>>, %arg10: memref<32x128xf32, #tpu.memory_space<vmem>>) attributes {dimension_semantics = [#tpu.dimension_semantics<parallel>, #tpu.dimension_semantics<parallel>, #tpu.dimension_semantics<arbitrary>], iteration_bounds = array<i64: 1, 1, 3>, scalar_prefetch = 0 : i64, scratch_operands = 1 : i64, tpu.core_type = #tpu.core_type<tc>, window_params = [{transform_indices = @transform_0, window_bounds = array<i64: 32, 384>}, {transform_indices = @transform_1, window_bounds = array<i64: 384, 128>}, {transform_indices = @transform_2, window_bounds = array<i64: 32, 128>}, {transform_indices = @transform_3, window_bounds = array<i64: 1, 128>}, {transform_indices = @transform_4, window_bounds = array<i64: 1, 128>}, {transform_indices = @transform_5, window_bounds = array<i64: 1, 128>}, {transform_indices = @transform_6, window_bounds = array<i64: 32, 128>}]} {
    %c0_i32 = arith.constant 0 : i32
    %0 = arith.cmpi eq, %arg2, %c0_i32 : i32
    %1 = arith.extui %0 : i1 to i32
    %c0_i32_0 = arith.constant 0 : i32
    %2 = arith.cmpi ne, %1, %c0_i32_0 : i32
    scf.if %2 {
      %cst_9 = arith.constant 0.000000e+00 : f32
      %12 = vector.broadcast %cst_9 : f32 to vector<32x128xf32>
      %c0_10 = arith.constant 0 : index
      %c0_11 = arith.constant 0 : index
      %13 = vector.load %arg10[%c0_10, %c0_11] : memref<32x128xf32, #tpu.memory_space<vmem>>, vector<32x128xf32>
      tpu.vector_store %arg10[%c0_10, %c0_11], %12 {strides = array<i32>} : memref<32x128xf32, #tpu.memory_space<vmem>>, vector<32x128xf32>,
    } else {
    }
    %c0 = arith.constant 0 : index
    %c0_1 = arith.constant 0 : index
    %3 = vector.load %arg10[%c0, %c0_1] : memref<32x128xf32, #tpu.memory_space<vmem>>, vector<32x128xf32>
    %c0_2 = arith.constant 0 : index
    %c0_3 = arith.constant 0 : index
    %4 = vector.load %arg3[%c0_2, %c0_3] : memref<32x384xbf16, #tpu.memory_space<vmem>>, vector<32x384xbf16>
    %c0_4 = arith.constant 0 : index
    %c0_5 = arith.constant 0 : index
    %5 = vector.load %arg4[%c0_4, %c0_5] : memref<384x128xbf16, #tpu.memory_space<vmem>>, vector<384x128xbf16>
    %cst = arith.constant dense<0.000000e+00> : vector<32x128xf32>
    %6 = tpu.matmul %4, %5, %cst {dimension_numbers = #tpu.dot_dimension_numbers<[1], [0], [0], [1], [0, 0, 1, 1], [], []>} : vector<32x384xbf16>, vector<384x128xbf16>, vector<32x128xf32> -> vector<32x128xf32>
    %7 = arith.addf %3, %6 : vector<32x128xf32>
    %c0_6 = arith.constant 0 : index
    %c0_7 = arith.constant 0 : index
    %8 = vector.load %arg10[%c0_6, %c0_7] : memref<32x128xf32, #tpu.memory_space<vmem>>, vector<32x128xf32>
    tpu.vector_store %arg10[%c0_6, %c0_7], %7 {strides = array<i32>} : memref<32x128xf32, #tpu.memory_space<vmem>>, vector<32x128xf32>,
    %c2_i32 = arith.constant 2 : i32
    %9 = arith.cmpi eq, %arg2, %c2_i32 : i32
    %10 = arith.extui %9 : i1 to i32
    %c0_i32_8 = arith.constant 0 : i32
    %11 = arith.cmpi ne, %10, %c0_i32_8 : i32
    scf.if %11 {
      %c0_9 = arith.constant 0 : index
      %c0_10 = arith.constant 0 : index
      %12 = vector.load %arg10[%c0_9, %c0_10] : memref<32x128xf32, #tpu.memory_space<vmem>>, vector<32x128xf32>
      %c0_11 = arith.constant 0 : index
      %c0_12 = arith.constant 0 : index
      %13 = vector.load %arg5[%c0_11, %c0_12] : memref<32x128xbf16, #tpu.memory_space<vmem>>, vector<32x128xbf16>
      %14 = arith.extf %13 : vector<32x128xbf16> to vector<32x128xf32>
      %15 = arith.addf %12, %14 : vector<32x128xf32>
      %c0_13 = arith.constant 0 : index
      %c0_14 = arith.constant 0 : index
      %16 = vector.load %arg6[%c0_13, %c0_14] : memref<1x128xf32, #tpu.memory_space<vmem>>, vector<1x128xf32>
      %17 = vector.broadcast %16 : vector<1x128xf32> to vector<32x128xf32>
      %18 = arith.mulf %15, %17 : vector<32x128xf32>
      %c0_15 = arith.constant 0 : index
      %c0_16 = arith.constant 0 : index
      %19 = vector.load %arg7[%c0_15, %c0_16] : memref<1x128xf32, #tpu.memory_space<vmem>>, vector<1x128xf32>
      %20 = vector.broadcast %19 : vector<1x128xf32> to vector<32x128xf32>
      %21 = arith.addf %18, %20 : vector<32x128xf32>
      %cst_17 = arith.constant 0.000000e+00 : f32
      %22 = vector.broadcast %cst_17 : f32 to vector<32x128xf32>
      %23 = arith.cmpf oge, %21, %22 : vector<32x128xf32>
      %c0_18 = arith.constant 0 : index
      %c0_19 = arith.constant 0 : index
      %24 = vector.load %arg8[%c0_18, %c0_19] : memref<1x128xf32, #tpu.memory_space<vmem>>, vector<1x128xf32>
      %25 = vector.broadcast %24 : vector<1x128xf32> to vector<32x128xf32>
      %26 = arith.mulf %25, %21 : vector<32x128xf32>
      %27 = arith.select %23, %21, %26 : vector<32x128xi1>, vector<32x128xf32>
      %28 = arith.truncf %27 : vector<32x128xf32> to vector<32x128xbf16>
      %c0_20 = arith.constant 0 : index
      %c0_21 = arith.constant 0 : index
      %29 = vector.load %arg9[%c0_20, %c0_21] : memref<32x128xbf16, #tpu.memory_space<vmem>>, vector<32x128xbf16>
      tpu.vector_store %arg9[%c0_20, %c0_21], %28 {strides = array<i32>} : memref<32x128xbf16, #tpu.memory_space<vmem>>, vector<32x128xbf16>,
    } else {
    }
    return
  }
  func.func @transform_0(%arg0: i32, %arg1: i32, %arg2: i32) -> (i32, i32) {
    %c0_i32 = arith.constant 0 : i32
    return %arg0, %arg2 : i32, i32
  }
  func.func @transform_1(%arg0: i32, %arg1: i32, %arg2: i32) -> (i32, i32) {
    %c0_i32 = arith.constant 0 : i32
    return %arg2, %arg1 : i32, i32
  }
  func.func @transform_2(%arg0: i32, %arg1: i32, %arg2: i32) -> (i32, i32) {
    %c0_i32 = arith.constant 0 : i32
    return %arg0, %arg1 : i32, i32
  }
  func.func @transform_3(%arg0: i32, %arg1: i32, %arg2: i32) -> (i32, i32) {
    %c0_i32 = arith.constant 0 : i32
    %c0_i32_0 = arith.constant 0 : i32
    return %c0_i32, %arg1 : i32, i32
  }
  func.func @transform_4(%arg0: i32, %arg1: i32, %arg2: i32) -> (i32, i32) {
    %c0_i32 = arith.constant 0 : i32
    %c0_i32_0 = arith.constant 0 : i32
    return %c0_i32, %arg1 : i32, i32
  }
  func.func @transform_5(%arg0: i32, %arg1: i32, %arg2: i32) -> (i32, i32) {
    %c0_i32 = arith.constant 0 : i32
    %c0_i32_0 = arith.constant 0 : i32
    return %c0_i32, %arg1 : i32, i32
  }
  func.func @transform_6(%arg0: i32, %arg1: i32, %arg2: i32) -> (i32, i32) {
    %c0_i32 = arith.constant 0 : i32
    return %arg0, %arg1 : i32, i32
  }
}

module attributes {stable_mosaic.version = 11 : i64} {
  func.func @_gemm_bn_act_kernel(%arg0: i32, %arg1: i32, %arg2: i32, %arg3: memref<32x768xbf16, #tpu.memory_space<vmem>>, %arg4: memref<768x128xbf16, #tpu.memory_space<vmem>>, %arg5: memref<1x128xf32, #tpu.memory_space<vmem>>, %arg6: memref<1x128xf32, #tpu.memory_space<vmem>>, %arg7: memref<1x128xf32, #tpu.memory_space<vmem>>, %arg8: memref<32x128xbf16, #tpu.memory_space<vmem>>, %arg9: memref<32x128xf32, #tpu.memory_space<vmem>>) attributes {dimension_semantics = [#tpu.dimension_semantics<parallel>, #tpu.dimension_semantics<parallel>, #tpu.dimension_semantics<arbitrary>], iteration_bounds = array<i64: 1, 1, 3>, scalar_prefetch = 0 : i64, scratch_operands = 1 : i64, tpu.core_type = #tpu.core_type<tc>, window_params = [{transform_indices = @transform_0, window_bounds = array<i64: 32, 768>}, {transform_indices = @transform_1, window_bounds = array<i64: 768, 128>}, {transform_indices = @transform_2, window_bounds = array<i64: 1, 128>}, {transform_indices = @transform_3, window_bounds = array<i64: 1, 128>}, {transform_indices = @transform_4, window_bounds = array<i64: 1, 128>}, {transform_indices = @transform_5, window_bounds = array<i64: 32, 128>}]} {
    %c0_i32 = arith.constant 0 : i32
    %0 = arith.cmpi eq, %arg2, %c0_i32 : i32
    %1 = arith.extui %0 : i1 to i32
    %c0_i32_0 = arith.constant 0 : i32
    %2 = arith.cmpi ne, %1, %c0_i32_0 : i32
    scf.if %2 {
      %cst_9 = arith.constant 0.000000e+00 : f32
      %12 = vector.broadcast %cst_9 : f32 to vector<32x128xf32>
      %c0_10 = arith.constant 0 : index
      %c0_11 = arith.constant 0 : index
      %13 = vector.load %arg9[%c0_10, %c0_11] : memref<32x128xf32, #tpu.memory_space<vmem>>, vector<32x128xf32>
      tpu.vector_store %arg9[%c0_10, %c0_11], %12 {strides = array<i32>} : memref<32x128xf32, #tpu.memory_space<vmem>>, vector<32x128xf32>,
    } else {
    }
    %c0 = arith.constant 0 : index
    %c0_1 = arith.constant 0 : index
    %3 = vector.load %arg9[%c0, %c0_1] : memref<32x128xf32, #tpu.memory_space<vmem>>, vector<32x128xf32>
    %c0_2 = arith.constant 0 : index
    %c0_3 = arith.constant 0 : index
    %4 = vector.load %arg3[%c0_2, %c0_3] : memref<32x768xbf16, #tpu.memory_space<vmem>>, vector<32x768xbf16>
    %c0_4 = arith.constant 0 : index
    %c0_5 = arith.constant 0 : index
    %5 = vector.load %arg4[%c0_4, %c0_5] : memref<768x128xbf16, #tpu.memory_space<vmem>>, vector<768x128xbf16>
    %cst = arith.constant dense<0.000000e+00> : vector<32x128xf32>
    %6 = tpu.matmul %4, %5, %cst {dimension_numbers = #tpu.dot_dimension_numbers<[1], [0], [0], [1], [0, 0, 1, 1], [], []>} : vector<32x768xbf16>, vector<768x128xbf16>, vector<32x128xf32> -> vector<32x128xf32>
    %7 = arith.addf %3, %6 : vector<32x128xf32>
    %c0_6 = arith.constant 0 : index
    %c0_7 = arith.constant 0 : index
    %8 = vector.load %arg9[%c0_6, %c0_7] : memref<32x128xf32, #tpu.memory_space<vmem>>, vector<32x128xf32>
    tpu.vector_store %arg9[%c0_6, %c0_7], %7 {strides = array<i32>} : memref<32x128xf32, #tpu.memory_space<vmem>>, vector<32x128xf32>,
    %c2_i32 = arith.constant 2 : i32
    %9 = arith.cmpi eq, %arg2, %c2_i32 : i32
    %10 = arith.extui %9 : i1 to i32
    %c0_i32_8 = arith.constant 0 : i32
    %11 = arith.cmpi ne, %10, %c0_i32_8 : i32
    scf.if %11 {
      %c0_9 = arith.constant 0 : index
      %c0_10 = arith.constant 0 : index
      %12 = vector.load %arg9[%c0_9, %c0_10] : memref<32x128xf32, #tpu.memory_space<vmem>>, vector<32x128xf32>
      %c0_11 = arith.constant 0 : index
      %c0_12 = arith.constant 0 : index
      %13 = vector.load %arg5[%c0_11, %c0_12] : memref<1x128xf32, #tpu.memory_space<vmem>>, vector<1x128xf32>
      %14 = vector.broadcast %13 : vector<1x128xf32> to vector<32x128xf32>
      %15 = arith.mulf %12, %14 : vector<32x128xf32>
      %c0_13 = arith.constant 0 : index
      %c0_14 = arith.constant 0 : index
      %16 = vector.load %arg6[%c0_13, %c0_14] : memref<1x128xf32, #tpu.memory_space<vmem>>, vector<1x128xf32>
      %17 = vector.broadcast %16 : vector<1x128xf32> to vector<32x128xf32>
      %18 = arith.addf %15, %17 : vector<32x128xf32>
      %cst_15 = arith.constant 0.000000e+00 : f32
      %19 = vector.broadcast %cst_15 : f32 to vector<32x128xf32>
      %20 = arith.cmpf oge, %18, %19 : vector<32x128xf32>
      %c0_16 = arith.constant 0 : index
      %c0_17 = arith.constant 0 : index
      %21 = vector.load %arg7[%c0_16, %c0_17] : memref<1x128xf32, #tpu.memory_space<vmem>>, vector<1x128xf32>
      %22 = vector.broadcast %21 : vector<1x128xf32> to vector<32x128xf32>
      %23 = arith.mulf %22, %18 : vector<32x128xf32>
      %24 = arith.select %20, %18, %23 : vector<32x128xi1>, vector<32x128xf32>
      %25 = arith.truncf %24 : vector<32x128xf32> to vector<32x128xbf16>
      %c0_18 = arith.constant 0 : index
      %c0_19 = arith.constant 0 : index
      %26 = vector.load %arg8[%c0_18, %c0_19] : memref<32x128xbf16, #tpu.memory_space<vmem>>, vector<32x128xbf16>
      tpu.vector_store %arg8[%c0_18, %c0_19], %25 {strides = array<i32>} : memref<32x128xbf16, #tpu.memory_space<vmem>>, vector<32x128xbf16>,
    } else {
    }
    return
  }
  func.func @transform_0(%arg0: i32, %arg1: i32, %arg2: i32) -> (i32, i32) {
    %c0_i32 = arith.constant 0 : i32
    return %arg0, %arg2 : i32, i32
  }
  func.func @transform_1(%arg0: i32, %arg1: i32, %arg2: i32) -> (i32, i32) {
    %c0_i32 = arith.constant 0 : i32
    return %arg2, %arg1 : i32, i32
  }
  func.func @transform_2(%arg0: i32, %arg1: i32, %arg2: i32) -> (i32, i32) {
    %c0_i32 = arith.constant 0 : i32
    %c0_i32_0 = arith.constant 0 : i32
    return %c0_i32, %arg1 : i32, i32
  }
  func.func @transform_3(%arg0: i32, %arg1: i32, %arg2: i32) -> (i32, i32) {
    %c0_i32 = arith.constant 0 : i32
    %c0_i32_0 = arith.constant 0 : i32
    return %c0_i32, %arg1 : i32, i32
  }
  func.func @transform_4(%arg0: i32, %arg1: i32, %arg2: i32) -> (i32, i32) {
    %c0_i32 = arith.constant 0 : i32
    %c0_i32_0 = arith.constant 0 : i32
    return %c0_i32, %arg1 : i32, i32
  }
  func.func @transform_5(%arg0: i32, %arg1: i32, %arg2: i32) -> (i32, i32) {
    %c0_i32 = arith.constant 0 : i32
    return %arg0, %arg1 : i32, i32
  }
}

module attributes {stable_mosaic.version = 11 : i64} {
  func.func @_cam_kernel(%arg0: i32, %arg1: memref<1x1xf32, #tpu.memory_space<vmem>>, %arg2: memref<1x32x16xf32, #tpu.memory_space<vmem>>, %arg3: memref<1x32x16xf32, #tpu.memory_space<vmem>>) attributes {dimension_semantics = [#tpu.dimension_semantics<parallel>], iteration_bounds = array<i64: 2>, scalar_prefetch = 0 : i64, scratch_operands = 0 : i64, tpu.core_type = #tpu.core_type<tc>, window_params = [{pipeline_mode = #tpu.pipeline_mode<synchronous>, transform_indices = @transform_0, window_bounds = array<i64: 1, 1>}, {transform_indices = @transform_1, window_bounds = array<i64: 1, 32, 16>}, {transform_indices = @transform_2, window_bounds = array<i64: 1, 32, 16>}]} {
    %c0 = arith.constant 0 : index
    %c0_0 = arith.constant 0 : index
    %c0_1 = arith.constant 0 : index
    %0 = vector.load %arg2[%c0, %c0_0, %c0_1] : memref<1x32x16xf32, #tpu.memory_space<vmem>>, vector<1x32x16xf32>
    %1 = vector.shape_cast %0 : vector<1x32x16xf32> to vector<32x16xf32>
    %2 = arith.truncf %1 : vector<32x16xf32> to vector<32x16xbf16>
    %cst = arith.constant dense<0.000000e+00> : vector<32x32xf32>
    %3 = tpu.matmul %2, %2, %cst {dimension_numbers = #tpu.dot_dimension_numbers<[1], [1], [0], [0], [0, 0, 1, 0], [], []>} : vector<32x16xbf16>, vector<32x16xbf16>, vector<32x32xf32> -> vector<32x32xf32>
    %cst_2 = arith.constant dense<0xFF800000> : vector<32xf32>
    %4 = vector.multi_reduction <maximumf>, %3, %cst_2 [1] : vector<32x32xf32> to vector<32xf32>
    %5 = vector.shape_cast %4 : vector<32xf32> to vector<32x1xf32>
    %6 = vector.broadcast %5 : vector<32x1xf32> to vector<32x32xf32>
    %7 = arith.subf %6, %3 : vector<32x32xf32>
    %cst_3 = arith.constant 0.000000e+00 : f32
    %8 = vector.broadcast %cst_3 : f32 to vector<32x32xf32>
    %9 = arith.cmpf oge, %7, %8 : vector<32x32xf32>
    %cst_4 = arith.constant 0.00999999977 : f32
    %10 = vector.broadcast %cst_4 : f32 to vector<32x32xf32>
    %11 = arith.mulf %10, %7 : vector<32x32xf32>
    %12 = arith.select %9, %7, %11 : vector<32x32xi1>, vector<32x32xf32>
    %13 = arith.truncf %12 : vector<32x32xf32> to vector<32x32xbf16>
    %cst_5 = arith.constant dense<0.000000e+00> : vector<32x16xf32>
    %14 = tpu.matmul %13, %2, %cst_5 {dimension_numbers = #tpu.dot_dimension_numbers<[1], [0], [0], [1], [0, 0, 1, 1], [], []>} : vector<32x32xbf16>, vector<32x16xbf16>, vector<32x16xf32> -> vector<32x16xf32>
    %c0_6 = arith.constant 0 : index
    %c0_7 = arith.constant 0 : index
    %15 = vector.load %arg1[%c0_6, %c0_7] : memref<1x1xf32, #tpu.memory_space<vmem>>, vector<1x1xf32>
    %16 = vector.broadcast %15 : vector<1x1xf32> to vector<32x16xf32>
    %17 = arith.mulf %16, %14 : vector<32x16xf32>
    %18 = arith.addf %17, %1 : vector<32x16xf32>
    %c0_8 = arith.constant 0 : index
    %c0_9 = arith.constant 0 : index
    %c0_10 = arith.constant 0 : index
    %19 = vector.load %arg3[%c0_8, %c0_9, %c0_10] : memref<1x32x16xf32, #tpu.memory_space<vmem>>, vector<1x32x16xf32>
    %20 = vector.shape_cast %19 : vector<1x32x16xf32> to vector<32x16xf32>
    %21 = vector.shape_cast %18 : vector<32x16xf32> to vector<1x32x16xf32>
    tpu.vector_store %arg3[%c0_8, %c0_9, %c0_10], %21 {strides = array<i32>} : memref<1x32x16xf32, #tpu.memory_space<vmem>>, vector<1x32x16xf32>,
    return
  }
  func.func @transform_0(%arg0: i32) -> (i32, i32) {
    %c0_i32 = arith.constant 0 : i32
    %c0_i32_0 = arith.constant 0 : i32
    %c0_i32_1 = arith.constant 0 : i32
    return %c0_i32, %c0_i32_0 : i32, i32
  }
  func.func @transform_1(%arg0: i32) -> (i32, i32, i32) {
    %c0_i32 = arith.constant 0 : i32
    %c0_i32_0 = arith.constant 0 : i32
    %c0_i32_1 = arith.constant 0 : i32
    return %arg0, %c0_i32, %c0_i32_0 : i32, i32, i32
  }
  func.func @transform_2(%arg0: i32) -> (i32, i32, i32) {
    %c0_i32 = arith.constant 0 : i32
    %c0_i32_0 = arith.constant 0 : i32
    %c0_i32_1 = arith.constant 0 : i32
    return %arg0, %c0_i32, %c0_i32_0 : i32, i32, i32
  }
}

module attributes {stable_mosaic.version = 11 : i64} {
  func.func @_gemm_bn_act_kernel(%arg0: i32, %arg1: i32, %arg2: i32, %arg3: memref<32x384xbf16, #tpu.memory_space<vmem>>, %arg4: memref<384x128xbf16, #tpu.memory_space<vmem>>, %arg5: memref<1x128xf32, #tpu.memory_space<vmem>>, %arg6: memref<1x128xf32, #tpu.memory_space<vmem>>, %arg7: memref<1x128xf32, #tpu.memory_space<vmem>>, %arg8: memref<32x128xbf16, #tpu.memory_space<vmem>>, %arg9: memref<32x128xf32, #tpu.memory_space<vmem>>) attributes {dimension_semantics = [#tpu.dimension_semantics<parallel>, #tpu.dimension_semantics<parallel>, #tpu.dimension_semantics<arbitrary>], iteration_bounds = array<i64: 1, 1, 1>, scalar_prefetch = 0 : i64, scratch_operands = 1 : i64, tpu.core_type = #tpu.core_type<tc>, window_params = [{transform_indices = @transform_0, window_bounds = array<i64: 32, 384>}, {transform_indices = @transform_1, window_bounds = array<i64: 384, 128>}, {transform_indices = @transform_2, window_bounds = array<i64: 1, 128>}, {transform_indices = @transform_3, window_bounds = array<i64: 1, 128>}, {transform_indices = @transform_4, window_bounds = array<i64: 1, 128>}, {transform_indices = @transform_5, window_bounds = array<i64: 32, 128>}]} {
    %c0_i32 = arith.constant 0 : i32
    %0 = arith.cmpi eq, %arg2, %c0_i32 : i32
    %1 = arith.extui %0 : i1 to i32
    %c0_i32_0 = arith.constant 0 : i32
    %2 = arith.cmpi ne, %1, %c0_i32_0 : i32
    scf.if %2 {
      %cst_10 = arith.constant 0.000000e+00 : f32
      %12 = vector.broadcast %cst_10 : f32 to vector<32x128xf32>
      %c0_11 = arith.constant 0 : index
      %c0_12 = arith.constant 0 : index
      %13 = vector.load %arg9[%c0_11, %c0_12] : memref<32x128xf32, #tpu.memory_space<vmem>>, vector<32x128xf32>
      tpu.vector_store %arg9[%c0_11, %c0_12], %12 {strides = array<i32>} : memref<32x128xf32, #tpu.memory_space<vmem>>, vector<32x128xf32>,
    } else {
    }
    %c0 = arith.constant 0 : index
    %c0_1 = arith.constant 0 : index
    %3 = vector.load %arg9[%c0, %c0_1] : memref<32x128xf32, #tpu.memory_space<vmem>>, vector<32x128xf32>
    %c0_2 = arith.constant 0 : index
    %c0_3 = arith.constant 0 : index
    %4 = vector.load %arg3[%c0_2, %c0_3] : memref<32x384xbf16, #tpu.memory_space<vmem>>, vector<32x384xbf16>
    %c0_4 = arith.constant 0 : index
    %c0_5 = arith.constant 0 : index
    %5 = vector.load %arg4[%c0_4, %c0_5] : memref<384x128xbf16, #tpu.memory_space<vmem>>, vector<384x128xbf16>
    %cst = arith.constant dense<0.000000e+00> : vector<32x128xf32>
    %6 = tpu.matmul %4, %5, %cst {dimension_numbers = #tpu.dot_dimension_numbers<[1], [0], [0], [1], [0, 0, 1, 1], [], []>} : vector<32x384xbf16>, vector<384x128xbf16>, vector<32x128xf32> -> vector<32x128xf32>
    %7 = arith.addf %3, %6 : vector<32x128xf32>
    %c0_6 = arith.constant 0 : index
    %c0_7 = arith.constant 0 : index
    %8 = vector.load %arg9[%c0_6, %c0_7] : memref<32x128xf32, #tpu.memory_space<vmem>>, vector<32x128xf32>
    tpu.vector_store %arg9[%c0_6, %c0_7], %7 {strides = array<i32>} : memref<32x128xf32, #tpu.memory_space<vmem>>, vector<32x128xf32>,
    %c0_i32_8 = arith.constant 0 : i32
    %9 = arith.cmpi eq, %arg2, %c0_i32_8 : i32
    %10 = arith.extui %9 : i1 to i32
    %c0_i32_9 = arith.constant 0 : i32
    %11 = arith.cmpi ne, %10, %c0_i32_9 : i32
    scf.if %11 {
      %c0_10 = arith.constant 0 : index
      %c0_11 = arith.constant 0 : index
      %12 = vector.load %arg9[%c0_10, %c0_11] : memref<32x128xf32, #tpu.memory_space<vmem>>, vector<32x128xf32>
      %c0_12 = arith.constant 0 : index
      %c0_13 = arith.constant 0 : index
      %13 = vector.load %arg5[%c0_12, %c0_13] : memref<1x128xf32, #tpu.memory_space<vmem>>, vector<1x128xf32>
      %14 = vector.broadcast %13 : vector<1x128xf32> to vector<32x128xf32>
      %15 = arith.mulf %12, %14 : vector<32x128xf32>
      %c0_14 = arith.constant 0 : index
      %c0_15 = arith.constant 0 : index
      %16 = vector.load %arg6[%c0_14, %c0_15] : memref<1x128xf32, #tpu.memory_space<vmem>>, vector<1x128xf32>
      %17 = vector.broadcast %16 : vector<1x128xf32> to vector<32x128xf32>
      %18 = arith.addf %15, %17 : vector<32x128xf32>
      %cst_16 = arith.constant 0.000000e+00 : f32
      %19 = vector.broadcast %cst_16 : f32 to vector<32x128xf32>
      %20 = arith.cmpf oge, %18, %19 : vector<32x128xf32>
      %c0_17 = arith.constant 0 : index
      %c0_18 = arith.constant 0 : index
      %21 = vector.load %arg7[%c0_17, %c0_18] : memref<1x128xf32, #tpu.memory_space<vmem>>, vector<1x128xf32>
      %22 = vector.broadcast %21 : vector<1x128xf32> to vector<32x128xf32>
      %23 = arith.mulf %22, %18 : vector<32x128xf32>
      %24 = arith.select %20, %18, %23 : vector<32x128xi1>, vector<32x128xf32>
      %25 = arith.truncf %24 : vector<32x128xf32> to vector<32x128xbf16>
      %c0_19 = arith.constant 0 : index
      %c0_20 = arith.constant 0 : index
      %26 = vector.load %arg8[%c0_19, %c0_20] : memref<32x128xbf16, #tpu.memory_space<vmem>>, vector<32x128xbf16>
      tpu.vector_store %arg8[%c0_19, %c0_20], %25 {strides = array<i32>} : memref<32x128xbf16, #tpu.memory_space<vmem>>, vector<32x128xbf16>,
    } else {
    }
    return
  }
  func.func @transform_0(%arg0: i32, %arg1: i32, %arg2: i32) -> (i32, i32) {
    %c0_i32 = arith.constant 0 : i32
    return %arg0, %arg2 : i32, i32
  }
  func.func @transform_1(%arg0: i32, %arg1: i32, %arg2: i32) -> (i32, i32) {
    %c0_i32 = arith.constant 0 : i32
    return %arg2, %arg1 : i32, i32
  }
  func.func @transform_2(%arg0: i32, %arg1: i32, %arg2: i32) -> (i32, i32) {
    %c0_i32 = arith.constant 0 : i32
    %c0_i32_0 = arith.constant 0 : i32
    return %c0_i32, %arg1 : i32, i32
  }
  func.func @transform_3(%arg0: i32, %arg1: i32, %arg2: i32) -> (i32, i32) {
    %c0_i32 = arith.constant 0 : i32
    %c0_i32_0 = arith.constant 0 : i32
    return %c0_i32, %arg1 : i32, i32
  }
  func.func @transform_4(%arg0: i32, %arg1: i32, %arg2: i32) -> (i32, i32) {
    %c0_i32 = arith.constant 0 : i32
    %c0_i32_0 = arith.constant 0 : i32
    return %c0_i32, %arg1 : i32, i32
  }
  func.func @transform_5(%arg0: i32, %arg1: i32, %arg2: i32) -> (i32, i32) {
    %c0_i32 = arith.constant 0 : i32
    return %arg0, %arg1 : i32, i32
  }
}

module attributes {stable_mosaic.version = 11 : i64} {
  func.func @_pam_kernel(%arg0: i32, %arg1: memref<1x1xf32, #tpu.memory_space<vmem>>, %arg2: memref<1x16x4xf32, #tpu.memory_space<vmem>>, %arg3: memref<1x4x16xf32, #tpu.memory_space<vmem>>, %arg4: memref<1x32x16xf32, #tpu.memory_space<vmem>>, %arg5: memref<16x16xf32, #tpu.memory_space<vmem>>, %arg6: memref<16x1xf32, #tpu.memory_space<vmem>>, %arg7: memref<1x32x16xf32, #tpu.memory_space<vmem>>, %arg8: memref<1x32x16xf32, #tpu.memory_space<vmem>>) attributes {dimension_semantics = [#tpu.dimension_semantics<parallel>], iteration_bounds = array<i64: 2>, scalar_prefetch = 0 : i64, scratch_operands = 0 : i64, tpu.core_type = #tpu.core_type<tc>, window_params = [{pipeline_mode = #tpu.pipeline_mode<synchronous>, transform_indices = @transform_0, window_bounds = array<i64: 1, 1>}, {transform_indices = @transform_1, window_bounds = array<i64: 1, 16, 4>}, {transform_indices = @transform_2, window_bounds = array<i64: 1, 4, 16>}, {transform_indices = @transform_3, window_bounds = array<i64: 1, 32, 16>}, {pipeline_mode = #tpu.pipeline_mode<synchronous>, transform_indices = @transform_4, window_bounds = array<i64: 16, 16>}, {pipeline_mode = #tpu.pipeline_mode<synchronous>, transform_indices = @transform_5, window_bounds = array<i64: 16, 1>}, {transform_indices = @transform_6, window_bounds = array<i64: 1, 32, 16>}, {transform_indices = @transform_7, window_bounds = array<i64: 1, 32, 16>}]} {
    %c0 = arith.constant 0 : index
    %c0_0 = arith.constant 0 : index
    %c0_1 = arith.constant 0 : index
    %0 = vector.load %arg2[%c0, %c0_0, %c0_1] : memref<1x16x4xf32, #tpu.memory_space<vmem>>, vector<1x16x4xf32>
    %1 = vector.shape_cast %0 : vector<1x16x4xf32> to vector<16x4xf32>
    %2 = arith.truncf %1 : vector<16x4xf32> to vector<16x4xbf16>
    %c0_2 = arith.constant 0 : index
    %c0_3 = arith.constant 0 : index
    %c0_4 = arith.constant 0 : index
    %3 = vector.load %arg3[%c0_2, %c0_3, %c0_4] : memref<1x4x16xf32, #tpu.memory_space<vmem>>, vector<1x4x16xf32>
    %4 = vector.shape_cast %3 : vector<1x4x16xf32> to vector<4x16xf32>
    %5 = arith.truncf %4 : vector<4x16xf32> to vector<4x16xbf16>
    %c0_5 = arith.constant 0 : index
    %c0_6 = arith.constant 0 : index
    %c0_7 = arith.constant 0 : index
    %6 = vector.load %arg4[%c0_5, %c0_6, %c0_7] : memref<1x32x16xf32, #tpu.memory_space<vmem>>, vector<1x32x16xf32>
    %7 = vector.shape_cast %6 : vector<1x32x16xf32> to vector<32x16xf32>
    %8 = arith.truncf %7 : vector<32x16xf32> to vector<32x16xbf16>
    %c0_8 = arith.constant 0 : index
    %c0_9 = arith.constant 0 : index
    %c0_10 = arith.constant 0 : index
    %9 = vector.load %arg7[%c0_8, %c0_9, %c0_10] : memref<1x32x16xf32, #tpu.memory_space<vmem>>, vector<1x32x16xf32>
    %10 = vector.shape_cast %9 : vector<1x32x16xf32> to vector<32x16xf32>
    %cst = arith.constant dense<0.000000e+00> : vector<16x16xf32>
    %11 = tpu.matmul %2, %5, %cst {dimension_numbers = #tpu.dot_dimension_numbers<[1], [0], [0], [1], [0, 0, 1, 1], [], []>} : vector<16x4xbf16>, vector<4x16xbf16>, vector<16x16xf32> -> vector<16x16xf32>
    %cst_11 = arith.constant 0.000000e+00 : f32
    %12 = vector.broadcast %cst_11 : f32 to vector<16x16xf32>
    %13 = arith.cmpf oge, %11, %12 : vector<16x16xf32>
    %cst_12 = arith.constant 0.00999999977 : f32
    %14 = vector.broadcast %cst_12 : f32 to vector<16x16xf32>
    %15 = arith.mulf %14, %11 : vector<16x16xf32>
    %16 = arith.select %13, %11, %15 : vector<16x16xi1>, vector<16x16xf32>
    %c0_13 = arith.constant 0 : index
    %c0_14 = arith.constant 0 : index
    %17 = vector.load %arg5[%c0_13, %c0_14] : memref<16x16xf32, #tpu.memory_space<vmem>>, vector<16x16xf32>
    %18 = arith.truncf %17 : vector<16x16xf32> to vector<16x16xbf16>
    %19 = arith.truncf %16 : vector<16x16xf32> to vector<16x16xbf16>
    %cst_15 = arith.constant dense<0.000000e+00> : vector<16x16xf32>
    %20 = tpu.matmul %18, %19, %cst_15 {dimension_numbers = #tpu.dot_dimension_numbers<[1], [0], [0], [1], [0, 0, 1, 1], [], []>} : vector<16x16xbf16>, vector<16x16xbf16>, vector<16x16xf32> -> vector<16x16xf32>
    %c0_16 = arith.constant 0 : index
    %c0_17 = arith.constant 0 : index
    %21 = vector.load %arg6[%c0_16, %c0_17] : memref<16x1xf32, #tpu.memory_space<vmem>>, vector<16x1xf32>
    %22 = vector.broadcast %21 : vector<16x1xf32> to vector<16x16xf32>
    %23 = arith.addf %20, %22 : vector<16x16xf32>
    %24 = arith.truncf %23 : vector<16x16xf32> to vector<16x16xbf16>
    %cst_18 = arith.constant dense<0.000000e+00> : vector<32x16xf32>
    %25 = tpu.matmul %8, %24, %cst_18 {dimension_numbers = #tpu.dot_dimension_numbers<[1], [0], [0], [1], [0, 0, 1, 1], [], []>} : vector<32x16xbf16>, vector<16x16xbf16>, vector<32x16xf32> -> vector<32x16xf32>
    %c0_19 = arith.constant 0 : index
    %c0_20 = arith.constant 0 : index
    %26 = vector.load %arg1[%c0_19, %c0_20] : memref<1x1xf32, #tpu.memory_space<vmem>>, vector<1x1xf32>
    %27 = vector.broadcast %26 : vector<1x1xf32> to vector<32x16xf32>
    %28 = arith.mulf %27, %25 : vector<32x16xf32>
    %29 = arith.addf %28, %10 : vector<32x16xf32>
    %c0_21 = arith.constant 0 : index
    %c0_22 = arith.constant 0 : index
    %c0_23 = arith.constant 0 : index
    %30 = vector.load %arg8[%c0_21, %c0_22, %c0_23] : memref<1x32x16xf32, #tpu.memory_space<vmem>>, vector<1x32x16xf32>
    %31 = vector.shape_cast %30 : vector<1x32x16xf32> to vector<32x16xf32>
    %32 = vector.shape_cast %29 : vector<32x16xf32> to vector<1x32x16xf32>
    tpu.vector_store %arg8[%c0_21, %c0_22, %c0_23], %32 {strides = array<i32>} : memref<1x32x16xf32, #tpu.memory_space<vmem>>, vector<1x32x16xf32>,
    return
  }
  func.func @transform_0(%arg0: i32) -> (i32, i32) {
    %c0_i32 = arith.constant 0 : i32
    %c0_i32_0 = arith.constant 0 : i32
    %c0_i32_1 = arith.constant 0 : i32
    return %c0_i32, %c0_i32_0 : i32, i32
  }
  func.func @transform_1(%arg0: i32) -> (i32, i32, i32) {
    %c0_i32 = arith.constant 0 : i32
    %c0_i32_0 = arith.constant 0 : i32
    %c0_i32_1 = arith.constant 0 : i32
    return %arg0, %c0_i32, %c0_i32_0 : i32, i32, i32
  }
  func.func @transform_2(%arg0: i32) -> (i32, i32, i32) {
    %c0_i32 = arith.constant 0 : i32
    %c0_i32_0 = arith.constant 0 : i32
    %c0_i32_1 = arith.constant 0 : i32
    return %arg0, %c0_i32, %c0_i32_0 : i32, i32, i32
  }
  func.func @transform_3(%arg0: i32) -> (i32, i32, i32) {
    %c0_i32 = arith.constant 0 : i32
    %c0_i32_0 = arith.constant 0 : i32
    %c0_i32_1 = arith.constant 0 : i32
    return %arg0, %c0_i32, %c0_i32_0 : i32, i32, i32
  }
  func.func @transform_4(%arg0: i32) -> (i32, i32) {
    %c0_i32 = arith.constant 0 : i32
    %c0_i32_0 = arith.constant 0 : i32
    %c0_i32_1 = arith.constant 0 : i32
    return %c0_i32, %c0_i32_0 : i32, i32
  }
  func.func @transform_5(%arg0: i32) -> (i32, i32) {
    %c0_i32 = arith.constant 0 : i32
    %c0_i32_0 = arith.constant 0 : i32
    %c0_i32_1 = arith.constant 0 : i32
    return %c0_i32, %c0_i32_0 : i32, i32
  }
  func.func @transform_6(%arg0: i32) -> (i32, i32, i32) {
    %c0_i32 = arith.constant 0 : i32
    %c0_i32_0 = arith.constant 0 : i32
    %c0_i32_1 = arith.constant 0 : i32
    return %arg0, %c0_i32, %c0_i32_0 : i32, i32, i32
  }
  func.func @transform_7(%arg0: i32) -> (i32, i32, i32) {
    %c0_i32 = arith.constant 0 : i32
    %c0_i32_0 = arith.constant 0 : i32
    %c0_i32_1 = arith.constant 0 : i32
    return %arg0, %c0_i32, %c0_i32_0 : i32, i32, i32
  }
}

</mosaic_0001>

<bundles_post_ra>
// kernel: espnet_encoder_forward.30
= control target key start
LH: loop header
LB: loop body
LE: loop exit
PB: predicated region body
PF: predicated region fallthrough
CT: control target
= control target key end

     0   :  { %s2658_s1 = inlined_call_operand.vmem [shape: bf16[128,128], index: 1, kind: input, shape index: {}]   ;;  %s2659_s0 = inlined_call_operand.vmem [shape: bf16[512,128], index: 0, kind: input, shape index: {}]   ;;  %s2660_s2 = inlined_call_operand.vmem [shape: f32[1,128], index: 2, kind: input, shape index: {}]   ;;  %s2661_s3 = inlined_call_operand.vmem [shape: f32[1,128], index: 3, kind: input, shape index: {}]   ;;  %s2662_s4 = inlined_call_operand.vmem [shape: f32[1,128], index: 4, kind: input, shape index: {}]   ;;  %s2663_s5 = inlined_call_operand.vmem [shape: bf16[512,128], index: 5, kind: output, shape index: {}]  }
   0x1   :  { %v2120_v0 = vld [vmem:[%s2658_s1 + $0x38] sm:$0xff]   ;;  %v2121_v1 = vld [vmem:[%s2658_s1 + $0x30] sm:$0xff]   ;;  %v2122_v2 = vld [vmem:[%s2658_s1 + $0x28] sm:$0xff]  }
   0x2   :  { %2024 = vmatprep.subr.bf16.mxu0 %v2120_v0  ;;  %2104 = vmatprep.subr.bf16.mxu1 %v2120_v0  ;;  %v2123_v3 = vld [vmem:[%s2658_s1 + $0x20] sm:$0xff]   ;;  %v2124_v6 = vld [vmem:[%s2658_s1 + $0x18] sm:$0xff]   ;;  %v2125_v7 = vld [vmem:[%s2658_s1 + $0x10] sm:$0xff]  }
   0x3   :  { %2025 = vmatpush3.bf16.msra.mxu0 %v2120_v0  ;;  %2112 = vmatpush3.bf16.msra.mxu1 %v2120_v0  ;;  %v2128_v4 = vld [vmem:[%s2659_s0] sm:$0xff]   ;;  %v2126_v8 = vld [vmem:[%s2658_s1 + $0x8] sm:$0xff]   ;;  %v2132_v12 = vld [vmem:[%s2659_s0 + $0x10] sm:$0xff]  }
   0x4   :  { %2026 = vmatprep.subr.bf16.mxu0 %v2121_v1  ;;  %2105 = vmatprep.subr.bf16.mxu1 %v2121_v1  ;;  %v2129_v5 = vld [vmem:[%s2659_s0 + $0x80] sm:$0xff]   ;;  %v2130_v10 = vld [vmem:[%s2659_s0 + $0x8] sm:$0xff]   ;;  %v2133_v13 = vld [vmem:[%s2659_s0 + $0x90] sm:$0xff]  }
   0x5   :  { %2040 = vmatprep.mubr.bf16.mxu0 %v2128_v4  ;;  %2072 = vmatprep.mubr.bf16.mxu1 %v2129_v5  ;;  %v2127_v9 = vld [vmem:[%s2658_s1] sm:$0xff]   ;;  %v2131_v11 = vld [vmem:[%s2659_s0 + $0x88] sm:$0xff]   ;;  %v2134_v14 = vld [vmem:[%s2659_s0 + $0x18] sm:$0xff]  }
   0x6   :  { %v2135_v15 = vld [vmem:[%s2659_s0 + $0x98] sm:$0xff]   ;;  %v2136_v16 = vld [vmem:[%s2659_s0 + $0x20] sm:$0xff]   ;;  %v2138_v18 = vld [vmem:[%s2659_s0 + $0x28] sm:$0xff]  }
   0x7   :  { %2027 = vmatpush3.bf16.msra.mxu0 %v2121_v1  ;;  %2113 = vmatpush3.bf16.msra.mxu1 %v2121_v1  ;;  %v2137_v17 = vld [vmem:[%s2659_s0 + $0xa0] sm:$0xff]   ;;  %v2139_v19 = vld [vmem:[%s2659_s0 + $0xa8] sm:$0xff]   ;;  %v2140_v20 = vld [vmem:[%s2659_s0 + $0x30] sm:$0xff]  }
   0x8   :  { %2028 = vmatprep.subr.bf16.mxu0 %v2122_v2  ;;  %2106 = vmatprep.subr.bf16.mxu1 %v2122_v2  ;;  %v2141_v21 = vld [vmem:[%s2659_s0 + $0xb0] sm:$0xff]   ;;  %v2142_v22 = vld [vmem:[%s2659_s0 + $0x38] sm:$0xff]   ;;  %v2144_v24 = vld [vmem:[%s2659_s0 + $0x40] sm:$0xff]  }
   0x9   :  { %v2143_v23 = vld [vmem:[%s2659_s0 + $0xb8] sm:$0xff]   ;;  %v2145_v25 = vld [vmem:[%s2659_s0 + $0xc0] sm:$0xff]   ;;  %v2146_v26 = vld [vmem:[%s2659_s0 + $0x48] sm:$0xff]  }
   0xa   :  { %v2147_v27 = vld [vmem:[%s2659_s0 + $0xc8] sm:$0xff]   ;;  %v2148_v28 = vld [vmem:[%s2659_s0 + $0x50] sm:$0xff]   ;;  %v2150_v30 = vld [vmem:[%s2659_s0 + $0x58] sm:$0xff]  }
   0xb   :  { %2029 = vmatpush3.bf16.msra.mxu0 %v2122_v2  ;;  %2114 = vmatpush3.bf16.msra.mxu1 %v2122_v2  ;;  %v2149_v29 = vld [vmem:[%s2659_s0 + $0xd0] sm:$0xff]   ;;  %v2151_v31 = vld [vmem:[%s2659_s0 + $0xd8] sm:$0xff]   ;;  %v2152_v32 = vld [vmem:[%s2659_s0 + $0x60] sm:$0xff]  }
   0xc   :  { %2030 = vmatprep.subr.bf16.mxu0 %v2123_v3  ;;  %2107 = vmatprep.subr.bf16.mxu1 %v2123_v3  ;;  %v2153_v33 = vld [vmem:[%s2659_s0 + $0xe0] sm:$0xff]   ;;  %v2154_v34 = vld [vmem:[%s2659_s0 + $0x68] sm:$0xff]   ;;  %v2156_v36 = vld [vmem:[%s2659_s0 + $0x70] sm:$0xff]  }
   0xd   :  { %v2155_v35 = vld [vmem:[%s2659_s0 + $0xe8] sm:$0xff]   ;;  %v2157_v37 = vld [vmem:[%s2659_s0 + $0xf0] sm:$0xff]   ;;  %v2158_v38 = vld [vmem:[%s2659_s0 + $0x78] sm:$0xff]  }
   0xe   :  { %v2159_v39 = vld [vmem:[%s2659_s0 + $0xf8] sm:$0xff]   ;;  %v2313_v40 = vld [vmem:[%s2660_s2] ss:$0 sm:$0xff] }
   0xf   :  { %2031 = vmatpush3.bf16.msra.mxu0 %v2123_v3  ;;  %2115 = vmatpush3.bf16.msra.mxu1 %v2123_v3  ;;  %v2318_v42 = vld [vmem:[%s2661_s3] ss:$0 sm:$0xff] }
  0x10   :  { %2032 = vmatprep.subr.bf16.mxu0 %v2124_v6  ;;  %2108 = vmatprep.subr.bf16.mxu1 %v2124_v6  ;;  %v2325_v46 = vld [vmem:[%s2662_s4] ss:$0 sm:$0xff] }
  0x13   :  { %2033 = vmatpush3.bf16.msra.mxu0 %v2124_v6  ;;  %2116 = vmatpush3.bf16.msra.mxu1 %v2124_v6 }
  0x14   :  { %2034 = vmatprep.subr.bf16.mxu0 %v2125_v7  ;;  %2109 = vmatprep.subr.bf16.mxu1 %v2125_v7 }
  0x17   :  { %2035 = vmatpush3.bf16.msra.mxu0 %v2125_v7  ;;  %2117 = vmatpush3.bf16.msra.mxu1 %v2125_v7 }
  0x18   :  { %2036 = vmatprep.subr.bf16.mxu0 %v2126_v8  ;;  %2110 = vmatprep.subr.bf16.mxu1 %v2126_v8 }
  0x1b   :  { %2037 = vmatpush3.bf16.msra.mxu0 %v2126_v8  ;;  %2118 = vmatpush3.bf16.msra.mxu1 %v2126_v8 }
  0x1c   :  { %2038 = vmatprep.subr.bf16.mxu0 %v2127_v9  ;;  %2111 = vmatprep.subr.bf16.mxu1 %v2127_v9 }
  0x1f   :  { %2039 = vmatpush3.bf16.msra.mxu0 %v2127_v9  ;;  %2119 = vmatpush3.bf16.msra.mxu1 %v2127_v9 }
  0x22   :  { %2041 = vmatmul.mubr.bf16.vlgmr.msra.gmra.mxu0 %v2130_v10  ;;  %2073 = vmatmul.mubr.bf16.vlgmr.msra.gmra.mxu1 %v2131_v11 }
  0x23   :  { %2044 = vmatprep.mubr.bf16.mxu0 %v2132_v12  ;;  %2076 = vmatprep.mubr.bf16.mxu1 %v2133_v13 }
  0x2a   :  { %2045 = vmatmul.mubr.bf16.gmra.mxu0 %v2134_v14  ;;  %2077 = vmatmul.mubr.bf16.gmra.mxu1 %v2135_v15 }
  0x2b   :  { %2048 = vmatprep.mubr.bf16.mxu0 %v2136_v16  ;;  %2080 = vmatprep.mubr.bf16.mxu1 %v2137_v17 }
  0x32   :  { %2049 = vmatmul.mubr.bf16.gmra.mxu0 %v2138_v18  ;;  %2081 = vmatmul.mubr.bf16.gmra.mxu1 %v2139_v19 }
  0x33   :  { %2052 = vmatprep.mubr.bf16.mxu0 %v2140_v20  ;;  %2084 = vmatprep.mubr.bf16.mxu1 %v2141_v21 }
  0x3a   :  { %2053 = vmatmul.mubr.bf16.gmra.mxu0 %v2142_v22  ;;  %2085 = vmatmul.mubr.bf16.gmra.mxu1 %v2143_v23 }
  0x3b   :  { %2056 = vmatprep.mubr.bf16.mxu0 %v2144_v24  ;;  %2088 = vmatprep.mubr.bf16.mxu1 %v2145_v25 }
  0x42   :  { %2057 = vmatmul.mubr.bf16.gmra.mxu0 %v2146_v26  ;;  %2089 = vmatmul.mubr.bf16.gmra.mxu1 %v2147_v27 }
  0x43   :  { %2060 = vmatprep.mubr.bf16.mxu0 %v2148_v28  ;;  %2092 = vmatprep.mubr.bf16.mxu1 %v2149_v29 }
  0x4a   :  { %2061 = vmatmul.mubr.bf16.gmra.mxu0 %v2150_v30  ;;  %2093 = vmatmul.mubr.bf16.gmra.mxu1 %v2151_v31 }
  0x4b   :  { %2064 = vmatprep.mubr.bf16.mxu0 %v2152_v32  ;;  %2096 = vmatprep.mubr.bf16.mxu1 %v2153_v33 }
  0x52   :  { %2065 = vmatmul.mubr.bf16.gmra.mxu0 %v2154_v34  ;;  %2097 = vmatmul.mubr.bf16.gmra.mxu1 %v2155_v35 }
  0x53   :  { %2068 = vmatprep.mubr.bf16.mxu0 %v2156_v36  ;;  %2100 = vmatprep.mubr.bf16.mxu1 %v2157_v37 }
  0x5a   :  { %2069 = vmatmul.mubr.bf16.gmra.mxu0 %v2158_v38  ;;  %2101 = vmatmul.mubr.bf16.gmra.mxu1 %v2159_v39 }
  0xe2   :  { %v2042_v41 = vpop.f32.mrf.mxu0  ;;  %v2074_v43 = vpop.f32.mrf.mxu1 }
  0xe3   :  { %v966_v44 = vmul.f32 %v2042_v41, %v2313_v40  ;;  %v998_v45 = vmul.f32 %v2074_v43, %v2313_v40 }
  0xe4   :  { %v507_v47 = vpop.f32.mrf.mxu0  ;;  %v635_v48 = vpop.f32.mrf.mxu1 }
  0xe5   :  { %v1037_v49 = vadd.f32 %v2318_v42, %v966_v44  ;;  %v1069_v50 = vadd.f32 %v2318_v42, %v998_v45  ;;  %v964_v51 = vmul.f32 %v2313_v40, %v507_v47  ;;  %v996_v52 = vmul.f32 %v2313_v40, %v635_v48 }
  0xe6   :  { %v2043_v53 = vpop.f32.mrf.mxu0  ;;  %v2075_v54 = vpop.f32.mrf.mxu1 }
  0xe7   :  { %vm1101_vm0 = vcmp.ge.f32.partialorder %v1037_v49, 0.0  ;;  %v1172_v55 = vmul.f32 %v2325_v46, %v1037_v49  ;;  %vm1133_vm1 = vcmp.ge.f32.partialorder %v1069_v50, 0.0  ;;  %v1204_v56 = vmul.f32 %v2325_v46, %v1069_v50 }
  0xe8   :  { %v1035_v57 = vadd.f32 %v2318_v42, %v964_v51  ;;  %v1067_v58 = vadd.f32 %v2318_v42, %v996_v52  ;;  %v967_v59 = vmul.f32 %v2043_v53, %v2313_v40  ;;  %v999_v60 = vmul.f32 %v2075_v54, %v2313_v40  ;;  %v510_v61 = vpop.f32.mrf.mxu0  ;;  %v638_v62 = vpop.f32.mrf.mxu1 }
  0xe9   :  { %v1236_v63 = vsel %vm1101_vm0, %v1037_v49, %v1172_v55  ;;  %v1268_v0 = vsel %vm1133_vm1, %v1069_v50, %v1204_v56  ;;  %v965_v1 = vmul.f32 %v2313_v40, %v510_v61  ;;  %v997_v2 = vmul.f32 %v2313_v40, %v638_v62 }
  0xea   :  { %vm1099_vm2 = vcmp.ge.f32.partialorder %v1035_v57, 0.0  ;;  %v1170_v3 = vmul.f32 %v2325_v46, %v1035_v57  ;;  %vm1131_vm3 = vcmp.ge.f32.partialorder %v1067_v58, 0.0  ;;  %v1202_v4 = vmul.f32 %v2325_v46, %v1067_v58  ;;  %v2046_v5 = vpop.f32.mrf.mxu0  ;;  %v2078_v6 = vpop.f32.mrf.mxu1 }
  0xeb   :  { %v1038_v7 = vadd.f32 %v2318_v42, %v967_v59  ;;  %v1070_v8 = vadd.f32 %v2318_v42, %v999_v60  ;;  %v1036_v9 = vadd.f32 %v2318_v42, %v965_v1  ;;  %v1068_v10 = vadd.f32 %v2318_v42, %v997_v2 }
  0xec   :  { %v1234_v11 = vsel %vm1099_vm2, %v1035_v57, %v1170_v3  ;;  %v1266_v12 = vsel %vm1131_vm3, %v1067_v58, %v1202_v4  ;;  %v970_v13 = vmul.f32 %v2046_v5, %v2313_v40  ;;  %v1002_v14 = vmul.f32 %v2078_v6, %v2313_v40  ;;  %v523_v15 = vpop.f32.mrf.mxu0  ;;  %v651_v16 = vpop.f32.mrf.mxu1 }
  0xed   :  { %vm1102_vm4 = vcmp.ge.f32.partialorder %v1038_v7, 0.0  ;;  %v1173_v17 = vmul.f32 %v2325_v46, %v1038_v7  ;;  %vm1134_vm5 = vcmp.ge.f32.partialorder %v1070_v8, 0.0  ;;  %v1205_v18 = vmul.f32 %v2325_v46, %v1070_v8 }
  0xee   :  { %vm1100_vm6 = vcmp.ge.f32.partialorder %v1036_v9, 0.0  ;;  %v1171_v19 = vmul.f32 %v2325_v46, %v1036_v9  ;;  %vm1132_vm7 = vcmp.ge.f32.partialorder %v1068_v10, 0.0  ;;  %v1203_v20 = vmul.f32 %v2325_v46, %v1068_v10  ;;  %v2047_v21 = vpop.f32.mrf.mxu0  ;;  %v2079_v22 = vpop.f32.mrf.mxu1 }
  0xef   :  { %v1237_v23 = vsel %vm1102_vm4, %v1038_v7, %v1173_v17  ;;  %v1269_v24 = vsel %vm1134_vm5, %v1070_v8, %v1205_v18  ;;  %v1041_v25 = vadd.f32 %v2318_v42, %v970_v13  ;;  %v1073_v26 = vadd.f32 %v2318_v42, %v1002_v14 }
  0xf0   :  { %v1801_v27 = vpack.c.bf16 %v1237_v23, %v1236_v63  ;;  %v1881_v28 = vpack.c.bf16 %v1269_v24, %v1268_v0  ;;  %v1235_v29 = vsel %vm1100_vm6, %v1036_v9, %v1171_v19  ;;  %v1267_v30 = vsel %vm1132_vm7, %v1068_v10, %v1203_v20  ;;  %v526_v31 = vpop.f32.mrf.mxu0  ;;  %v654_v32 = vpop.f32.mrf.mxu1 }
  0xf1   :  { %v1796_v33 = vpack.c.bf16 %v1235_v29, %v1234_v11  ;;  %v1876_v34 = vpack.c.bf16 %v1267_v30, %v1266_v12  ;;  %vm1105_vm8 = vcmp.ge.f32.partialorder %v1041_v25, 0.0  ;;  %v1176_v35 = vmul.f32 %v2325_v46, %v1041_v25 }
  0xf2   :  { %1953 = vst [vmem:[%s2663_s5 + $0x8] sm:$0xff] %v1801_v27   ;;  %1969 = vst [vmem:[%s2663_s5 + $0x88] sm:$0xff] %v1881_v28   ;;  %vm1137_vm9 = vcmp.ge.f32.partialorder %v1073_v26, 0.0  ;;  %v1208_v36 = vmul.f32 %v2325_v46, %v1073_v26  ;;  %v968_v37 = vmul.f32 %v2313_v40, %v523_v15  ;;  %v1000_v38 = vmul.f32 %v2313_v40, %v651_v16  ;;  %v2050_v39 = vpop.f32.mrf.mxu0  ;;  %v2082_v41 = vpop.f32.mrf.mxu1 }
  0xf3   :  { %1797 = vst [vmem:[%s2663_s5] sm:$0xff] %v1796_v33   ;;  %1968 = vst [vmem:[%s2663_s5 + $0x80] sm:$0xff] %v1876_v34   ;;  %v1240_v43 = vsel %vm1105_vm8, %v1041_v25, %v1176_v35  ;;  %v971_v44 = vmul.f32 %v2047_v21, %v2313_v40  ;;  %v1003_v45 = vmul.f32 %v2079_v22, %v2313_v40 }
  0xf4   :  { %v969_v47 = vmul.f32 %v2313_v40, %v526_v31  ;;  %v1272_v48 = vsel %vm1137_vm9, %v1073_v26, %v1208_v36  ;;  %v1039_v49 = vadd.f32 %v2318_v42, %v968_v37  ;;  %v1071_v50 = vadd.f32 %v2318_v42, %v1000_v38  ;;  %v539_v52 = vpop.f32.mrf.mxu0  ;;  %v667_v53 = vpop.f32.mrf.mxu1 }
  0xf5   :  { %v1001_v51 = vmul.f32 %v2313_v40, %v654_v32  ;;  %v1042_v54 = vadd.f32 %v2318_v42, %v971_v44  ;;  %v1074_v55 = vadd.f32 %v2318_v42, %v1003_v45  ;;  %v974_v57 = vmul.f32 %v2050_v39, %v2313_v40 }
  0xf6   :  { %v1040_v56 = vadd.f32 %v2318_v42, %v969_v47  ;;  %vm1103_vm10 = vcmp.ge.f32.partialorder %v1039_v49, 0.0  ;;  %v1174_v58 = vmul.f32 %v2325_v46, %v1039_v49  ;;  %vm1135_vm11 = vcmp.ge.f32.partialorder %v1071_v50, 0.0  ;;  %v2051_v60 = vpop.f32.mrf.mxu0  ;;  %v2083_v61 = vpop.f32.mrf.mxu1 }
  0xf7   :  { %v1206_v59 = vmul.f32 %v2325_v46, %v1071_v50  ;;  %vm1106_vm12 = vcmp.ge.f32.partialorder %v1042_v54, 0.0  ;;  %v1177_v62 = vmul.f32 %v2325_v46, %v1042_v54  ;;  %vm1138_vm13 = vcmp.ge.f32.partialorder %v1074_v55, 0.0 }
  0xf8   :  { %v1209_v63 = vmul.f32 %v2325_v46, %v1074_v55  ;;  %v1238_v0 = vsel %vm1103_vm10, %v1039_v49, %v1174_v58  ;;  %vm1104_vm14 = vcmp.ge.f32.partialorder %v1040_v56, 0.0  ;;  %v1175_v2 = vmul.f32 %v2325_v46, %v1040_v56  ;;  %v542_v3 = vpop.f32.mrf.mxu0  ;;  %v670_v4 = vpop.f32.mrf.mxu1 }
  0xf9   :  { %v1270_v1 = vsel %vm1135_vm11, %v1071_v50, %v1206_v59  ;;  %v1241_v5 = vsel %vm1106_vm12, %v1042_v54, %v1177_v62  ;;  %v1072_v7 = vadd.f32 %v2318_v42, %v1001_v51  ;;  %v1045_v8 = vadd.f32 %v2318_v42, %v974_v57 }
  0xfa   :  { %v1273_v6 = vsel %vm1138_vm13, %v1074_v55, %v1209_v63  ;;  %v1811_v9 = vpack.c.bf16 %v1241_v5, %v1240_v43  ;;  %v1239_v11 = vsel %vm1104_vm14, %v1040_v56, %v1175_v2  ;;  %v1006_v12 = vmul.f32 %v2082_v41, %v2313_v40  ;;  %v2054_v13 = vpop.f32.mrf.mxu0  ;;  %v2086_v14 = vpop.f32.mrf.mxu1 }
  0xfb   :  { %v1891_v10 = vpack.c.bf16 %v1273_v6, %v1272_v48  ;;  %v1806_v15 = vpack.c.bf16 %v1239_v11, %v1238_v0  ;;  %vm1136_vm15 = vcmp.ge.f32.partialorder %v1072_v7, 0.0  ;;  %v1207_v16 = vmul.f32 %v2325_v46, %v1072_v7 }
  0xfc   :  { %vm1109_vm0 = vcmp.ge.f32.partialorder %v1045_v8, 0.0  ;;  %1955 = vst [vmem:[%s2663_s5 + $0x18] sm:$0xff] %v1811_v9   ;;  %v1180_v17 = vmul.f32 %v2325_v46, %v1045_v8  ;;  %v1077_v18 = vadd.f32 %v2318_v42, %v1006_v12  ;;  %v972_v19 = vmul.f32 %v2313_v40, %v539_v52  ;;  %v555_v21 = vpop.f32.mrf.mxu0  ;;  %v683_v22 = vpop.f32.mrf.mxu1 }
  0xfd   :  { %1971 = vst [vmem:[%s2663_s5 + $0x98] sm:$0xff] %v1891_v10   ;;  %v1004_v20 = vmul.f32 %v2313_v40, %v667_v53  ;;  %1954 = vst [vmem:[%s2663_s5 + $0x10] sm:$0xff] %v1806_v15   ;;  %v1271_v23 = vsel %vm1136_vm15, %v1072_v7, %v1207_v16  ;;  %v975_v24 = vmul.f32 %v2051_v60, %v2313_v40 }
  0xfe   :  { %v1007_v25 = vmul.f32 %v2083_v61, %v2313_v40  ;;  %v973_v26 = vmul.f32 %v2313_v40, %v542_v3  ;;  %v1886_v27 = vpack.c.bf16 %v1271_v23, %v1270_v1  ;;  %v1244_v28 = vsel %vm1109_vm0, %v1045_v8, %v1180_v17  ;;  %v2055_v30 = vpop.f32.mrf.mxu0  ;;  %v2087_v31 = vpop.f32.mrf.mxu1 }
  0xff   :  { %vm1141_vm1 = vcmp.ge.f32.partialorder %v1077_v18, 0.0  ;;  %v1212_v29 = vmul.f32 %v2325_v46, %v1077_v18  ;;  %v1043_v32 = vadd.f32 %v2318_v42, %v972_v19  ;;  %v1075_v33 = vadd.f32 %v2318_v42, %v1004_v20 }
 0x100   :  { %v1046_v34 = vadd.f32 %v2318_v42, %v975_v24  ;;  %v1078_v35 = vadd.f32 %v2318_v42, %v1007_v25  ;;  %1970 = vst [vmem:[%s2663_s5 + $0x90] sm:$0xff] %v1886_v27   ;;  %v1044_v37 = vadd.f32 %v2318_v42, %v973_v26  ;;  %v1005_v38 = vmul.f32 %v2313_v40, %v670_v4  ;;  %v558_v41 = vpop.f32.mrf.mxu0  ;;  %v686_v43 = vpop.f32.mrf.mxu1 }
 0x101   :  { %v1276_v36 = vsel %vm1141_vm1, %v1077_v18, %v1212_v29  ;;  %v978_v39 = vmul.f32 %v2054_v13, %v2313_v40  ;;  %vm1107_vm2 = vcmp.ge.f32.partialorder %v1043_v32, 0.0  ;;  %v1178_v44 = vmul.f32 %v2325_v46, %v1043_v32 }
 0x102   :  { %vm1139_vm3 = vcmp.ge.f32.partialorder %v1075_v33, 0.0  ;;  %v1210_v45 = vmul.f32 %v2325_v46, %v1075_v33  ;;  %vm1110_vm4 = vcmp.ge.f32.partialorder %v1046_v34, 0.0  ;;  %v1181_v47 = vmul.f32 %v2325_v46, %v1046_v34  ;;  %v2058_v49 = vpop.f32.mrf.mxu0  ;;  %v2419_v50 = vpop.f32.mrf.mxu1 }
 0x103   :  { %vm1142_vm5 = vcmp.ge.f32.partialorder %v1078_v35, 0.0  ;;  %v1213_v48 = vmul.f32 %v2325_v46, %v1078_v35  ;;  %v1242_v51 = vsel %vm1107_vm2, %v1043_v32, %v1178_v44  ;;  %vm1108_vm6 = vcmp.ge.f32.partialorder %v1044_v37, 0.0 }
 0x104   :  { %v1274_v52 = vsel %vm1139_vm3, %v1075_v33, %v1210_v45  ;;  %v1179_v53 = vmul.f32 %v2325_v46, %v1044_v37  ;;  %v1245_v54 = vsel %vm1110_vm4, %v1046_v34, %v1181_v47  ;;  %v1076_v56 = vadd.f32 %v2318_v42, %v1005_v38  ;;  %v2424_v58 = vpop.f32.mrf.mxu0  ;;  %v2426_v59 = vpop.f32.mrf.mxu1 }
 0x105   :  { %v1277_v55 = vsel %vm1142_vm5, %v1078_v35, %v1213_v48  ;;  %v1049_v57 = vadd.f32 %v2318_v42, %v978_v39  ;;  %v1821_v60 = vpack.c.bf16 %v1245_v54, %v1244_v28  ;;  %v1010_v63 = vmul.f32 %v2086_v14, %v2313_v40 }
 0x106   :  { %v1901_v61 = vpack.c.bf16 %v1277_v55, %v1276_v36  ;;  %v1243_v62 = vsel %vm1108_vm6, %v1044_v37, %v1179_v53  ;;  %vm1140_vm7 = vcmp.ge.f32.partialorder %v1076_v56, 0.0  ;;  %v1211_v1 = vmul.f32 %v2325_v46, %v1076_v56  ;;  %v2430_v2 = vpop.f32.mrf.mxu0  ;;  %v2432_v3 = vpop.f32.mrf.mxu1 }
 0x107   :  { %v1816_v0 = vpack.c.bf16 %v1243_v62, %v1242_v51  ;;  %vm1113_vm8 = vcmp.ge.f32.partialorder %v1049_v57, 0.0  ;;  %1957 = vst [vmem:[%s2663_s5 + $0x28] sm:$0xff] %v1821_v60   ;;  %v1184_v4 = vmul.f32 %v2325_v46, %v1049_v57  ;;  %v1081_v5 = vadd.f32 %v2318_v42, %v1010_v63 }
 0x108   :  { %1973 = vst [vmem:[%s2663_s5 + $0xa8] sm:$0xff] %v1901_v61   ;;  %v976_v6 = vmul.f32 %v2313_v40, %v555_v21  ;;  %v1008_v7 = vmul.f32 %v2313_v40, %v683_v22  ;;  %v1275_v8 = vsel %vm1140_vm7, %v1076_v56, %v1211_v1  ;;  %v979_v9 = vmul.f32 %v2055_v30, %v2313_v40  ;;  %v574_v12 = vpop.f32.mrf.mxu0  ;;  %v2450_v13 = vpop.f32.mrf.mxu1 }
 0x109   :  { %1956 = vst [vmem:[%s2663_s5 + $0x20] sm:$0xff] %v1816_v0   ;;  %v1011_v10 = vmul.f32 %v2087_v31, %v2313_v40  ;;  %v977_v11 = vmul.f32 %v2313_v40, %v558_v41  ;;  %v1896_v14 = vpack.c.bf16 %v1275_v8, %v1274_v52  ;;  %v1248_v15 = vsel %vm1113_vm8, %v1049_v57, %v1184_v4 }
 0x10a   :  { %vm1145_vm9 = vcmp.ge.f32.partialorder %v1081_v5, 0.0  ;;  %v1216_v16 = vmul.f32 %v2325_v46, %v1081_v5  ;;  %v1047_v17 = vadd.f32 %v2318_v42, %v976_v6  ;;  %v1079_v18 = vadd.f32 %v2318_v42, %v1008_v7  ;;  %v2062_v21 = vpop.f32.mrf.mxu0  ;;  %v2458_v22 = vpop.f32.mrf.mxu1 }
 0x10b   :  { %v1050_v19 = vadd.f32 %v2318_v42, %v979_v9  ;;  %v1082_v20 = vadd.f32 %v2318_v42, %v1011_v10  ;;  %1972 = vst [vmem:[%s2663_s5 + $0xa0] sm:$0xff] %v1896_v14   ;;  %v1048_v24 = vadd.f32 %v2318_v42, %v977_v11  ;;  %v1009_v25 = vmul.f32 %v2313_v40, %v686_v43 }
 0x10c   :  { %v1280_v23 = vsel %vm1145_vm9, %v1081_v5, %v1216_v16  ;;  %v982_v26 = vmul.f32 %v2058_v49, %v2313_v40  ;;  %vm1111_vm10 = vcmp.ge.f32.partialorder %v1047_v17, 0.0  ;;  %v1182_v27 = vmul.f32 %v2325_v46, %v1047_v17  ;;  %v2468_v29 = vpop.f32.mrf.mxu0  ;;  %v2470_v30 = vpop.f32.mrf.mxu1 }
 0x10d   :  { %vm1143_vm11 = vcmp.ge.f32.partialorder %v1079_v18, 0.0  ;;  %v1214_v28 = vmul.f32 %v2325_v46, %v1079_v18  ;;  %vm1114_vm12 = vcmp.ge.f32.partialorder %v1050_v19, 0.0  ;;  %v1185_v31 = vmul.f32 %v2325_v46, %v1050_v19 }
 0x10e   :  { %vm1146_vm13 = vcmp.ge.f32.partialorder %v1082_v20, 0.0  ;;  %v1217_v32 = vmul.f32 %v2325_v46, %v1082_v20  ;;  %v1246_v33 = vsel %vm1111_vm10, %v1047_v17, %v1182_v27  ;;  %vm1112_vm14 = vcmp.ge.f32.partialorder %v1048_v24, 0.0  ;;  %v2475_v36 = vpop.f32.mrf.mxu0  ;;  %v2481_v48 = vpop.f32.mrf.mxu1 }
 0x10f   :  { %v1278_v34 = vsel %vm1143_vm11, %v1079_v18, %v1214_v28  ;;  %v1183_v35 = vmul.f32 %v2325_v46, %v1048_v24  ;;  %v1249_v37 = vsel %vm1114_vm12, %v1050_v19, %v1185_v31  ;;  %v1080_v39 = vadd.f32 %v2318_v42, %v1009_v25 }
 0x110   :  { %v1281_v38 = vsel %vm1146_vm13, %v1082_v20, %v1217_v32  ;;  %v1053_v41 = vadd.f32 %v2318_v42, %v982_v26  ;;  %v1831_v43 = vpack.c.bf16 %v1249_v37, %v1248_v15  ;;  %v1014_v47 = vmul.f32 %v2419_v50, %v2313_v40  ;;  %v2484_v52 = vpop.f32.mrf.mxu0  ;;  %v718_v0 = vpop.f32.mrf.mxu1 }
 0x111   :  { %v1911_v44 = vpack.c.bf16 %v1281_v38, %v1280_v23  ;;  %v1247_v45 = vsel %vm1112_vm14, %v1048_v24, %v1183_v35  ;;  %vm1144_vm15 = vcmp.ge.f32.partialorder %v1080_v39, 0.0  ;;  %v1215_v51 = vmul.f32 %v2325_v46, %v1080_v39 }
 0x112   :  { %v1826_v49 = vpack.c.bf16 %v1247_v45, %v1246_v33  ;;  %vm1117_vm0 = vcmp.ge.f32.partialorder %v1053_v41, 0.0  ;;  %1959 = vst [vmem:[%s2663_s5 + $0x38] sm:$0xff] %v1831_v43   ;;  %v1188_v53 = vmul.f32 %v2325_v46, %v1053_v41  ;;  %v1085_v50 = vadd.f32 %v2318_v42, %v1014_v47  ;;  %v2522_v14 = vpop.f32.mrf.mxu1 }
 0x113   :  { %1975 = vst [vmem:[%s2663_s5 + $0xb8] sm:$0xff] %v1911_v44   ;;  %v980_v54 = vmul.f32 %v2313_v40, %v2424_v58  ;;  %v1012_v55 = vmul.f32 %v2313_v40, %v2426_v59  ;;  %v1279_v56 = vsel %vm1144_vm15, %v1080_v39, %v1215_v51  ;;  %v983_v57 = vmul.f32 %v2430_v2, %v2313_v40  ;;  %v2066_v2 = vpop.f32.mrf.mxu0 }
 0x114   :  { %1958 = vst [vmem:[%s2663_s5 + $0x30] sm:$0xff] %v1826_v49   ;;  %v1015_v60 = vmul.f32 %v2432_v3, %v2313_v40  ;;  %v981_v61 = vmul.f32 %v2313_v40, %v574_v12  ;;  %v1906_v62 = vpack.c.bf16 %v1279_v56, %v1278_v34  ;;  %v1252_v63 = vsel %vm1117_vm0, %v1053_v41, %v1188_v53  ;;  %v731_v31 = vpop.f32.mrf.mxu1 }
 0x115   :  { %vm1149_vm1 = vcmp.ge.f32.partialorder %v1085_v50, 0.0  ;;  %v1220_v58 = vmul.f32 %v2325_v46, %v1085_v50  ;;  %v1051_v59 = vadd.f32 %v2318_v42, %v980_v54  ;;  %v1083_v1 = vadd.f32 %v2318_v42, %v1012_v55  ;;  %v2525_v17 = vpop.f32.mrf.mxu0 }
 0x116   :  { %v1054_v4 = vadd.f32 %v2318_v42, %v983_v57  ;;  %v1086_v5 = vadd.f32 %v2318_v42, %v1015_v60  ;;  %1974 = vst [vmem:[%s2663_s5 + $0xb0] sm:$0xff] %v1906_v62   ;;  %v1052_v6 = vadd.f32 %v2318_v42, %v981_v61  ;;  %v1013_v7 = vmul.f32 %v2313_v40, %v2450_v13 }
 0x117   :  { %v1284_v3 = vsel %vm1149_vm1, %v1085_v50, %v1220_v58  ;;  %v986_v8 = vmul.f32 %v2062_v21, %v2313_v40  ;;  %vm1115_vm2 = vcmp.ge.f32.partialorder %v1051_v59, 0.0  ;;  %v1186_v9 = vmul.f32 %v2325_v46, %v1051_v59  ;;  %v2067_v35 = vpop.f32.mrf.mxu0 }
 0x118   :  { %vm1147_vm3 = vcmp.ge.f32.partialorder %v1083_v1, 0.0  ;;  %v1218_v10 = vmul.f32 %v2325_v46, %v1083_v1  ;;  %vm1118_vm4 = vcmp.ge.f32.partialorder %v1054_v4, 0.0  ;;  %v1189_v11 = vmul.f32 %v2325_v46, %v1054_v4 }
 0x119   :  { %vm1150_vm5 = vcmp.ge.f32.partialorder %v1086_v5, 0.0  ;;  %v1221_v12 = vmul.f32 %v2325_v46, %v1086_v5  ;;  %v1250_v15 = vsel %vm1115_vm2, %v1051_v59, %v1186_v9  ;;  %vm1116_vm6 = vcmp.ge.f32.partialorder %v1052_v6, 0.0  ;;  %v606_v50 = vpop.f32.mrf.mxu0 }
 0x11a   :  { %v1282_v16 = vsel %vm1147_vm3, %v1083_v1, %v1218_v10  ;;  %v1187_v13 = vmul.f32 %v2325_v46, %v1052_v6  ;;  %v1253_v18 = vsel %vm1118_vm4, %v1054_v4, %v1189_v11  ;;  %v1084_v20 = vadd.f32 %v2318_v42, %v1013_v7 }
 0x11b   :  { %v1285_v19 = vsel %vm1150_vm5, %v1086_v5, %v1221_v12  ;;  %v1057_v21 = vadd.f32 %v2318_v42, %v986_v8  ;;  %v1841_v23 = vpack.c.bf16 %v1253_v18, %v1252_v63  ;;  %v1018_v26 = vmul.f32 %v2458_v22, %v2313_v40  ;;  %v2070_v4 = vpop.f32.mrf.mxu0 }
 0x11c   :  { %v1921_v24 = vpack.c.bf16 %v1285_v19, %v1284_v3  ;;  %v1251_v25 = vsel %vm1116_vm6, %v1052_v6, %v1187_v13  ;;  %vm1148_vm7 = vcmp.ge.f32.partialorder %v1084_v20, 0.0  ;;  %v1219_v28 = vmul.f32 %v2325_v46, %v1084_v20 }
 0x11d   :  { %v1836_v27 = vpack.c.bf16 %v1251_v25, %v1250_v15  ;;  %vm1121_vm8 = vcmp.ge.f32.partialorder %v1057_v21, 0.0  ;;  %1961 = vst [vmem:[%s2663_s5 + $0x48] sm:$0xff] %v1841_v23   ;;  %v1192_v32 = vmul.f32 %v2325_v46, %v1057_v21  ;;  %v1089_v33 = vadd.f32 %v2318_v42, %v1018_v26  ;;  %v619_v19 = vpop.f32.mrf.mxu0 }
 0x11e   :  { %1977 = vst [vmem:[%s2663_s5 + $0xc8] sm:$0xff] %v1921_v24   ;;  %v984_v22 = vmul.f32 %v2313_v40, %v2468_v29  ;;  %v1016_v34 = vmul.f32 %v2313_v40, %v2470_v30  ;;  %v1283_v37 = vsel %vm1148_vm7, %v1084_v20, %v1219_v28  ;;  %v987_v38 = vmul.f32 %v2475_v36, %v2313_v40  ;;  %v2099_v36 = vpop.f32.mrf.mxu1 }
 0x11f   :  { %1960 = vst [vmem:[%s2663_s5 + $0x40] sm:$0xff] %v1836_v27   ;;  %v1019_v39 = vmul.f32 %v2481_v48, %v2313_v40  ;;  %v985_v41 = vmul.f32 %v2313_v40, %v2484_v52  ;;  %v1916_v43 = vpack.c.bf16 %v1283_v37, %v1282_v16  ;;  %v1256_v29 = vsel %vm1121_vm8, %v1057_v21, %v1192_v32 }
 0x120   :  { %vm1153_vm9 = vcmp.ge.f32.partialorder %v1089_v33, 0.0  ;;  %v1224_v30 = vmul.f32 %v2325_v46, %v1089_v33  ;;  %v1055_v44 = vadd.f32 %v2318_v42, %v984_v22  ;;  %v1087_v45 = vadd.f32 %v2318_v42, %v1016_v34  ;;  %v734_v63 = vpop.f32.mrf.mxu1 }
 0x121   :  { %v1058_v47 = vadd.f32 %v2318_v42, %v987_v38  ;;  %v1090_v49 = vadd.f32 %v2318_v42, %v1019_v39  ;;  %1976 = vst [vmem:[%s2663_s5 + $0xc0] sm:$0xff] %v1916_v43   ;;  %v1056_v51 = vadd.f32 %v2318_v42, %v985_v41  ;;  %v1017_v52 = vmul.f32 %v2313_v40, %v718_v0 }
 0x122   :  { %v1288_v48 = vsel %vm1153_vm9, %v1089_v33, %v1224_v30  ;;  %v990_v53 = vmul.f32 %v2066_v2, %v2313_v40  ;;  %vm1119_vm10 = vcmp.ge.f32.partialorder %v1055_v44, 0.0  ;;  %v1190_v54 = vmul.f32 %v2325_v46, %v1055_v44 }
 0x123   :  { %vm1151_vm11 = vcmp.ge.f32.partialorder %v1087_v45, 0.0  ;;  %v1222_v55 = vmul.f32 %v2325_v46, %v1087_v45  ;;  %vm1122_vm12 = vcmp.ge.f32.partialorder %v1058_v47, 0.0  ;;  %v1193_v56 = vmul.f32 %v2325_v46, %v1058_v47 }
 0x124   :  { %vm1154_vm13 = vcmp.ge.f32.partialorder %v1090_v49, 0.0  ;;  %v1225_v57 = vmul.f32 %v2325_v46, %v1090_v49  ;;  %v1254_v60 = vsel %vm1119_vm10, %v1055_v44, %v1190_v54  ;;  %vm1120_vm14 = vcmp.ge.f32.partialorder %v1056_v51, 0.0 }
 0x125   :  { %v1286_v61 = vsel %vm1151_vm11, %v1087_v45, %v1222_v55  ;;  %v1191_v62 = vmul.f32 %v2325_v46, %v1056_v51  ;;  %v1257_v58 = vsel %vm1122_vm12, %v1058_v47, %v1193_v56  ;;  %v1088_v59 = vadd.f32 %v2318_v42, %v1017_v52 }
 0x126   :  { %v1289_v0 = vsel %vm1154_vm13, %v1090_v49, %v1225_v57  ;;  %v1061_v1 = vadd.f32 %v2318_v42, %v990_v53  ;;  %v1851_v5 = vpack.c.bf16 %v1257_v58, %v1256_v29  ;;  %v1022_v6 = vmul.f32 %v2522_v14, %v2313_v40  ;;  %v2102_v14 = vpop.f32.mrf.mxu1 }
 0x127   :  { %v1931_v2 = vpack.c.bf16 %v1289_v0, %v1288_v48  ;;  %v1255_v3 = vsel %vm1120_vm14, %v1056_v51, %v1191_v62  ;;  %vm1152_vm15 = vcmp.ge.f32.partialorder %v1088_v59, 0.0  ;;  %v1223_v8 = vmul.f32 %v2325_v46, %v1088_v59 }
 0x128   :  { %v1846_v7 = vpack.c.bf16 %v1255_v3, %v1254_v60  ;;  %vm1125_vm0 = vcmp.ge.f32.partialorder %v1061_v1, 0.0  ;;  %1963 = vst [vmem:[%s2663_s5 + $0x58] sm:$0xff] %v1851_v5   ;;  %v1196_v9 = vmul.f32 %v2325_v46, %v1061_v1  ;;  %v1093_v10 = vadd.f32 %v2318_v42, %v1022_v6  ;;  %v747_v32 = vpop.f32.mrf.mxu1 }
 0x129   :  { %1979 = vst [vmem:[%s2663_s5 + $0xd8] sm:$0xff] %v1931_v2   ;;  %v988_v11 = vmul.f32 %v2313_v40, %v2525_v17  ;;  %v1020_v12 = vmul.f32 %v2313_v40, %v731_v31  ;;  %v1287_v15 = vsel %vm1152_vm15, %v1088_v59, %v1223_v8  ;;  %v991_v16 = vmul.f32 %v2067_v35, %v2313_v40  ;;  %v2071_v35 = vpop.f32.mrf.mxu0 }
 0x12a   :  { %1962 = vst [vmem:[%s2663_s5 + $0x50] sm:$0xff] %v1846_v7   ;;  %v1023_v13 = vmul.f32 %v2099_v36, %v2313_v40  ;;  %v989_v18 = vmul.f32 %v2313_v40, %v606_v50  ;;  %v1926_v20 = vpack.c.bf16 %v1287_v15, %v1286_v61  ;;  %vm1157_vm1 = vcmp.ge.f32.partialorder %v1093_v10, 0.0  ;;  %v2103_v45 = vpop.f32.mrf.mxu1 }
 0x12b   :  { %v1228_v21 = vmul.f32 %v2325_v46, %v1093_v10  ;;  %v1059_v17 = vadd.f32 %v2318_v42, %v988_v11  ;;  %v1091_v23 = vadd.f32 %v2318_v42, %v1020_v12  ;;  %v1062_v24 = vadd.f32 %v2318_v42, %v991_v16  ;;  %v622_v51 = vpop.f32.mrf.mxu0 }
 0x12c   :  { %v1094_v25 = vadd.f32 %v2318_v42, %v1023_v13  ;;  %1978 = vst [vmem:[%s2663_s5 + $0xd0] sm:$0xff] %v1926_v20   ;;  %v1260_v26 = vsel %vm1125_vm0, %v1061_v1, %v1196_v9  ;;  %v1060_v27 = vadd.f32 %v2318_v42, %v989_v18  ;;  %v1021_v28 = vmul.f32 %v2313_v40, %v734_v63  ;;  %v750_v58 = vpop.f32.mrf.mxu1 }
 0x12d   :  { %v994_v31 = vmul.f32 %v2070_v4, %v2313_v40  ;;  %v1292_v33 = vsel %vm1157_vm1, %v1093_v10, %v1228_v21  ;;  %vm1123_vm2 = vcmp.ge.f32.partialorder %v1059_v17, 0.0  ;;  %v1194_v22 = vmul.f32 %v2325_v46, %v1059_v17 }
 0x12e   :  { %v1226_v34 = vmul.f32 %v2325_v46, %v1091_v23  ;;  %vm1126_vm3 = vcmp.ge.f32.partialorder %v1062_v24, 0.0  ;;  %v1197_v37 = vmul.f32 %v2325_v46, %v1062_v24  ;;  %vm1158_vm4 = vcmp.ge.f32.partialorder %v1094_v25, 0.0 }
 0x12f   :  { %v1229_v38 = vmul.f32 %v2325_v46, %v1094_v25  ;;  %v1258_v39 = vsel %vm1123_vm2, %v1059_v17, %v1194_v22  ;;  %vm1155_vm5 = vcmp.ge.f32.partialorder %v1091_v23, 0.0  ;;  %vm1124_vm6 = vcmp.ge.f32.partialorder %v1060_v27, 0.0 }
 0x130   :  { %v1195_v41 = vmul.f32 %v2325_v46, %v1060_v27  ;;  %v1261_v43 = vsel %vm1126_vm3, %v1062_v24, %v1197_v37  ;;  %v1092_v30 = vadd.f32 %v2318_v42, %v1021_v28  ;;  %v1065_v44 = vadd.f32 %v2318_v42, %v994_v31 }
 0x131   :  { %v1293_v29 = vsel %vm1158_vm4, %v1094_v25, %v1229_v38  ;;  %v1861_v47 = vpack.c.bf16 %v1261_v43, %v1260_v26  ;;  %v1026_v48 = vmul.f32 %v2102_v14, %v2313_v40  ;;  %v1290_v52 = vsel %vm1155_vm5, %v1091_v23, %v1226_v34 }
 0x132   :  { %v1941_v49 = vpack.c.bf16 %v1293_v29, %v1292_v33  ;;  %v1259_v36 = vsel %vm1124_vm6, %v1060_v27, %v1195_v41  ;;  %vm1156_vm7 = vcmp.ge.f32.partialorder %v1092_v30, 0.0  ;;  %v1227_v50 = vmul.f32 %v2325_v46, %v1092_v30 }
 0x133   :  { %v1856_v53 = vpack.c.bf16 %v1259_v36, %v1258_v39  ;;  %1965 = vst [vmem:[%s2663_s5 + $0x68] sm:$0xff] %v1861_v47   ;;  %v1200_v54 = vmul.f32 %v2325_v46, %v1065_v44  ;;  %v1097_v55 = vadd.f32 %v2318_v42, %v1026_v48  ;;  %v992_v56 = vmul.f32 %v2313_v40, %v619_v19 }
 0x134   :  { %1981 = vst [vmem:[%s2663_s5 + $0xe8] sm:$0xff] %v1941_v49   ;;  %v1024_v57 = vmul.f32 %v2313_v40, %v747_v32  ;;  %v1291_v60 = vsel %vm1156_vm7, %v1092_v30, %v1227_v50  ;;  %v995_v61 = vmul.f32 %v2071_v35, %v2313_v40  ;;  %v1027_v62 = vmul.f32 %v2103_v45, %v2313_v40 }
 0x135   :  { %1964 = vst [vmem:[%s2663_s5 + $0x60] sm:$0xff] %v1856_v53   ;;  %v993_v63 = vmul.f32 %v2313_v40, %v622_v51  ;;  %v1936_v0 = vpack.c.bf16 %v1291_v60, %v1290_v52  ;;  %vm1129_vm8 = vcmp.ge.f32.partialorder %v1065_v44, 0.0  ;;  %v1232_v59 = vmul.f32 %v2325_v46, %v1097_v55 }
 0x136   :  { %v1063_v1 = vadd.f32 %v2318_v42, %v992_v56  ;;  %v1095_v4 = vadd.f32 %v2318_v42, %v1024_v57  ;;  %v1066_v5 = vadd.f32 %v2318_v42, %v995_v61  ;;  %v1098_v2 = vadd.f32 %v2318_v42, %v1027_v62 }
 0x137   :  { %1980 = vst [vmem:[%s2663_s5 + $0xe0] sm:$0xff] %v1936_v0   ;;  %vm1161_vm9 = vcmp.ge.f32.partialorder %v1097_v55, 0.0  ;;  %v1064_v3 = vadd.f32 %v2318_v42, %v993_v63  ;;  %v1025_v6 = vmul.f32 %v2313_v40, %v750_v58  ;;  %v1264_v7 = vsel %vm1129_vm8, %v1065_v44, %v1200_v54 }
 0x138   :  { %vm1127_vm10 = vcmp.ge.f32.partialorder %v1063_v1, 0.0  ;;  %v1198_v8 = vmul.f32 %v2325_v46, %v1063_v1  ;;  %vm1130_vm11 = vcmp.ge.f32.partialorder %v1066_v5, 0.0  ;;  %v1201_v9 = vmul.f32 %v2325_v46, %v1066_v5 }
 0x139   :  { %vm1162_vm12 = vcmp.ge.f32.partialorder %v1098_v2, 0.0  ;;  %v1233_v10 = vmul.f32 %v2325_v46, %v1098_v2  ;;  %v1296_v11 = vsel %vm1161_vm9, %v1097_v55, %v1232_v59  ;;  %vm1159_vm13 = vcmp.ge.f32.partialorder %v1095_v4, 0.0 }
 0x13a   :  { %vm1128_vm14 = vcmp.ge.f32.partialorder %v1064_v3, 0.0  ;;  %v1199_v12 = vmul.f32 %v2325_v46, %v1064_v3  ;;  %v1230_v14 = vmul.f32 %v2325_v46, %v1095_v4  ;;  %v1265_v15 = vsel %vm1130_vm11, %v1066_v5, %v1201_v9 }
 0x13b   :  { %v1297_v16 = vsel %vm1162_vm12, %v1098_v2, %v1233_v10  ;;  %v1096_v40 = vadd.f32 %v2318_v42, %v1025_v6  ;;  %v1262_v13 = vsel %vm1127_vm10, %v1063_v1, %v1198_v8  ;;  %v1871_v18 = vpack.c.bf16 %v1265_v15, %v1264_v7 }
 0x13c   :  { %v1951_v19 = vpack.c.bf16 %v1297_v16, %v1296_v11  ;;  %v1263_v20 = vsel %vm1128_vm14, %v1064_v3, %v1199_v12  ;;  %v1294_v23 = vsel %vm1159_vm13, %v1095_v4, %v1230_v14 }
 0x13d   :  { %v1866_v21 = vpack.c.bf16 %v1263_v20, %v1262_v13  ;;  %vm1160_vm15 = vcmp.ge.f32.partialorder %v1096_v40, 0.0  ;;  %v1231_v17 = vmul.f32 %v2325_v46, %v1096_v40  ;;  %1967 = vst [vmem:[%s2663_s5 + $0x78] sm:$0xff] %v1871_v18  }
 0x13e   :  { %1983 = vst [vmem:[%s2663_s5 + $0xf8] sm:$0xff] %v1951_v19  }
 0x13f   :  { %1966 = vst [vmem:[%s2663_s5 + $0x70] sm:$0xff] %v1866_v21   ;;  %v1295_v42 = vsel %vm1160_vm15, %v1096_v40, %v1231_v17 }
 0x140   :  { %v1946_v24 = vpack.c.bf16 %v1295_v42, %v1294_v23 }
 0x142   :  { %1982 = vst [vmem:[%s2663_s5 + $0xf0] sm:$0xff] %v1946_v24  }

// kernel: espnet_encoder_forward.31
= control target key start
LH: loop header
LB: loop body
LE: loop exit
PB: predicated region body
PF: predicated region fallthrough
CT: control target
= control target key end

     0   :  { %v2361_v0 = vmov 0   ;;  %s2967_s1 = inlined_call_operand.vmem [shape: bf16[256,128], index: 1, kind: input, shape index: {}]   ;;  %s2968_s0 = inlined_call_operand.vmem [shape: bf16[512,256], index: 0, kind: input, shape index: {}]   ;;  %s2969_s2 = inlined_call_operand.vmem [shape: f32[1,128], index: 2, kind: input, shape index: {}]   ;;  %s2970_s3 = inlined_call_operand.vmem [shape: f32[1,128], index: 3, kind: input, shape index: {}]   ;;  %s2971_s4 = inlined_call_operand.vmem [shape: f32[1,128], index: 4, kind: input, shape index: {}]   ;;  %s2972_s5 = inlined_call_operand.vmem [shape: bf16[512,128], index: 5, kind: output, shape index: {}]  }
   0x1   :  { %665 = vmatprep.subr.bf16.mxu0 %v2361_v0  ;;  %2216 = vmatprep.subr.bf16.mxu1 %v2361_v0  ;;  %v2249_v1 = vld [vmem:[%s2967_s1 + $0x38] sm:$0xff]   ;;  %v2250_v2 = vld [vmem:[%s2967_s1 + $0x30] sm:$0xff]   ;;  %v2251_v3 = vld [vmem:[%s2967_s1 + $0x28] sm:$0xff]  }
   0x2   :  { %666 = vmatpush1.bf16.msra.mxu0 %v2249_v1  ;;  %2232 = vmatpush1.bf16.msra.mxu1 %v2249_v1  ;;  %v2252_v4 = vld [vmem:[%s2967_s1 + $0x20] sm:$0xff]   ;;  %v2253_v5 = vld [vmem:[%s2967_s1 + $0x18] sm:$0xff]   ;;  %v2254_v7 = vld [vmem:[%s2967_s1 + $0x10] sm:$0xff]  }
   0x3   :  { %667 = vmatprep.subr.bf16.mxu0 %v2361_v0  ;;  %2217 = vmatprep.subr.bf16.mxu1 %v2361_v0  ;;  %v2267_v6 = vld [vmem:[%s2968_s0 + $0x4] ss:$8 sps:$4 sm:$0xff]   ;;  %v2257_v11 = vld [vmem:[%s2967_s1 + $0x78] sm:$0xff]   ;;  %v2258_v12 = vld [vmem:[%s2967_s1 + $0x70] sm:$0xff]  }
   0x4   :  { %v2270_v8 = vld [vmem:[%s2968_s0 + $0x104] ss:$8 sps:$4 sm:$0xff]   ;;  %697 = vmatprep.mubr.bf16.mxu0 %v2267_v6  ;;  %v2261_v15 = vld [vmem:[%s2967_s1 + $0x58] sm:$0xff]   ;;  %v2262_v16 = vld [vmem:[%s2967_s1 + $0x50] sm:$0xff]  }
   0x5   :  { %825 = vmatprep.mubr.bf16.mxu1 %v2270_v8  ;;  %v2255_v9 = vld [vmem:[%s2967_s1 + $0x8] sm:$0xff]   ;;  %v2256_v10 = vld [vmem:[%s2967_s1] sm:$0xff]   ;;  %v2271_v21 = vld [vmem:[%s2968_s0 + $0x14] ss:$8 sps:$4 sm:$0xff]  }
   0x6   :  { %668 = vmatpush1.bf16.msra.mxu0 %v2250_v2  ;;  %2233 = vmatpush1.bf16.msra.mxu1 %v2250_v2  ;;  %v2259_v13 = vld [vmem:[%s2967_s1 + $0x68] sm:$0xff]   ;;  %v2260_v14 = vld [vmem:[%s2967_s1 + $0x60] sm:$0xff]   ;;  %v2273_v22 = vld [vmem:[%s2968_s0 + $0x114] ss:$8 sps:$4 sm:$0xff]  }
   0x7   :  { %669 = vmatprep.subr.bf16.mxu0 %v2361_v0  ;;  %2218 = vmatprep.subr.bf16.mxu1 %v2361_v0  ;;  %v2263_v17 = vld [vmem:[%s2967_s1 + $0x48] sm:$0xff]   ;;  %v2264_v18 = vld [vmem:[%s2967_s1 + $0x40] sm:$0xff]   ;;  %v2275_v23 = vld [vmem:[%s2968_s0 + $0x10] ss:$8 sps:$4 sm:$0xff]  }
   0x8   :  { %v2265_v19 = vld [vmem:[%s2968_s0] ss:$8 sps:$4 sm:$0xff]   ;;  %v2276_v24 = vld [vmem:[%s2968_s0 + $0x110] ss:$8 sps:$4 sm:$0xff]   ;;  %v2277_v25 = vld [vmem:[%s2968_s0 + $0x24] ss:$8 sps:$4 sm:$0xff]  }
   0x9   :  { %v2268_v20 = vld [vmem:[%s2968_s0 + $0x100] ss:$8 sps:$4 sm:$0xff]   ;;  %v2279_v26 = vld [vmem:[%s2968_s0 + $0x124] ss:$8 sps:$4 sm:$0xff]   ;;  %v2283_v29 = vld [vmem:[%s2968_s0 + $0x34] ss:$8 sps:$4 sm:$0xff]  }
   0xa   :  { %670 = vmatpush1.bf16.msra.mxu0 %v2251_v3  ;;  %2234 = vmatpush1.bf16.msra.mxu1 %v2251_v3  ;;  %v2281_v27 = vld [vmem:[%s2968_s0 + $0x20] ss:$8 sps:$4 sm:$0xff]   ;;  %v2285_v30 = vld [vmem:[%s2968_s0 + $0x134] ss:$8 sps:$4 sm:$0xff]   ;;  %v2287_v31 = vld [vmem:[%s2968_s0 + $0x30] ss:$8 sps:$4 sm:$0xff]  }
   0xb   :  { %671 = vmatprep.subr.bf16.mxu0 %v2361_v0  ;;  %2219 = vmatprep.subr.bf16.mxu1 %v2361_v0  ;;  %v2282_v28 = vld [vmem:[%s2968_s0 + $0x120] ss:$8 sps:$4 sm:$0xff]   ;;  %v2288_v32 = vld [vmem:[%s2968_s0 + $0x130] ss:$8 sps:$4 sm:$0xff]   ;;  %v2289_v33 = vld [vmem:[%s2968_s0 + $0x44] ss:$8 sps:$4 sm:$0xff]  }
   0xc   :  { %v2291_v34 = vld [vmem:[%s2968_s0 + $0x144] ss:$8 sps:$4 sm:$0xff]   ;;  %v2293_v35 = vld [vmem:[%s2968_s0 + $0x40] ss:$8 sps:$4 sm:$0xff]   ;;  %v2295_v37 = vld [vmem:[%s2968_s0 + $0x54] ss:$8 sps:$4 sm:$0xff]  }
   0xd   :  { %v2294_v36 = vld [vmem:[%s2968_s0 + $0x140] ss:$8 sps:$4 sm:$0xff]   ;;  %v2297_v38 = vld [vmem:[%s2968_s0 + $0x154] ss:$8 sps:$4 sm:$0xff]   ;;  %v2299_v39 = vld [vmem:[%s2968_s0 + $0x50] ss:$8 sps:$4 sm:$0xff]  }
   0xe   :  { %672 = vmatpush1.bf16.msra.mxu0 %v2252_v4  ;;  %2235 = vmatpush1.bf16.msra.mxu1 %v2252_v4  ;;  %v2300_v40 = vld [vmem:[%s2968_s0 + $0x150] ss:$8 sps:$4 sm:$0xff]   ;;  %v2301_v41 = vld [vmem:[%s2968_s0 + $0x64] ss:$8 sps:$4 sm:$0xff]   ;;  %v2305_v43 = vld [vmem:[%s2968_s0 + $0x60] ss:$8 sps:$4 sm:$0xff]  }
   0xf   :  { %673 = vmatprep.subr.bf16.mxu0 %v2361_v0  ;;  %2220 = vmatprep.subr.bf16.mxu1 %v2361_v0  ;;  %v2303_v42 = vld [vmem:[%s2968_s0 + $0x164] ss:$8 sps:$4 sm:$0xff]   ;;  %v2306_v44 = vld [vmem:[%s2968_s0 + $0x160] ss:$8 sps:$4 sm:$0xff]   ;;  %v2307_v45 = vld [vmem:[%s2968_s0 + $0x74] ss:$8 sps:$4 sm:$0xff]  }
  0x10   :  { %v2309_v46 = vld [vmem:[%s2968_s0 + $0x174] ss:$8 sps:$4 sm:$0xff]   ;;  %v2311_v47 = vld [vmem:[%s2968_s0 + $0x70] ss:$8 sps:$4 sm:$0xff]   ;;  %v2313_v49 = vld [vmem:[%s2968_s0 + $0x84] ss:$8 sps:$4 sm:$0xff]  }
  0x11   :  { %v2312_v48 = vld [vmem:[%s2968_s0 + $0x170] ss:$8 sps:$4 sm:$0xff]   ;;  %v2315_v50 = vld [vmem:[%s2968_s0 + $0x184] ss:$8 sps:$4 sm:$0xff]   ;;  %v2317_v51 = vld [vmem:[%s2968_s0 + $0x80] ss:$8 sps:$4 sm:$0xff]  }
  0x12   :  { %674 = vmatpush1.bf16.msra.mxu0 %v2253_v5  ;;  %2236 = vmatpush1.bf16.msra.mxu1 %v2253_v5  ;;  %v2318_v52 = vld [vmem:[%s2968_s0 + $0x180] ss:$8 sps:$4 sm:$0xff]   ;;  %v2319_v53 = vld [vmem:[%s2968_s0 + $0x94] ss:$8 sps:$4 sm:$0xff]   ;;  %v2323_v55 = vld [vmem:[%s2968_s0 + $0x90] ss:$8 sps:$4 sm:$0xff]  }
  0x13   :  { %675 = vmatprep.subr.bf16.mxu0 %v2361_v0  ;;  %2221 = vmatprep.subr.bf16.mxu1 %v2361_v0  ;;  %v2321_v54 = vld [vmem:[%s2968_s0 + $0x194] ss:$8 sps:$4 sm:$0xff]   ;;  %v2324_v56 = vld [vmem:[%s2968_s0 + $0x190] ss:$8 sps:$4 sm:$0xff]   ;;  %v2325_v57 = vld [vmem:[%s2968_s0 + $0xa4] ss:$8 sps:$4 sm:$0xff]  }
  0x14   :  { %v2327_v58 = vld [vmem:[%s2968_s0 + $0x1a4] ss:$8 sps:$4 sm:$0xff]   ;;  %v2329_v59 = vld [vmem:[%s2968_s0 + $0xa0] ss:$8 sps:$4 sm:$0xff]   ;;  %v2331_v61 = vld [vmem:[%s2968_s0 + $0xb4] ss:$8 sps:$4 sm:$0xff]  }
  0x15   :  { %v2330_v60 = vld [vmem:[%s2968_s0 + $0x1a0] ss:$8 sps:$4 sm:$0xff]   ;;  %v2333_v62 = vld [vmem:[%s2968_s0 + $0x1b4] ss:$8 sps:$4 sm:$0xff]   ;;  %v2335_v63 = vld [vmem:[%s2968_s0 + $0xb0] ss:$8 sps:$4 sm:$0xff]  }
  0x16   :  { %676 = vmatpush1.bf16.msra.mxu0 %v2254_v7  ;;  %2237 = vmatpush1.bf16.msra.mxu1 %v2254_v7  ;;  %v2337_v1 = vld [vmem:[%s2968_s0 + $0xc4] ss:$8 sps:$4 sm:$0xff]   ;;  %v2341_v3 = vld [vmem:[%s2968_s0 + $0xc0] ss:$8 sps:$4 sm:$0xff]   ;;  %v2343_v5 = vld [vmem:[%s2968_s0 + $0xd4] ss:$8 sps:$4 sm:$0xff]  }
  0x17   :  { %677 = vmatprep.subr.bf16.mxu0 %v2361_v0  ;;  %2222 = vmatprep.subr.bf16.mxu1 %v2361_v0  ;;  %v2339_v2 = vld [vmem:[%s2968_s0 + $0x1c4] ss:$8 sps:$4 sm:$0xff]   ;;  %v2342_v4 = vld [vmem:[%s2968_s0 + $0x1c0] ss:$8 sps:$4 sm:$0xff]   ;;  %v2345_v6 = vld [vmem:[%s2968_s0 + $0x1d4] ss:$8 sps:$4 sm:$0xff]  }
  0x18   :  { %v2347_v7 = vld [vmem:[%s2968_s0 + $0xd0] ss:$8 sps:$4 sm:$0xff]  }
  0x19   :  { %v2348_v8 = vld [vmem:[%s2968_s0 + $0x1d0] ss:$8 sps:$4 sm:$0xff]  }
  0x1a   :  { %678 = vmatpush1.bf16.msra.mxu0 %v2255_v9  ;;  %2238 = vmatpush1.bf16.msra.mxu1 %v2255_v9  ;;  %v2349_v9 = vld [vmem:[%s2968_s0 + $0xe4] ss:$8 sps:$4 sm:$0xff]  }
  0x1b   :  { %679 = vmatprep.subr.bf16.mxu0 %v2361_v0  ;;  %2223 = vmatprep.subr.bf16.mxu1 %v2361_v0 }
  0x1e   :  { %680 = vmatpush1.bf16.msra.mxu0 %v2256_v10  ;;  %2239 = vmatpush1.bf16.msra.mxu1 %v2256_v10  ;;  %v2351_v10 = vld [vmem:[%s2968_s0 + $0x1e4] ss:$8 sps:$4 sm:$0xff]  }
  0x1f   :  { %681 = vmatprep.subr.bf16.mxu0 %v2361_v0  ;;  %2224 = vmatprep.subr.bf16.mxu1 %v2361_v0 }
  0x22   :  { %682 = vmatpush2.bf16.msra.mxu0 %v2257_v11  ;;  %2240 = vmatpush2.bf16.msra.mxu1 %v2257_v11  ;;  %v2353_v11 = vld [vmem:[%s2968_s0 + $0xe0] ss:$8 sps:$4 sm:$0xff]  }
  0x23   :  { %683 = vmatprep.subr.bf16.mxu0 %v2361_v0  ;;  %2225 = vmatprep.subr.bf16.mxu1 %v2361_v0 }
  0x26   :  { %684 = vmatpush2.bf16.msra.mxu0 %v2258_v12  ;;  %2241 = vmatpush2.bf16.msra.mxu1 %v2258_v12  ;;  %v2354_v12 = vld [vmem:[%s2968_s0 + $0x1e0] ss:$8 sps:$4 sm:$0xff]  }
  0x27   :  { %685 = vmatprep.subr.bf16.mxu0 %v2361_v0  ;;  %2226 = vmatprep.subr.bf16.mxu1 %v2361_v0 }
  0x2a   :  { %686 = vmatpush2.bf16.msra.mxu0 %v2259_v13  ;;  %2242 = vmatpush2.bf16.msra.mxu1 %v2259_v13  ;;  %v2355_v13 = vld [vmem:[%s2968_s0 + $0xf4] ss:$8 sps:$4 sm:$0xff]  }
  0x2b   :  { %687 = vmatprep.subr.bf16.mxu0 %v2361_v0  ;;  %2227 = vmatprep.subr.bf16.mxu1 %v2361_v0 }
  0x2e   :  { %688 = vmatpush2.bf16.msra.mxu0 %v2260_v14  ;;  %2243 = vmatpush2.bf16.msra.mxu1 %v2260_v14  ;;  %v2357_v14 = vld [vmem:[%s2968_s0 + $0x1f4] ss:$8 sps:$4 sm:$0xff]  }
  0x2f   :  { %689 = vmatprep.subr.bf16.mxu0 %v2361_v0  ;;  %2228 = vmatprep.subr.bf16.mxu1 %v2361_v0 }
  0x32   :  { %690 = vmatpush2.bf16.msra.mxu0 %v2261_v15  ;;  %2244 = vmatpush2.bf16.msra.mxu1 %v2261_v15  ;;  %v2359_v15 = vld [vmem:[%s2968_s0 + $0xf0] ss:$8 sps:$4 sm:$0xff]  }
  0x33   :  { %691 = vmatprep.subr.bf16.mxu0 %v2361_v0  ;;  %2229 = vmatprep.subr.bf16.mxu1 %v2361_v0 }
  0x36   :  { %692 = vmatpush2.bf16.msra.mxu0 %v2262_v16  ;;  %2245 = vmatpush2.bf16.msra.mxu1 %v2262_v16  ;;  %v2360_v16 = vld [vmem:[%s2968_s0 + $0x1f0] ss:$8 sps:$4 sm:$0xff]  }
  0x37   :  { %693 = vmatprep.subr.bf16.mxu0 %v2361_v0  ;;  %2230 = vmatprep.subr.bf16.mxu1 %v2361_v0 }
  0x3a   :  { %694 = vmatpush2.bf16.msra.mxu0 %v2263_v17  ;;  %2246 = vmatpush2.bf16.msra.mxu1 %v2263_v17  ;;  %v2667_v17 = vld [vmem:[%s2969_s2] ss:$0 sm:$0xff] }
  0x3b   :  { %695 = vmatprep.subr.bf16.mxu0 %v2361_v0  ;;  %2231 = vmatprep.subr.bf16.mxu1 %v2361_v0  ;;  %v2336_v0 = vld [vmem:[%s2968_s0 + $0x1b0] ss:$8 sps:$4 sm:$0xff]  }
  0x3e   :  { %696 = vmatpush2.bf16.msra.mxu0 %v2264_v18  ;;  %2247 = vmatpush2.bf16.msra.mxu1 %v2264_v18 }
  0x41   :  { %698 = vmatmul.mubr.bf16.vlgmr.msra.gmra.mxu0 %v2265_v19  ;;  %826 = vmatmul.mubr.bf16.vlgmr.msra.gmra.mxu1 %v2268_v20  ;;  %v2672_v19 = vld [vmem:[%s2970_s3] ss:$0 sm:$0xff] }
  0x42   :  { %705 = vmatprep.mubr.bf16.mxu0 %v2271_v21  ;;  %833 = vmatprep.mubr.bf16.mxu1 %v2273_v22 }
  0x49   :  { %706 = vmatmul.mubr.bf16.gmra.mxu0 %v2275_v23  ;;  %834 = vmatmul.mubr.bf16.gmra.mxu1 %v2276_v24 }
  0x4a   :  { %713 = vmatprep.mubr.bf16.mxu0 %v2277_v25  ;;  %841 = vmatprep.mubr.bf16.mxu1 %v2279_v26 }
  0x51   :  { %714 = vmatmul.mubr.bf16.gmra.mxu0 %v2281_v27  ;;  %842 = vmatmul.mubr.bf16.gmra.mxu1 %v2282_v28  ;;  %v2681_v27 = vld [vmem:[%s2971_s4] ss:$0 sm:$0xff] }
  0x52   :  { %721 = vmatprep.mubr.bf16.mxu0 %v2283_v29  ;;  %849 = vmatprep.mubr.bf16.mxu1 %v2285_v30 }
  0x59   :  { %722 = vmatmul.mubr.bf16.gmra.mxu0 %v2287_v31  ;;  %850 = vmatmul.mubr.bf16.gmra.mxu1 %v2288_v32 }
  0x5a   :  { %729 = vmatprep.mubr.bf16.mxu0 %v2289_v33  ;;  %857 = vmatprep.mubr.bf16.mxu1 %v2291_v34 }
  0x61   :  { %730 = vmatmul.mubr.bf16.gmra.mxu0 %v2293_v35  ;;  %858 = vmatmul.mubr.bf16.gmra.mxu1 %v2294_v36 }
  0x62   :  { %737 = vmatprep.mubr.bf16.mxu0 %v2295_v37  ;;  %865 = vmatprep.mubr.bf16.mxu1 %v2297_v38 }
  0x69   :  { %738 = vmatmul.mubr.bf16.gmra.mxu0 %v2299_v39  ;;  %866 = vmatmul.mubr.bf16.gmra.mxu1 %v2300_v40 }
  0x6a   :  { %745 = vmatprep.mubr.bf16.mxu0 %v2301_v41  ;;  %873 = vmatprep.mubr.bf16.mxu1 %v2303_v42 }
  0x71   :  { %746 = vmatmul.mubr.bf16.gmra.mxu0 %v2305_v43  ;;  %874 = vmatmul.mubr.bf16.gmra.mxu1 %v2306_v44 }
  0x72   :  { %753 = vmatprep.mubr.bf16.mxu0 %v2307_v45  ;;  %881 = vmatprep.mubr.bf16.mxu1 %v2309_v46 }
  0x79   :  { %754 = vmatmul.mubr.bf16.gmra.mxu0 %v2311_v47  ;;  %882 = vmatmul.mubr.bf16.gmra.mxu1 %v2312_v48 }
  0x7a   :  { %761 = vmatprep.mubr.bf16.mxu0 %v2313_v49  ;;  %889 = vmatprep.mubr.bf16.mxu1 %v2315_v50 }
  0x81   :  { %762 = vmatmul.mubr.bf16.gmra.mxu0 %v2317_v51  ;;  %890 = vmatmul.mubr.bf16.gmra.mxu1 %v2318_v52 }
  0x82   :  { %769 = vmatprep.mubr.bf16.mxu0 %v2319_v53  ;;  %897 = vmatprep.mubr.bf16.mxu1 %v2321_v54 }
  0x89   :  { %770 = vmatmul.mubr.bf16.gmra.mxu0 %v2323_v55  ;;  %898 = vmatmul.mubr.bf16.gmra.mxu1 %v2324_v56 }
  0x8a   :  { %777 = vmatprep.mubr.bf16.mxu0 %v2325_v57  ;;  %905 = vmatprep.mubr.bf16.mxu1 %v2327_v58 }
  0x91   :  { %778 = vmatmul.mubr.bf16.gmra.mxu0 %v2329_v59  ;;  %906 = vmatmul.mubr.bf16.gmra.mxu1 %v2330_v60 }
  0x92   :  { %785 = vmatprep.mubr.bf16.mxu0 %v2331_v61  ;;  %913 = vmatprep.mubr.bf16.mxu1 %v2333_v62 }
  0x99   :  { %786 = vmatmul.mubr.bf16.gmra.mxu0 %v2335_v63  ;;  %914 = vmatmul.mubr.bf16.gmra.mxu1 %v2336_v0 }
  0x9a   :  { %793 = vmatprep.mubr.bf16.mxu0 %v2337_v1  ;;  %921 = vmatprep.mubr.bf16.mxu1 %v2339_v2 }
  0xa1   :  { %794 = vmatmul.mubr.bf16.gmra.mxu0 %v2341_v3  ;;  %922 = vmatmul.mubr.bf16.gmra.mxu1 %v2342_v4 }
  0xa2   :  { %801 = vmatprep.mubr.bf16.mxu0 %v2343_v5  ;;  %929 = vmatprep.mubr.bf16.mxu1 %v2345_v6 }
  0xa9   :  { %802 = vmatmul.mubr.bf16.gmra.mxu0 %v2347_v7  ;;  %930 = vmatmul.mubr.bf16.gmra.mxu1 %v2348_v8 }
  0xaa   :  { %809 = vmatprep.mubr.bf16.mxu0 %v2349_v9  ;;  %937 = vmatprep.mubr.bf16.mxu1 %v2351_v10 }
  0xb1   :  { %810 = vmatmul.mubr.bf16.gmra.mxu0 %v2353_v11  ;;  %938 = vmatmul.mubr.bf16.gmra.mxu1 %v2354_v12 }
  0xb2   :  { %817 = vmatprep.mubr.bf16.mxu0 %v2355_v13  ;;  %945 = vmatprep.mubr.bf16.mxu1 %v2357_v14 }
  0xb9   :  { %818 = vmatmul.mubr.bf16.gmra.mxu0 %v2359_v15  ;;  %946 = vmatmul.mubr.bf16.gmra.mxu1 %v2360_v16 }
 0x101   :  { %v699_v18 = vpop.f32.mrf.mxu0  ;;  %v827_v20 = vpop.f32.mrf.mxu1 }
 0x102   :  { %v1156_v21 = vmul.f32 %v2667_v17, %v699_v18  ;;  %v1188_v22 = vmul.f32 %v2667_v17, %v827_v20 }
 0x103   :  { %v701_v23 = vpop.f32.mrf.mxu0  ;;  %v829_v24 = vpop.f32.mrf.mxu1 }
 0x104   :  { %v1227_v25 = vadd.f32 %v2672_v19, %v1156_v21  ;;  %v1259_v26 = vadd.f32 %v2672_v19, %v1188_v22 }
 0x105   :  { %v702_v28 = vpop.f32.mrf.mxu0  ;;  %v830_v29 = vpop.f32.mrf.mxu1 }
 0x106   :  { %v1157_v30 = vmul.f32 %v2667_v17, %v702_v28  ;;  %v1189_v31 = vmul.f32 %v2667_v17, %v830_v29  ;;  %v1362_v34 = vmul.f32 %v2681_v27, %v1227_v25  ;;  %v1394_v35 = vmul.f32 %v2681_v27, %v1259_v26 }
 0x107   :  { %v704_v32 = vpop.f32.mrf.mxu0  ;;  %v832_v33 = vpop.f32.mrf.mxu1  ;;  %vm1291_vm0 = vcmp.ge.f32.partialorder %v1227_v25, 0.0  ;;  %vm1323_vm1 = vcmp.ge.f32.partialorder %v1259_v26, 0.0 }
 0x108   :  { %v1228_v36 = vadd.f32 %v2672_v19, %v1157_v30  ;;  %v1260_v37 = vadd.f32 %v2672_v19, %v1189_v31  ;;  %v1426_v46 = vsel %vm1291_vm0, %v1227_v25, %v1362_v34  ;;  %v1458_v47 = vsel %vm1323_vm1, %v1259_v26, %v1394_v35 }
 0x109   :  { %v707_v38 = vpop.f32.mrf.mxu0  ;;  %v835_v39 = vpop.f32.mrf.mxu1 }
 0x10a   :  { %v1158_v40 = vmul.f32 %v2667_v17, %v707_v38  ;;  %v1190_v41 = vmul.f32 %v2667_v17, %v835_v39  ;;  %vm1292_vm2 = vcmp.ge.f32.partialorder %v1228_v36, 0.0  ;;  %v1363_v42 = vmul.f32 %v2681_v27, %v1228_v36 }
 0x10b   :  { %vm1324_vm3 = vcmp.ge.f32.partialorder %v1260_v37, 0.0  ;;  %v1395_v43 = vmul.f32 %v2681_v27, %v1260_v37  ;;  %v709_v44 = vpop.f32.mrf.mxu0  ;;  %v837_v45 = vpop.f32.mrf.mxu1 }
 0x10c   :  { %v1427_v48 = vsel %vm1292_vm2, %v1228_v36, %v1363_v42  ;;  %v1229_v50 = vadd.f32 %v2672_v19, %v1158_v40  ;;  %v1261_v51 = vadd.f32 %v2672_v19, %v1190_v41 }
 0x10d   :  { %v1459_v49 = vsel %vm1324_vm3, %v1260_v37, %v1395_v43  ;;  %v710_v52 = vpop.f32.mrf.mxu0  ;;  %v838_v53 = vpop.f32.mrf.mxu1  ;;  %v2028_v54 = vpack.c.bf16 %v1427_v48, %v1426_v46 }
 0x10e   :  { %v2108_v55 = vpack.c.bf16 %v1459_v49, %v1458_v47  ;;  %v1159_v56 = vmul.f32 %v2667_v17, %v710_v52  ;;  %v1191_v57 = vmul.f32 %v2667_v17, %v838_v53  ;;  %v1364_v60 = vmul.f32 %v2681_v27, %v1229_v50 }
 0x10f   :  { %v712_v58 = vpop.f32.mrf.mxu0  ;;  %v840_v59 = vpop.f32.mrf.mxu1  ;;  %2029 = vst [vmem:[%s2972_s5] sm:$0xff] %v2028_v54   ;;  %v1396_v61 = vmul.f32 %v2681_v27, %v1261_v51  ;;  %vm1293_vm4 = vcmp.ge.f32.partialorder %v1229_v50, 0.0  ;;  %vm1325_vm5 = vcmp.ge.f32.partialorder %v1261_v51, 0.0 }
 0x110   :  { %2200 = vst [vmem:[%s2972_s5 + $0x80] sm:$0xff] %v2108_v55   ;;  %v1230_v62 = vadd.f32 %v2672_v19, %v1159_v56  ;;  %v1262_v63 = vadd.f32 %v2672_v19, %v1191_v57  ;;  %v1428_v10 = vsel %vm1293_vm4, %v1229_v50, %v1364_v60 }
 0x111   :  { %v715_v0 = vpop.f32.mrf.mxu0  ;;  %v843_v1 = vpop.f32.mrf.mxu1  ;;  %v1460_v11 = vsel %vm1325_vm5, %v1261_v51, %v1396_v61 }
 0x112   :  { %v1160_v2 = vmul.f32 %v2667_v17, %v715_v0  ;;  %v1192_v3 = vmul.f32 %v2667_v17, %v843_v1  ;;  %vm1294_vm6 = vcmp.ge.f32.partialorder %v1230_v62, 0.0  ;;  %v1365_v4 = vmul.f32 %v2681_v27, %v1230_v62 }
 0x113   :  { %vm1326_vm7 = vcmp.ge.f32.partialorder %v1262_v63, 0.0  ;;  %v1397_v5 = vmul.f32 %v2681_v27, %v1262_v63  ;;  %v717_v6 = vpop.f32.mrf.mxu0  ;;  %v845_v7 = vpop.f32.mrf.mxu1 }
 0x114   :  { %v1231_v8 = vadd.f32 %v2672_v19, %v1160_v2  ;;  %v1263_v9 = vadd.f32 %v2672_v19, %v1192_v3  ;;  %v1429_v12 = vsel %vm1294_vm6, %v1230_v62, %v1365_v4 }
 0x115   :  { %v1461_v13 = vsel %vm1326_vm7, %v1262_v63, %v1397_v5  ;;  %v718_v14 = vpop.f32.mrf.mxu0  ;;  %v846_v15 = vpop.f32.mrf.mxu1  ;;  %v2033_v16 = vpack.c.bf16 %v1429_v12, %v1428_v10 }
 0x116   :  { %v2113_v18 = vpack.c.bf16 %v1461_v13, %v1460_v11  ;;  %v1161_v20 = vmul.f32 %v2667_v17, %v718_v14  ;;  %v1193_v21 = vmul.f32 %v2667_v17, %v846_v15  ;;  %v1366_v24 = vmul.f32 %v2681_v27, %v1231_v8 }
 0x117   :  { %v720_v22 = vpop.f32.mrf.mxu0  ;;  %v848_v23 = vpop.f32.mrf.mxu1  ;;  %2185 = vst [vmem:[%s2972_s5 + $0x8] sm:$0xff] %v2033_v16   ;;  %v1398_v25 = vmul.f32 %v2681_v27, %v1263_v9  ;;  %vm1295_vm8 = vcmp.ge.f32.partialorder %v1231_v8, 0.0  ;;  %vm1327_vm9 = vcmp.ge.f32.partialorder %v1263_v9, 0.0 }
 0x118   :  { %2201 = vst [vmem:[%s2972_s5 + $0x88] sm:$0xff] %v2113_v18   ;;  %v1232_v26 = vadd.f32 %v2672_v19, %v1161_v20  ;;  %v1264_v28 = vadd.f32 %v2672_v19, %v1193_v21  ;;  %v1430_v37 = vsel %vm1295_vm8, %v1231_v8, %v1366_v24 }
 0x119   :  { %v723_v29 = vpop.f32.mrf.mxu0  ;;  %v851_v30 = vpop.f32.mrf.mxu1  ;;  %v1462_v38 = vsel %vm1327_vm9, %v1263_v9, %v1398_v25 }
 0x11a   :  { %v1162_v31 = vmul.f32 %v2667_v17, %v723_v29  ;;  %v1194_v32 = vmul.f32 %v2667_v17, %v851_v30  ;;  %vm1296_vm10 = vcmp.ge.f32.partialorder %v1232_v26, 0.0  ;;  %v1367_v33 = vmul.f32 %v2681_v27, %v1232_v26 }
 0x11b   :  { %vm1328_vm11 = vcmp.ge.f32.partialorder %v1264_v28, 0.0  ;;  %v1399_v34 = vmul.f32 %v2681_v27, %v1264_v28  ;;  %v725_v35 = vpop.f32.mrf.mxu0  ;;  %v853_v36 = vpop.f32.mrf.mxu1 }
 0x11c   :  { %v1431_v39 = vsel %vm1296_vm10, %v1232_v26, %v1367_v33  ;;  %v1233_v41 = vadd.f32 %v2672_v19, %v1162_v31  ;;  %v1265_v42 = vadd.f32 %v2672_v19, %v1194_v32 }
 0x11d   :  { %v1463_v40 = vsel %vm1328_vm11, %v1264_v28, %v1399_v34  ;;  %v726_v43 = vpop.f32.mrf.mxu0  ;;  %v854_v44 = vpop.f32.mrf.mxu1  ;;  %v2038_v45 = vpack.c.bf16 %v1431_v39, %v1430_v37 }
 0x11e   :  { %v2118_v46 = vpack.c.bf16 %v1463_v40, %v1462_v38  ;;  %v1163_v47 = vmul.f32 %v2667_v17, %v726_v43  ;;  %v1195_v48 = vmul.f32 %v2667_v17, %v854_v44  ;;  %v1368_v51 = vmul.f32 %v2681_v27, %v1233_v41 }
 0x11f   :  { %v728_v49 = vpop.f32.mrf.mxu0  ;;  %v856_v50 = vpop.f32.mrf.mxu1  ;;  %2186 = vst [vmem:[%s2972_s5 + $0x10] sm:$0xff] %v2038_v45   ;;  %v1400_v52 = vmul.f32 %v2681_v27, %v1265_v42  ;;  %vm1297_vm12 = vcmp.ge.f32.partialorder %v1233_v41, 0.0  ;;  %vm1329_vm13 = vcmp.ge.f32.partialorder %v1265_v42, 0.0 }
 0x120   :  { %2202 = vst [vmem:[%s2972_s5 + $0x90] sm:$0xff] %v2118_v46   ;;  %v1234_v53 = vadd.f32 %v2672_v19, %v1163_v47  ;;  %v1266_v54 = vadd.f32 %v2672_v19, %v1195_v48  ;;  %v1432_v1 = vsel %vm1297_vm12, %v1233_v41, %v1368_v51 }
 0x121   :  { %v731_v55 = vpop.f32.mrf.mxu0  ;;  %v859_v56 = vpop.f32.mrf.mxu1  ;;  %v1464_v2 = vsel %vm1329_vm13, %v1265_v42, %v1400_v52 }
 0x122   :  { %v1164_v57 = vmul.f32 %v2667_v17, %v731_v55  ;;  %v1196_v58 = vmul.f32 %v2667_v17, %v859_v56  ;;  %vm1298_vm14 = vcmp.ge.f32.partialorder %v1234_v53, 0.0  ;;  %v1369_v59 = vmul.f32 %v2681_v27, %v1234_v53 }
 0x123   :  { %vm1330_vm15 = vcmp.ge.f32.partialorder %v1266_v54, 0.0  ;;  %v1401_v60 = vmul.f32 %v2681_v27, %v1266_v54  ;;  %v733_v61 = vpop.f32.mrf.mxu0  ;;  %v861_v62 = vpop.f32.mrf.mxu1 }
 0x124   :  { %v1235_v63 = vadd.f32 %v2672_v19, %v1164_v57  ;;  %v1267_v0 = vadd.f32 %v2672_v19, %v1196_v58  ;;  %v1433_v3 = vsel %vm1298_vm14, %v1234_v53, %v1369_v59 }
 0x125   :  { %v1465_v4 = vsel %vm1330_vm15, %v1266_v54, %v1401_v60  ;;  %v734_v5 = vpop.f32.mrf.mxu0  ;;  %v862_v6 = vpop.f32.mrf.mxu1  ;;  %v2043_v7 = vpack.c.bf16 %v1433_v3, %v1432_v1 }
 0x126   :  { %v2123_v8 = vpack.c.bf16 %v1465_v4, %v1464_v2  ;;  %v1165_v9 = vmul.f32 %v2667_v17, %v734_v5  ;;  %v1197_v10 = vmul.f32 %v2667_v17, %v862_v6  ;;  %v1370_v13 = vmul.f32 %v2681_v27, %v1235_v63 }
 0x127   :  { %v736_v11 = vpop.f32.mrf.mxu0  ;;  %v864_v12 = vpop.f32.mrf.mxu1  ;;  %2187 = vst [vmem:[%s2972_s5 + $0x18] sm:$0xff] %v2043_v7   ;;  %v1402_v14 = vmul.f32 %v2681_v27, %v1267_v0  ;;  %vm1299_vm0 = vcmp.ge.f32.partialorder %v1235_v63, 0.0  ;;  %vm1331_vm1 = vcmp.ge.f32.partialorder %v1267_v0, 0.0 }
 0x128   :  { %2203 = vst [vmem:[%s2972_s5 + $0x98] sm:$0xff] %v2123_v8   ;;  %v1236_v15 = vadd.f32 %v2672_v19, %v1165_v9  ;;  %v1268_v16 = vadd.f32 %v2672_v19, %v1197_v10  ;;  %v1434_v28 = vsel %vm1299_vm0, %v1235_v63, %v1370_v13 }
 0x129   :  { %v739_v18 = vpop.f32.mrf.mxu0  ;;  %v867_v20 = vpop.f32.mrf.mxu1  ;;  %v1466_v29 = vsel %vm1331_vm1, %v1267_v0, %v1402_v14 }
 0x12a   :  { %v1166_v21 = vmul.f32 %v2667_v17, %v739_v18  ;;  %v1198_v22 = vmul.f32 %v2667_v17, %v867_v20  ;;  %vm1300_vm2 = vcmp.ge.f32.partialorder %v1236_v15, 0.0  ;;  %v1371_v23 = vmul.f32 %v2681_v27, %v1236_v15 }
 0x12b   :  { %vm1332_vm3 = vcmp.ge.f32.partialorder %v1268_v16, 0.0  ;;  %v1403_v24 = vmul.f32 %v2681_v27, %v1268_v16  ;;  %v741_v25 = vpop.f32.mrf.mxu0  ;;  %v869_v26 = vpop.f32.mrf.mxu1 }
 0x12c   :  { %v1435_v30 = vsel %vm1300_vm2, %v1236_v15, %v1371_v23  ;;  %v1237_v32 = vadd.f32 %v2672_v19, %v1166_v21  ;;  %v1269_v33 = vadd.f32 %v2672_v19, %v1198_v22 }
 0x12d   :  { %v1467_v31 = vsel %vm1332_vm3, %v1268_v16, %v1403_v24  ;;  %v742_v34 = vpop.f32.mrf.mxu0  ;;  %v870_v35 = vpop.f32.mrf.mxu1  ;;  %v2048_v36 = vpack.c.bf16 %v1435_v30, %v1434_v28 }
 0x12e   :  { %v2128_v37 = vpack.c.bf16 %v1467_v31, %v1466_v29  ;;  %v1167_v38 = vmul.f32 %v2667_v17, %v742_v34  ;;  %v1199_v39 = vmul.f32 %v2667_v17, %v870_v35  ;;  %v1372_v42 = vmul.f32 %v2681_v27, %v1237_v32 }
 0x12f   :  { %v744_v40 = vpop.f32.mrf.mxu0  ;;  %v872_v41 = vpop.f32.mrf.mxu1  ;;  %2188 = vst [vmem:[%s2972_s5 + $0x20] sm:$0xff] %v2048_v36   ;;  %v1404_v43 = vmul.f32 %v2681_v27, %v1269_v33  ;;  %vm1301_vm4 = vcmp.ge.f32.partialorder %v1237_v32, 0.0  ;;  %vm1333_vm5 = vcmp.ge.f32.partialorder %v1269_v33, 0.0 }
 0x130   :  { %2204 = vst [vmem:[%s2972_s5 + $0xa0] sm:$0xff] %v2128_v37   ;;  %v1238_v44 = vadd.f32 %v2672_v19, %v1167_v38  ;;  %v1270_v45 = vadd.f32 %v2672_v19, %v1199_v39  ;;  %v1436_v56 = vsel %vm1301_vm4, %v1237_v32, %v1372_v42 }
 0x131   :  { %v747_v46 = vpop.f32.mrf.mxu0  ;;  %v875_v47 = vpop.f32.mrf.mxu1  ;;  %v1468_v57 = vsel %vm1333_vm5, %v1269_v33, %v1404_v43 }
 0x132   :  { %v1168_v48 = vmul.f32 %v2667_v17, %v747_v46  ;;  %v1200_v49 = vmul.f32 %v2667_v17, %v875_v47  ;;  %vm1302_vm6 = vcmp.ge.f32.partialorder %v1238_v44, 0.0  ;;  %v1373_v50 = vmul.f32 %v2681_v27, %v1238_v44 }
 0x133   :  { %vm1334_vm7 = vcmp.ge.f32.partialorder %v1270_v45, 0.0  ;;  %v1405_v51 = vmul.f32 %v2681_v27, %v1270_v45  ;;  %v749_v52 = vpop.f32.mrf.mxu0  ;;  %v877_v53 = vpop.f32.mrf.mxu1 }
 0x134   :  { %v1239_v54 = vadd.f32 %v2672_v19, %v1168_v48  ;;  %v1271_v55 = vadd.f32 %v2672_v19, %v1200_v49  ;;  %v1437_v58 = vsel %vm1302_vm6, %v1238_v44, %v1373_v50 }
 0x135   :  { %v1469_v59 = vsel %vm1334_vm7, %v1270_v45, %v1405_v51  ;;  %v750_v60 = vpop.f32.mrf.mxu0  ;;  %v878_v61 = vpop.f32.mrf.mxu1  ;;  %v2053_v62 = vpack.c.bf16 %v1437_v58, %v1436_v56 }
 0x136   :  { %v2133_v63 = vpack.c.bf16 %v1469_v59, %v1468_v57  ;;  %v1169_v0 = vmul.f32 %v2667_v17, %v750_v60  ;;  %v1201_v1 = vmul.f32 %v2667_v17, %v878_v61  ;;  %v1374_v4 = vmul.f32 %v2681_v27, %v1239_v54 }
 0x137   :  { %v752_v2 = vpop.f32.mrf.mxu0  ;;  %v880_v3 = vpop.f32.mrf.mxu1  ;;  %2189 = vst [vmem:[%s2972_s5 + $0x28] sm:$0xff] %v2053_v62   ;;  %v1406_v5 = vmul.f32 %v2681_v27, %v1271_v55  ;;  %vm1303_vm8 = vcmp.ge.f32.partialorder %v1239_v54, 0.0  ;;  %vm1335_vm9 = vcmp.ge.f32.partialorder %v1271_v55, 0.0 }
 0x138   :  { %2205 = vst [vmem:[%s2972_s5 + $0xa8] sm:$0xff] %v2133_v63   ;;  %v1240_v6 = vadd.f32 %v2672_v19, %v1169_v0  ;;  %v1272_v7 = vadd.f32 %v2672_v19, %v1201_v1  ;;  %v1438_v16 = vsel %vm1303_vm8, %v1239_v54, %v1374_v4 }
 0x139   :  { %v755_v8 = vpop.f32.mrf.mxu0  ;;  %v883_v9 = vpop.f32.mrf.mxu1  ;;  %v1470_v18 = vsel %vm1335_vm9, %v1271_v55, %v1406_v5 }
 0x13a   :  { %v1170_v10 = vmul.f32 %v2667_v17, %v755_v8  ;;  %v1202_v11 = vmul.f32 %v2667_v17, %v883_v9  ;;  %vm1304_vm10 = vcmp.ge.f32.partialorder %v1240_v6, 0.0  ;;  %v1375_v12 = vmul.f32 %v2681_v27, %v1240_v6 }
 0x13b   :  { %vm1336_vm11 = vcmp.ge.f32.partialorder %v1272_v7, 0.0  ;;  %v1407_v13 = vmul.f32 %v2681_v27, %v1272_v7  ;;  %v757_v14 = vpop.f32.mrf.mxu0  ;;  %v885_v15 = vpop.f32.mrf.mxu1 }
 0x13c   :  { %v1439_v20 = vsel %vm1304_vm10, %v1240_v6, %v1375_v12  ;;  %v1241_v22 = vadd.f32 %v2672_v19, %v1170_v10  ;;  %v1273_v23 = vadd.f32 %v2672_v19, %v1202_v11 }
 0x13d   :  { %v1471_v21 = vsel %vm1336_vm11, %v1272_v7, %v1407_v13  ;;  %v758_v24 = vpop.f32.mrf.mxu0  ;;  %v886_v25 = vpop.f32.mrf.mxu1  ;;  %v2058_v26 = vpack.c.bf16 %v1439_v20, %v1438_v16 }
 0x13e   :  { %v2138_v28 = vpack.c.bf16 %v1471_v21, %v1470_v18  ;;  %v1171_v29 = vmul.f32 %v2667_v17, %v758_v24  ;;  %v1203_v30 = vmul.f32 %v2667_v17, %v886_v25  ;;  %v1376_v33 = vmul.f32 %v2681_v27, %v1241_v22 }
 0x13f   :  { %v760_v31 = vpop.f32.mrf.mxu0  ;;  %v888_v32 = vpop.f32.mrf.mxu1  ;;  %2190 = vst [vmem:[%s2972_s5 + $0x30] sm:$0xff] %v2058_v26   ;;  %v1408_v34 = vmul.f32 %v2681_v27, %v1273_v23  ;;  %vm1305_vm12 = vcmp.ge.f32.partialorder %v1241_v22, 0.0  ;;  %vm1337_vm13 = vcmp.ge.f32.partialorder %v1273_v23, 0.0 }
 0x140   :  { %2206 = vst [vmem:[%s2972_s5 + $0xb0] sm:$0xff] %v2138_v28   ;;  %v1242_v35 = vadd.f32 %v2672_v19, %v1171_v29  ;;  %v1274_v36 = vadd.f32 %v2672_v19, %v1203_v30  ;;  %v1440_v47 = vsel %vm1305_vm12, %v1241_v22, %v1376_v33 }
 0x141   :  { %v763_v37 = vpop.f32.mrf.mxu0  ;;  %v891_v38 = vpop.f32.mrf.mxu1  ;;  %v1472_v48 = vsel %vm1337_vm13, %v1273_v23, %v1408_v34 }
 0x142   :  { %v1172_v39 = vmul.f32 %v2667_v17, %v763_v37  ;;  %v1204_v40 = vmul.f32 %v2667_v17, %v891_v38  ;;  %vm1306_vm14 = vcmp.ge.f32.partialorder %v1242_v35, 0.0  ;;  %v1377_v41 = vmul.f32 %v2681_v27, %v1242_v35 }
 0x143   :  { %vm1338_vm15 = vcmp.ge.f32.partialorder %v1274_v36, 0.0  ;;  %v1409_v42 = vmul.f32 %v2681_v27, %v1274_v36  ;;  %v765_v43 = vpop.f32.mrf.mxu0  ;;  %v893_v44 = vpop.f32.mrf.mxu1 }
 0x144   :  { %v1243_v45 = vadd.f32 %v2672_v19, %v1172_v39  ;;  %v1275_v46 = vadd.f32 %v2672_v19, %v1204_v40  ;;  %v1441_v49 = vsel %vm1306_vm14, %v1242_v35, %v1377_v41 }
 0x145   :  { %v1473_v50 = vsel %vm1338_vm15, %v1274_v36, %v1409_v42  ;;  %v766_v51 = vpop.f32.mrf.mxu0  ;;  %v894_v52 = vpop.f32.mrf.mxu1  ;;  %v2063_v53 = vpack.c.bf16 %v1441_v49, %v1440_v47 }
 0x146   :  { %v2143_v54 = vpack.c.bf16 %v1473_v50, %v1472_v48  ;;  %v1173_v55 = vmul.f32 %v2667_v17, %v766_v51  ;;  %v1205_v56 = vmul.f32 %v2667_v17, %v894_v52  ;;  %v1378_v59 = vmul.f32 %v2681_v27, %v1243_v45 }
 0x147   :  { %v768_v57 = vpop.f32.mrf.mxu0  ;;  %v896_v58 = vpop.f32.mrf.mxu1  ;;  %2191 = vst [vmem:[%s2972_s5 + $0x38] sm:$0xff] %v2063_v53   ;;  %v1410_v60 = vmul.f32 %v2681_v27, %v1275_v46  ;;  %vm1307_vm0 = vcmp.ge.f32.partialorder %v1243_v45, 0.0  ;;  %vm1339_vm1 = vcmp.ge.f32.partialorder %v1275_v46, 0.0 }
 0x148   :  { %2207 = vst [vmem:[%s2972_s5 + $0xb8] sm:$0xff] %v2143_v54   ;;  %v1244_v61 = vadd.f32 %v2672_v19, %v1173_v55  ;;  %v1276_v62 = vadd.f32 %v2672_v19, %v1205_v56  ;;  %v1442_v7 = vsel %vm1307_vm0, %v1243_v45, %v1378_v59 }
 0x149   :  { %v771_v63 = vpop.f32.mrf.mxu0  ;;  %v899_v0 = vpop.f32.mrf.mxu1  ;;  %v1474_v8 = vsel %vm1339_vm1, %v1275_v46, %v1410_v60 }
 0x14a   :  { %v1174_v1 = vmul.f32 %v2667_v17, %v771_v63  ;;  %v1206_v2 = vmul.f32 %v2667_v17, %v899_v0  ;;  %vm1308_vm2 = vcmp.ge.f32.partialorder %v1244_v61, 0.0  ;;  %v1379_v3 = vmul.f32 %v2681_v27, %v1244_v61 }
 0x14b   :  { %vm1340_vm3 = vcmp.ge.f32.partialorder %v1276_v62, 0.0  ;;  %v1411_v4 = vmul.f32 %v2681_v27, %v1276_v62  ;;  %v773_v5 = vpop.f32.mrf.mxu0  ;;  %v901_v6 = vpop.f32.mrf.mxu1 }
 0x14c   :  { %v1443_v9 = vsel %vm1308_vm2, %v1244_v61, %v1379_v3  ;;  %v1245_v11 = vadd.f32 %v2672_v19, %v1174_v1  ;;  %v1277_v12 = vadd.f32 %v2672_v19, %v1206_v2 }
 0x14d   :  { %v1475_v10 = vsel %vm1340_vm3, %v1276_v62, %v1411_v4  ;;  %v774_v13 = vpop.f32.mrf.mxu0  ;;  %v902_v14 = vpop.f32.mrf.mxu1  ;;  %v2068_v15 = vpack.c.bf16 %v1443_v9, %v1442_v7 }
 0x14e   :  { %v2148_v16 = vpack.c.bf16 %v1475_v10, %v1474_v8  ;;  %v1175_v18 = vmul.f32 %v2667_v17, %v774_v13  ;;  %v1207_v20 = vmul.f32 %v2667_v17, %v902_v14  ;;  %v1380_v23 = vmul.f32 %v2681_v27, %v1245_v11 }
 0x14f   :  { %v776_v21 = vpop.f32.mrf.mxu0  ;;  %v904_v22 = vpop.f32.mrf.mxu1  ;;  %2192 = vst [vmem:[%s2972_s5 + $0x40] sm:$0xff] %v2068_v15   ;;  %v1412_v24 = vmul.f32 %v2681_v27, %v1277_v12  ;;  %vm1309_vm4 = vcmp.ge.f32.partialorder %v1245_v11, 0.0  ;;  %vm1341_vm5 = vcmp.ge.f32.partialorder %v1277_v12, 0.0 }
 0x150   :  { %2208 = vst [vmem:[%s2972_s5 + $0xc0] sm:$0xff] %v2148_v16   ;;  %v1246_v25 = vadd.f32 %v2672_v19, %v1175_v18  ;;  %v1278_v26 = vadd.f32 %v2672_v19, %v1207_v20  ;;  %v1444_v38 = vsel %vm1309_vm4, %v1245_v11, %v1380_v23 }
 0x151   :  { %v779_v28 = vpop.f32.mrf.mxu0  ;;  %v907_v29 = vpop.f32.mrf.mxu1  ;;  %v1476_v39 = vsel %vm1341_vm5, %v1277_v12, %v1412_v24 }
 0x152   :  { %v1176_v30 = vmul.f32 %v2667_v17, %v779_v28  ;;  %v1208_v31 = vmul.f32 %v2667_v17, %v907_v29  ;;  %vm1310_vm6 = vcmp.ge.f32.partialorder %v1246_v25, 0.0  ;;  %v1381_v32 = vmul.f32 %v2681_v27, %v1246_v25 }
 0x153   :  { %vm1342_vm7 = vcmp.ge.f32.partialorder %v1278_v26, 0.0  ;;  %v1413_v33 = vmul.f32 %v2681_v27, %v1278_v26  ;;  %v781_v34 = vpop.f32.mrf.mxu0  ;;  %v909_v35 = vpop.f32.mrf.mxu1 }
 0x154   :  { %v1247_v36 = vadd.f32 %v2672_v19, %v1176_v30  ;;  %v1279_v37 = vadd.f32 %v2672_v19, %v1208_v31  ;;  %v1445_v40 = vsel %vm1310_vm6, %v1246_v25, %v1381_v32 }
 0x155   :  { %v1477_v41 = vsel %vm1342_vm7, %v1278_v26, %v1413_v33  ;;  %v782_v42 = vpop.f32.mrf.mxu0  ;;  %v910_v43 = vpop.f32.mrf.mxu1  ;;  %v2073_v44 = vpack.c.bf16 %v1445_v40, %v1444_v38 }
 0x156   :  { %v2153_v45 = vpack.c.bf16 %v1477_v41, %v1476_v39  ;;  %v1177_v46 = vmul.f32 %v2667_v17, %v782_v42  ;;  %v1209_v47 = vmul.f32 %v2667_v17, %v910_v43  ;;  %v1382_v50 = vmul.f32 %v2681_v27, %v1247_v36 }
 0x157   :  { %v784_v48 = vpop.f32.mrf.mxu0  ;;  %v912_v49 = vpop.f32.mrf.mxu1  ;;  %2193 = vst [vmem:[%s2972_s5 + $0x48] sm:$0xff] %v2073_v44   ;;  %v1414_v51 = vmul.f32 %v2681_v27, %v1279_v37  ;;  %vm1311_vm8 = vcmp.ge.f32.partialorder %v1247_v36, 0.0  ;;  %vm1343_vm9 = vcmp.ge.f32.partialorder %v1279_v37, 0.0 }
 0x158   :  { %2209 = vst [vmem:[%s2972_s5 + $0xc8] sm:$0xff] %v2153_v45   ;;  %v1248_v52 = vadd.f32 %v2672_v19, %v1177_v46  ;;  %v1280_v53 = vadd.f32 %v2672_v19, %v1209_v47  ;;  %v1446_v62 = vsel %vm1311_vm8, %v1247_v36, %v1382_v50 }
 0x159   :  { %v787_v54 = vpop.f32.mrf.mxu0  ;;  %v915_v55 = vpop.f32.mrf.mxu1  ;;  %v1478_v63 = vsel %vm1343_vm9, %v1279_v37, %v1414_v51 }
 0x15a   :  { %v1178_v56 = vmul.f32 %v2667_v17, %v787_v54  ;;  %v1210_v57 = vmul.f32 %v2667_v17, %v915_v55  ;;  %vm1312_vm10 = vcmp.ge.f32.partialorder %v1248_v52, 0.0  ;;  %v1383_v58 = vmul.f32 %v2681_v27, %v1248_v52 }
 0x15b   :  { %vm1344_vm11 = vcmp.ge.f32.partialorder %v1280_v53, 0.0  ;;  %v1415_v59 = vmul.f32 %v2681_v27, %v1280_v53  ;;  %v789_v60 = vpop.f32.mrf.mxu0  ;;  %v917_v61 = vpop.f32.mrf.mxu1 }
 0x15c   :  { %v1447_v0 = vsel %vm1312_vm10, %v1248_v52, %v1383_v58  ;;  %v1249_v2 = vadd.f32 %v2672_v19, %v1178_v56  ;;  %v1281_v3 = vadd.f32 %v2672_v19, %v1210_v57 }
 0x15d   :  { %v1479_v1 = vsel %vm1344_vm11, %v1280_v53, %v1415_v59  ;;  %v790_v4 = vpop.f32.mrf.mxu0  ;;  %v918_v5 = vpop.f32.mrf.mxu1  ;;  %v2078_v6 = vpack.c.bf16 %v1447_v0, %v1446_v62 }
 0x15e   :  { %v2158_v7 = vpack.c.bf16 %v1479_v1, %v1478_v63  ;;  %v1179_v8 = vmul.f32 %v2667_v17, %v790_v4  ;;  %v1211_v9 = vmul.f32 %v2667_v17, %v918_v5  ;;  %v1384_v12 = vmul.f32 %v2681_v27, %v1249_v2 }
 0x15f   :  { %v792_v10 = vpop.f32.mrf.mxu0  ;;  %v920_v11 = vpop.f32.mrf.mxu1  ;;  %2194 = vst [vmem:[%s2972_s5 + $0x50] sm:$0xff] %v2078_v6   ;;  %v1416_v13 = vmul.f32 %v2681_v27, %v1281_v3  ;;  %vm1313_vm12 = vcmp.ge.f32.partialorder %v1249_v2, 0.0  ;;  %vm1345_vm13 = vcmp.ge.f32.partialorder %v1281_v3, 0.0 }
 0x160   :  { %2210 = vst [vmem:[%s2972_s5 + $0xd0] sm:$0xff] %v2158_v7   ;;  %v1250_v14 = vadd.f32 %v2672_v19, %v1179_v8  ;;  %v1282_v15 = vadd.f32 %v2672_v19, %v1211_v9  ;;  %v1448_v29 = vsel %vm1313_vm12, %v1249_v2, %v1384_v12 }
 0x161   :  { %v795_v16 = vpop.f32.mrf.mxu0  ;;  %v923_v18 = vpop.f32.mrf.mxu1  ;;  %v1480_v30 = vsel %vm1345_vm13, %v1281_v3, %v1416_v13 }
 0x162   :  { %v1180_v20 = vmul.f32 %v2667_v17, %v795_v16  ;;  %v1212_v21 = vmul.f32 %v2667_v17, %v923_v18  ;;  %vm1314_vm14 = vcmp.ge.f32.partialorder %v1250_v14, 0.0  ;;  %v1385_v22 = vmul.f32 %v2681_v27, %v1250_v14 }
 0x163   :  { %vm1346_vm15 = vcmp.ge.f32.partialorder %v1282_v15, 0.0  ;;  %v1417_v23 = vmul.f32 %v2681_v27, %v1282_v15  ;;  %v797_v24 = vpop.f32.mrf.mxu0  ;;  %v925_v25 = vpop.f32.mrf.mxu1 }
 0x164   :  { %v1251_v26 = vadd.f32 %v2672_v19, %v1180_v20  ;;  %v1283_v28 = vadd.f32 %v2672_v19, %v1212_v21  ;;  %v1449_v31 = vsel %vm1314_vm14, %v1250_v14, %v1385_v22 }
 0x165   :  { %v1481_v32 = vsel %vm1346_vm15, %v1282_v15, %v1417_v23  ;;  %v798_v33 = vpop.f32.mrf.mxu0  ;;  %v926_v34 = vpop.f32.mrf.mxu1  ;;  %v2083_v35 = vpack.c.bf16 %v1449_v31, %v1448_v29 }
 0x166   :  { %v2163_v36 = vpack.c.bf16 %v1481_v32, %v1480_v30  ;;  %v1181_v37 = vmul.f32 %v2667_v17, %v798_v33  ;;  %v1213_v38 = vmul.f32 %v2667_v17, %v926_v34  ;;  %v1386_v41 = vmul.f32 %v2681_v27, %v1251_v26 }
 0x167   :  { %v800_v39 = vpop.f32.mrf.mxu0  ;;  %v928_v40 = vpop.f32.mrf.mxu1  ;;  %2195 = vst [vmem:[%s2972_s5 + $0x58] sm:$0xff] %v2083_v35   ;;  %v1418_v42 = vmul.f32 %v2681_v27, %v1283_v28  ;;  %vm1315_vm0 = vcmp.ge.f32.partialorder %v1251_v26, 0.0  ;;  %vm1347_vm1 = vcmp.ge.f32.partialorder %v1283_v28, 0.0 }
 0x168   :  { %2211 = vst [vmem:[%s2972_s5 + $0xd8] sm:$0xff] %v2163_v36   ;;  %v1252_v43 = vadd.f32 %v2672_v19, %v1181_v37  ;;  %v1284_v44 = vadd.f32 %v2672_v19, %v1213_v38  ;;  %v1450_v53 = vsel %vm1315_vm0, %v1251_v26, %v1386_v41 }
 0x169   :  { %v803_v45 = vpop.f32.mrf.mxu0  ;;  %v931_v46 = vpop.f32.mrf.mxu1  ;;  %v1482_v54 = vsel %vm1347_vm1, %v1283_v28, %v1418_v42 }
 0x16a   :  { %v1182_v47 = vmul.f32 %v2667_v17, %v803_v45  ;;  %v1214_v48 = vmul.f32 %v2667_v17, %v931_v46  ;;  %vm1316_vm2 = vcmp.ge.f32.partialorder %v1252_v43, 0.0  ;;  %v1387_v49 = vmul.f32 %v2681_v27, %v1252_v43 }
 0x16b   :  { %vm1348_vm3 = vcmp.ge.f32.partialorder %v1284_v44, 0.0  ;;  %v1419_v50 = vmul.f32 %v2681_v27, %v1284_v44  ;;  %v805_v51 = vpop.f32.mrf.mxu0  ;;  %v933_v52 = vpop.f32.mrf.mxu1 }
 0x16c   :  { %v1451_v55 = vsel %vm1316_vm2, %v1252_v43, %v1387_v49  ;;  %v1253_v57 = vadd.f32 %v2672_v19, %v1182_v47  ;;  %v1285_v58 = vadd.f32 %v2672_v19, %v1214_v48 }
 0x16d   :  { %v1483_v56 = vsel %vm1348_vm3, %v1284_v44, %v1419_v50  ;;  %v806_v59 = vpop.f32.mrf.mxu0  ;;  %v934_v60 = vpop.f32.mrf.mxu1  ;;  %v2088_v61 = vpack.c.bf16 %v1451_v55, %v1450_v53 }
 0x16e   :  { %v2168_v62 = vpack.c.bf16 %v1483_v56, %v1482_v54  ;;  %v1183_v63 = vmul.f32 %v2667_v17, %v806_v59  ;;  %v1215_v0 = vmul.f32 %v2667_v17, %v934_v60  ;;  %v1388_v3 = vmul.f32 %v2681_v27, %v1253_v57 }
 0x16f   :  { %v808_v1 = vpop.f32.mrf.mxu0  ;;  %v936_v2 = vpop.f32.mrf.mxu1  ;;  %2196 = vst [vmem:[%s2972_s5 + $0x60] sm:$0xff] %v2088_v61   ;;  %v1420_v4 = vmul.f32 %v2681_v27, %v1285_v58  ;;  %vm1317_vm4 = vcmp.ge.f32.partialorder %v1253_v57, 0.0  ;;  %vm1349_vm5 = vcmp.ge.f32.partialorder %v1285_v58, 0.0 }
 0x170   :  { %2212 = vst [vmem:[%s2972_s5 + $0xe0] sm:$0xff] %v2168_v62   ;;  %v1254_v5 = vadd.f32 %v2672_v19, %v1183_v63  ;;  %v1286_v6 = vadd.f32 %v2672_v19, %v1215_v0  ;;  %v1452_v18 = vsel %vm1317_vm4, %v1253_v57, %v1388_v3 }
 0x171   :  { %v811_v7 = vpop.f32.mrf.mxu0  ;;  %v939_v8 = vpop.f32.mrf.mxu1  ;;  %v1484_v20 = vsel %vm1349_vm5, %v1285_v58, %v1420_v4 }
 0x172   :  { %v1184_v9 = vmul.f32 %v2667_v17, %v811_v7  ;;  %v1216_v10 = vmul.f32 %v2667_v17, %v939_v8  ;;  %vm1318_vm6 = vcmp.ge.f32.partialorder %v1254_v5, 0.0  ;;  %v1389_v11 = vmul.f32 %v2681_v27, %v1254_v5 }
 0x173   :  { %vm1350_vm7 = vcmp.ge.f32.partialorder %v1286_v6, 0.0  ;;  %v1421_v12 = vmul.f32 %v2681_v27, %v1286_v6  ;;  %v813_v13 = vpop.f32.mrf.mxu0  ;;  %v941_v14 = vpop.f32.mrf.mxu1 }
 0x174   :  { %v1255_v15 = vadd.f32 %v2672_v19, %v1184_v9  ;;  %v1287_v16 = vadd.f32 %v2672_v19, %v1216_v10  ;;  %v1453_v21 = vsel %vm1318_vm6, %v1254_v5, %v1389_v11 }
 0x175   :  { %v1485_v22 = vsel %vm1350_vm7, %v1286_v6, %v1421_v12  ;;  %v814_v23 = vpop.f32.mrf.mxu0  ;;  %v942_v24 = vpop.f32.mrf.mxu1  ;;  %v2093_v25 = vpack.c.bf16 %v1453_v21, %v1452_v18 }
 0x176   :  { %v2173_v26 = vpack.c.bf16 %v1485_v22, %v1484_v20  ;;  %v1185_v28 = vmul.f32 %v2667_v17, %v814_v23  ;;  %v1217_v29 = vmul.f32 %v2667_v17, %v942_v24  ;;  %v1390_v32 = vmul.f32 %v2681_v27, %v1255_v15 }
 0x177   :  { %v816_v30 = vpop.f32.mrf.mxu0  ;;  %v944_v31 = vpop.f32.mrf.mxu1  ;;  %2197 = vst [vmem:[%s2972_s5 + $0x68] sm:$0xff] %v2093_v25   ;;  %v1422_v33 = vmul.f32 %v2681_v27, %v1287_v16  ;;  %vm1319_vm8 = vcmp.ge.f32.partialorder %v1255_v15, 0.0  ;;  %vm1351_vm9 = vcmp.ge.f32.partialorder %v1287_v16, 0.0 }
 0x178   :  { %2213 = vst [vmem:[%s2972_s5 + $0xe8] sm:$0xff] %v2173_v26   ;;  %v1256_v34 = vadd.f32 %v2672_v19, %v1185_v28  ;;  %v1288_v35 = vadd.f32 %v2672_v19, %v1217_v29  ;;  %v1454_v44 = vsel %vm1319_vm8, %v1255_v15, %v1390_v32 }
 0x179   :  { %v819_v36 = vpop.f32.mrf.mxu0  ;;  %v947_v37 = vpop.f32.mrf.mxu1  ;;  %v1486_v45 = vsel %vm1351_vm9, %v1287_v16, %v1422_v33 }
 0x17a   :  { %v1186_v38 = vmul.f32 %v2667_v17, %v819_v36  ;;  %v1218_v39 = vmul.f32 %v2667_v17, %v947_v37  ;;  %vm1320_vm10 = vcmp.ge.f32.partialorder %v1256_v34, 0.0  ;;  %v1391_v40 = vmul.f32 %v2681_v27, %v1256_v34 }
 0x17b   :  { %vm1352_vm11 = vcmp.ge.f32.partialorder %v1288_v35, 0.0  ;;  %v1423_v41 = vmul.f32 %v2681_v27, %v1288_v35  ;;  %v821_v42 = vpop.f32.mrf.mxu0  ;;  %v949_v43 = vpop.f32.mrf.mxu1 }
 0x17c   :  { %v1455_v46 = vsel %vm1320_vm10, %v1256_v34, %v1391_v40  ;;  %v1257_v48 = vadd.f32 %v2672_v19, %v1186_v38  ;;  %v1289_v49 = vadd.f32 %v2672_v19, %v1218_v39 }
 0x17d   :  { %v1487_v47 = vsel %vm1352_vm11, %v1288_v35, %v1423_v41  ;;  %v822_v50 = vpop.f32.mrf.mxu0  ;;  %v950_v51 = vpop.f32.mrf.mxu1  ;;  %v2098_v52 = vpack.c.bf16 %v1455_v46, %v1454_v44 }
 0x17e   :  { %v2178_v53 = vpack.c.bf16 %v1487_v47, %v1486_v45  ;;  %v1187_v54 = vmul.f32 %v2667_v17, %v822_v50  ;;  %v1219_v55 = vmul.f32 %v2667_v17, %v950_v51  ;;  %v1392_v58 = vmul.f32 %v2681_v27, %v1257_v48 }
 0x17f   :  { %v824_v56 = vpop.f32.mrf.mxu0  ;;  %v952_v57 = vpop.f32.mrf.mxu1  ;;  %2198 = vst [vmem:[%s2972_s5 + $0x70] sm:$0xff] %v2098_v52   ;;  %v1424_v59 = vmul.f32 %v2681_v27, %v1289_v49  ;;  %vm1321_vm12 = vcmp.ge.f32.partialorder %v1257_v48, 0.0  ;;  %vm1353_vm13 = vcmp.ge.f32.partialorder %v1289_v49, 0.0 }
 0x180   :  { %2214 = vst [vmem:[%s2972_s5 + $0xf0] sm:$0xff] %v2178_v53   ;;  %v1258_v60 = vadd.f32 %v2672_v19, %v1187_v54  ;;  %v1290_v61 = vadd.f32 %v2672_v19, %v1219_v55  ;;  %v1456_v63 = vsel %vm1321_vm12, %v1257_v48, %v1392_v58 }
 0x181   :  { %v1488_v0 = vsel %vm1353_vm13, %v1289_v49, %v1424_v59 }
 0x182   :  { %vm1322_vm14 = vcmp.ge.f32.partialorder %v1258_v60, 0.0  ;;  %v1393_v17 = vmul.f32 %v2681_v27, %v1258_v60  ;;  %vm1354_vm15 = vcmp.ge.f32.partialorder %v1290_v61, 0.0  ;;  %v1425_v62 = vmul.f32 %v2681_v27, %v1290_v61 }
 0x184   :  { %v1457_v1 = vsel %vm1322_vm14, %v1258_v60, %v1393_v17  ;;  %v1489_v2 = vsel %vm1354_vm15, %v1290_v61, %v1425_v62 }
 0x185   :  { %v2103_v3 = vpack.c.bf16 %v1457_v1, %v1456_v63  ;;  %v2183_v4 = vpack.c.bf16 %v1489_v2, %v1488_v0 }
 0x187   :  { %2199 = vst [vmem:[%s2972_s5 + $0x78] sm:$0xff] %v2103_v3   ;;  %2215 = vst [vmem:[%s2972_s5 + $0xf8] sm:$0xff] %v2183_v4  }

// kernel: espnet_encoder_forward.32
= control target key start
LH: loop header
LB: loop body
LE: loop exit
PB: predicated region body
PF: predicated region fallthrough
CT: control target
= control target key end

     0   :  { %s1061_s1 = inlined_call_operand.vmem [shape: bf16[256,128], index: 1, kind: input, shape index: {}]   ;;  %s1062_s0 = inlined_call_operand.vmem [shape: bf16[128,256], index: 0, kind: input, shape index: {}]   ;;  %s1063_s2 = inlined_call_operand.vmem [shape: f32[1,128], index: 2, kind: input, shape index: {}, may-alias: {2,4}]   ;;  %s1064_s3 = inlined_call_operand.vmem [shape: f32[1,128], index: 3, kind: input, shape index: {}]   ;;  %s1065_s4 = inlined_call_operand.vmem [shape: f32[1,128], index: 4, kind: input, shape index: {}, may-alias: {2,4}]   ;;  %s1066_s5 = inlined_call_operand.vmem [shape: bf16[128,128], index: 5, kind: output, shape index: {}]  }
   0x1   :  { %v808_v0 = vld [vmem:[%s1061_s1 + $0x78] sm:$0xff]   ;;  %v810_v2 = vld [vmem:[%s1061_s1 + $0x70] sm:$0xff]   ;;  %v812_v4 = vld [vmem:[%s1061_s1 + $0x68] sm:$0xff]  }
   0x2   :  { %v809_v1 = vld [vmem:[%s1061_s1 + $0x38] sm:$0xff]   ;;  %728 = vmatprep.subr.bf16.mxu0 %v808_v0  ;;  %792 = vmatprep.subr.bf16.mxu1 %v808_v0  ;;  %v811_v3 = vld [vmem:[%s1061_s1 + $0x30] sm:$0xff]   ;;  %v813_v5 = vld [vmem:[%s1061_s1 + $0x28] sm:$0xff]  }
   0x3   :  { %729 = vmatpush3.bf16.msra.mxu0 %v809_v1  ;;  %800 = vmatpush3.bf16.msra.mxu1 %v809_v1  ;;  %v814_v6 = vld [vmem:[%s1061_s1 + $0x60] sm:$0xff]   ;;  %v816_v8 = vld [vmem:[%s1061_s1 + $0x58] sm:$0xff]   ;;  %v818_v10 = vld [vmem:[%s1061_s1 + $0x50] sm:$0xff]  }
   0x4   :  { %730 = vmatprep.subr.bf16.mxu0 %v810_v2  ;;  %793 = vmatprep.subr.bf16.mxu1 %v810_v2  ;;  %v815_v7 = vld [vmem:[%s1061_s1 + $0x20] sm:$0xff]   ;;  %v817_v9 = vld [vmem:[%s1061_s1 + $0x18] sm:$0xff]   ;;  %v819_v13 = vld [vmem:[%s1061_s1 + $0x10] sm:$0xff]  }
   0x5   :  { %v826_v11 = vld [vmem:[%s1062_s0 + $0x4] ss:$8 sps:$4 sm:$0xff]   ;;  %v824_v18 = vld [vmem:[%s1062_s0] ss:$8 sps:$4 sm:$0xff]   ;;  %v830_v20 = vld [vmem:[%s1062_s0 + $0x14] ss:$8 sps:$4 sm:$0xff]  }
   0x6   :  { %v829_v12 = vld [vmem:[%s1062_s0 + $0x44] ss:$8 sps:$4 sm:$0xff]   ;;  %313 = vmatprep.mubr.bf16.mxu0 %v826_v11  ;;  %v827_v19 = vld [vmem:[%s1062_s0 + $0x40] ss:$8 sps:$4 sm:$0xff]   ;;  %v832_v21 = vld [vmem:[%s1062_s0 + $0x54] ss:$8 sps:$4 sm:$0xff]  }
   0x7   :  { %731 = vmatpush3.bf16.msra.mxu0 %v811_v3  ;;  %801 = vmatpush3.bf16.msra.mxu1 %v811_v3  ;;  %v820_v14 = vld [vmem:[%s1061_s1 + $0x48] sm:$0xff]   ;;  %v822_v16 = vld [vmem:[%s1061_s1 + $0x40] sm:$0xff]   ;;  %v834_v22 = vld [vmem:[%s1062_s0 + $0x10] ss:$8 sps:$4 sm:$0xff]  }
   0x8   :  { %732 = vmatprep.subr.bf16.mxu0 %v812_v4  ;;  %794 = vmatprep.subr.bf16.mxu1 %v812_v4  ;;  %v821_v15 = vld [vmem:[%s1061_s1 + $0x8] sm:$0xff]   ;;  %v823_v17 = vld [vmem:[%s1061_s1] sm:$0xff]   ;;  %v835_v23 = vld [vmem:[%s1062_s0 + $0x50] ss:$8 sps:$4 sm:$0xff]  }
   0x9   :  { %345 = vmatprep.mubr.bf16.mxu1 %v829_v12  ;;  %v836_v24 = vld [vmem:[%s1062_s0 + $0x24] ss:$8 sps:$4 sm:$0xff]   ;;  %v840_v26 = vld [vmem:[%s1062_s0 + $0x20] ss:$8 sps:$4 sm:$0xff]   ;;  %v842_v28 = vld [vmem:[%s1062_s0 + $0x34] ss:$8 sps:$4 sm:$0xff]  }
   0xa   :  { %v838_v25 = vld [vmem:[%s1062_s0 + $0x64] ss:$8 sps:$4 sm:$0xff]   ;;  %v841_v27 = vld [vmem:[%s1062_s0 + $0x60] ss:$8 sps:$4 sm:$0xff]   ;;  %v844_v29 = vld [vmem:[%s1062_s0 + $0x74] ss:$8 sps:$4 sm:$0xff]  }
   0xb   :  { %733 = vmatpush3.bf16.msra.mxu0 %v813_v5  ;;  %802 = vmatpush3.bf16.msra.mxu1 %v813_v5  ;;  %v846_v30 = vld [vmem:[%s1062_s0 + $0x30] ss:$8 sps:$4 sm:$0xff]   ;;  %v977_v35 = vld [vmem:[%s1063_s2] ss:$0 sm:$0xff] }
   0xc   :  { %734 = vmatprep.subr.bf16.mxu0 %v814_v6  ;;  %795 = vmatprep.subr.bf16.mxu1 %v814_v6  ;;  %v847_v31 = vld [vmem:[%s1062_s0 + $0x70] ss:$8 sps:$4 sm:$0xff]   ;;  %v982_v39 = vld [vmem:[%s1064_s3] ss:$0 sm:$0xff] }
   0xd   :  { %v991_v50 = vld [vmem:[%s1065_s4] ss:$0 sm:$0xff] }
   0xf   :  { %735 = vmatpush3.bf16.msra.mxu0 %v815_v7  ;;  %803 = vmatpush3.bf16.msra.mxu1 %v815_v7 }
  0x10   :  { %736 = vmatprep.subr.bf16.mxu0 %v816_v8  ;;  %796 = vmatprep.subr.bf16.mxu1 %v816_v8 }
  0x13   :  { %737 = vmatpush3.bf16.msra.mxu0 %v817_v9  ;;  %804 = vmatpush3.bf16.msra.mxu1 %v817_v9 }
  0x14   :  { %738 = vmatprep.subr.bf16.mxu0 %v818_v10  ;;  %797 = vmatprep.subr.bf16.mxu1 %v818_v10 }
  0x17   :  { %739 = vmatpush3.bf16.msra.mxu0 %v819_v13  ;;  %805 = vmatpush3.bf16.msra.mxu1 %v819_v13 }
  0x18   :  { %740 = vmatprep.subr.bf16.mxu0 %v820_v14  ;;  %798 = vmatprep.subr.bf16.mxu1 %v820_v14 }
  0x1b   :  { %741 = vmatpush3.bf16.msra.mxu0 %v821_v15  ;;  %806 = vmatpush3.bf16.msra.mxu1 %v821_v15 }
  0x1c   :  { %742 = vmatprep.subr.bf16.mxu0 %v822_v16  ;;  %799 = vmatprep.subr.bf16.mxu1 %v822_v16 }
  0x1f   :  { %743 = vmatpush3.bf16.msra.mxu0 %v823_v17  ;;  %807 = vmatpush3.bf16.msra.mxu1 %v823_v17 }
  0x22   :  { %314 = vmatmul.mubr.bf16.vlgmr.msra.gmra.mxu0 %v824_v18  ;;  %346 = vmatmul.mubr.bf16.vlgmr.msra.gmra.mxu1 %v827_v19 }
  0x23   :  { %321 = vmatprep.mubr.bf16.mxu0 %v830_v20  ;;  %353 = vmatprep.mubr.bf16.mxu1 %v832_v21 }
  0x2a   :  { %322 = vmatmul.mubr.bf16.gmra.mxu0 %v834_v22  ;;  %354 = vmatmul.mubr.bf16.gmra.mxu1 %v835_v23 }
  0x2b   :  { %329 = vmatprep.mubr.bf16.mxu0 %v836_v24  ;;  %361 = vmatprep.mubr.bf16.mxu1 %v838_v25 }
  0x32   :  { %330 = vmatmul.mubr.bf16.gmra.mxu0 %v840_v26  ;;  %362 = vmatmul.mubr.bf16.gmra.mxu1 %v841_v27 }
  0x33   :  { %337 = vmatprep.mubr.bf16.mxu0 %v842_v28  ;;  %369 = vmatprep.mubr.bf16.mxu1 %v844_v29 }
  0x3a   :  { %338 = vmatmul.mubr.bf16.gmra.mxu0 %v846_v30  ;;  %370 = vmatmul.mubr.bf16.gmra.mxu1 %v847_v31 }
  0xe2   :  { %v744_v32 = vpop.f32.mrf.mxu0  ;;  %v768_v33 = vpop.f32.mrf.mxu1 }
  0xe4   :  { %v745_v34 = vpop.f32.mrf.mxu0  ;;  %v769_v36 = vpop.f32.mrf.mxu1 }
  0xe5   :  { %v746_v37 = vadd.f32 %v745_v34, %v744_v32  ;;  %v770_v38 = vadd.f32 %v769_v36, %v768_v33 }
  0xe6   :  { %v747_v40 = vpop.f32.mrf.mxu0  ;;  %v771_v41 = vpop.f32.mrf.mxu1 }
  0xe7   :  { %v436_v42 = vmul.f32 %v746_v37, %v977_v35  ;;  %v444_v43 = vmul.f32 %v770_v38, %v977_v35 }
  0xe8   :  { %v748_v44 = vpop.f32.mrf.mxu0  ;;  %v772_v45 = vpop.f32.mrf.mxu1 }
  0xe9   :  { %v459_v46 = vadd.f32 %v982_v39, %v436_v42  ;;  %v467_v47 = vadd.f32 %v982_v39, %v444_v43  ;;  %v749_v48 = vadd.f32 %v748_v44, %v747_v40  ;;  %v773_v49 = vadd.f32 %v772_v45, %v771_v41 }
  0xea   :  { %v750_v51 = vpop.f32.mrf.mxu0  ;;  %v774_v52 = vpop.f32.mrf.mxu1 }
  0xeb   :  { %v437_v53 = vmul.f32 %v749_v48, %v977_v35  ;;  %v445_v54 = vmul.f32 %v773_v49, %v977_v35  ;;  %v498_v57 = vmul.f32 %v991_v50, %v459_v46  ;;  %v506_v58 = vmul.f32 %v991_v50, %v467_v47 }
  0xec   :  { %v751_v55 = vpop.f32.mrf.mxu0  ;;  %v775_v56 = vpop.f32.mrf.mxu1  ;;  %vm475_vm0 = vcmp.ge.f32.partialorder %v459_v46, 0.0  ;;  %vm483_vm1 = vcmp.ge.f32.partialorder %v467_v47, 0.0 }
  0xed   :  { %v752_v59 = vadd.f32 %v751_v55, %v750_v51  ;;  %v776_v60 = vadd.f32 %v775_v56, %v774_v52  ;;  %v460_v61 = vadd.f32 %v982_v39, %v437_v53  ;;  %v468_v62 = vadd.f32 %v982_v39, %v445_v54 }
  0xee   :  { %v753_v63 = vpop.f32.mrf.mxu0  ;;  %v777_v0 = vpop.f32.mrf.mxu1  ;;  %v514_v7 = vsel %vm475_vm0, %v459_v46, %v498_v57  ;;  %v522_v8 = vsel %vm483_vm1, %v467_v47, %v506_v58 }
  0xef   :  { %v438_v1 = vmul.f32 %v752_v59, %v977_v35  ;;  %v446_v2 = vmul.f32 %v776_v60, %v977_v35  ;;  %vm476_vm2 = vcmp.ge.f32.partialorder %v460_v61, 0.0  ;;  %v499_v3 = vmul.f32 %v991_v50, %v460_v61 }
  0xf0   :  { %vm484_vm3 = vcmp.ge.f32.partialorder %v468_v62, 0.0  ;;  %v507_v4 = vmul.f32 %v991_v50, %v468_v62  ;;  %v754_v5 = vpop.f32.mrf.mxu0  ;;  %v778_v6 = vpop.f32.mrf.mxu1 }
  0xf1   :  { %v755_v9 = vadd.f32 %v754_v5, %v753_v63  ;;  %v779_v10 = vadd.f32 %v778_v6, %v777_v0  ;;  %v515_v11 = vsel %vm476_vm2, %v460_v61, %v499_v3  ;;  %v461_v13 = vadd.f32 %v982_v39, %v438_v1 }
  0xf2   :  { %v523_v12 = vsel %vm484_vm3, %v468_v62, %v507_v4  ;;  %v469_v14 = vadd.f32 %v982_v39, %v446_v2  ;;  %v756_v15 = vpop.f32.mrf.mxu0  ;;  %v780_v16 = vpop.f32.mrf.mxu1  ;;  %v684_v17 = vpack.c.bf16 %v515_v11, %v514_v7 }
  0xf3   :  { %v704_v18 = vpack.c.bf16 %v523_v12, %v522_v8  ;;  %v439_v19 = vmul.f32 %v755_v9, %v977_v35  ;;  %v447_v20 = vmul.f32 %v779_v10, %v977_v35  ;;  %v500_v25 = vmul.f32 %v991_v50, %v461_v13 }
  0xf4   :  { %v757_v21 = vpop.f32.mrf.mxu0  ;;  %v781_v22 = vpop.f32.mrf.mxu1  ;;  %685 = vst [vmem:[%s1066_s5] sm:$0xff] %v684_v17   ;;  %v508_v26 = vmul.f32 %v991_v50, %v469_v14  ;;  %vm477_vm4 = vcmp.ge.f32.partialorder %v461_v13, 0.0  ;;  %vm485_vm5 = vcmp.ge.f32.partialorder %v469_v14, 0.0 }
  0xf5   :  { %724 = vst [vmem:[%s1066_s5 + $0x20] sm:$0xff] %v704_v18   ;;  %v758_v23 = vadd.f32 %v757_v21, %v756_v15  ;;  %v782_v24 = vadd.f32 %v781_v22, %v780_v16  ;;  %v462_v27 = vadd.f32 %v982_v39, %v439_v19  ;;  %v470_v28 = vadd.f32 %v982_v39, %v447_v20 }
  0xf6   :  { %v759_v29 = vpop.f32.mrf.mxu0  ;;  %v783_v30 = vpop.f32.mrf.mxu1  ;;  %v516_v43 = vsel %vm477_vm4, %v461_v13, %v500_v25  ;;  %v524_v44 = vsel %vm485_vm5, %v469_v14, %v508_v26 }
  0xf7   :  { %v440_v31 = vmul.f32 %v758_v23, %v977_v35  ;;  %v448_v32 = vmul.f32 %v782_v24, %v977_v35  ;;  %vm478_vm6 = vcmp.ge.f32.partialorder %v462_v27, 0.0  ;;  %v501_v33 = vmul.f32 %v991_v50, %v462_v27 }
  0xf8   :  { %vm486_vm7 = vcmp.ge.f32.partialorder %v470_v28, 0.0  ;;  %v509_v34 = vmul.f32 %v991_v50, %v470_v28  ;;  %v760_v36 = vpop.f32.mrf.mxu0  ;;  %v784_v37 = vpop.f32.mrf.mxu1 }
  0xf9   :  { %v463_v38 = vadd.f32 %v982_v39, %v440_v31  ;;  %v471_v40 = vadd.f32 %v982_v39, %v448_v32  ;;  %v761_v41 = vadd.f32 %v760_v36, %v759_v29  ;;  %v785_v42 = vadd.f32 %v784_v37, %v783_v30 }
  0xfa   :  { %v517_v45 = vsel %vm478_vm6, %v462_v27, %v501_v33  ;;  %v525_v46 = vsel %vm486_vm7, %v470_v28, %v509_v34  ;;  %v762_v47 = vpop.f32.mrf.mxu0  ;;  %v786_v48 = vpop.f32.mrf.mxu1 }
  0xfb   :  { %v689_v49 = vpack.c.bf16 %v517_v45, %v516_v43  ;;  %v709_v51 = vpack.c.bf16 %v525_v46, %v524_v44  ;;  %v441_v52 = vmul.f32 %v761_v41, %v977_v35  ;;  %v449_v53 = vmul.f32 %v785_v42, %v977_v35 }
  0xfc   :  { %v763_v54 = vpop.f32.mrf.mxu0  ;;  %v787_v55 = vpop.f32.mrf.mxu1  ;;  %v502_v56 = vmul.f32 %v991_v50, %v463_v38  ;;  %v510_v57 = vmul.f32 %v991_v50, %v471_v40  ;;  %vm479_vm8 = vcmp.ge.f32.partialorder %v463_v38, 0.0  ;;  %vm487_vm9 = vcmp.ge.f32.partialorder %v471_v40, 0.0 }
  0xfd   :  { %721 = vst [vmem:[%s1066_s5 + $0x8] sm:$0xff] %v689_v49   ;;  %725 = vst [vmem:[%s1066_s5 + $0x28] sm:$0xff] %v709_v51   ;;  %v764_v58 = vadd.f32 %v763_v54, %v762_v47  ;;  %v788_v59 = vadd.f32 %v787_v55, %v786_v48  ;;  %v464_v60 = vadd.f32 %v982_v39, %v441_v52 }
  0xfe   :  { %v472_v61 = vadd.f32 %v982_v39, %v449_v53  ;;  %v765_v62 = vpop.f32.mrf.mxu0  ;;  %v789_v63 = vpop.f32.mrf.mxu1  ;;  %v518_v6 = vsel %vm479_vm8, %v463_v38, %v502_v56  ;;  %v526_v7 = vsel %vm487_vm9, %v471_v40, %v510_v57 }
  0xff   :  { %v442_v0 = vmul.f32 %v764_v58, %v977_v35  ;;  %v450_v1 = vmul.f32 %v788_v59, %v977_v35  ;;  %vm480_vm10 = vcmp.ge.f32.partialorder %v464_v60, 0.0  ;;  %v503_v2 = vmul.f32 %v991_v50, %v464_v60 }
 0x100   :  { %vm488_vm11 = vcmp.ge.f32.partialorder %v472_v61, 0.0  ;;  %v511_v3 = vmul.f32 %v991_v50, %v472_v61  ;;  %v766_v4 = vpop.f32.mrf.mxu0  ;;  %v790_v5 = vpop.f32.mrf.mxu1 }
 0x101   :  { %v767_v8 = vadd.f32 %v766_v4, %v765_v62  ;;  %v791_v9 = vadd.f32 %v790_v5, %v789_v63  ;;  %v519_v10 = vsel %vm480_vm10, %v464_v60, %v503_v2  ;;  %v465_v12 = vadd.f32 %v982_v39, %v442_v0 }
 0x102   :  { %v527_v11 = vsel %vm488_vm11, %v472_v61, %v511_v3  ;;  %v473_v13 = vadd.f32 %v982_v39, %v450_v1  ;;  %v694_v14 = vpack.c.bf16 %v519_v10, %v518_v6 }
 0x103   :  { %v714_v15 = vpack.c.bf16 %v527_v11, %v526_v7  ;;  %v443_v16 = vmul.f32 %v767_v8, %v977_v35  ;;  %v451_v17 = vmul.f32 %v791_v9, %v977_v35  ;;  %v504_v18 = vmul.f32 %v991_v50, %v465_v12 }
 0x104   :  { %722 = vst [vmem:[%s1066_s5 + $0x10] sm:$0xff] %v694_v14   ;;  %v512_v19 = vmul.f32 %v991_v50, %v473_v13  ;;  %vm481_vm12 = vcmp.ge.f32.partialorder %v465_v12, 0.0  ;;  %vm489_vm13 = vcmp.ge.f32.partialorder %v473_v13, 0.0 }
 0x105   :  { %726 = vst [vmem:[%s1066_s5 + $0x30] sm:$0xff] %v714_v15   ;;  %v466_v20 = vadd.f32 %v982_v39, %v443_v16  ;;  %v474_v21 = vadd.f32 %v982_v39, %v451_v17  ;;  %v520_v23 = vsel %vm481_vm12, %v465_v12, %v504_v18 }
 0x106   :  { %v528_v24 = vsel %vm489_vm13, %v473_v13, %v512_v19 }
 0x107   :  { %vm482_vm14 = vcmp.ge.f32.partialorder %v466_v20, 0.0  ;;  %v505_v35 = vmul.f32 %v991_v50, %v466_v20  ;;  %vm490_vm15 = vcmp.ge.f32.partialorder %v474_v21, 0.0  ;;  %v513_v22 = vmul.f32 %v991_v50, %v474_v21 }
 0x109   :  { %v521_v25 = vsel %vm482_vm14, %v466_v20, %v505_v35  ;;  %v529_v26 = vsel %vm490_vm15, %v474_v21, %v513_v22 }
 0x10a   :  { %v699_v27 = vpack.c.bf16 %v521_v25, %v520_v23  ;;  %v719_v28 = vpack.c.bf16 %v529_v26, %v528_v24 }
 0x10c   :  { %723 = vst [vmem:[%s1066_s5 + $0x18] sm:$0xff] %v699_v27   ;;  %727 = vst [vmem:[%s1066_s5 + $0x38] sm:$0xff] %v719_v28  }

// kernel: espnet_encoder_forward.33
= control target key start
LH: loop header
LB: loop body
LE: loop exit
PB: predicated region body
PF: predicated region fallthrough
CT: control target
= control target key end

     0   :  { %s2011_s1 = inlined_call_operand.vmem [shape: bf16[640,128], index: 1, kind: input, shape index: {}]   ;;  %s2012_s0 = inlined_call_operand.vmem [shape: bf16[128,640], index: 0, kind: input, shape index: {}]   ;;  %s2013_s2 = inlined_call_operand.vmem [shape: f32[1,128], index: 2, kind: input, shape index: {}]   ;;  %s2014_s3 = inlined_call_operand.vmem [shape: f32[1,128], index: 3, kind: input, shape index: {}]   ;;  %s2015_s4 = inlined_call_operand.vmem [shape: f32[1,128], index: 4, kind: input, shape index: {}]   ;;  %s2016_s5 = inlined_call_operand.vmem [shape: bf16[128,128], index: 5, kind: output, shape index: {}]  }
   0x1   :  { %v1514_v0 = vld [vmem:[%s2011_s1 + $0x78] sm:$0xff]   ;;  %v1518_v4 = vld [vmem:[%s2011_s1 + $0x70] sm:$0xff]   ;;  %v1522_v8 = vld [vmem:[%s2011_s1 + $0x68] sm:$0xff]  }
   0x2   :  { %v1515_v1 = vld [vmem:[%s2011_s1 + $0xf8] sm:$0xff]   ;;  %1322 = vmatprep.subr.bf16.mxu0 %v1514_v0  ;;  %v1519_v5 = vld [vmem:[%s2011_s1 + $0xf0] sm:$0xff]   ;;  %v1523_v9 = vld [vmem:[%s2011_s1 + $0xe8] sm:$0xff]  }
   0x3   :  { %v1516_v2 = vld [vmem:[%s2011_s1 + $0x38] sm:$0xff]   ;;  %1386 = vmatprep.subr.bf16.mxu1 %v1515_v1  ;;  %v1520_v6 = vld [vmem:[%s2011_s1 + $0x30] sm:$0xff]   ;;  %v1524_v10 = vld [vmem:[%s2011_s1 + $0x28] sm:$0xff]  }
   0x4   :  { %v1517_v3 = vld [vmem:[%s2011_s1 + $0xb8] sm:$0xff]   ;;  %1323 = vmatpush3.bf16.msra.mxu0 %v1516_v2  ;;  %v1521_v7 = vld [vmem:[%s2011_s1 + $0xb0] sm:$0xff]   ;;  %v1525_v11 = vld [vmem:[%s2011_s1 + $0xa8] sm:$0xff]  }
   0x5   :  { %1387 = vmatpush3.bf16.msra.mxu1 %v1517_v3  ;;  %1324 = vmatprep.subr.bf16.mxu0 %v1518_v4  ;;  %v1526_v12 = vld [vmem:[%s2011_s1 + $0x60] sm:$0xff]   ;;  %v1530_v16 = vld [vmem:[%s2011_s1 + $0x58] sm:$0xff]   ;;  %v1534_v20 = vld [vmem:[%s2011_s1 + $0x50] sm:$0xff]  }
   0x6   :  { %1388 = vmatprep.subr.bf16.mxu1 %v1519_v5  ;;  %v1527_v13 = vld [vmem:[%s2011_s1 + $0xe0] sm:$0xff]   ;;  %v1531_v17 = vld [vmem:[%s2011_s1 + $0xd8] sm:$0xff]   ;;  %v1535_v21 = vld [vmem:[%s2011_s1 + $0xd0] sm:$0xff]  }
   0x7   :  { %v1528_v14 = vld [vmem:[%s2011_s1 + $0x20] sm:$0xff]   ;;  %v1532_v18 = vld [vmem:[%s2011_s1 + $0x18] sm:$0xff]   ;;  %v1536_v22 = vld [vmem:[%s2011_s1 + $0x10] sm:$0xff]  }
   0x8   :  { %1325 = vmatpush3.bf16.msra.mxu0 %v1520_v6  ;;  %v1529_v15 = vld [vmem:[%s2011_s1 + $0xa0] sm:$0xff]   ;;  %v1533_v19 = vld [vmem:[%s2011_s1 + $0x98] sm:$0xff]   ;;  %v1537_v23 = vld [vmem:[%s2011_s1 + $0x90] sm:$0xff]  }
   0x9   :  { %1389 = vmatpush3.bf16.msra.mxu1 %v1521_v7  ;;  %1326 = vmatprep.subr.bf16.mxu0 %v1522_v8  ;;  %v1538_v24 = vld [vmem:[%s2011_s1 + $0x48] sm:$0xff]   ;;  %v1542_v28 = vld [vmem:[%s2011_s1 + $0x40] sm:$0xff]   ;;  %v1552_v36 = vld [vmem:[%s2011_s1 + $0x138] sm:$0xff]  }
   0xa   :  { %1390 = vmatprep.subr.bf16.mxu1 %v1523_v9  ;;  %v1539_v25 = vld [vmem:[%s2011_s1 + $0xc8] sm:$0xff]   ;;  %v1543_v29 = vld [vmem:[%s2011_s1 + $0xc0] sm:$0xff]   ;;  %v1559_v39 = vld [vmem:[%s2011_s1 + $0x130] sm:$0xff]  }
   0xb   :  { %v1540_v26 = vld [vmem:[%s2011_s1 + $0x8] sm:$0xff]   ;;  %v1544_v30 = vld [vmem:[%s2011_s1] sm:$0xff]   ;;  %v1562_v43 = vld [vmem:[%s2012_s0 + $0x5c] ss:$20 sps:$4 sm:$0xff]  }
   0xc   :  { %1327 = vmatpush3.bf16.msra.mxu0 %v1524_v10  ;;  %v1541_v27 = vld [vmem:[%s2011_s1 + $0x88] sm:$0xff]   ;;  %v1545_v31 = vld [vmem:[%s2011_s1 + $0x80] sm:$0xff]   ;;  %v1567_v48 = vld [vmem:[%s2012_s0 + $0x7c] ss:$20 sps:$4 sm:$0xff]  }
   0xd   :  { %1391 = vmatpush3.bf16.msra.mxu1 %v1525_v11  ;;  %1328 = vmatprep.subr.bf16.mxu0 %v1526_v12  ;;  %v1546_v32 = vld [vmem:[%s2012_s0] ss:$20 sps:$4 sm:$0xff]   ;;  %v1548_v33 = vld [vmem:[%s2012_s0 + $0x4] ss:$20 sps:$4 sm:$0xff]   ;;  %v1549_v34 = vld [vmem:[%s2012_s0 + $0x8] ss:$20 sps:$4 sm:$0xff]  }
   0xe   :  { %1392 = vmatprep.subr.bf16.mxu1 %v1527_v13  ;;  %v1551_v35 = vld [vmem:[%s2012_s0 + $0xc] ss:$20 sps:$4 sm:$0xff]   ;;  %665 = vmatprep.mubr.bf16.mxu0 %v1548_v33  ;;  %v1555_v38 = vld [vmem:[%s2012_s0 + $0x34] ss:$20 sps:$4 sm:$0xff]   ;;  %v1558_v41 = vld [vmem:[%s2012_s0 + $0x30] ss:$20 sps:$4 sm:$0xff]  }
   0xf   :  { %762 = vmatprep.mubr.bf16.mxu1 %v1551_v35  ;;  %v1553_v37 = vld [vmem:[%s2012_s0 + $0x2c] ss:$20 sps:$4 sm:$0xff]   ;;  %v1557_v40 = vld [vmem:[%s2012_s0 + $0x28] ss:$20 sps:$4 sm:$0xff]   ;;  %v1564_v46 = vld [vmem:[%s2012_s0 + $0x50] ss:$20 sps:$4 sm:$0xff]  }
  0x10   :  { %1329 = vmatpush3.bf16.msra.mxu0 %v1528_v14  ;;  %v1560_v42 = vld [vmem:[%s2012_s0 + $0x54] ss:$20 sps:$4 sm:$0xff]   ;;  %v1573_v45 = vld [vmem:[%s2011_s1 + $0x120] sm:$0xff]   ;;  %v1565_v47 = vld [vmem:[%s2012_s0 + $0x58] ss:$20 sps:$4 sm:$0xff]  }
  0x11   :  { %1393 = vmatpush3.bf16.msra.mxu1 %v1529_v15  ;;  %1330 = vmatprep.subr.bf16.mxu0 %v1530_v16  ;;  %v1566_v44 = vld [vmem:[%s2011_s1 + $0x128] sm:$0xff]   ;;  %v1569_v49 = vld [vmem:[%s2012_s0 + $0x84] ss:$20 sps:$4 sm:$0xff]   ;;  %v1587_v51 = vld [vmem:[%s2011_s1 + $0x110] sm:$0xff]  }
  0x12   :  { %1394 = vmatprep.subr.bf16.mxu1 %v1531_v17  ;;  %v1580_v50 = vld [vmem:[%s2011_s1 + $0x118] sm:$0xff]   ;;  %v1572_v53 = vld [vmem:[%s2012_s0 + $0x80] ss:$20 sps:$4 sm:$0xff]   ;;  %v1594_v55 = vld [vmem:[%s2011_s1 + $0x108] sm:$0xff]  }
  0x13   :  { %v1571_v52 = vld [vmem:[%s2012_s0 + $0x78] ss:$20 sps:$4 sm:$0xff]   ;;  %v1601_v57 = vld [vmem:[%s2011_s1 + $0x100] sm:$0xff]   ;;  %v1579_v59 = vld [vmem:[%s2012_s0 + $0xa8] ss:$20 sps:$4 sm:$0xff]  }
  0x14   :  { %1331 = vmatpush3.bf16.msra.mxu0 %v1532_v18  ;;  %v1574_v54 = vld [vmem:[%s2012_s0 + $0xa4] ss:$20 sps:$4 sm:$0xff]   ;;  %v1576_v56 = vld [vmem:[%s2012_s0 + $0xac] ss:$20 sps:$4 sm:$0xff]   ;;  %v1583_v61 = vld [vmem:[%s2012_s0 + $0xd4] ss:$20 sps:$4 sm:$0xff]  }
  0x15   :  { %1395 = vmatpush3.bf16.msra.mxu1 %v1533_v19  ;;  %1332 = vmatprep.subr.bf16.mxu0 %v1534_v20  ;;  %v1578_v58 = vld [vmem:[%s2012_s0 + $0xa0] ss:$20 sps:$4 sm:$0xff]   ;;  %v1585_v62 = vld [vmem:[%s2012_s0 + $0xc8] ss:$20 sps:$4 sm:$0xff]   ;;  %v1586_v63 = vld [vmem:[%s2012_s0 + $0xd0] ss:$20 sps:$4 sm:$0xff]  }
  0x16   :  { %1396 = vmatprep.subr.bf16.mxu1 %v1535_v21  ;;  %v1581_v60 = vld [vmem:[%s2012_s0 + $0xcc] ss:$20 sps:$4 sm:$0xff]   ;;  %v1588_v0 = vld [vmem:[%s2012_s0 + $0xf4] ss:$20 sps:$4 sm:$0xff]   ;;  %v1590_v1 = vld [vmem:[%s2012_s0 + $0xfc] ss:$20 sps:$4 sm:$0xff]  }
  0x17   :  { %v1592_v2 = vld [vmem:[%s2012_s0 + $0xf0] ss:$20 sps:$4 sm:$0xff]   ;;  %v1593_v3 = vld [vmem:[%s2012_s0 + $0xf8] ss:$20 sps:$4 sm:$0xff]   ;;  %v1600_v7 = vld [vmem:[%s2012_s0 + $0x120] ss:$20 sps:$4 sm:$0xff]  }
  0x18   :  { %1333 = vmatpush3.bf16.msra.mxu0 %v1536_v22  ;;  %v1595_v4 = vld [vmem:[%s2012_s0 + $0x11c] ss:$20 sps:$4 sm:$0xff]   ;;  %v1597_v5 = vld [vmem:[%s2012_s0 + $0x124] ss:$20 sps:$4 sm:$0xff]   ;;  %v1606_v12 = vld [vmem:[%s2012_s0 + $0x60] ss:$20 sps:$4 sm:$0xff]  }
  0x19   :  { %1397 = vmatpush3.bf16.msra.mxu1 %v1537_v23  ;;  %1334 = vmatprep.subr.bf16.mxu0 %v1538_v24  ;;  %v1599_v6 = vld [vmem:[%s2012_s0 + $0x118] ss:$20 sps:$4 sm:$0xff]   ;;  %v1602_v8 = vld [vmem:[%s2012_s0 + $0x10] ss:$20 sps:$4 sm:$0xff]   ;;  %v1607_v13 = vld [vmem:[%s2012_s0 + $0x100] ss:$20 sps:$4 sm:$0xff]  }
  0x1a   :  { %1398 = vmatprep.subr.bf16.mxu1 %v1539_v25  ;;  %v1603_v9 = vld [vmem:[%s2012_s0 + $0xb0] ss:$20 sps:$4 sm:$0xff]   ;;  %v1604_v10 = vld [vmem:[%s2012_s0 + $0x38] ss:$20 sps:$4 sm:$0xff]   ;;  %v1608_v14 = vld [vmem:[%s2012_s0 + $0x88] ss:$20 sps:$4 sm:$0xff]  }
  0x1b   :  { %v1605_v11 = vld [vmem:[%s2012_s0 + $0xd8] ss:$20 sps:$4 sm:$0xff]   ;;  %v1609_v15 = vld [vmem:[%s2012_s0 + $0x128] ss:$20 sps:$4 sm:$0xff]  }
  0x1c   :  { %1335 = vmatpush3.bf16.msra.mxu0 %v1540_v26 }
  0x1d   :  { %1399 = vmatpush3.bf16.msra.mxu1 %v1541_v27  ;;  %1336 = vmatprep.subr.bf16.mxu0 %v1542_v28 }
  0x1e   :  { %1400 = vmatprep.subr.bf16.mxu1 %v1543_v29 }
  0x20   :  { %1337 = vmatpush3.bf16.msra.mxu0 %v1544_v30 }
  0x21   :  { %1401 = vmatpush3.bf16.msra.mxu1 %v1545_v31  ;;  %1466 = vmatprep.subr.bf16.mxu0 %v1552_v36 }
  0x22   :  { %1498 = vmatprep.subr.bf16.mxu1 %v1552_v36 }
  0x23   :  { %666 = vmatmul.mubr.bf16.vlgmr.msra.gmra.mxu0 %v1546_v32 }
  0x24   :  { %763 = vmatmul.mubr.bf16.vlgmr.msra.gmra.mxu1 %v1549_v34  ;;  %1467 = vmatpush3.bf16.msra.mxu0 %v1552_v36 }
  0x25   :  { %1506 = vmatpush3.bf16.msra.mxu1 %v1552_v36  ;;  %673 = vmatprep.mubr.bf16.mxu0 %v1553_v37 }
  0x26   :  { %770 = vmatprep.mubr.bf16.mxu1 %v1555_v38  ;;  %1468 = vmatprep.subr.bf16.mxu0 %v1559_v39 }
  0x27   :  { %1499 = vmatprep.subr.bf16.mxu1 %v1559_v39 }
  0x28   :  { %1469 = vmatpush3.bf16.msra.mxu0 %v1559_v39 }
  0x29   :  { %1507 = vmatpush3.bf16.msra.mxu1 %v1559_v39  ;;  %1470 = vmatprep.subr.bf16.mxu0 %v1566_v44 }
  0x2a   :  { %1500 = vmatprep.subr.bf16.mxu1 %v1566_v44 }
  0x2b   :  { %674 = vmatmul.mubr.bf16.gmra.mxu0 %v1557_v40 }
  0x2c   :  { %771 = vmatmul.mubr.bf16.gmra.mxu1 %v1558_v41  ;;  %681 = vmatprep.mubr.bf16.mxu0 %v1560_v42 }
  0x2d   :  { %778 = vmatprep.mubr.bf16.mxu1 %v1562_v43  ;;  %1471 = vmatpush3.bf16.msra.mxu0 %v1566_v44 }
  0x2e   :  { %1508 = vmatpush3.bf16.msra.mxu1 %v1566_v44  ;;  %1472 = vmatprep.subr.bf16.mxu0 %v1573_v45 }
  0x2f   :  { %1501 = vmatprep.subr.bf16.mxu1 %v1573_v45 }
  0x31   :  { %1473 = vmatpush3.bf16.msra.mxu0 %v1573_v45 }
  0x32   :  { %1509 = vmatpush3.bf16.msra.mxu1 %v1573_v45  ;;  %1474 = vmatprep.subr.bf16.mxu0 %v1580_v50 }
  0x33   :  { %682 = vmatmul.mubr.bf16.gmra.mxu0 %v1564_v46  ;;  %1502 = vmatprep.subr.bf16.mxu1 %v1580_v50 }
  0x34   :  { %779 = vmatmul.mubr.bf16.gmra.mxu1 %v1565_v47  ;;  %689 = vmatprep.mubr.bf16.mxu0 %v1567_v48 }
  0x35   :  { %786 = vmatprep.mubr.bf16.mxu1 %v1569_v49  ;;  %1475 = vmatpush3.bf16.msra.mxu0 %v1580_v50 }
  0x36   :  { %1510 = vmatpush3.bf16.msra.mxu1 %v1580_v50  ;;  %1476 = vmatprep.subr.bf16.mxu0 %v1587_v51 }
  0x37   :  { %1503 = vmatprep.subr.bf16.mxu1 %v1587_v51 }
  0x39   :  { %1477 = vmatpush3.bf16.msra.mxu0 %v1587_v51 }
  0x3a   :  { %1511 = vmatpush3.bf16.msra.mxu1 %v1587_v51  ;;  %1478 = vmatprep.subr.bf16.mxu0 %v1594_v55 }
  0x3b   :  { %690 = vmatmul.mubr.bf16.gmra.mxu0 %v1571_v52  ;;  %1504 = vmatprep.subr.bf16.mxu1 %v1594_v55 }
  0x3c   :  { %787 = vmatmul.mubr.bf16.gmra.mxu1 %v1572_v53  ;;  %697 = vmatprep.mubr.bf16.mxu0 %v1574_v54 }
  0x3d   :  { %794 = vmatprep.mubr.bf16.mxu1 %v1576_v56  ;;  %1479 = vmatpush3.bf16.msra.mxu0 %v1594_v55 }
  0x3e   :  { %1512 = vmatpush3.bf16.msra.mxu1 %v1594_v55  ;;  %1480 = vmatprep.subr.bf16.mxu0 %v1601_v57 }
  0x3f   :  { %1505 = vmatprep.subr.bf16.mxu1 %v1601_v57 }
  0x41   :  { %1481 = vmatpush3.bf16.msra.mxu0 %v1601_v57 }
  0x42   :  { %1513 = vmatpush3.bf16.msra.mxu1 %v1601_v57 }
  0x43   :  { %698 = vmatmul.mubr.bf16.gmra.mxu0 %v1578_v58 }
  0x44   :  { %795 = vmatmul.mubr.bf16.gmra.mxu1 %v1579_v59  ;;  %705 = vmatprep.mubr.bf16.mxu0 %v1581_v60 }
  0x45   :  { %802 = vmatprep.mubr.bf16.mxu1 %v1583_v61 }
  0x4b   :  { %706 = vmatmul.mubr.bf16.gmra.mxu0 %v1585_v62 }
  0x4c   :  { %803 = vmatmul.mubr.bf16.gmra.mxu1 %v1586_v63  ;;  %713 = vmatprep.mubr.bf16.mxu0 %v1588_v0 }
  0x4d   :  { %810 = vmatprep.mubr.bf16.mxu1 %v1590_v1 }
  0x53   :  { %714 = vmatmul.mubr.bf16.gmra.mxu0 %v1592_v2 }
  0x54   :  { %811 = vmatmul.mubr.bf16.gmra.mxu1 %v1593_v3  ;;  %721 = vmatprep.mubr.bf16.mxu0 %v1595_v4 }
  0x55   :  { %818 = vmatprep.mubr.bf16.mxu1 %v1597_v5 }
  0x5b   :  { %722 = vmatmul.mubr.bf16.gmra.mxu0 %v1599_v6 }
  0x5c   :  { %819 = vmatmul.mubr.bf16.gmra.mxu1 %v1600_v7  ;;  %1482 = vmatprep.mubr.bf16.mxu0 %v1602_v8 }
  0x5d   :  { %1490 = vmatprep.mubr.bf16.mxu1 %v1603_v9 }
  0x63   :  { %1483 = vmatmul.mubr.bf16.vlgmr.msra.gmra.mxu0 %v1604_v10 }
  0x64   :  { %1491 = vmatmul.mubr.bf16.vlgmr.msra.gmra.mxu1 %v1605_v11  ;;  %1486 = vmatprep.mubr.bf16.mxu0 %v1606_v12 }
  0x65   :  { %1494 = vmatprep.mubr.bf16.mxu1 %v1607_v13 }
  0x6b   :  { %1487 = vmatmul.mubr.bf16.gmra.mxu0 %v1608_v14 }
  0x6c   :  { %1495 = vmatmul.mubr.bf16.gmra.mxu1 %v1609_v15 }
  0xe3   :  { %v1338_v16 = vpop.f32.mrf.mxu0 }
  0xe4   :  { %v1402_v17 = vpop.f32.mrf.mxu1 }
  0xe5   :  { %v1339_v18 = vpop.f32.mrf.mxu0 }
  0xe6   :  { %v1340_v19 = vadd.f32 %v1339_v18, %v1338_v16  ;;  %v1403_v20 = vpop.f32.mrf.mxu1 }
  0xe7   :  { %v1404_v21 = vadd.f32 %v1403_v20, %v1402_v17  ;;  %v1341_v22 = vpop.f32.mrf.mxu0 }
  0xe8   :  { %v1405_v23 = vpop.f32.mrf.mxu1 }
  0xe9   :  { %v1342_v24 = vpop.f32.mrf.mxu0  ;;  %v1880_v25 = vadd.f32 %v1404_v21, %v1340_v19 }
  0xea   :  { %v1343_v26 = vadd.f32 %v1342_v24, %v1341_v22  ;;  %v1406_v27 = vpop.f32.mrf.mxu1 }
  0xeb   :  { %v1407_v28 = vadd.f32 %v1406_v27, %v1405_v23  ;;  %v1344_v29 = vpop.f32.mrf.mxu0 }
  0xec   :  { %v1408_v30 = vpop.f32.mrf.mxu1 }
  0xed   :  { %v1345_v31 = vpop.f32.mrf.mxu0  ;;  %v1882_v32 = vadd.f32 %v1407_v28, %v1343_v26 }
  0xee   :  { %v1409_v33 = vpop.f32.mrf.mxu1  ;;  %v1346_v19 = vadd.f32 %v1345_v31, %v1344_v29 }
  0xef   :  { %2017 = vst [vmem:[#allocation3_spill] sm:$0xff] %v1882_v32  ;;  %v1347_v34 = vpop.f32.mrf.mxu0  ;;  %v1410_v20 = vadd.f32 %v1409_v33, %v1408_v30 }
  0xf0   :  { %v1411_v35 = vpop.f32.mrf.mxu1 }
  0xf1   :  { %v1348_v36 = vpop.f32.mrf.mxu0 }
  0xf2   :  { %v1412_v37 = vpop.f32.mrf.mxu1  ;;  %v1349_v23 = vadd.f32 %v1348_v36, %v1347_v34 }
  0xf3   :  { %v1350_v38 = vpop.f32.mrf.mxu0  ;;  %v1413_v24 = vadd.f32 %v1412_v37, %v1411_v35 }
  0xf4   :  { %v1414_v39 = vpop.f32.mrf.mxu1 }
  0xf5   :  { %v1351_v40 = vpop.f32.mrf.mxu0 }
  0xf6   :  { %v1352_v41 = vadd.f32 %v1351_v40, %v1350_v38  ;;  %v1415_v42 = vpop.f32.mrf.mxu1 }
  0xf7   :  { %v1416_v43 = vadd.f32 %v1415_v42, %v1414_v39  ;;  %v1353_v44 = vpop.f32.mrf.mxu0 }
  0xf8   :  { %v1417_v45 = vpop.f32.mrf.mxu1 }
  0xf9   :  { %v1354_v46 = vpop.f32.mrf.mxu0  ;;  %v1884_v47 = vadd.f32 %v1416_v43, %v1352_v41 }
  0xfa   :  { %v1418_v48 = vpop.f32.mrf.mxu1  ;;  %v1355_v38 = vadd.f32 %v1354_v46, %v1353_v44  ;;  %v1901_v44 = vld [vmem:[%s2013_s2] ss:$0 sm:$0xff] }
  0xfb   :  { %2018 = vst [vmem:[#allocation4_spill] sm:$0xff] %v1884_v47  ;;  %v1356_v49 = vpop.f32.mrf.mxu0  ;;  %v1419_v39 = vadd.f32 %v1418_v48, %v1417_v45 }
  0xfc   :  { %v1420_v50 = vpop.f32.mrf.mxu1 }
  0xfd   :  { %v1357_v51 = vpop.f32.mrf.mxu0 }
  0xfe   :  { %v1421_v52 = vpop.f32.mrf.mxu1  ;;  %v1358_v40 = vadd.f32 %v1357_v51, %v1356_v49  ;;  %v776_v49 = vadd.f32 %v1413_v24, %v1349_v23  ;;  %v1903_v51 = vadd.f32 %v1419_v39, %v1355_v38 }
  0xff   :  { %v1359_v53 = vpop.f32.mrf.mxu0  ;;  %v1422_v41 = vadd.f32 %v1421_v52, %v1420_v50 }
 0x100   :  { %v1423_v54 = vpop.f32.mrf.mxu1 }
 0x101   :  { %v1360_v55 = vpop.f32.mrf.mxu0  ;;  %v789_v50 = vadd.f32 %v1422_v41, %v1358_v40 }
 0x102   :  { %v1424_v56 = vpop.f32.mrf.mxu1  ;;  %v1361_v29 = vadd.f32 %v1360_v55, %v1359_v53 }
 0x103   :  { %v1362_v57 = vpop.f32.mrf.mxu0  ;;  %v1425_v30 = vadd.f32 %v1424_v56, %v1423_v54  ;;  %v1908_v54 = vld [vmem:[%s2014_s3] ss:$0 sm:$0xff] }
 0x104   :  { %v1426_v58 = vpop.f32.mrf.mxu1 }
 0x105   :  { %v1363_v59 = vpop.f32.mrf.mxu0 }
 0x106   :  { %v1427_v60 = vpop.f32.mrf.mxu1  ;;  %v1364_v43 = vadd.f32 %v1363_v59, %v1362_v57 }
 0x107   :  { %v1365_v61 = vpop.f32.mrf.mxu0  ;;  %v1428_v47 = vadd.f32 %v1427_v60, %v1426_v58 }
 0x108   :  { %v1429_v62 = vpop.f32.mrf.mxu1 }
 0x109   :  { %v1366_v63 = vpop.f32.mrf.mxu0  ;;  %v797_v57 = vadd.f32 %v1428_v47, %v1364_v43 }
 0x10a   :  { %v1430_v0 = vpop.f32.mrf.mxu1  ;;  %v1367_v31 = vadd.f32 %v1366_v63, %v1365_v61 }
 0x10b   :  { %v1368_v1 = vpop.f32.mrf.mxu0  ;;  %v1431_v33 = vadd.f32 %v1430_v0, %v1429_v62  ;;  %v1912_v62 = vadd.f32 %v1425_v30, %v1361_v29  ;;  %v1917_v0 = vld [vmem:[%s2015_s4] ss:$0 sm:$0xff] }
 0x10c   :  { %v1432_v2 = vpop.f32.mrf.mxu1  ;;  %v2021_v29 = vld [vmem:[#allocation3_spill] sm:$0xff] }
 0x10d   :  { %v1369_v3 = vpop.f32.mrf.mxu0  ;;  %v800_v61 = vadd.f32 %v1431_v33, %v1367_v31 }
 0x10e   :  { %v1433_v4 = vpop.f32.mrf.mxu1  ;;  %v1370_v26 = vadd.f32 %v1369_v3, %v1368_v1 }
 0x10f   :  { %v1371_v5 = vpop.f32.mrf.mxu0  ;;  %v1434_v27 = vadd.f32 %v1433_v4, %v1432_v2 }
 0x110   :  { %v1435_v6 = vpop.f32.mrf.mxu1 }
 0x111   :  { %v1372_v7 = vpop.f32.mrf.mxu0  ;;  %v805_v45 = vadd.f32 %v1434_v27, %v1370_v26 }
 0x112   :  { %v1436_v8 = vpop.f32.mrf.mxu1  ;;  %v1373_v35 = vadd.f32 %v1372_v7, %v1371_v5 }
 0x113   :  { %v1374_v9 = vpop.f32.mrf.mxu0  ;;  %v1437_v36 = vadd.f32 %v1436_v8, %v1435_v6 }
 0x114   :  { %v1438_v10 = vpop.f32.mrf.mxu1 }
 0x115   :  { %v1375_v11 = vpop.f32.mrf.mxu0  ;;  %v808_v4 = vadd.f32 %v1437_v36, %v1373_v35 }
 0x116   :  { %v1439_v12 = vpop.f32.mrf.mxu1  ;;  %v1376_v52 = vadd.f32 %v1375_v11, %v1374_v9 }
 0x117   :  { %v1886_v13 = vpop.f32.mrf.mxu0  ;;  %v1440_v53 = vadd.f32 %v1439_v12, %v1438_v10 }
 0x118   :  { %v1888_v14 = vpop.f32.mrf.mxu1 }
 0x119   :  { %v1890_v15 = vpop.f32.mrf.mxu0  ;;  %v813_v12 = vadd.f32 %v1440_v53, %v1376_v52 }
 0x11a   :  { %v1892_v16 = vpop.f32.mrf.mxu1 }
 0x11b   :  { %2019 = vst [vmem:[#allocation5_spill] sm:$0xff] %v1892_v16  ;;  %v1380_v17 = vpop.f32.mrf.mxu0  ;;  %v773_v16 = vadd.f32 %v1410_v20, %v1346_v19  ;;  %v1929_v20 = vadd.f32 %v1890_v15, %v1886_v13 }
 0x11c   :  { %v1444_v18 = vpop.f32.mrf.mxu1 }
 0x11d   :  { %v1381_v21 = vpop.f32.mrf.mxu0 }
 0x11e   :  { %v1445_v22 = vpop.f32.mrf.mxu1  ;;  %v1382_v63 = vadd.f32 %v1381_v21, %v1380_v17 }
 0x11f   :  { %v1894_v28 = vpop.f32.mrf.mxu0  ;;  %v1446_v47 = vadd.f32 %v1445_v22, %v1444_v18 }
 0x120   :  { %v1896_v42 = vpop.f32.mrf.mxu1 }
 0x121   :  { %v1384_v32 = vpop.f32.mrf.mxu0  ;;  %v821_v39 = vadd.f32 %v1446_v47, %v1382_v63 }
 0x122   :  { %v1448_v34 = vpop.f32.mrf.mxu1  ;;  %v2020_v21 = vld [vmem:[#allocation5_spill] sm:$0xff]  ;;  %v1385_v27 = vadd.f32 %v1384_v32, %v1894_v28 }
 0x123   :  { %v1484_v37 = vpop.f32.mrf.mxu0  ;;  %v1933_v22 = vadd.f32 %v2020_v21, %v1888_v14  ;;  %v1449_v41 = vadd.f32 %v1448_v34, %v1896_v42 }
 0x124   :  { %v870_v46 = vadd.f32 %v1484_v37, %v773_v16  ;;  %v1492_v48 = vpop.f32.mrf.mxu1 }
 0x125   :  { %v902_v55 = vadd.f32 %v1492_v48, %v805_v45  ;;  %v861_v56 = vpop.f32.mrf.mxu0  ;;  %v824_v47 = vadd.f32 %v1449_v41, %v1385_v27 }
 0x126   :  { %v984_v58 = vmul.f32 %v1901_v44, %v870_v46  ;;  %v862_v59 = vadd.f32 %v861_v56, %v1880_v25  ;;  %v893_v60 = vpop.f32.mrf.mxu1 }
 0x127   :  { %v992_v1 = vmul.f32 %v1901_v44, %v902_v55  ;;  %v894_v2 = vadd.f32 %v893_v60, %v797_v57  ;;  %v1485_v3 = vpop.f32.mrf.mxu0 }
 0x128   :  { %v1007_v5 = vadd.f32 %v1908_v54, %v984_v58  ;;  %v982_v25 = vmul.f32 %v1901_v44, %v862_v59  ;;  %v873_v6 = vadd.f32 %v1485_v3, %v776_v49  ;;  %v1493_v7 = vpop.f32.mrf.mxu1  ;;  %v2022_v49 = vld [vmem:[#allocation4_spill] sm:$0xff] }
 0x129   :  { %v1015_v8 = vadd.f32 %v1908_v54, %v992_v1  ;;  %v990_v9 = vmul.f32 %v1901_v44, %v894_v2  ;;  %v905_v10 = vadd.f32 %v1493_v7, %v808_v4  ;;  %v864_v11 = vpop.f32.mrf.mxu0 }
 0x12a   :  { %vm1023_vm0 = vcmp.ge.f32.partialorder %v1007_v5, 0.0  ;;  %v1046_v16 = vmul.f32 %v1917_v0, %v1007_v5  ;;  %v1005_v17 = vadd.f32 %v1908_v54, %v982_v25  ;;  %v985_v18 = vmul.f32 %v1901_v44, %v873_v6  ;;  %v896_v19 = vpop.f32.mrf.mxu1 }
 0x12b   :  { %v1054_v23 = vmul.f32 %v1917_v0, %v1015_v8  ;;  %v993_v24 = vmul.f32 %v1901_v44, %v905_v10  ;;  %v1488_v26 = vpop.f32.mrf.mxu0  ;;  %vm1031_vm1 = vcmp.ge.f32.partialorder %v1015_v8, 0.0  ;;  %v1013_v15 = vadd.f32 %v1908_v54, %v990_v9 }
 0x12c   :  { %v1008_v38 = vadd.f32 %v1908_v54, %v985_v18  ;;  %v1496_v40 = vpop.f32.mrf.mxu1  ;;  %v1062_v13 = vsel %vm1023_vm0, %v1007_v5, %v1046_v16  ;;  %vm1021_vm2 = vcmp.ge.f32.partialorder %v1005_v17, 0.0  ;;  %v865_v30 = vadd.f32 %v864_v11, %v2021_v29 }
 0x12d   :  { %v1016_v14 = vadd.f32 %v1908_v54, %v993_v24  ;;  %v877_v32 = vpop.f32.mrf.mxu0  ;;  %v1070_v28 = vsel %vm1031_vm1, %v1015_v8, %v1054_v23  ;;  %v897_v33 = vadd.f32 %v896_v19, %v800_v61  ;;  %v886_v36 = vadd.f32 %v1488_v26, %v789_v50 }
 0x12e   :  { %vm1024_vm3 = vcmp.ge.f32.partialorder %v1008_v38, 0.0  ;;  %v1047_v43 = vmul.f32 %v1917_v0, %v1008_v38  ;;  %v909_v35 = vpop.f32.mrf.mxu1  ;;  %v983_v34 = vmul.f32 %v1901_v44, %v865_v30  ;;  %v918_v37 = vadd.f32 %v1496_v40, %v821_v39 }
 0x12f   :  { %vm1032_vm4 = vcmp.ge.f32.partialorder %v1016_v14, 0.0  ;;  %v1055_v31 = vmul.f32 %v1917_v0, %v1016_v14  ;;  %v991_v48 = vmul.f32 %v1901_v44, %v897_v33  ;;  %v878_v52 = vadd.f32 %v877_v32, %v2022_v49  ;;  %v1489_v58 = vpop.f32.mrf.mxu0 }
 0x130   :  { %v1063_v42 = vsel %vm1024_vm3, %v1008_v38, %v1047_v43  ;;  %v1044_v53 = vmul.f32 %v1917_v0, %v1005_v17  ;;  %v1006_v56 = vadd.f32 %v1908_v54, %v983_v34  ;;  %v988_v57 = vmul.f32 %v1901_v44, %v886_v36  ;;  %v1497_v63 = vpop.f32.mrf.mxu1 }
 0x131   :  { %v1283_v45 = vpack.c.bf16 %v1063_v42, %v1062_v13  ;;  %v1071_v46 = vsel %vm1032_vm4, %v1016_v14, %v1055_v31  ;;  %v1052_v59 = vmul.f32 %v1917_v0, %v1013_v15  ;;  %v1014_v50 = vadd.f32 %v1908_v54, %v991_v48  ;;  %v880_v8 = vpop.f32.mrf.mxu0 }
 0x132   :  { %v1303_v55 = vpack.c.bf16 %v1071_v46, %v1070_v28  ;;  %v996_v60 = vmul.f32 %v1901_v44, %v918_v37  ;;  %v910_v61 = vadd.f32 %v909_v35, %v813_v12  ;;  %vm1029_vm5 = vcmp.ge.f32.partialorder %v1013_v15, 0.0  ;;  %v912_v16 = vpop.f32.mrf.mxu1 }
 0x133   :  { %1315 = vst [vmem:[%s2016_s5 + $0x8] sm:$0xff] %v1283_v45   ;;  %vm1022_vm6 = vcmp.ge.f32.partialorder %v1006_v56, 0.0  ;;  %v1045_v1 = vmul.f32 %v1917_v0, %v1006_v56  ;;  %v986_v2 = vmul.f32 %v1901_v44, %v878_v52  ;;  %vm1030_vm7 = vcmp.ge.f32.partialorder %v1014_v50, 0.0 }
 0x134   :  { %1319 = vst [vmem:[%s2016_s5 + $0x28] sm:$0xff] %v1303_v55   ;;  %v1053_v3 = vmul.f32 %v1917_v0, %v1014_v50  ;;  %v889_v4 = vadd.f32 %v1489_v58, %v1912_v62  ;;  %v1060_v5 = vsel %vm1021_vm2, %v1005_v17, %v1044_v53  ;;  %v1011_v6 = vadd.f32 %v1908_v54, %v988_v57 }
 0x135   :  { %v1061_v25 = vsel %vm1022_vm6, %v1006_v56, %v1045_v1  ;;  %v994_v7 = vmul.f32 %v1901_v44, %v910_v61  ;;  %v1068_v9 = vsel %vm1029_vm5, %v1013_v15, %v1052_v59  ;;  %v1019_v12 = vadd.f32 %v1908_v54, %v996_v60 }
 0x136   :  { %v1278_v10 = vpack.c.bf16 %v1061_v25, %v1060_v5  ;;  %v1069_v11 = vsel %vm1030_vm7, %v1014_v50, %v1053_v3  ;;  %v1009_v19 = vadd.f32 %v1908_v54, %v986_v2  ;;  %v816_v62 = vadd.f32 %v1933_v22, %v1929_v20 }
 0x137   :  { %v1298_v18 = vpack.c.bf16 %v1069_v11, %v1068_v9  ;;  %v989_v17 = vmul.f32 %v1901_v44, %v889_v4  ;;  %v921_v21 = vadd.f32 %v1497_v63, %v824_v47  ;;  %v881_v23 = vadd.f32 %v880_v8, %v1903_v51 }
 0x138   :  { %1279 = vst [vmem:[%s2016_s5] sm:$0xff] %v1278_v10   ;;  %vm1027_vm8 = vcmp.ge.f32.partialorder %v1011_v6, 0.0  ;;  %v1050_v24 = vmul.f32 %v1917_v0, %v1011_v6  ;;  %v1017_v26 = vadd.f32 %v1908_v54, %v994_v7  ;;  %v913_v27 = vadd.f32 %v912_v16, %v816_v62 }
 0x139   :  { %1318 = vst [vmem:[%s2016_s5 + $0x20] sm:$0xff] %v1298_v18   ;;  %vm1035_vm9 = vcmp.ge.f32.partialorder %v1019_v12, 0.0  ;;  %v1012_v20 = vadd.f32 %v1908_v54, %v989_v17  ;;  %v997_v22 = vmul.f32 %v1901_v44, %v921_v21  ;;  %v987_v38 = vmul.f32 %v1901_v44, %v881_v23 }
 0x13a   :  { %v1058_v39 = vmul.f32 %v1917_v0, %v1019_v12  ;;  %vm1025_vm10 = vcmp.ge.f32.partialorder %v1009_v19, 0.0  ;;  %v1048_v51 = vmul.f32 %v1917_v0, %v1009_v19  ;;  %v995_v40 = vmul.f32 %v1901_v44, %v913_v27 }
 0x13b   :  { %vm1028_vm11 = vcmp.ge.f32.partialorder %v1012_v20, 0.0  ;;  %v1051_v41 = vmul.f32 %v1917_v0, %v1012_v20  ;;  %v1020_v13 = vadd.f32 %v1908_v54, %v997_v22  ;;  %v1010_v15 = vadd.f32 %v1908_v54, %v987_v38 }
 0x13c   :  { %v1066_v14 = vsel %vm1027_vm8, %v1011_v6, %v1050_v24  ;;  %vm1033_vm12 = vcmp.ge.f32.partialorder %v1017_v26, 0.0  ;;  %v1056_v43 = vmul.f32 %v1917_v0, %v1017_v26  ;;  %v1018_v29 = vadd.f32 %v1908_v54, %v995_v40 }
 0x13d   :  { %v1067_v30 = vsel %vm1028_vm11, %v1012_v20, %v1051_v41  ;;  %vm1036_vm13 = vcmp.ge.f32.partialorder %v1020_v13, 0.0  ;;  %v1059_v32 = vmul.f32 %v1917_v0, %v1020_v13  ;;  %vm1026_vm14 = vcmp.ge.f32.partialorder %v1010_v15, 0.0 }
 0x13e   :  { %v1293_v44 = vpack.c.bf16 %v1067_v30, %v1066_v14  ;;  %v1049_v28 = vmul.f32 %v1917_v0, %v1010_v15  ;;  %vm1034_vm15 = vcmp.ge.f32.partialorder %v1018_v29, 0.0  ;;  %v1057_v31 = vmul.f32 %v1917_v0, %v1018_v29 }
 0x13f   :  { %v1074_v33 = vsel %vm1035_vm9, %v1019_v12, %v1058_v39  ;;  %v1064_v35 = vsel %vm1025_vm10, %v1009_v19, %v1048_v51  ;;  %v1075_v42 = vsel %vm1036_vm13, %v1020_v13, %v1059_v32  ;;  %v1072_v34 = vsel %vm1033_vm12, %v1017_v26, %v1056_v43 }
 0x140   :  { %1317 = vst [vmem:[%s2016_s5 + $0x18] sm:$0xff] %v1293_v44   ;;  %v1313_v54 = vpack.c.bf16 %v1075_v42, %v1074_v33  ;;  %v1065_v36 = vsel %vm1026_vm14, %v1010_v15, %v1049_v28  ;;  %v1073_v37 = vsel %vm1034_vm15, %v1018_v29, %v1057_v31 }
 0x141   :  { %v1288_v45 = vpack.c.bf16 %v1065_v36, %v1064_v35  ;;  %v1308_v46 = vpack.c.bf16 %v1073_v37, %v1072_v34 }
 0x142   :  { %1321 = vst [vmem:[%s2016_s5 + $0x38] sm:$0xff] %v1313_v54  }
 0x143   :  { %1316 = vst [vmem:[%s2016_s5 + $0x10] sm:$0xff] %v1288_v45   ;;  %1320 = vst [vmem:[%s2016_s5 + $0x30] sm:$0xff] %v1308_v46  }

// kernel: espnet_encoder_forward.34
= control target key start
LH: loop header
LB: loop body
LE: loop exit
PB: predicated region body
PF: predicated region fallthrough
CT: control target
= control target key end

     0   :  { %s862_s1 = inlined_call_operand.vmem [shape: bf16[128,128], index: 1, kind: input, shape index: {}]   ;;  %s863_s0 = inlined_call_operand.vmem [shape: bf16[128,128], index: 0, kind: input, shape index: {}]   ;;  %s864_s2 = inlined_call_operand.vmem [shape: f32[1,128], index: 2, kind: input, shape index: {}, may-alias: {2,4}]   ;;  %s865_s3 = inlined_call_operand.vmem [shape: f32[1,128], index: 3, kind: input, shape index: {}]   ;;  %s866_s4 = inlined_call_operand.vmem [shape: f32[1,128], index: 4, kind: input, shape index: {}, may-alias: {2,4}]   ;;  %s867_s5 = inlined_call_operand.vmem [shape: bf16[128,128], index: 5, kind: output, shape index: {}]  }
   0x1   :  { %v680_v0 = vld [vmem:[%s862_s1 + $0x38] sm:$0xff]   ;;  %v681_v1 = vld [vmem:[%s862_s1 + $0x30] sm:$0xff]   ;;  %v682_v2 = vld [vmem:[%s862_s1 + $0x28] sm:$0xff]  }
   0x2   :  { %632 = vmatprep.subr.bf16.mxu0 %v680_v0  ;;  %664 = vmatprep.subr.bf16.mxu1 %v680_v0  ;;  %v683_v3 = vld [vmem:[%s862_s1 + $0x20] sm:$0xff]   ;;  %v684_v6 = vld [vmem:[%s862_s1 + $0x18] sm:$0xff]   ;;  %v685_v7 = vld [vmem:[%s862_s1 + $0x10] sm:$0xff]  }
   0x3   :  { %633 = vmatpush3.bf16.msra.mxu0 %v680_v0  ;;  %672 = vmatpush3.bf16.msra.mxu1 %v680_v0  ;;  %v688_v4 = vld [vmem:[%s863_s0] sm:$0xff]   ;;  %v686_v8 = vld [vmem:[%s862_s1 + $0x8] sm:$0xff]   ;;  %v692_v12 = vld [vmem:[%s863_s0 + $0x10] sm:$0xff]  }
   0x4   :  { %634 = vmatprep.subr.bf16.mxu0 %v681_v1  ;;  %665 = vmatprep.subr.bf16.mxu1 %v681_v1  ;;  %v689_v5 = vld [vmem:[%s863_s0 + $0x20] sm:$0xff]   ;;  %v690_v10 = vld [vmem:[%s863_s0 + $0x8] sm:$0xff]   ;;  %v693_v13 = vld [vmem:[%s863_s0 + $0x30] sm:$0xff]  }
   0x5   :  { %648 = vmatprep.mubr.bf16.mxu0 %v688_v4  ;;  %656 = vmatprep.mubr.bf16.mxu1 %v689_v5  ;;  %v687_v9 = vld [vmem:[%s862_s1] sm:$0xff]   ;;  %v691_v11 = vld [vmem:[%s863_s0 + $0x28] sm:$0xff]   ;;  %v694_v14 = vld [vmem:[%s863_s0 + $0x18] sm:$0xff]  }
   0x6   :  { %v695_v15 = vld [vmem:[%s863_s0 + $0x38] sm:$0xff]   ;;  %v777_v16 = vld [vmem:[%s864_s2] ss:$0 sm:$0xff] }
   0x7   :  { %635 = vmatpush3.bf16.msra.mxu0 %v681_v1  ;;  %673 = vmatpush3.bf16.msra.mxu1 %v681_v1  ;;  %v782_v18 = vld [vmem:[%s865_s3] ss:$0 sm:$0xff] }
   0x8   :  { %636 = vmatprep.subr.bf16.mxu0 %v682_v2  ;;  %666 = vmatprep.subr.bf16.mxu1 %v682_v2  ;;  %v789_v22 = vld [vmem:[%s866_s4] ss:$0 sm:$0xff] }
   0xb   :  { %637 = vmatpush3.bf16.msra.mxu0 %v682_v2  ;;  %674 = vmatpush3.bf16.msra.mxu1 %v682_v2 }
   0xc   :  { %638 = vmatprep.subr.bf16.mxu0 %v683_v3  ;;  %667 = vmatprep.subr.bf16.mxu1 %v683_v3 }
   0xf   :  { %639 = vmatpush3.bf16.msra.mxu0 %v683_v3  ;;  %675 = vmatpush3.bf16.msra.mxu1 %v683_v3 }
  0x10   :  { %640 = vmatprep.subr.bf16.mxu0 %v684_v6  ;;  %668 = vmatprep.subr.bf16.mxu1 %v684_v6 }
  0x13   :  { %641 = vmatpush3.bf16.msra.mxu0 %v684_v6  ;;  %676 = vmatpush3.bf16.msra.mxu1 %v684_v6 }
  0x14   :  { %642 = vmatprep.subr.bf16.mxu0 %v685_v7  ;;  %669 = vmatprep.subr.bf16.mxu1 %v685_v7 }
  0x17   :  { %643 = vmatpush3.bf16.msra.mxu0 %v685_v7  ;;  %677 = vmatpush3.bf16.msra.mxu1 %v685_v7 }
  0x18   :  { %644 = vmatprep.subr.bf16.mxu0 %v686_v8  ;;  %670 = vmatprep.subr.bf16.mxu1 %v686_v8 }
  0x1b   :  { %645 = vmatpush3.bf16.msra.mxu0 %v686_v8  ;;  %678 = vmatpush3.bf16.msra.mxu1 %v686_v8 }
  0x1c   :  { %646 = vmatprep.subr.bf16.mxu0 %v687_v9  ;;  %671 = vmatprep.subr.bf16.mxu1 %v687_v9 }
  0x1f   :  { %647 = vmatpush3.bf16.msra.mxu0 %v687_v9  ;;  %679 = vmatpush3.bf16.msra.mxu1 %v687_v9 }
  0x22   :  { %649 = vmatmul.mubr.bf16.vlgmr.msra.gmra.mxu0 %v690_v10  ;;  %657 = vmatmul.mubr.bf16.vlgmr.msra.gmra.mxu1 %v691_v11 }
  0x23   :  { %652 = vmatprep.mubr.bf16.mxu0 %v692_v12  ;;  %660 = vmatprep.mubr.bf16.mxu1 %v693_v13 }
  0x2a   :  { %653 = vmatmul.mubr.bf16.gmra.mxu0 %v694_v14  ;;  %661 = vmatmul.mubr.bf16.gmra.mxu1 %v695_v15 }
  0xe2   :  { %v650_v17 = vpop.f32.mrf.mxu0  ;;  %v658_v19 = vpop.f32.mrf.mxu1 }
  0xe3   :  { %v342_v20 = vmul.f32 %v650_v17, %v777_v16  ;;  %v350_v21 = vmul.f32 %v658_v19, %v777_v16 }
  0xe4   :  { %v219_v23 = vpop.f32.mrf.mxu0  ;;  %v251_v24 = vpop.f32.mrf.mxu1 }
  0xe5   :  { %v365_v25 = vadd.f32 %v782_v18, %v342_v20  ;;  %v373_v26 = vadd.f32 %v782_v18, %v350_v21  ;;  %v340_v27 = vmul.f32 %v777_v16, %v219_v23  ;;  %v348_v28 = vmul.f32 %v777_v16, %v251_v24 }
  0xe6   :  { %v651_v29 = vpop.f32.mrf.mxu0  ;;  %v659_v30 = vpop.f32.mrf.mxu1 }
  0xe7   :  { %vm381_vm0 = vcmp.ge.f32.partialorder %v365_v25, 0.0  ;;  %v404_v31 = vmul.f32 %v789_v22, %v365_v25  ;;  %vm389_vm1 = vcmp.ge.f32.partialorder %v373_v26, 0.0  ;;  %v412_v32 = vmul.f32 %v789_v22, %v373_v26 }
  0xe8   :  { %v363_v33 = vadd.f32 %v782_v18, %v340_v27  ;;  %v371_v34 = vadd.f32 %v782_v18, %v348_v28  ;;  %v343_v35 = vmul.f32 %v651_v29, %v777_v16  ;;  %v351_v36 = vmul.f32 %v659_v30, %v777_v16  ;;  %v222_v37 = vpop.f32.mrf.mxu0  ;;  %v254_v38 = vpop.f32.mrf.mxu1 }
  0xe9   :  { %v420_v39 = vsel %vm381_vm0, %v365_v25, %v404_v31  ;;  %v428_v40 = vsel %vm389_vm1, %v373_v26, %v412_v32  ;;  %v341_v41 = vmul.f32 %v777_v16, %v222_v37  ;;  %v349_v42 = vmul.f32 %v777_v16, %v254_v38 }
  0xea   :  { %vm379_vm2 = vcmp.ge.f32.partialorder %v363_v33, 0.0  ;;  %v402_v43 = vmul.f32 %v789_v22, %v363_v33  ;;  %vm387_vm3 = vcmp.ge.f32.partialorder %v371_v34, 0.0  ;;  %v410_v44 = vmul.f32 %v789_v22, %v371_v34  ;;  %v654_v45 = vpop.f32.mrf.mxu0  ;;  %v662_v46 = vpop.f32.mrf.mxu1 }
  0xeb   :  { %v366_v47 = vadd.f32 %v782_v18, %v343_v35  ;;  %v374_v48 = vadd.f32 %v782_v18, %v351_v36  ;;  %v364_v49 = vadd.f32 %v782_v18, %v341_v41  ;;  %v372_v50 = vadd.f32 %v782_v18, %v349_v42 }
  0xec   :  { %v418_v51 = vsel %vm379_vm2, %v363_v33, %v402_v43  ;;  %v426_v52 = vsel %vm387_vm3, %v371_v34, %v410_v44  ;;  %v346_v53 = vmul.f32 %v654_v45, %v777_v16  ;;  %v354_v54 = vmul.f32 %v662_v46, %v777_v16  ;;  %v235_v55 = vpop.f32.mrf.mxu0  ;;  %v267_v56 = vpop.f32.mrf.mxu1 }
  0xed   :  { %vm382_vm4 = vcmp.ge.f32.partialorder %v366_v47, 0.0  ;;  %v405_v57 = vmul.f32 %v789_v22, %v366_v47  ;;  %vm390_vm5 = vcmp.ge.f32.partialorder %v374_v48, 0.0  ;;  %v413_v58 = vmul.f32 %v789_v22, %v374_v48 }
  0xee   :  { %vm380_vm6 = vcmp.ge.f32.partialorder %v364_v49, 0.0  ;;  %v403_v59 = vmul.f32 %v789_v22, %v364_v49  ;;  %vm388_vm7 = vcmp.ge.f32.partialorder %v372_v50, 0.0  ;;  %v411_v60 = vmul.f32 %v789_v22, %v372_v50  ;;  %v655_v61 = vpop.f32.mrf.mxu0  ;;  %v663_v62 = vpop.f32.mrf.mxu1 }
  0xef   :  { %v421_v63 = vsel %vm382_vm4, %v366_v47, %v405_v57  ;;  %v429_v0 = vsel %vm390_vm5, %v374_v48, %v413_v58  ;;  %v369_v1 = vadd.f32 %v782_v18, %v346_v53  ;;  %v377_v2 = vadd.f32 %v782_v18, %v354_v54 }
  0xf0   :  { %v577_v3 = vpack.c.bf16 %v421_v63, %v420_v39  ;;  %v597_v4 = vpack.c.bf16 %v429_v0, %v428_v40  ;;  %v419_v5 = vsel %vm380_vm6, %v364_v49, %v403_v59  ;;  %v427_v6 = vsel %vm388_vm7, %v372_v50, %v411_v60  ;;  %v238_v7 = vpop.f32.mrf.mxu0  ;;  %v270_v13 = vpop.f32.mrf.mxu1 }
  0xf1   :  { %v572_v8 = vpack.c.bf16 %v419_v5, %v418_v51  ;;  %v592_v9 = vpack.c.bf16 %v427_v6, %v426_v52  ;;  %v408_v10 = vmul.f32 %v789_v22, %v369_v1  ;;  %v344_v11 = vmul.f32 %v777_v16, %v235_v55 }
  0xf2   :  { %609 = vst [vmem:[%s867_s5 + $0x8] sm:$0xff] %v577_v3   ;;  %613 = vst [vmem:[%s867_s5 + $0x28] sm:$0xff] %v597_v4   ;;  %v352_v12 = vmul.f32 %v777_v16, %v267_v56  ;;  %vm385_vm8 = vcmp.ge.f32.partialorder %v369_v1, 0.0  ;;  %v347_v14 = vmul.f32 %v655_v61, %v777_v16  ;;  %v355_v15 = vmul.f32 %v663_v62, %v777_v16 }
  0xf3   :  { %573 = vst [vmem:[%s867_s5] sm:$0xff] %v572_v8   ;;  %612 = vst [vmem:[%s867_s5 + $0x20] sm:$0xff] %v592_v9   ;;  %v345_v17 = vmul.f32 %v777_v16, %v238_v7  ;;  %vm393_vm9 = vcmp.ge.f32.partialorder %v377_v2, 0.0  ;;  %v416_v19 = vmul.f32 %v789_v22, %v377_v2  ;;  %v367_v20 = vadd.f32 %v782_v18, %v344_v11 }
  0xf4   :  { %v375_v21 = vadd.f32 %v782_v18, %v352_v12  ;;  %v370_v23 = vadd.f32 %v782_v18, %v347_v14  ;;  %v378_v24 = vadd.f32 %v782_v18, %v355_v15  ;;  %v353_v26 = vmul.f32 %v777_v16, %v270_v13 }
  0xf5   :  { %v368_v25 = vadd.f32 %v782_v18, %v345_v17  ;;  %v424_v27 = vsel %vm385_vm8, %v369_v1, %v408_v10  ;;  %vm383_vm10 = vcmp.ge.f32.partialorder %v367_v20, 0.0  ;;  %v406_v28 = vmul.f32 %v789_v22, %v367_v20 }
  0xf6   :  { %vm386_vm11 = vcmp.ge.f32.partialorder %v370_v23, 0.0  ;;  %v409_v29 = vmul.f32 %v789_v22, %v370_v23  ;;  %vm394_vm12 = vcmp.ge.f32.partialorder %v378_v24, 0.0  ;;  %v417_v30 = vmul.f32 %v789_v22, %v378_v24 }
  0xf7   :  { %v432_v31 = vsel %vm393_vm9, %v377_v2, %v416_v19  ;;  %vm391_vm13 = vcmp.ge.f32.partialorder %v375_v21, 0.0  ;;  %vm384_vm14 = vcmp.ge.f32.partialorder %v368_v25, 0.0  ;;  %v407_v32 = vmul.f32 %v789_v22, %v368_v25 }
  0xf8   :  { %v414_v33 = vmul.f32 %v789_v22, %v375_v21  ;;  %v425_v34 = vsel %vm386_vm11, %v370_v23, %v409_v29  ;;  %v433_v35 = vsel %vm394_vm12, %v378_v24, %v417_v30  ;;  %v376_v16 = vadd.f32 %v782_v18, %v353_v26 }
  0xf9   :  { %v422_v36 = vsel %vm383_vm10, %v367_v20, %v406_v28  ;;  %v587_v37 = vpack.c.bf16 %v425_v34, %v424_v27  ;;  %v607_v38 = vpack.c.bf16 %v433_v35, %v432_v31  ;;  %v423_v39 = vsel %vm384_vm14, %v368_v25, %v407_v32 }
  0xfa   :  { %v582_v40 = vpack.c.bf16 %v423_v39, %v422_v36  ;;  %vm392_vm15 = vcmp.ge.f32.partialorder %v376_v16, 0.0  ;;  %v415_v41 = vmul.f32 %v789_v22, %v376_v16  ;;  %v430_v42 = vsel %vm391_vm13, %v375_v21, %v414_v33 }
  0xfb   :  { %611 = vst [vmem:[%s867_s5 + $0x18] sm:$0xff] %v587_v37   ;;  %615 = vst [vmem:[%s867_s5 + $0x38] sm:$0xff] %v607_v38  }
  0xfc   :  { %610 = vst [vmem:[%s867_s5 + $0x10] sm:$0xff] %v582_v40   ;;  %v431_v18 = vsel %vm392_vm15, %v376_v16, %v415_v41 }
  0xfd   :  { %v602_v43 = vpack.c.bf16 %v431_v18, %v430_v42 }
  0xff   :  { %614 = vst [vmem:[%s867_s5 + $0x30] sm:$0xff] %v602_v43  }

// kernel: espnet_encoder_forward.35
= control target key start
LH: loop header
LB: loop body
LE: loop exit
PB: predicated region body
PF: predicated region fallthrough
CT: control target
= control target key end

     0   :  { %s2247_s1 = inlined_call_operand.vmem [shape: bf16[640,128], index: 1, kind: input, shape index: {}]   ;;  %s2248_s0 = inlined_call_operand.vmem [shape: bf16[128,640], index: 0, kind: input, shape index: {}]   ;;  %s2249_s2 = inlined_call_operand.vmem [shape: bf16[128,128], index: 2, kind: input, shape index: {}]   ;;  %s2250_s3 = inlined_call_operand.vmem [shape: f32[1,128], index: 3, kind: input, shape index: {}]   ;;  %s2251_s4 = inlined_call_operand.vmem [shape: f32[1,128], index: 4, kind: input, shape index: {}]   ;;  %s2252_s5 = inlined_call_operand.vmem [shape: f32[1,128], index: 5, kind: input, shape index: {}]   ;;  %s2253_s6 = inlined_call_operand.vmem [shape: bf16[128,128], index: 6, kind: output, shape index: {}]  }
   0x1   :  { %v1604_v0 = vld [vmem:[%s2247_s1 + $0x78] sm:$0xff]   ;;  %v1608_v4 = vld [vmem:[%s2247_s1 + $0x70] sm:$0xff]   ;;  %v1612_v8 = vld [vmem:[%s2247_s1 + $0x68] sm:$0xff]  }
   0x2   :  { %v1605_v1 = vld [vmem:[%s2247_s1 + $0xf8] sm:$0xff]   ;;  %1412 = vmatprep.subr.bf16.mxu0 %v1604_v0  ;;  %v1609_v5 = vld [vmem:[%s2247_s1 + $0xf0] sm:$0xff]   ;;  %v1613_v9 = vld [vmem:[%s2247_s1 + $0xe8] sm:$0xff]  }
   0x3   :  { %v1606_v2 = vld [vmem:[%s2247_s1 + $0x38] sm:$0xff]   ;;  %1476 = vmatprep.subr.bf16.mxu1 %v1605_v1  ;;  %v1610_v6 = vld [vmem:[%s2247_s1 + $0x30] sm:$0xff]   ;;  %v1614_v10 = vld [vmem:[%s2247_s1 + $0x28] sm:$0xff]  }
   0x4   :  { %v1607_v3 = vld [vmem:[%s2247_s1 + $0xb8] sm:$0xff]   ;;  %1413 = vmatpush3.bf16.msra.mxu0 %v1606_v2  ;;  %v1611_v7 = vld [vmem:[%s2247_s1 + $0xb0] sm:$0xff]   ;;  %v1615_v11 = vld [vmem:[%s2247_s1 + $0xa8] sm:$0xff]  }
   0x5   :  { %1477 = vmatpush3.bf16.msra.mxu1 %v1607_v3  ;;  %1414 = vmatprep.subr.bf16.mxu0 %v1608_v4  ;;  %v1616_v12 = vld [vmem:[%s2247_s1 + $0x60] sm:$0xff]   ;;  %v1620_v16 = vld [vmem:[%s2247_s1 + $0x58] sm:$0xff]   ;;  %v1624_v20 = vld [vmem:[%s2247_s1 + $0x50] sm:$0xff]  }
   0x6   :  { %1478 = vmatprep.subr.bf16.mxu1 %v1609_v5  ;;  %v1617_v13 = vld [vmem:[%s2247_s1 + $0xe0] sm:$0xff]   ;;  %v1621_v17 = vld [vmem:[%s2247_s1 + $0xd8] sm:$0xff]   ;;  %v1625_v21 = vld [vmem:[%s2247_s1 + $0xd0] sm:$0xff]  }
   0x7   :  { %v1618_v14 = vld [vmem:[%s2247_s1 + $0x20] sm:$0xff]   ;;  %v1622_v18 = vld [vmem:[%s2247_s1 + $0x18] sm:$0xff]   ;;  %v1626_v22 = vld [vmem:[%s2247_s1 + $0x10] sm:$0xff]  }
   0x8   :  { %1415 = vmatpush3.bf16.msra.mxu0 %v1610_v6  ;;  %v1619_v15 = vld [vmem:[%s2247_s1 + $0xa0] sm:$0xff]   ;;  %v1623_v19 = vld [vmem:[%s2247_s1 + $0x98] sm:$0xff]   ;;  %v1627_v23 = vld [vmem:[%s2247_s1 + $0x90] sm:$0xff]  }
   0x9   :  { %1479 = vmatpush3.bf16.msra.mxu1 %v1611_v7  ;;  %1416 = vmatprep.subr.bf16.mxu0 %v1612_v8  ;;  %v1628_v24 = vld [vmem:[%s2247_s1 + $0x48] sm:$0xff]   ;;  %v1632_v28 = vld [vmem:[%s2247_s1 + $0x40] sm:$0xff]   ;;  %v1642_v36 = vld [vmem:[%s2247_s1 + $0x138] sm:$0xff]  }
   0xa   :  { %1480 = vmatprep.subr.bf16.mxu1 %v1613_v9  ;;  %v1629_v25 = vld [vmem:[%s2247_s1 + $0xc8] sm:$0xff]   ;;  %v1633_v29 = vld [vmem:[%s2247_s1 + $0xc0] sm:$0xff]   ;;  %v1649_v39 = vld [vmem:[%s2247_s1 + $0x130] sm:$0xff]  }
   0xb   :  { %v1630_v26 = vld [vmem:[%s2247_s1 + $0x8] sm:$0xff]   ;;  %v1634_v30 = vld [vmem:[%s2247_s1] sm:$0xff]   ;;  %v1652_v43 = vld [vmem:[%s2248_s0 + $0x5c] ss:$20 sps:$4 sm:$0xff]  }
   0xc   :  { %1417 = vmatpush3.bf16.msra.mxu0 %v1614_v10  ;;  %v1631_v27 = vld [vmem:[%s2247_s1 + $0x88] sm:$0xff]   ;;  %v1635_v31 = vld [vmem:[%s2247_s1 + $0x80] sm:$0xff]   ;;  %v1657_v48 = vld [vmem:[%s2248_s0 + $0x7c] ss:$20 sps:$4 sm:$0xff]  }
   0xd   :  { %1481 = vmatpush3.bf16.msra.mxu1 %v1615_v11  ;;  %1418 = vmatprep.subr.bf16.mxu0 %v1616_v12  ;;  %v1636_v32 = vld [vmem:[%s2248_s0] ss:$20 sps:$4 sm:$0xff]   ;;  %v1638_v33 = vld [vmem:[%s2248_s0 + $0x4] ss:$20 sps:$4 sm:$0xff]   ;;  %v1639_v34 = vld [vmem:[%s2248_s0 + $0x8] ss:$20 sps:$4 sm:$0xff]  }
   0xe   :  { %1482 = vmatprep.subr.bf16.mxu1 %v1617_v13  ;;  %v1641_v35 = vld [vmem:[%s2248_s0 + $0xc] ss:$20 sps:$4 sm:$0xff]   ;;  %668 = vmatprep.mubr.bf16.mxu0 %v1638_v33  ;;  %v1645_v38 = vld [vmem:[%s2248_s0 + $0x34] ss:$20 sps:$4 sm:$0xff]   ;;  %v1648_v41 = vld [vmem:[%s2248_s0 + $0x30] ss:$20 sps:$4 sm:$0xff]  }
   0xf   :  { %765 = vmatprep.mubr.bf16.mxu1 %v1641_v35  ;;  %v1643_v37 = vld [vmem:[%s2248_s0 + $0x2c] ss:$20 sps:$4 sm:$0xff]   ;;  %v1647_v40 = vld [vmem:[%s2248_s0 + $0x28] ss:$20 sps:$4 sm:$0xff]   ;;  %v1654_v46 = vld [vmem:[%s2248_s0 + $0x50] ss:$20 sps:$4 sm:$0xff]  }
  0x10   :  { %1419 = vmatpush3.bf16.msra.mxu0 %v1618_v14  ;;  %v1650_v42 = vld [vmem:[%s2248_s0 + $0x54] ss:$20 sps:$4 sm:$0xff]   ;;  %v1663_v45 = vld [vmem:[%s2247_s1 + $0x120] sm:$0xff]   ;;  %v1655_v47 = vld [vmem:[%s2248_s0 + $0x58] ss:$20 sps:$4 sm:$0xff]  }
  0x11   :  { %1483 = vmatpush3.bf16.msra.mxu1 %v1619_v15  ;;  %1420 = vmatprep.subr.bf16.mxu0 %v1620_v16  ;;  %v1656_v44 = vld [vmem:[%s2247_s1 + $0x128] sm:$0xff]   ;;  %v1659_v49 = vld [vmem:[%s2248_s0 + $0x84] ss:$20 sps:$4 sm:$0xff]   ;;  %v1677_v51 = vld [vmem:[%s2247_s1 + $0x110] sm:$0xff]  }
  0x12   :  { %1484 = vmatprep.subr.bf16.mxu1 %v1621_v17  ;;  %v1670_v50 = vld [vmem:[%s2247_s1 + $0x118] sm:$0xff]   ;;  %v1662_v53 = vld [vmem:[%s2248_s0 + $0x80] ss:$20 sps:$4 sm:$0xff]   ;;  %v1684_v55 = vld [vmem:[%s2247_s1 + $0x108] sm:$0xff]  }
  0x13   :  { %v1661_v52 = vld [vmem:[%s2248_s0 + $0x78] ss:$20 sps:$4 sm:$0xff]   ;;  %v1691_v57 = vld [vmem:[%s2247_s1 + $0x100] sm:$0xff]   ;;  %v1669_v59 = vld [vmem:[%s2248_s0 + $0xa8] ss:$20 sps:$4 sm:$0xff]  }
  0x14   :  { %1421 = vmatpush3.bf16.msra.mxu0 %v1622_v18  ;;  %v1664_v54 = vld [vmem:[%s2248_s0 + $0xa4] ss:$20 sps:$4 sm:$0xff]   ;;  %v1666_v56 = vld [vmem:[%s2248_s0 + $0xac] ss:$20 sps:$4 sm:$0xff]   ;;  %v1673_v61 = vld [vmem:[%s2248_s0 + $0xd4] ss:$20 sps:$4 sm:$0xff]  }
  0x15   :  { %1485 = vmatpush3.bf16.msra.mxu1 %v1623_v19  ;;  %1422 = vmatprep.subr.bf16.mxu0 %v1624_v20  ;;  %v1668_v58 = vld [vmem:[%s2248_s0 + $0xa0] ss:$20 sps:$4 sm:$0xff]   ;;  %v1675_v62 = vld [vmem:[%s2248_s0 + $0xc8] ss:$20 sps:$4 sm:$0xff]   ;;  %v1676_v63 = vld [vmem:[%s2248_s0 + $0xd0] ss:$20 sps:$4 sm:$0xff]  }
  0x16   :  { %1486 = vmatprep.subr.bf16.mxu1 %v1625_v21  ;;  %v1671_v60 = vld [vmem:[%s2248_s0 + $0xcc] ss:$20 sps:$4 sm:$0xff]   ;;  %v1678_v0 = vld [vmem:[%s2248_s0 + $0xf4] ss:$20 sps:$4 sm:$0xff]   ;;  %v1680_v1 = vld [vmem:[%s2248_s0 + $0xfc] ss:$20 sps:$4 sm:$0xff]  }
  0x17   :  { %v1682_v2 = vld [vmem:[%s2248_s0 + $0xf0] ss:$20 sps:$4 sm:$0xff]   ;;  %v1683_v3 = vld [vmem:[%s2248_s0 + $0xf8] ss:$20 sps:$4 sm:$0xff]   ;;  %v1690_v7 = vld [vmem:[%s2248_s0 + $0x120] ss:$20 sps:$4 sm:$0xff]  }
  0x18   :  { %1423 = vmatpush3.bf16.msra.mxu0 %v1626_v22  ;;  %v1685_v4 = vld [vmem:[%s2248_s0 + $0x11c] ss:$20 sps:$4 sm:$0xff]   ;;  %v1687_v5 = vld [vmem:[%s2248_s0 + $0x124] ss:$20 sps:$4 sm:$0xff]   ;;  %v1696_v12 = vld [vmem:[%s2248_s0 + $0x60] ss:$20 sps:$4 sm:$0xff]  }
  0x19   :  { %1487 = vmatpush3.bf16.msra.mxu1 %v1627_v23  ;;  %1424 = vmatprep.subr.bf16.mxu0 %v1628_v24  ;;  %v1689_v6 = vld [vmem:[%s2248_s0 + $0x118] ss:$20 sps:$4 sm:$0xff]   ;;  %v1692_v8 = vld [vmem:[%s2248_s0 + $0x10] ss:$20 sps:$4 sm:$0xff]   ;;  %v1697_v13 = vld [vmem:[%s2248_s0 + $0x100] ss:$20 sps:$4 sm:$0xff]  }
  0x1a   :  { %1488 = vmatprep.subr.bf16.mxu1 %v1629_v25  ;;  %v1693_v9 = vld [vmem:[%s2248_s0 + $0xb0] ss:$20 sps:$4 sm:$0xff]   ;;  %v1694_v10 = vld [vmem:[%s2248_s0 + $0x38] ss:$20 sps:$4 sm:$0xff]   ;;  %v1698_v14 = vld [vmem:[%s2248_s0 + $0x88] ss:$20 sps:$4 sm:$0xff]  }
  0x1b   :  { %v1695_v11 = vld [vmem:[%s2248_s0 + $0xd8] ss:$20 sps:$4 sm:$0xff]   ;;  %v1699_v15 = vld [vmem:[%s2248_s0 + $0x128] ss:$20 sps:$4 sm:$0xff]  }
  0x1c   :  { %1425 = vmatpush3.bf16.msra.mxu0 %v1630_v26 }
  0x1d   :  { %1489 = vmatpush3.bf16.msra.mxu1 %v1631_v27  ;;  %1426 = vmatprep.subr.bf16.mxu0 %v1632_v28 }
  0x1e   :  { %1490 = vmatprep.subr.bf16.mxu1 %v1633_v29 }
  0x20   :  { %1427 = vmatpush3.bf16.msra.mxu0 %v1634_v30 }
  0x21   :  { %1491 = vmatpush3.bf16.msra.mxu1 %v1635_v31  ;;  %1556 = vmatprep.subr.bf16.mxu0 %v1642_v36 }
  0x22   :  { %1588 = vmatprep.subr.bf16.mxu1 %v1642_v36 }
  0x23   :  { %669 = vmatmul.mubr.bf16.vlgmr.msra.gmra.mxu0 %v1636_v32 }
  0x24   :  { %766 = vmatmul.mubr.bf16.vlgmr.msra.gmra.mxu1 %v1639_v34  ;;  %1557 = vmatpush3.bf16.msra.mxu0 %v1642_v36 }
  0x25   :  { %1596 = vmatpush3.bf16.msra.mxu1 %v1642_v36  ;;  %676 = vmatprep.mubr.bf16.mxu0 %v1643_v37 }
  0x26   :  { %773 = vmatprep.mubr.bf16.mxu1 %v1645_v38  ;;  %1558 = vmatprep.subr.bf16.mxu0 %v1649_v39 }
  0x27   :  { %1589 = vmatprep.subr.bf16.mxu1 %v1649_v39 }
  0x28   :  { %1559 = vmatpush3.bf16.msra.mxu0 %v1649_v39 }
  0x29   :  { %1597 = vmatpush3.bf16.msra.mxu1 %v1649_v39  ;;  %1560 = vmatprep.subr.bf16.mxu0 %v1656_v44 }
  0x2a   :  { %1590 = vmatprep.subr.bf16.mxu1 %v1656_v44 }
  0x2b   :  { %677 = vmatmul.mubr.bf16.gmra.mxu0 %v1647_v40 }
  0x2c   :  { %774 = vmatmul.mubr.bf16.gmra.mxu1 %v1648_v41  ;;  %684 = vmatprep.mubr.bf16.mxu0 %v1650_v42 }
  0x2d   :  { %781 = vmatprep.mubr.bf16.mxu1 %v1652_v43  ;;  %1561 = vmatpush3.bf16.msra.mxu0 %v1656_v44 }
  0x2e   :  { %1598 = vmatpush3.bf16.msra.mxu1 %v1656_v44  ;;  %1562 = vmatprep.subr.bf16.mxu0 %v1663_v45 }
  0x2f   :  { %1591 = vmatprep.subr.bf16.mxu1 %v1663_v45 }
  0x31   :  { %1563 = vmatpush3.bf16.msra.mxu0 %v1663_v45 }
  0x32   :  { %1599 = vmatpush3.bf16.msra.mxu1 %v1663_v45  ;;  %1564 = vmatprep.subr.bf16.mxu0 %v1670_v50 }
  0x33   :  { %685 = vmatmul.mubr.bf16.gmra.mxu0 %v1654_v46  ;;  %1592 = vmatprep.subr.bf16.mxu1 %v1670_v50 }
  0x34   :  { %782 = vmatmul.mubr.bf16.gmra.mxu1 %v1655_v47  ;;  %692 = vmatprep.mubr.bf16.mxu0 %v1657_v48 }
  0x35   :  { %789 = vmatprep.mubr.bf16.mxu1 %v1659_v49  ;;  %1565 = vmatpush3.bf16.msra.mxu0 %v1670_v50 }
  0x36   :  { %1600 = vmatpush3.bf16.msra.mxu1 %v1670_v50  ;;  %1566 = vmatprep.subr.bf16.mxu0 %v1677_v51 }
  0x37   :  { %1593 = vmatprep.subr.bf16.mxu1 %v1677_v51 }
  0x39   :  { %1567 = vmatpush3.bf16.msra.mxu0 %v1677_v51 }
  0x3a   :  { %1601 = vmatpush3.bf16.msra.mxu1 %v1677_v51  ;;  %1568 = vmatprep.subr.bf16.mxu0 %v1684_v55 }
  0x3b   :  { %693 = vmatmul.mubr.bf16.gmra.mxu0 %v1661_v52  ;;  %1594 = vmatprep.subr.bf16.mxu1 %v1684_v55 }
  0x3c   :  { %790 = vmatmul.mubr.bf16.gmra.mxu1 %v1662_v53  ;;  %700 = vmatprep.mubr.bf16.mxu0 %v1664_v54 }
  0x3d   :  { %797 = vmatprep.mubr.bf16.mxu1 %v1666_v56  ;;  %1569 = vmatpush3.bf16.msra.mxu0 %v1684_v55 }
  0x3e   :  { %1602 = vmatpush3.bf16.msra.mxu1 %v1684_v55  ;;  %1570 = vmatprep.subr.bf16.mxu0 %v1691_v57 }
  0x3f   :  { %1595 = vmatprep.subr.bf16.mxu1 %v1691_v57 }
  0x41   :  { %1571 = vmatpush3.bf16.msra.mxu0 %v1691_v57 }
  0x42   :  { %1603 = vmatpush3.bf16.msra.mxu1 %v1691_v57 }
  0x43   :  { %701 = vmatmul.mubr.bf16.gmra.mxu0 %v1668_v58 }
  0x44   :  { %798 = vmatmul.mubr.bf16.gmra.mxu1 %v1669_v59  ;;  %708 = vmatprep.mubr.bf16.mxu0 %v1671_v60 }
  0x45   :  { %805 = vmatprep.mubr.bf16.mxu1 %v1673_v61 }
  0x4b   :  { %709 = vmatmul.mubr.bf16.gmra.mxu0 %v1675_v62 }
  0x4c   :  { %806 = vmatmul.mubr.bf16.gmra.mxu1 %v1676_v63  ;;  %716 = vmatprep.mubr.bf16.mxu0 %v1678_v0 }
  0x4d   :  { %813 = vmatprep.mubr.bf16.mxu1 %v1680_v1 }
  0x53   :  { %717 = vmatmul.mubr.bf16.gmra.mxu0 %v1682_v2 }
  0x54   :  { %814 = vmatmul.mubr.bf16.gmra.mxu1 %v1683_v3  ;;  %724 = vmatprep.mubr.bf16.mxu0 %v1685_v4 }
  0x55   :  { %821 = vmatprep.mubr.bf16.mxu1 %v1687_v5 }
  0x5b   :  { %725 = vmatmul.mubr.bf16.gmra.mxu0 %v1689_v6 }
  0x5c   :  { %822 = vmatmul.mubr.bf16.gmra.mxu1 %v1690_v7  ;;  %1572 = vmatprep.mubr.bf16.mxu0 %v1692_v8 }
  0x5d   :  { %1580 = vmatprep.mubr.bf16.mxu1 %v1693_v9 }
  0x63   :  { %1573 = vmatmul.mubr.bf16.vlgmr.msra.gmra.mxu0 %v1694_v10 }
  0x64   :  { %1581 = vmatmul.mubr.bf16.vlgmr.msra.gmra.mxu1 %v1695_v11  ;;  %1576 = vmatprep.mubr.bf16.mxu0 %v1696_v12 }
  0x65   :  { %1584 = vmatprep.mubr.bf16.mxu1 %v1697_v13 }
  0x6b   :  { %1577 = vmatmul.mubr.bf16.gmra.mxu0 %v1698_v14 }
  0x6c   :  { %1585 = vmatmul.mubr.bf16.gmra.mxu1 %v1699_v15  ;;  %v2016_v15 = vld [vmem:[%s2249_s2 + $0x8] sm:$0xff]  }
  0xe3   :  { %v1428_v16 = vpop.f32.mrf.mxu0 }
  0xe4   :  { %v1492_v17 = vpop.f32.mrf.mxu1 }
  0xe5   :  { %v1429_v18 = vpop.f32.mrf.mxu0 }
  0xe6   :  { %v1430_v19 = vadd.f32 %v1429_v18, %v1428_v16  ;;  %v1493_v20 = vpop.f32.mrf.mxu1  ;;  %v2028_v18 = vld [vmem:[%s2249_s2] sm:$0xff]  }
  0xe7   :  { %v1494_v21 = vadd.f32 %v1493_v20, %v1492_v17  ;;  %v1431_v22 = vpop.f32.mrf.mxu0  ;;  %v2023_v17 = vld [vmem:[%s2249_s2 + $0x28] sm:$0xff]  }
  0xe8   :  { %v1495_v23 = vpop.f32.mrf.mxu1  ;;  %2257 = vst [vmem:[#allocation5_spill] sm:$0xff] %v2023_v17 }
  0xe9   :  { %v1432_v24 = vpop.f32.mrf.mxu0  ;;  %v1975_v25 = vadd.f32 %v1494_v21, %v1430_v19  ;;  %v2033_v19 = vld [vmem:[%s2249_s2 + $0x20] sm:$0xff]  }
  0xea   :  { %v1433_v26 = vadd.f32 %v1432_v24, %v1431_v22  ;;  %v1496_v27 = vpop.f32.mrf.mxu1 }
  0xeb   :  { %v1497_v28 = vadd.f32 %v1496_v27, %v1495_v23  ;;  %v1434_v29 = vpop.f32.mrf.mxu0  ;;  %v2040_v23 = vld [vmem:[%s2249_s2 + $0x18] sm:$0xff]  }
  0xec   :  { %v1498_v30 = vpop.f32.mrf.mxu1  ;;  %v2048_v27 = vld [vmem:[%s2249_s2 + $0x38] sm:$0xff]  }
  0xed   :  { %v1435_v31 = vpop.f32.mrf.mxu0  ;;  %v1977_v32 = vadd.f32 %v1497_v28, %v1433_v26  ;;  %v1332_v26 = vunpack.c.l.bf16 %v2016_v15  ;;  %v2053_v28 = vld [vmem:[%s2249_s2 + $0x10] sm:$0xff]  }
  0xee   :  { %v1499_v33 = vpop.f32.mrf.mxu1  ;;  %v1436_v20 = vadd.f32 %v1435_v31, %v1434_v29  ;;  %v2058_v29 = vld [vmem:[%s2249_s2 + $0x30] sm:$0xff]   ;;  %v1348_v31 = vunpack.c.l.bf16 %v2023_v17 }
  0xef   :  { %2255 = vst [vmem:[#allocation3_spill] sm:$0xff] %v1977_v32  ;;  %v1979_v34 = vpop.f32.mrf.mxu0  ;;  %v1500_v21 = vadd.f32 %v1499_v33, %v1498_v30 }
  0xf0   :  { %v1981_v35 = vpop.f32.mrf.mxu1 }
  0xf1   :  { %v1983_v36 = vpop.f32.mrf.mxu0 }
  0xf2   :  { %v1985_v37 = vpop.f32.mrf.mxu1 }
  0xf3   :  { %v1440_v38 = vpop.f32.mrf.mxu0 }
  0xf4   :  { %v1504_v39 = vpop.f32.mrf.mxu1 }
  0xf5   :  { %v1441_v40 = vpop.f32.mrf.mxu0 }
  0xf6   :  { %v1442_v41 = vadd.f32 %v1441_v40, %v1440_v38  ;;  %v1505_v42 = vpop.f32.mrf.mxu1 }
  0xf7   :  { %v1506_v43 = vadd.f32 %v1505_v42, %v1504_v39  ;;  %v1987_v44 = vpop.f32.mrf.mxu0  ;;  %v1439_v39 = vadd.f32 %v1983_v36, %v1979_v34 }
  0xf8   :  { %v1989_v45 = vpop.f32.mrf.mxu1 }
  0xf9   :  { %v1991_v46 = vpop.f32.mrf.mxu0  ;;  %v1993_v47 = vadd.f32 %v1506_v43, %v1442_v41  ;;  %v1345_v43 = vunpack.c.h.bf16 %v2033_v19  ;;  %v1503_v41 = vadd.f32 %v1985_v37, %v1981_v35 }
  0xfa   :  { %v1995_v48 = vpop.f32.mrf.mxu1 }
  0xfb   :  { %2256 = vst [vmem:[#allocation4_spill] sm:$0xff] %v1993_v47  ;;  %v1997_v49 = vpop.f32.mrf.mxu0 }
  0xfc   :  { %v1999_v50 = vpop.f32.mrf.mxu1 }
  0xfd   :  { %v2001_v51 = vpop.f32.mrf.mxu0 }
  0xfe   :  { %v2003_v52 = vpop.f32.mrf.mxu1  ;;  %v1448_v47 = vadd.f32 %v2001_v51, %v1997_v49 }
  0xff   :  { %v2005_v53 = vpop.f32.mrf.mxu0 }
 0x100   :  { %v2007_v54 = vpop.f32.mrf.mxu1 }
 0x101   :  { %v1450_v55 = vpop.f32.mrf.mxu0 }
 0x102   :  { %v1514_v56 = vpop.f32.mrf.mxu1 }
 0x103   :  { %v1452_v57 = vpop.f32.mrf.mxu0  ;;  %v1515_v33 = vadd.f32 %v1514_v56, %v2007_v54  ;;  %v1357_v54 = vunpack.c.h.bf16 %v2048_v27  ;;  %v2099_v56 = vadd.f32 %v1995_v48, %v1989_v45 }
 0x104   :  { %v1516_v58 = vpop.f32.mrf.mxu1 }
 0x105   :  { %v1453_v59 = vpop.f32.mrf.mxu0 }
 0x106   :  { %v1517_v60 = vpop.f32.mrf.mxu1  ;;  %v1454_v34 = vadd.f32 %v1453_v59, %v1452_v57 }
 0x107   :  { %v1455_v61 = vpop.f32.mrf.mxu0  ;;  %v1518_v36 = vadd.f32 %v1517_v60, %v1516_v58  ;;  %v2106_v60 = vld [vmem:[%s2250_s3] ss:$0 sm:$0xff] }
 0x108   :  { %v1519_v62 = vpop.f32.mrf.mxu1 }
 0x109   :  { %v1456_v63 = vpop.f32.mrf.mxu0 }
 0x10a   :  { %v1520_v0 = vpop.f32.mrf.mxu1 }
 0x10b   :  { %v1458_v1 = vpop.f32.mrf.mxu0  ;;  %v1521_v35 = vadd.f32 %v1520_v0, %v1519_v62 }
 0x10c   :  { %v1522_v2 = vpop.f32.mrf.mxu1 }
 0x10d   :  { %v1459_v3 = vpop.f32.mrf.mxu0 }
 0x10e   :  { %v1523_v4 = vpop.f32.mrf.mxu1  ;;  %v1460_v38 = vadd.f32 %v1459_v3, %v1458_v1 }
 0x10f   :  { %v1461_v5 = vpop.f32.mrf.mxu0  ;;  %v1524_v42 = vadd.f32 %v1523_v4, %v1522_v2 }
 0x110   :  { %v1525_v6 = vpop.f32.mrf.mxu1 }
 0x111   :  { %v1462_v7 = vpop.f32.mrf.mxu0 }
 0x112   :  { %v1526_v8 = vpop.f32.mrf.mxu1  ;;  %v1463_v1 = vadd.f32 %v1462_v7, %v1461_v5 }
 0x113   :  { %v1464_v9 = vpop.f32.mrf.mxu0  ;;  %v1527_v2 = vadd.f32 %v1526_v8, %v1525_v6 }
 0x114   :  { %v1528_v10 = vpop.f32.mrf.mxu1 }
 0x115   :  { %v1465_v11 = vpop.f32.mrf.mxu0  ;;  %v811_v48 = vadd.f32 %v1527_v2, %v1463_v1 }
 0x116   :  { %v1529_v12 = vpop.f32.mrf.mxu1  ;;  %v1466_v3 = vadd.f32 %v1465_v11, %v1464_v9  ;;  %v2124_v9 = vld [vmem:[%s2251_s4] ss:$0 sm:$0xff] }
 0x117   :  { %v2009_v13 = vpop.f32.mrf.mxu0  ;;  %v1530_v4 = vadd.f32 %v1529_v12, %v1528_v10 }
 0x118   :  { %v2011_v14 = vpop.f32.mrf.mxu1 }
 0x119   :  { %v2018_v16 = vpop.f32.mrf.mxu0  ;;  %v2111_v6 = vadd.f32 %v1530_v4, %v1466_v3 }
 0x11a   :  { %v2035_v22 = vpop.f32.mrf.mxu1 }
 0x11b   :  { %2258 = vst [vmem:[#allocation6_spill] sm:$0xff] %v2035_v22  ;;  %v2042_v24 = vpop.f32.mrf.mxu0 }
 0x11c   :  { %2259 = vst [vmem:[#allocation7_spill] sm:$0xff] %v2042_v24  ;;  %v2060_v30 = vpop.f32.mrf.mxu1  ;;  %v776_v24 = vadd.f32 %v1500_v21, %v1436_v20  ;;  %v1512_v20 = vadd.f32 %v2003_v52, %v1999_v50  ;;  %v1451_v21 = vadd.f32 %v1450_v55, %v2005_v53  ;;  %v808_v50 = vadd.f32 %v1524_v42, %v1460_v38 }
 0x11d   :  { %2260 = vst [vmem:[#allocation8_spill] sm:$0xff] %v2060_v30  ;;  %v1471_v40 = vpop.f32.mrf.mxu0  ;;  %v1457_v30 = vadd.f32 %v1456_v63, %v1455_v61  ;;  %v779_v52 = vadd.f32 %v1503_v41, %v1439_v39  ;;  %v1341_v53 = vunpack.c.h.bf16 %v2040_v23  ;;  %v2095_v55 = vadd.f32 %v1991_v46, %v1987_v44  ;;  %v2134_v39 = vld [vmem:[%s2252_s5] ss:$0 sm:$0xff] }
 0x11e   :  { %v1535_v32 = vpop.f32.mrf.mxu1  ;;  %v2101_v59 = vadd.f32 %v1512_v20, %v1448_v47  ;;  %v800_v63 = vadd.f32 %v1518_v36, %v1454_v34  ;;  %v2108_v5 = vadd.f32 %v1515_v33, %v1451_v21  ;;  %v2115_v47 = vadd.f32 %v2018_v16, %v2009_v13 }
 0x11f   :  { %v2077_v17 = vpop.f32.mrf.mxu0  ;;  %v803_v0 = vadd.f32 %v1521_v35, %v1457_v30  ;;  %v2263_v30 = vunpack.c.l.bf16 %v2028_v18  ;;  %v2265_v41 = vunpack.c.l.bf16 %v2033_v19  ;;  %v2266_v36 = vunpack.c.h.bf16 %v2016_v15 }
 0x120   :  { %v2085_v22 = vpop.f32.mrf.mxu1  ;;  %v2272_v19 = vunpack.c.l.bf16 %v2040_v23 }
 0x121   :  { %v2087_v37 = vpop.f32.mrf.mxu0 }
 0x122   :  { %v2089_v49 = vpop.f32.mrf.mxu1  ;;  %v2261_v7 = vld [vmem:[#allocation6_spill] sm:$0xff] }
 0x123   :  { %v1574_v51 = vpop.f32.mrf.mxu0  ;;  %v2119_v8 = vadd.f32 %v2261_v7, %v2011_v14  ;;  %v2262_v12 = vld [vmem:[#allocation7_spill] sm:$0xff] }
 0x124   :  { %v873_v57 = vadd.f32 %v1574_v51, %v776_v24  ;;  %v1582_v58 = vpop.f32.mrf.mxu1  ;;  %v1472_v24 = vadd.f32 %v1471_v40, %v2262_v12  ;;  %v2264_v38 = vld [vmem:[#allocation8_spill] sm:$0xff]  ;;  %v2268_v51 = vld [vmem:[#allocation5_spill] sm:$0xff] }
 0x125   :  { %v905_v61 = vadd.f32 %v1582_v58, %v808_v50  ;;  %v864_v62 = vpop.f32.mrf.mxu0  ;;  %v1536_v14 = vadd.f32 %v1535_v32, %v2264_v38  ;;  %v2267_v32 = vld [vmem:[#allocation3_spill] sm:$0xff]  ;;  %v2269_v50 = vunpack.c.h.bf16 %v2268_v51 }
 0x126   :  { %v1012_v44 = vadd.f32 %v1332_v26, %v873_v57  ;;  %v865_v46 = vadd.f32 %v864_v62, %v1975_v25  ;;  %v896_v45 = vpop.f32.mrf.mxu1 }
 0x127   :  { %v1020_v10 = vadd.f32 %v1348_v31, %v905_v61  ;;  %v897_v11 = vadd.f32 %v896_v45, %v800_v63  ;;  %v1575_v25 = vpop.f32.mrf.mxu0  ;;  %v1475_v45 = vadd.f32 %v2087_v37, %v2077_v17  ;;  %v824_v7 = vadd.f32 %v1536_v14, %v1472_v24 }
 0x128   :  { %v1035_v26 = vmul.f32 %v2106_v60, %v1012_v44  ;;  %v1010_v13 = vadd.f32 %v2263_v30, %v865_v46  ;;  %v876_v16 = vadd.f32 %v1575_v25, %v779_v52  ;;  %v1583_v33 = vpop.f32.mrf.mxu1 }
 0x129   :  { %v1043_v31 = vmul.f32 %v2106_v60, %v1020_v10  ;;  %v1018_v42 = vadd.f32 %v2265_v41, %v897_v11  ;;  %v908_v40 = vadd.f32 %v1583_v33, %v811_v48  ;;  %v867_v20 = vpop.f32.mrf.mxu0 }
 0x12a   :  { %v1058_v21 = vadd.f32 %v2124_v9, %v1035_v26  ;;  %v1033_v34 = vmul.f32 %v2106_v60, %v1010_v13  ;;  %v1013_v35 = vadd.f32 %v2266_v36, %v876_v16  ;;  %v868_v1 = vadd.f32 %v867_v20, %v2267_v32  ;;  %v899_v2 = vpop.f32.mrf.mxu1 }
 0x12b   :  { %v1066_v3 = vadd.f32 %v2124_v9, %v1043_v31  ;;  %v1041_v4 = vmul.f32 %v2106_v60, %v1018_v42  ;;  %v1021_v52 = vadd.f32 %v2269_v50, %v908_v40  ;;  %v900_v57 = vadd.f32 %v899_v2, %v803_v0  ;;  %v1578_v58 = vpop.f32.mrf.mxu0 }
 0x12c   :  { %vm1074_vm0 = vcmp.ge.f32.partialorder %v1058_v21, 0.0  ;;  %v1097_v61 = vmul.f32 %v2134_v39, %v1058_v21  ;;  %v1056_v62 = vadd.f32 %v2124_v9, %v1033_v34  ;;  %v1036_v15 = vmul.f32 %v2106_v60, %v1013_v35  ;;  %v1586_v10 = vpop.f32.mrf.mxu1 }
 0x12d   :  { %vm1082_vm1 = vcmp.ge.f32.partialorder %v1066_v3, 0.0  ;;  %v1105_v63 = vmul.f32 %v2134_v39, %v1066_v3  ;;  %v1064_v44 = vadd.f32 %v2124_v9, %v1041_v4  ;;  %v1044_v46 = vmul.f32 %v2106_v60, %v1021_v52  ;;  %v880_v11 = vpop.f32.mrf.mxu0 }
 0x12e   :  { %v1113_v48 = vsel %vm1074_vm0, %v1058_v21, %v1097_v61  ;;  %v1059_v0 = vadd.f32 %v2124_v9, %v1036_v15  ;;  %vm1072_vm2 = vcmp.ge.f32.partialorder %v1056_v62, 0.0  ;;  %v1095_v12 = vmul.f32 %v2134_v39, %v1056_v62  ;;  %v912_v41 = vpop.f32.mrf.mxu1  ;;  %v2271_v21 = vld [vmem:[#allocation4_spill] sm:$0xff] }
 0x12f   :  { %v1121_v25 = vsel %vm1082_vm1, %v1066_v3, %v1105_v63  ;;  %v1067_v26 = vadd.f32 %v2124_v9, %v1044_v46  ;;  %vm1080_vm3 = vcmp.ge.f32.partialorder %v1064_v44, 0.0  ;;  %v2270_v13 = vunpack.c.h.bf16 %v2028_v18  ;;  %v1579_v42 = vpop.f32.mrf.mxu0 }
 0x130   :  { %vm1075_vm4 = vcmp.ge.f32.partialorder %v1059_v0, 0.0  ;;  %v1098_v30 = vmul.f32 %v2134_v39, %v1059_v0  ;;  %v1103_v17 = vmul.f32 %v2134_v39, %v1064_v44  ;;  %v1019_v24 = vadd.f32 %v1345_v43, %v900_v57 }
 0x131   :  { %v1011_v16 = vadd.f32 %v2270_v13, %v868_v1  ;;  %vm1083_vm5 = vcmp.ge.f32.partialorder %v1067_v26, 0.0  ;;  %v1106_v37 = vmul.f32 %v2134_v39, %v1067_v26  ;;  %v889_v14 = vadd.f32 %v1578_v58, %v2101_v59 }
 0x132   :  { %v1114_v33 = vsel %vm1075_vm4, %v1059_v0, %v1098_v30  ;;  %v921_v31 = vadd.f32 %v1586_v10, %v824_v7  ;;  %v1042_v18 = vmul.f32 %v2106_v60, %v1019_v24  ;;  %v881_v34 = vadd.f32 %v880_v11, %v2271_v21  ;;  %v883_v10 = vpop.f32.mrf.mxu0 }
 0x133   :  { %v1034_v38 = vmul.f32 %v2106_v60, %v1011_v16  ;;  %v1366_v40 = vpack.c.bf16 %v1114_v33, %v1113_v48  ;;  %v1122_v20 = vsel %vm1083_vm5, %v1067_v26, %v1106_v37  ;;  %v1016_v43 = vadd.f32 %v2272_v19, %v889_v14 }
 0x134   :  { %v1386_v36 = vpack.c.bf16 %v1122_v20, %v1121_v25  ;;  %v2273_v32 = vunpack.c.l.bf16 %v2048_v27  ;;  %v1065_v59 = vadd.f32 %v2124_v9, %v1042_v18  ;;  %v2274_v2 = vunpack.c.l.bf16 %v2053_v28 }
 0x135   :  { %v1057_v35 = vadd.f32 %v2124_v9, %v1034_v38  ;;  %1405 = vst [vmem:[%s2253_s6 + $0x8] sm:$0xff] %v1366_v40   ;;  %v913_v4 = vadd.f32 %v912_v41, %v2111_v6  ;;  %v892_v51 = vadd.f32 %v1579_v42, %v2108_v5  ;;  %v1539_v50 = vadd.f32 %v2089_v49, %v2085_v22  ;;  %v1587_v5 = vpop.f32.mrf.mxu1 }
 0x136   :  { %v1024_v1 = vadd.f32 %v2273_v32, %v921_v31  ;;  %v1014_v3 = vadd.f32 %v2274_v2, %v881_v34  ;;  %1409 = vst [vmem:[%s2253_s6 + $0x28] sm:$0xff] %v1386_v36   ;;  %v1039_v57 = vmul.f32 %v2106_v60, %v1016_v43  ;;  %v1111_v58 = vsel %vm1072_vm2, %v1056_v62, %v1095_v12 }
 0x137   :  { %vm1073_vm6 = vcmp.ge.f32.partialorder %v1057_v35, 0.0  ;;  %v1096_v52 = vmul.f32 %v2134_v39, %v1057_v35  ;;  %vm1081_vm7 = vcmp.ge.f32.partialorder %v1065_v59, 0.0  ;;  %v1104_v61 = vmul.f32 %v2134_v39, %v1065_v59 }
 0x138   :  { %v1047_v6 = vmul.f32 %v2106_v60, %v1024_v1  ;;  %v1119_v15 = vsel %vm1080_vm3, %v1064_v44, %v1103_v17  ;;  %v1037_v49 = vmul.f32 %v2106_v60, %v1014_v3  ;;  %v1017_v63 = vadd.f32 %v1341_v53, %v892_v51  ;;  %v915_v53 = vpop.f32.mrf.mxu1 }
 0x139   :  { %v1112_v22 = vsel %vm1073_vm6, %v1057_v35, %v1096_v52  ;;  %v1120_v48 = vsel %vm1081_vm7, %v1065_v59, %v1104_v61  ;;  %v1062_v0 = vadd.f32 %v2124_v9, %v1039_v57  ;;  %v2275_v62 = vunpack.c.l.bf16 %v2058_v29 }
 0x13a   :  { %v1361_v46 = vpack.c.bf16 %v1112_v22, %v1111_v58  ;;  %v1381_v11 = vpack.c.bf16 %v1120_v48, %v1119_v15  ;;  %v827_v25 = vadd.f32 %v1539_v50, %v1475_v45  ;;  %v787_v12 = vadd.f32 %v2099_v56, %v2095_v55 }
 0x13b   :  { %v1022_v7 = vadd.f32 %v2275_v62, %v913_v4  ;;  %v1337_v44 = vunpack.c.h.bf16 %v2053_v28  ;;  %v1070_v23 = vadd.f32 %v2124_v9, %v1047_v6  ;;  %v1040_v26 = vmul.f32 %v2106_v60, %v1017_v63 }
 0x13c   :  { %1362 = vst [vmem:[%s2253_s6] sm:$0xff] %v1361_v46   ;;  %1408 = vst [vmem:[%s2253_s6 + $0x20] sm:$0xff] %v1381_v11   ;;  %v924_v30 = vadd.f32 %v1587_v5, %v827_v25  ;;  %v884_v45 = vadd.f32 %v883_v10, %v787_v12  ;;  %v819_v55 = vadd.f32 %v2119_v8, %v2115_v47  ;;  %v1353_v16 = vunpack.c.h.bf16 %v2058_v29 }
 0x13d   :  { %v1101_v28 = vmul.f32 %v2134_v39, %v1062_v0  ;;  %v1060_v56 = vadd.f32 %v2124_v9, %v1037_v49  ;;  %v1045_v13 = vmul.f32 %v2106_v60, %v1022_v7  ;;  %v1063_v17 = vadd.f32 %v2124_v9, %v1040_v26 }
 0x13e   :  { %v1025_v37 = vadd.f32 %v1357_v54, %v924_v30  ;;  %v1015_v24 = vadd.f32 %v1337_v44, %v884_v45  ;;  %v916_v33 = vadd.f32 %v915_v53, %v819_v55  ;;  %vm1078_vm8 = vcmp.ge.f32.partialorder %v1062_v0, 0.0 }
 0x13f   :  { %vm1086_vm9 = vcmp.ge.f32.partialorder %v1070_v23, 0.0  ;;  %vm1079_vm10 = vcmp.ge.f32.partialorder %v1063_v17, 0.0  ;;  %v1102_v47 = vmul.f32 %v2134_v39, %v1063_v17  ;;  %v1109_v14 = vmul.f32 %v2134_v39, %v1070_v23 }
 0x140   :  { %v1048_v8 = vmul.f32 %v2106_v60, %v1025_v37  ;;  %v1038_v38 = vmul.f32 %v2106_v60, %v1015_v24  ;;  %v1099_v29 = vmul.f32 %v2134_v39, %v1060_v56  ;;  %v1068_v31 = vadd.f32 %v2124_v9, %v1045_v13 }
 0x141   :  { %v1023_v41 = vadd.f32 %v1353_v16, %v916_v33  ;;  %v1117_v27 = vsel %vm1078_vm8, %v1062_v0, %v1101_v28  ;;  %v1118_v54 = vsel %vm1079_vm10, %v1063_v17, %v1102_v47  ;;  %vm1076_vm11 = vcmp.ge.f32.partialorder %v1060_v56, 0.0 }
 0x142   :  { %v1071_v42 = vadd.f32 %v2124_v9, %v1048_v8  ;;  %v1061_v40 = vadd.f32 %v2124_v9, %v1038_v38  ;;  %v1376_v20 = vpack.c.bf16 %v1118_v54, %v1117_v27  ;;  %v1125_v36 = vsel %vm1086_vm9, %v1070_v23, %v1109_v14 }
 0x143   :  { %v1046_v18 = vmul.f32 %v2106_v60, %v1023_v41  ;;  %v1107_v35 = vmul.f32 %v2134_v39, %v1068_v31  ;;  %v1115_v43 = vsel %vm1076_vm11, %v1060_v56, %v1099_v29  ;;  %vm1084_vm14 = vcmp.ge.f32.partialorder %v1068_v31, 0.0 }
 0x144   :  { %vm1087_vm12 = vcmp.ge.f32.partialorder %v1071_v42, 0.0  ;;  %v1110_v21 = vmul.f32 %v2134_v39, %v1071_v42  ;;  %vm1077_vm13 = vcmp.ge.f32.partialorder %v1061_v40, 0.0  ;;  %v1100_v34 = vmul.f32 %v2134_v39, %v1061_v40  ;;  %1407 = vst [vmem:[%s2253_s6 + $0x18] sm:$0xff] %v1376_v20  }
 0x145   :  { %v1069_v19 = vadd.f32 %v2124_v9, %v1046_v18  ;;  %v1123_v3 = vsel %vm1084_vm14, %v1068_v31, %v1107_v35 }
 0x146   :  { %v1126_v32 = vsel %vm1087_vm12, %v1071_v42, %v1110_v21  ;;  %v1116_v60 = vsel %vm1077_vm13, %v1061_v40, %v1100_v34 }
 0x147   :  { %v1396_v1 = vpack.c.bf16 %v1126_v32, %v1125_v36  ;;  %v1371_v59 = vpack.c.bf16 %v1116_v60, %v1115_v43  ;;  %vm1085_vm15 = vcmp.ge.f32.partialorder %v1069_v19, 0.0  ;;  %v1108_v2 = vmul.f32 %v2134_v39, %v1069_v19 }
 0x149   :  { %1411 = vst [vmem:[%s2253_s6 + $0x38] sm:$0xff] %v1396_v1   ;;  %1406 = vst [vmem:[%s2253_s6 + $0x10] sm:$0xff] %v1371_v59   ;;  %v1124_v4 = vsel %vm1085_vm15, %v1069_v19, %v1108_v2 }
 0x14a   :  { %v1391_v9 = vpack.c.bf16 %v1124_v4, %v1123_v3 }
 0x14c   :  { %1410 = vst [vmem:[%s2253_s6 + $0x30] sm:$0xff] %v1391_v9  }

// kernel: espnet_encoder_forward.44
= control target key start
LH: loop header
LB: loop body
LE: loop exit
PB: predicated region body
PF: predicated region fallthrough
CT: control target
= control target key end

     0   :  { %s2700_s18 = smov 0   ;;  %s2702_s19 = smov 0   ;;  %s3319_s0 = inlined_call_operand.vmem [shape: bf16[128,1280], index: 0, kind: input, shape index: {}]   ;;  %s3320_s1 = inlined_call_operand.vmem [shape: bf16[1280,256], index: 1, kind: input, shape index: {}]   ;;  %s3321_s2 = inlined_call_operand.vmem [shape: f32[1,256], index: 2, kind: input, shape index: {}]   ;;  %s3322_s3 = inlined_call_operand.vmem [shape: f32[1,256], index: 3, kind: input, shape index: {}]   ;;  %s3323_s4 = inlined_call_operand.vmem [shape: f32[1,256], index: 4, kind: input, shape index: {}]   ;;  %s3324_s5 = inlined_call_operand.vmem [shape: bf16[128,256], index: 5, kind: output, shape index: {}]  }
   0x1   :  { %s2704_s20 = smov 0   ;;  %s2706_s21 = smov 0  }
   0x2   :  { %s2708_s22 = smov 0  }
   0x3 LB: > { %s27_s23 = sadd.s32 1, %s2662_s21  ;;  %p50_p1 = scmp.ne.s32.totalorder %s2654_s19, %s2650_s18  ;;  %s2666_s22 = sphi %s2708_s22, %s15_s22   ;;  %s2662_s21 = sphi %s2706_s21, %s3364_s21   ;;  %s2658_s20 = sphi %s2704_s20, %s3363_s20   ;;  %s2654_s19 = sphi %s2702_s19, %s3362_s19   ;;  %s2650_s18 = sphi %s2700_s18, %s3361_s18  }
   0x4   : > { %p28_p0 = scmp.ge.s32.totalorder %s27_s23, 2  ;;  %p51_p2 = scmp.eq.s32.totalorder %s2666_s22, 0 }
   0x5   : > { %s43_s25 = sadd.s32 1, %s2654_s19  ;;  %p2195_p5 = scmp.ge.s32.totalorder %s2666_s22, 2 }
   0x6   : > { %s3366_s23 = smov (%p28_p0, %s27_s23), 0  ;;  %p52_p3 = por %p51_p2, %p50_p1 }
   0x7   : > { %s39_s24 = ssub.s32 %s2662_s21, %s3366_s23  ;;  %234 = sbr.rel (%p2195_p5) target bundleno = 43 (0x2b), region = 28 }
   0x8   : > { %p41_p4 = scmp.eq.s32.totalorder %s39_s24, 0 }
   0xa   : > { %s2735_s26 = scalar_select %p41_p4, %s2654_s19, %s43_s25  }
   0xc   : > { %237 = sbr.rel (!%p52_p3) target bundleno = 43 (0x2b), region = 32  ;;  %s239_s27 = sand.u32 (%p52_p3), 1, %s2654_s19  }
   0xd   : > { %s2374_s28 = smul.u32 (%p52_p3), 20, %s2662_s21 }
   0xe   : > { %s2408_s29 = smul.u32 (%p52_p3), 320, %s239_s27 }
   0xf   : > { %s2743_s7 = scalar_lea.vmem (%p52_p3), %s3319_s0, %s2374_s28 }
  0x10   : > { %v262_v0 = vld [vmem:[%s2743_s7] sm:$0xff] (%p52_p3)  ;;  %v264_v1 = vld [vmem:[%s2743_s7 + $0x8] sm:$0xff] (%p52_p3)  ;;  %s2748_s8 = scalar_lea.vmem (%p52_p3), [#allocation3], %s2408_s29  ;;  %v268_v3 = vld [vmem:[%s2743_s7 + $0x30] sm:$0xff] (%p52_p3) }
  0x11   : > { %v266_v2 = vld [vmem:[%s2743_s7 + $0x28] sm:$0xff]  ;;  %263 = vst [vmem:[%s2748_s8] sm:$0xff] %v262_v0  ;;  %265 = vst [vmem:[%s2748_s8 + $0x8] sm:$0xff] %v264_v1  ;;  %v270_v4 = vld [vmem:[%s2743_s7 + $0x50] sm:$0xff] }
  0x12   : > { %267 = vst [vmem:[%s2748_s8 + $0x14] sm:$0xff] %v266_v2  ;;  %v272_v5 = vld [vmem:[%s2743_s7 + $0x58] sm:$0xff]  ;;  %269 = vst [vmem:[%s2748_s8 + $0x1c] sm:$0xff] %v268_v3  ;;  %v276_v7 = vld [vmem:[%s2743_s7 + $0x80] sm:$0xff] }
  0x13   : > { %271 = vst [vmem:[%s2748_s8 + $0x28] sm:$0xff] %v270_v4  ;;  %273 = vst [vmem:[%s2748_s8 + $0x30] sm:$0xff] %v272_v5  ;;  %v274_v6 = vld [vmem:[%s2743_s7 + $0x78] sm:$0xff]  ;;  %v278_v8 = vld [vmem:[%s2743_s7 + $0xa0] sm:$0xff] }
  0x14   : > { %275 = vst [vmem:[%s2748_s8 + $0x3c] sm:$0xff] %v274_v6  ;;  %277 = vst [vmem:[%s2748_s8 + $0x44] sm:$0xff] %v276_v7  ;;  %v280_v9 = vld [vmem:[%s2743_s7 + $0xa8] sm:$0xff]  ;;  %v284_v11 = vld [vmem:[%s2743_s7 + $0xd0] sm:$0xff] }
  0x15   : > { %279 = vst [vmem:[%s2748_s8 + $0x50] sm:$0xff] %v278_v8  ;;  %v282_v10 = vld [vmem:[%s2743_s7 + $0xc8] sm:$0xff]  ;;  %281 = vst [vmem:[%s2748_s8 + $0x58] sm:$0xff] %v280_v9  ;;  %v286_v12 = vld [vmem:[%s2743_s7 + $0xf0] sm:$0xff] }
  0x16   : > { %283 = vst [vmem:[%s2748_s8 + $0x64] sm:$0xff] %v282_v10  ;;  %285 = vst [vmem:[%s2748_s8 + $0x6c] sm:$0xff] %v284_v11  ;;  %v288_v13 = vld [vmem:[%s2743_s7 + $0xf8] sm:$0xff]  ;;  %v292_v15 = vld [vmem:[%s2743_s7 + $0x120] sm:$0xff] }
  0x17   : > { %v290_v14 = vld [vmem:[%s2743_s7 + $0x118] sm:$0xff]  ;;  %287 = vst [vmem:[%s2748_s8 + $0x78] sm:$0xff] %v286_v12  ;;  %289 = vst [vmem:[%s2748_s8 + $0x80] sm:$0xff] %v288_v13  ;;  %v294_v16 = vld [vmem:[%s2743_s7 + $0x140] sm:$0xff] }
  0x18   : > { %291 = vst [vmem:[%s2748_s8 + $0x8c] sm:$0xff] %v290_v14  ;;  %v296_v17 = vld [vmem:[%s2743_s7 + $0x148] sm:$0xff]  ;;  %293 = vst [vmem:[%s2748_s8 + $0x94] sm:$0xff] %v292_v15  ;;  %v300_v19 = vld [vmem:[%s2743_s7 + $0x170] sm:$0xff] }
  0x19   : > { %295 = vst [vmem:[%s2748_s8 + $0xa0] sm:$0xff] %v294_v16  ;;  %297 = vst [vmem:[%s2748_s8 + $0xa8] sm:$0xff] %v296_v17  ;;  %v298_v18 = vld [vmem:[%s2743_s7 + $0x168] sm:$0xff]  ;;  %v302_v20 = vld [vmem:[%s2743_s7 + $0x190] sm:$0xff] }
  0x1a   : > { %299 = vst [vmem:[%s2748_s8 + $0xb4] sm:$0xff] %v298_v18  ;;  %301 = vst [vmem:[%s2748_s8 + $0xbc] sm:$0xff] %v300_v19  ;;  %v304_v21 = vld [vmem:[%s2743_s7 + $0x198] sm:$0xff]  ;;  %v308_v23 = vld [vmem:[%s2743_s7 + $0x1c0] sm:$0xff] }
  0x1b   : > { %303 = vst [vmem:[%s2748_s8 + $0xc8] sm:$0xff] %v302_v20  ;;  %v306_v22 = vld [vmem:[%s2743_s7 + $0x1b8] sm:$0xff]  ;;  %305 = vst [vmem:[%s2748_s8 + $0xd0] sm:$0xff] %v304_v21  ;;  %v310_v24 = vld [vmem:[%s2743_s7 + $0x1e0] sm:$0xff] }
  0x1c   : > { %307 = vst [vmem:[%s2748_s8 + $0xdc] sm:$0xff] %v306_v22  ;;  %309 = vst [vmem:[%s2748_s8 + $0xe4] sm:$0xff] %v308_v23  ;;  %v312_v25 = vld [vmem:[%s2743_s7 + $0x1e8] sm:$0xff]  ;;  %v316_v27 = vld [vmem:[%s2743_s7 + $0x210] sm:$0xff] }
  0x1d   : > { %v314_v26 = vld [vmem:[%s2743_s7 + $0x208] sm:$0xff]  ;;  %311 = vst [vmem:[%s2748_s8 + $0xf0] sm:$0xff] %v310_v24  ;;  %313 = vst [vmem:[%s2748_s8 + $0xf8] sm:$0xff] %v312_v25  ;;  %v318_v28 = vld [vmem:[%s2743_s7 + $0x230] sm:$0xff] }
  0x1e   : > { %315 = vst [vmem:[%s2748_s8 + $0x104] sm:$0xff] %v314_v26  ;;  %v320_v29 = vld [vmem:[%s2743_s7 + $0x238] sm:$0xff]  ;;  %317 = vst [vmem:[%s2748_s8 + $0x10c] sm:$0xff] %v316_v27  ;;  %v324_v31 = vld [vmem:[%s2743_s7 + $0x260] sm:$0xff] }
  0x1f   : > { %319 = vst [vmem:[%s2748_s8 + $0x118] sm:$0xff] %v318_v28  ;;  %321 = vst [vmem:[%s2748_s8 + $0x120] sm:$0xff] %v320_v29  ;;  %v322_v30 = vld [vmem:[%s2743_s7 + $0x258] sm:$0xff]  ;;  %v2197_v32 = vld [vmem:[%s2743_s7 + $0x10] sm:$0xf] }
  0x20   : > { %323 = vst [vmem:[%s2748_s8 + $0x12c] sm:$0xff] %v322_v30  ;;  %325 = vst [vmem:[%s2748_s8 + $0x134] sm:$0xff] %v324_v31  ;;  %v2199_v33 = vld [vmem:[%s2743_s7 + $0x38] sm:$0xf]  ;;  %v2201_v34 = vld [vmem:[%s2743_s7 + $0x60] sm:$0xf] }
  0x21   : > { %2198 = vst [vmem:[%s2748_s8 + $0x10] sm:$0xf] %v2197_v32  ;;  %v2203_v35 = vld [vmem:[%s2743_s7 + $0x88] sm:$0xf]  ;;  %2200 = vst [vmem:[%s2748_s8 + $0x24] sm:$0xf] %v2199_v33 }
  0x22   : > { %2202 = vst [vmem:[%s2748_s8 + $0x38] sm:$0xf] %v2201_v34  ;;  %2204 = vst [vmem:[%s2748_s8 + $0x4c] sm:$0xf] %v2203_v35  ;;  %v2205_v36 = vld [vmem:[%s2743_s7 + $0xb0] sm:$0xf] }
  0x23   : > { %v2207_v37 = vld [vmem:[%s2743_s7 + $0xd8] sm:$0xf]  ;;  %v2209_v38 = vld [vmem:[%s2743_s7 + $0x100] sm:$0xf]  ;;  %2206 = vst [vmem:[%s2748_s8 + $0x60] sm:$0xf] %v2205_v36 }
  0x24   : > { %2208 = vst [vmem:[%s2748_s8 + $0x74] sm:$0xf] %v2207_v37  ;;  %2210 = vst [vmem:[%s2748_s8 + $0x88] sm:$0xf] %v2209_v38  ;;  %v2211_v39 = vld [vmem:[%s2743_s7 + $0x128] sm:$0xf] }
  0x25   : > { %v2213_v40 = vld [vmem:[%s2743_s7 + $0x150] sm:$0xf]  ;;  %v2215_v41 = vld [vmem:[%s2743_s7 + $0x178] sm:$0xf]  ;;  %2212 = vst [vmem:[%s2748_s8 + $0x9c] sm:$0xf] %v2211_v39 }
  0x26   : > { %2214 = vst [vmem:[%s2748_s8 + $0xb0] sm:$0xf] %v2213_v40  ;;  %2216 = vst [vmem:[%s2748_s8 + $0xc4] sm:$0xf] %v2215_v41  ;;  %v2217_v42 = vld [vmem:[%s2743_s7 + $0x1a0] sm:$0xf] }
  0x27   : > { %v2219_v43 = vld [vmem:[%s2743_s7 + $0x1c8] sm:$0xf]  ;;  %v2221_v44 = vld [vmem:[%s2743_s7 + $0x1f0] sm:$0xf]  ;;  %2218 = vst [vmem:[%s2748_s8 + $0xd8] sm:$0xf] %v2217_v42 }
  0x28   : > { %2220 = vst [vmem:[%s2748_s8 + $0xec] sm:$0xf] %v2219_v43  ;;  %2222 = vst [vmem:[%s2748_s8 + $0x100] sm:$0xf] %v2221_v44  ;;  %v2223_v45 = vld [vmem:[%s2743_s7 + $0x218] sm:$0xf] }
  0x29   : > { %v2225_v46 = vld [vmem:[%s2743_s7 + $0x240] sm:$0xf]  ;;  %v2227_v47 = vld [vmem:[%s2743_s7 + $0x268] sm:$0xf]  ;;  %2224 = vst [vmem:[%s2748_s8 + $0x114] sm:$0xf] %v2223_v45 }
  0x2a   : > { %2226 = vst [vmem:[%s2748_s8 + $0x128] sm:$0xf] %v2225_v46  ;;  %2228 = vst [vmem:[%s2748_s8 + $0x13c] sm:$0xf] %v2227_v47 }
  0x2b PF: > { %p2229_p6 = scmp.ge.s32.totalorder %s2666_s22, 1  ;;  %p385_p7 = scmp.lt.s32.totalorder %s2666_s22, 3 }
  0x2d   : > { %p386_p8 = pnand %p2229_p6, %p385_p7 }
  0x2f   : > { %389 = sbr.rel (%p386_p8) target bundleno = 493 (0x1ed), region = 62 }
  0x34   : > { %s392_s9 = sand.u32 1, %s2650_s18   ;;  %s448_s10 = smul.u32 80, %s2658_s20 }
  0x35   : > { %s2409_s11 = smul.u32 320, %s392_s9  ;;  %p2232_p10 = scmp.ne.s32.totalorder %s2658_s20, 0 }
  0x36   : > { %p450_p9 = scmp.lt.s32.totalorder %s448_s10, 159 }
  0x37   : > { %s2852_s16 = scalar_lea.vmem [#allocation3], %s2409_s11  ;;  %491 = sbr.rel (%p2232_p10) target bundleno = 77 (0x4d), region = 70 }
  0x38   : > { %s3368_s10 = smov (!%p450_p9, %s448_s10), 159 }
  0x39   : > { %s2375_s12 = sshll.u32 %s3368_s10, 3 }
  0x3a   : > { %s2850_s15 = scalar_lea.vmem %s3320_s1, %s2375_s12 }
  0x3c   : > { %v2668_v48 = vmov 0.0  }
  0x3d   : > { %492 = vst [vmem:[#allocation2 + $0xb0] sm:$0xff] %v2668_v48  ;;  %493 = vst [vmem:[#allocation2] sm:$0xff] %v2668_v48 }
  0x3e   : > { %494 = vst [vmem:[#allocation2 + $0xd8] sm:$0xff] %v2668_v48  ;;  %495 = vst [vmem:[#allocation2 + $0x18] sm:$0xff] %v2668_v48 }
  0x3f   : > { %496 = vst [vmem:[#allocation2 + $0x50] sm:$0xff] %v2668_v48  ;;  %497 = vst [vmem:[#allocation2 + $0x68] sm:$0xff] %v2668_v48 }
  0x40   : > { %498 = vst [vmem:[#allocation2 + $0x30] sm:$0xff] %v2668_v48  ;;  %499 = vst [vmem:[#allocation2 + $0x48] sm:$0xff] %v2668_v48 }
  0x41   : > { %500 = vst [vmem:[#allocation2 + $0x80] sm:$0xff] %v2668_v48  ;;  %501 = vst [vmem:[#allocation2 + $0x88] sm:$0xff] %v2668_v48 }
  0x42   : > { %502 = vst [vmem:[#allocation2 + $0xe8] sm:$0xff] %v2668_v48  ;;  %503 = vst [vmem:[#allocation2 + $0xb8] sm:$0xff] %v2668_v48 }
  0x43   : > { %504 = vst [vmem:[#allocation2 + $0x60] sm:$0xff] %v2668_v48  ;;  %505 = vst [vmem:[#allocation2 + $0xf0] sm:$0xff] %v2668_v48 }
  0x44   : > { %506 = vst [vmem:[#allocation2 + $0x8] sm:$0xff] %v2668_v48  ;;  %507 = vst [vmem:[#allocation2 + $0x78] sm:$0xff] %v2668_v48 }
  0x45   : > { %508 = vst [vmem:[#allocation2 + $0x38] sm:$0xff] %v2668_v48  ;;  %509 = vst [vmem:[#allocation2 + $0x58] sm:$0xff] %v2668_v48 }
  0x46   : > { %510 = vst [vmem:[#allocation2 + $0x40] sm:$0xff] %v2668_v48  ;;  %511 = vst [vmem:[#allocation2 + $0xc8] sm:$0xff] %v2668_v48 }
  0x47   : > { %512 = vst [vmem:[#allocation2 + $0xe0] sm:$0xff] %v2668_v48  ;;  %513 = vst [vmem:[#allocation2 + $0x90] sm:$0xff] %v2668_v48 }
  0x48   : > { %514 = vst [vmem:[#allocation2 + $0x70] sm:$0xff] %v2668_v48  ;;  %515 = vst [vmem:[#allocation2 + $0xc0] sm:$0xff] %v2668_v48 }
  0x49   : > { %516 = vst [vmem:[#allocation2 + $0xa8] sm:$0xff] %v2668_v48  ;;  %517 = vst [vmem:[#allocation2 + $0xd0] sm:$0xff] %v2668_v48 }
  0x4a   : > { %518 = vst [vmem:[#allocation2 + $0x10] sm:$0xff] %v2668_v48  ;;  %519 = vst [vmem:[#allocation2 + $0x28] sm:$0xff] %v2668_v48 }
  0x4b   : > { %520 = vst [vmem:[#allocation2 + $0xa0] sm:$0xff] %v2668_v48  ;;  %521 = vst [vmem:[#allocation2 + $0xf8] sm:$0xff] %v2668_v48 }
  0x4c   : > { %522 = vst [vmem:[#allocation2 + $0x20] sm:$0xff] %v2668_v48  ;;  %523 = vst [vmem:[#allocation2 + $0x98] sm:$0xff] %v2668_v48 }
  0x4d PF: > { %v2452_v49 = vld [vmem:[%s2850_s15 + $0x74] ss:$8 sps:$4 sm:$0xff]   ;;  %v2456_v51 = vld [vmem:[%s2850_s15 + $0x70] ss:$8 sps:$4 sm:$0xff]   ;;  %v2458_v53 = vld [vmem:[%s2850_s15 + $0x64] ss:$8 sps:$4 sm:$0xff]  }
  0x4e   : > { %v2454_v50 = vld [vmem:[%s2850_s15 + $0x174] ss:$8 sps:$4 sm:$0xff]   ;;  %1292 = vmatprep.subr.bf16.mxu0 %v2452_v49  ;;  %v2457_v52 = vld [vmem:[%s2850_s15 + $0x170] ss:$8 sps:$4 sm:$0xff]   ;;  %v2460_v54 = vld [vmem:[%s2850_s15 + $0x164] ss:$8 sps:$4 sm:$0xff]  }
  0x4f   : > { %1405 = vmatprep.subr.bf16.mxu1 %v2454_v50  ;;  %1293 = vmatpush1.bf16.msra.mxu0 %v2456_v51  ;;  %v2462_v55 = vld [vmem:[%s2850_s15 + $0x60] ss:$8 sps:$4 sm:$0xff]   ;;  %v2464_v57 = vld [vmem:[%s2850_s15 + $0x54] ss:$8 sps:$4 sm:$0xff]   ;;  %v2468_v59 = vld [vmem:[%s2850_s15 + $0x50] ss:$8 sps:$4 sm:$0xff]  }
  0x50   : > { %1406 = vmatpush1.bf16.msra.mxu1 %v2457_v52  ;;  %1294 = vmatprep.subr.bf16.mxu0 %v2458_v53  ;;  %v2463_v56 = vld [vmem:[%s2850_s15 + $0x160] ss:$8 sps:$4 sm:$0xff]   ;;  %v2466_v58 = vld [vmem:[%s2850_s15 + $0x154] ss:$8 sps:$4 sm:$0xff]   ;;  %v2469_v60 = vld [vmem:[%s2850_s15 + $0x150] ss:$8 sps:$4 sm:$0xff]  }
  0x51   : > { %1407 = vmatprep.subr.bf16.mxu1 %v2460_v54  ;;  %v2470_v61 = vld [vmem:[%s2850_s15 + $0x44] ss:$8 sps:$4 sm:$0xff]   ;;  %v2474_v63 = vld [vmem:[%s2850_s15 + $0x40] ss:$8 sps:$4 sm:$0xff]   ;;  %v2476_v1 = vld [vmem:[%s2850_s15 + $0x34] ss:$8 sps:$4 sm:$0xff]  }
  0x52   : > { %v2472_v62 = vld [vmem:[%s2850_s15 + $0x144] ss:$8 sps:$4 sm:$0xff]   ;;  %v2475_v0 = vld [vmem:[%s2850_s15 + $0x140] ss:$8 sps:$4 sm:$0xff]   ;;  %v2478_v2 = vld [vmem:[%s2850_s15 + $0x134] ss:$8 sps:$4 sm:$0xff]  }
  0x53   : > { %1295 = vmatpush1.bf16.msra.mxu0 %v2462_v55  ;;  %v2480_v3 = vld [vmem:[%s2850_s15 + $0x30] ss:$8 sps:$4 sm:$0xff]   ;;  %v2482_v5 = vld [vmem:[%s2850_s15 + $0x24] ss:$8 sps:$4 sm:$0xff]   ;;  %v2486_v7 = vld [vmem:[%s2850_s15 + $0x20] ss:$8 sps:$4 sm:$0xff]  }
  0x54   : > { %1408 = vmatpush1.bf16.msra.mxu1 %v2463_v56  ;;  %1296 = vmatprep.subr.bf16.mxu0 %v2464_v57  ;;  %v2481_v4 = vld [vmem:[%s2850_s15 + $0x130] ss:$8 sps:$4 sm:$0xff]   ;;  %v2484_v6 = vld [vmem:[%s2850_s15 + $0x124] ss:$8 sps:$4 sm:$0xff]   ;;  %v2487_v8 = vld [vmem:[%s2850_s15 + $0x120] ss:$8 sps:$4 sm:$0xff]  }
  0x55   : > { %1409 = vmatprep.subr.bf16.mxu1 %v2466_v58  ;;  %v2488_v9 = vld [vmem:[%s2850_s15 + $0x14] ss:$8 sps:$4 sm:$0xff]   ;;  %v2492_v11 = vld [vmem:[%s2850_s15 + $0x10] ss:$8 sps:$4 sm:$0xff]   ;;  %v2494_v13 = vld [vmem:[%s2850_s15 + $0x4] ss:$8 sps:$4 sm:$0xff]  }
  0x56   : > { %v2490_v10 = vld [vmem:[%s2850_s15 + $0x114] ss:$8 sps:$4 sm:$0xff]   ;;  %v2493_v12 = vld [vmem:[%s2850_s15 + $0x110] ss:$8 sps:$4 sm:$0xff]   ;;  %v2496_v14 = vld [vmem:[%s2850_s15 + $0x104] ss:$8 sps:$4 sm:$0xff]  }
  0x57   : > { %1297 = vmatpush1.bf16.msra.mxu0 %v2468_v59  ;;  %v2498_v15 = vld [vmem:[%s2850_s15] ss:$8 sps:$4 sm:$0xff]   ;;  %v2500_v17 = vld [vmem:[%s2850_s15 + $0xf4] ss:$8 sps:$4 sm:$0xff]   ;;  %v2504_v19 = vld [vmem:[%s2850_s15 + $0xf0] ss:$8 sps:$4 sm:$0xff]  }
  0x58   : > { %1410 = vmatpush1.bf16.msra.mxu1 %v2469_v60  ;;  %1298 = vmatprep.subr.bf16.mxu0 %v2470_v61  ;;  %v2499_v16 = vld [vmem:[%s2850_s15 + $0x100] ss:$8 sps:$4 sm:$0xff]   ;;  %v2502_v18 = vld [vmem:[%s2850_s15 + $0x1f4] ss:$8 sps:$4 sm:$0xff]   ;;  %v2505_v20 = vld [vmem:[%s2850_s15 + $0x1f0] ss:$8 sps:$4 sm:$0xff]  }
  0x59   : > { %1411 = vmatprep.subr.bf16.mxu1 %v2472_v62  ;;  %v2506_v21 = vld [vmem:[%s2850_s15 + $0xe4] ss:$8 sps:$4 sm:$0xff]   ;;  %v2510_v23 = vld [vmem:[%s2850_s15 + $0xe0] ss:$8 sps:$4 sm:$0xff]   ;;  %v2512_v25 = vld [vmem:[%s2850_s15 + $0xd4] ss:$8 sps:$4 sm:$0xff]  }
  0x5a   : > { %v2508_v22 = vld [vmem:[%s2850_s15 + $0x1e4] ss:$8 sps:$4 sm:$0xff]   ;;  %v2511_v24 = vld [vmem:[%s2850_s15 + $0x1e0] ss:$8 sps:$4 sm:$0xff]   ;;  %v2514_v26 = vld [vmem:[%s2850_s15 + $0x1d4] ss:$8 sps:$4 sm:$0xff]  }
  0x5b   : > { %1299 = vmatpush1.bf16.msra.mxu0 %v2474_v63  ;;  %v2516_v27 = vld [vmem:[%s2850_s15 + $0xd0] ss:$8 sps:$4 sm:$0xff]   ;;  %v2518_v29 = vld [vmem:[%s2850_s15 + $0xc4] ss:$8 sps:$4 sm:$0xff]   ;;  %v2522_v31 = vld [vmem:[%s2850_s15 + $0xc0] ss:$8 sps:$4 sm:$0xff]  }
  0x5c   : > { %1412 = vmatpush1.bf16.msra.mxu1 %v2475_v0  ;;  %1300 = vmatprep.subr.bf16.mxu0 %v2476_v1  ;;  %v2517_v28 = vld [vmem:[%s2850_s15 + $0x1d0] ss:$8 sps:$4 sm:$0xff]   ;;  %v2520_v30 = vld [vmem:[%s2850_s15 + $0x1c4] ss:$8 sps:$4 sm:$0xff]   ;;  %v2523_v32 = vld [vmem:[%s2850_s15 + $0x1c0] ss:$8 sps:$4 sm:$0xff]  }
  0x5d   : > { %1413 = vmatprep.subr.bf16.mxu1 %v2478_v2  ;;  %v2524_v33 = vld [vmem:[%s2850_s15 + $0xb4] ss:$8 sps:$4 sm:$0xff]   ;;  %v2550_v34 = vld [vmem:[%s2852_s16 + $0x4] ss:$20 sps:$4 sm:$0xff]   ;;  %v2553_v36 = vld [vmem:[%s2852_s16 + $0xc] ss:$20 sps:$4 sm:$0xff]  }
  0x5e   : > { %v2526_v35 = vld [vmem:[%s2850_s15 + $0x1b4] ss:$8 sps:$4 sm:$0xff]   ;;  %1324 = vmatprep.mubr.bf16.mxu0 %v2550_v34  ;;  %v2528_v37 = vld [vmem:[%s2850_s15 + $0xb0] ss:$8 sps:$4 sm:$0xff]   ;;  %1437 = vmatprep.mubr.bf16.mxu1 %v2553_v36  ;;  %v2530_v39 = vld [vmem:[%s2850_s15 + $0xa4] ss:$8 sps:$4 sm:$0xff]  }
  0x5f   : > { %1301 = vmatpush1.bf16.msra.mxu0 %v2480_v3  ;;  %v2529_v38 = vld [vmem:[%s2850_s15 + $0x1b0] ss:$8 sps:$4 sm:$0xff]   ;;  %v2532_v40 = vld [vmem:[%s2850_s15 + $0x1a4] ss:$8 sps:$4 sm:$0xff]   ;;  %v2534_v41 = vld [vmem:[%s2850_s15 + $0xa0] ss:$8 sps:$4 sm:$0xff]  }
  0x60   : > { %1414 = vmatpush1.bf16.msra.mxu1 %v2481_v4  ;;  %1302 = vmatprep.subr.bf16.mxu0 %v2482_v5  ;;  %v2535_v42 = vld [vmem:[%s2850_s15 + $0x1a0] ss:$8 sps:$4 sm:$0xff]   ;;  %v2536_v43 = vld [vmem:[%s2850_s15 + $0x94] ss:$8 sps:$4 sm:$0xff]   ;;  %v2540_v45 = vld [vmem:[%s2850_s15 + $0x90] ss:$8 sps:$4 sm:$0xff]  }
  0x61   : > { %1415 = vmatprep.subr.bf16.mxu1 %v2484_v6  ;;  %v2538_v44 = vld [vmem:[%s2850_s15 + $0x194] ss:$8 sps:$4 sm:$0xff]   ;;  %v2541_v46 = vld [vmem:[%s2850_s15 + $0x190] ss:$8 sps:$4 sm:$0xff]   ;;  %v2542_v47 = vld [vmem:[%s2850_s15 + $0x84] ss:$8 sps:$4 sm:$0xff]  }
  0x62   : > { %v2544_v48 = vld [vmem:[%s2850_s15 + $0x184] ss:$8 sps:$4 sm:$0xff]   ;;  %v2546_v49 = vld [vmem:[%s2850_s15 + $0x80] ss:$8 sps:$4 sm:$0xff]   ;;  %v2556_v51 = vld [vmem:[%s2850_s15 + $0x274] ss:$8 sps:$4 sm:$0xff]  }
  0x63   : > { %1303 = vmatpush1.bf16.msra.mxu0 %v2486_v7  ;;  %v2547_v50 = vld [vmem:[%s2850_s15 + $0x180] ss:$8 sps:$4 sm:$0xff]   ;;  %v2554_v54 = vld [vmem:[%s2850_s15 + $0x270] ss:$8 sps:$4 sm:$0xff]   ;;  %v2565_v57 = vld [vmem:[%s2850_s15 + $0x264] ss:$8 sps:$4 sm:$0xff]  }
  0x64   : > { %1416 = vmatpush1.bf16.msra.mxu1 %v2487_v8  ;;  %1304 = vmatprep.subr.bf16.mxu0 %v2488_v9  ;;  %v2548_v52 = vld [vmem:[%s2852_s16] ss:$20 sps:$4 sm:$0xff]   ;;  %v2551_v53 = vld [vmem:[%s2852_s16 + $0x8] ss:$20 sps:$4 sm:$0xff]   ;;  %v2562_v61 = vld [vmem:[%s2852_s16 + $0x30] ss:$20 sps:$4 sm:$0xff]  }
  0x65   : > { %1417 = vmatprep.subr.bf16.mxu1 %v2490_v10  ;;  %v2557_v55 = vld [vmem:[%s2852_s16 + $0x2c] ss:$20 sps:$4 sm:$0xff]   ;;  %v2559_v56 = vld [vmem:[%s2852_s16 + $0x34] ss:$20 sps:$4 sm:$0xff]   ;;  %v2568_v63 = vld [vmem:[%s2852_s16 + $0x5c] ss:$20 sps:$4 sm:$0xff]  }
  0x66   : > { %v2563_v58 = vld [vmem:[%s2850_s15 + $0x260] ss:$8 sps:$4 sm:$0xff]   ;;  %v2574_v59 = vld [vmem:[%s2850_s15 + $0x254] ss:$8 sps:$4 sm:$0xff]   ;;  %v2572_v0 = vld [vmem:[%s2850_s15 + $0x250] ss:$8 sps:$4 sm:$0xff]  }
  0x67   : > { %1305 = vmatpush1.bf16.msra.mxu0 %v2492_v11  ;;  %v2561_v60 = vld [vmem:[%s2852_s16 + $0x28] ss:$20 sps:$4 sm:$0xff]   ;;  %v2583_v1 = vld [vmem:[%s2850_s15 + $0x244] ss:$8 sps:$4 sm:$0xff]   ;;  %v2590_v8 = vld [vmem:[%s2850_s15 + $0x230] ss:$8 sps:$4 sm:$0xff]  }
  0x68   : > { %1418 = vmatpush1.bf16.msra.mxu1 %v2493_v12  ;;  %1306 = vmatprep.subr.bf16.mxu0 %v2494_v13  ;;  %v2566_v62 = vld [vmem:[%s2852_s16 + $0x54] ss:$20 sps:$4 sm:$0xff]   ;;  %v2570_v2 = vld [vmem:[%s2852_s16 + $0x50] ss:$20 sps:$4 sm:$0xff]   ;;  %v2571_v3 = vld [vmem:[%s2852_s16 + $0x58] ss:$20 sps:$4 sm:$0xff]  }
  0x69   : > { %1419 = vmatprep.subr.bf16.mxu1 %v2496_v14  ;;  %v2581_v4 = vld [vmem:[%s2850_s15 + $0x240] ss:$8 sps:$4 sm:$0xff]   ;;  %v2592_v5 = vld [vmem:[%s2850_s15 + $0x234] ss:$8 sps:$4 sm:$0xff]   ;;  %v2577_v7 = vld [vmem:[%s2852_s16 + $0x84] ss:$20 sps:$4 sm:$0xff]  }
  0x6a   : > { %v2575_v6 = vld [vmem:[%s2852_s16 + $0x7c] ss:$20 sps:$4 sm:$0xff]   ;;  %v2601_v9 = vld [vmem:[%s2850_s15 + $0x224] ss:$8 sps:$4 sm:$0xff]   ;;  %v2599_v10 = vld [vmem:[%s2850_s15 + $0x220] ss:$8 sps:$4 sm:$0xff]  }
  0x6b   : > { %1307 = vmatpush1.bf16.msra.mxu0 %v2498_v15  ;;  %v2610_v11 = vld [vmem:[%s2850_s15 + $0x214] ss:$8 sps:$4 sm:$0xff]   ;;  %v2579_v12 = vld [vmem:[%s2852_s16 + $0x78] ss:$20 sps:$4 sm:$0xff]   ;;  %v2620_v34 = vld [vmem:[%s2852_s16 + $0x10] ss:$20 sps:$4 sm:$0xff]  }
  0x6c   : > { %1420 = vmatpush1.bf16.msra.mxu1 %v2499_v16  ;;  %1308 = vmatprep.subr.bf16.mxu0 %v2500_v17  ;;  %v2580_v13 = vld [vmem:[%s2852_s16 + $0x80] ss:$20 sps:$4 sm:$0xff]   ;;  %v2584_v14 = vld [vmem:[%s2852_s16 + $0xa4] ss:$20 sps:$4 sm:$0xff]   ;;  %p2353_p11 = scmp.ne.s32.totalorder %s2658_s20, 1 }
  0x6d   : > { %1421 = vmatprep.subr.bf16.mxu1 %v2502_v18  ;;  %v2586_v15 = vld [vmem:[%s2852_s16 + $0xac] ss:$20 sps:$4 sm:$0xff]   ;;  %v2608_v16 = vld [vmem:[%s2850_s15 + $0x210] ss:$8 sps:$4 sm:$0xff]  }
  0x6e   : > { %v2619_v17 = vld [vmem:[%s2850_s15 + $0x204] ss:$8 sps:$4 sm:$0xff]   ;;  %v2617_v18 = vld [vmem:[%s2850_s15 + $0x200] ss:$8 sps:$4 sm:$0xff]  }
  0x6f   : > { %1309 = vmatpush2.bf16.msra.mxu0 %v2504_v19  ;;  %v2588_v19 = vld [vmem:[%s2852_s16 + $0xa0] ss:$20 sps:$4 sm:$0xff]   ;;  %v2622_v36 = vld [vmem:[%s2852_s16 + $0x38] ss:$20 sps:$4 sm:$0xff]  }
  0x70   : > { %1422 = vmatpush2.bf16.msra.mxu1 %v2505_v20  ;;  %1310 = vmatprep.subr.bf16.mxu0 %v2506_v21  ;;  %v2589_v20 = vld [vmem:[%s2852_s16 + $0xa8] ss:$20 sps:$4 sm:$0xff]   ;;  %v2593_v21 = vld [vmem:[%s2852_s16 + $0xcc] ss:$20 sps:$4 sm:$0xff]  }
  0x71   : > { %1423 = vmatprep.subr.bf16.mxu1 %v2508_v22  ;;  %v2595_v22 = vld [vmem:[%s2852_s16 + $0xd4] ss:$20 sps:$4 sm:$0xff]  }
  0x73   : > { %1311 = vmatpush2.bf16.msra.mxu0 %v2510_v23  ;;  %v2597_v23 = vld [vmem:[%s2852_s16 + $0xc8] ss:$20 sps:$4 sm:$0xff]  }
  0x74   : > { %1424 = vmatpush2.bf16.msra.mxu1 %v2511_v24  ;;  %1312 = vmatprep.subr.bf16.mxu0 %v2512_v25  ;;  %v2598_v24 = vld [vmem:[%s2852_s16 + $0xd0] ss:$20 sps:$4 sm:$0xff]   ;;  %v2602_v25 = vld [vmem:[%s2852_s16 + $0xf4] ss:$20 sps:$4 sm:$0xff]  }
  0x75   : > { %1425 = vmatprep.subr.bf16.mxu1 %v2514_v26  ;;  %v2604_v26 = vld [vmem:[%s2852_s16 + $0xfc] ss:$20 sps:$4 sm:$0xff]  }
  0x77   : > { %1313 = vmatpush2.bf16.msra.mxu0 %v2516_v27  ;;  %v2606_v27 = vld [vmem:[%s2852_s16 + $0xf0] ss:$20 sps:$4 sm:$0xff]  }
  0x78   : > { %1426 = vmatpush2.bf16.msra.mxu1 %v2517_v28  ;;  %1314 = vmatprep.subr.bf16.mxu0 %v2518_v29  ;;  %v2607_v28 = vld [vmem:[%s2852_s16 + $0xf8] ss:$20 sps:$4 sm:$0xff]   ;;  %v2611_v29 = vld [vmem:[%s2852_s16 + $0x11c] ss:$20 sps:$4 sm:$0xff]  }
  0x79   : > { %1427 = vmatprep.subr.bf16.mxu1 %v2520_v30  ;;  %v2613_v30 = vld [vmem:[%s2852_s16 + $0x124] ss:$20 sps:$4 sm:$0xff]  }
  0x7b   : > { %1315 = vmatpush2.bf16.msra.mxu0 %v2522_v31  ;;  %v2615_v31 = vld [vmem:[%s2852_s16 + $0x118] ss:$20 sps:$4 sm:$0xff]  }
  0x7c   : > { %1428 = vmatpush2.bf16.msra.mxu1 %v2523_v32  ;;  %1316 = vmatprep.subr.bf16.mxu0 %v2524_v33  ;;  %v2616_v32 = vld [vmem:[%s2852_s16 + $0x120] ss:$20 sps:$4 sm:$0xff]   ;;  %v2669_v33 = vmov 0  }
  0x7d   : > { %1429 = vmatprep.subr.bf16.mxu1 %v2526_v35  ;;  %v2621_v35 = vld [vmem:[%s2852_s16 + $0xb0] ss:$20 sps:$4 sm:$0xff]  }
  0x7f   : > { %1317 = vmatpush2.bf16.msra.mxu0 %v2528_v37  ;;  %v2623_v37 = vld [vmem:[%s2852_s16 + $0xd8] ss:$20 sps:$4 sm:$0xff]  }
  0x80   : > { %1430 = vmatpush2.bf16.msra.mxu1 %v2529_v38  ;;  %1318 = vmatprep.subr.bf16.mxu0 %v2530_v39  ;;  %v2624_v38 = vld [vmem:[%s2852_s16 + $0x60] ss:$20 sps:$4 sm:$0xff]  }
  0x81   : > { %1431 = vmatprep.subr.bf16.mxu1 %v2532_v40  ;;  %v2625_v39 = vld [vmem:[%s2852_s16 + $0x100] ss:$20 sps:$4 sm:$0xff]   ;;  %v2626_v40 = vld [vmem:[%s2852_s16 + $0x88] ss:$20 sps:$4 sm:$0xff]  }
  0x83   : > { %1319 = vmatpush2.bf16.msra.mxu0 %v2534_v41  ;;  %v2627_v41 = vld [vmem:[%s2852_s16 + $0x128] ss:$20 sps:$4 sm:$0xff]  }
  0x84   : > { %1432 = vmatpush2.bf16.msra.mxu1 %v2535_v42  ;;  %1320 = vmatprep.subr.bf16.mxu0 %v2536_v43 }
  0x85   : > { %1433 = vmatprep.subr.bf16.mxu1 %v2538_v44 }
  0x87   : > { %1321 = vmatpush2.bf16.msra.mxu0 %v2540_v45 }
  0x88   : > { %1434 = vmatpush2.bf16.msra.mxu1 %v2541_v46  ;;  %1322 = vmatprep.subr.bf16.mxu0 %v2542_v47 }
  0x89   : > { %1435 = vmatprep.subr.bf16.mxu1 %v2544_v48 }
  0x8b   : > { %1323 = vmatpush2.bf16.msra.mxu0 %v2546_v49 }
  0x8c   : > { %1436 = vmatpush2.bf16.msra.mxu1 %v2547_v50  ;;  %1518 = vmatprep.subr.bf16.mxu0 %v2556_v51 }
  0x8d   : > { %2392 = vmatprep.subr.bf16.mxu1 %v2556_v51 }
  0x8e   : > { %1325 = vmatmul.mubr.bf16.vlgmr.msra.gmra.mxu0 %v2548_v52 }
  0x8f   : > { %1438 = vmatmul.mubr.bf16.vlgmr.msra.gmra.mxu1 %v2551_v53  ;;  %1519 = vmatpush1.bf16.msra.mxu0 %v2554_v54 }
  0x90   : > { %2400 = vmatpush1.bf16.msra.mxu1 %v2554_v54  ;;  %1334 = vmatprep.mubr.bf16.mxu0 %v2557_v55 }
  0x91   : > { %1447 = vmatprep.mubr.bf16.mxu1 %v2559_v56  ;;  %1520 = vmatprep.subr.bf16.mxu0 %v2565_v57 }
  0x92   : > { %2393 = vmatprep.subr.bf16.mxu1 %v2565_v57 }
  0x93   : > { %1521 = vmatpush1.bf16.msra.mxu0 %v2563_v58 }
  0x94   : > { %2401 = vmatpush1.bf16.msra.mxu1 %v2563_v58  ;;  %1522 = vmatprep.subr.bf16.mxu0 %v2574_v59 }
  0x95   : > { %2394 = vmatprep.subr.bf16.mxu1 %v2574_v59 }
  0x96   : > { %1335 = vmatmul.mubr.bf16.gmra.mxu0 %v2561_v60 }
  0x97   : > { %1448 = vmatmul.mubr.bf16.gmra.mxu1 %v2562_v61  ;;  %1344 = vmatprep.mubr.bf16.mxu0 %v2566_v62 }
  0x98   : > { %1457 = vmatprep.mubr.bf16.mxu1 %v2568_v63  ;;  %1523 = vmatpush1.bf16.msra.mxu0 %v2572_v0 }
  0x99   : > { %2402 = vmatpush1.bf16.msra.mxu1 %v2572_v0  ;;  %1524 = vmatprep.subr.bf16.mxu0 %v2583_v1 }
  0x9a   : > { %2395 = vmatprep.subr.bf16.mxu1 %v2583_v1 }
  0x9c   : > { %1525 = vmatpush1.bf16.msra.mxu0 %v2581_v4 }
  0x9d   : > { %2403 = vmatpush1.bf16.msra.mxu1 %v2581_v4  ;;  %1526 = vmatprep.subr.bf16.mxu0 %v2592_v5 }
  0x9e   : > { %2396 = vmatprep.subr.bf16.mxu1 %v2592_v5  ;;  %1345 = vmatmul.mubr.bf16.gmra.mxu0 %v2570_v2 }
  0x9f   : > { %1458 = vmatmul.mubr.bf16.gmra.mxu1 %v2571_v3  ;;  %1354 = vmatprep.mubr.bf16.mxu0 %v2575_v6 }
  0xa0   : > { %1467 = vmatprep.mubr.bf16.mxu1 %v2577_v7  ;;  %1527 = vmatpush1.bf16.msra.mxu0 %v2590_v8 }
  0xa1   : > { %2404 = vmatpush1.bf16.msra.mxu1 %v2590_v8  ;;  %1528 = vmatprep.subr.bf16.mxu0 %v2601_v9 }
  0xa2   : > { %2397 = vmatprep.subr.bf16.mxu1 %v2601_v9 }
  0xa4   : > { %1529 = vmatpush1.bf16.msra.mxu0 %v2599_v10 }
  0xa5   : > { %2405 = vmatpush1.bf16.msra.mxu1 %v2599_v10  ;;  %1530 = vmatprep.subr.bf16.mxu0 %v2610_v11 }
  0xa6   : > { %2398 = vmatprep.subr.bf16.mxu1 %v2610_v11  ;;  %1355 = vmatmul.mubr.bf16.gmra.mxu0 %v2579_v12 }
  0xa7   : > { %1468 = vmatmul.mubr.bf16.gmra.mxu1 %v2580_v13  ;;  %1364 = vmatprep.mubr.bf16.mxu0 %v2584_v14 }
  0xa8   : > { %1477 = vmatprep.mubr.bf16.mxu1 %v2586_v15  ;;  %1531 = vmatpush1.bf16.msra.mxu0 %v2608_v16 }
  0xa9   : > { %2406 = vmatpush1.bf16.msra.mxu1 %v2608_v16  ;;  %1532 = vmatprep.subr.bf16.mxu0 %v2619_v17 }
  0xaa   : > { %2399 = vmatprep.subr.bf16.mxu1 %v2619_v17 }
  0xac   : > { %1533 = vmatpush1.bf16.msra.mxu0 %v2617_v18 }
  0xad   : > { %2407 = vmatpush1.bf16.msra.mxu1 %v2617_v18 }
  0xae   : > { %1365 = vmatmul.mubr.bf16.gmra.mxu0 %v2588_v19 }
  0xaf   : > { %1478 = vmatmul.mubr.bf16.gmra.mxu1 %v2589_v20  ;;  %1374 = vmatprep.mubr.bf16.mxu0 %v2593_v21 }
  0xb0   : > { %1487 = vmatprep.mubr.bf16.mxu1 %v2595_v22 }
  0xb6   : > { %1375 = vmatmul.mubr.bf16.gmra.mxu0 %v2597_v23 }
  0xb7   : > { %1488 = vmatmul.mubr.bf16.gmra.mxu1 %v2598_v24  ;;  %1384 = vmatprep.mubr.bf16.mxu0 %v2602_v25 }
  0xb8   : > { %1497 = vmatprep.mubr.bf16.mxu1 %v2604_v26 }
  0xbe   : > { %1385 = vmatmul.mubr.bf16.gmra.mxu0 %v2606_v27 }
  0xbf   : > { %1498 = vmatmul.mubr.bf16.gmra.mxu1 %v2607_v28  ;;  %1394 = vmatprep.mubr.bf16.mxu0 %v2611_v29 }
  0xc0   : > { %1507 = vmatprep.mubr.bf16.mxu1 %v2613_v30 }
  0xc6   : > { %1395 = vmatmul.mubr.bf16.gmra.mxu0 %v2615_v31 }
  0xc7   : > { %1508 = vmatmul.mubr.bf16.gmra.mxu1 %v2616_v32  ;;  %1550 = vmatprep.mubr.bf16.mxu0 %v2669_v33 }
  0xc8   : > { %1590 = vmatprep.mubr.bf16.mxu1 %v2669_v33 }
  0xce   : > { %1551 = vmatmul.mubr.bf16.vlgmr.msra.gmra.mxu0 %v2620_v34 }
  0xcf   : > { %1591 = vmatmul.mubr.bf16.vlgmr.msra.gmra.mxu1 %v2621_v35  ;;  %1560 = vmatprep.mubr.bf16.mxu0 %v2669_v33 }
  0xd0   : > { %1600 = vmatprep.mubr.bf16.mxu1 %v2669_v33 }
  0xd6   : > { %1561 = vmatmul.mubr.bf16.gmra.mxu0 %v2622_v36 }
  0xd7   : > { %1601 = vmatmul.mubr.bf16.gmra.mxu1 %v2623_v37  ;;  %1570 = vmatprep.mubr.bf16.mxu0 %v2669_v33 }
  0xd8   : > { %1610 = vmatprep.mubr.bf16.mxu1 %v2669_v33 }
  0xde   : > { %1571 = vmatmul.mubr.bf16.gmra.mxu0 %v2624_v38 }
  0xdf   : > { %1611 = vmatmul.mubr.bf16.gmra.mxu1 %v2625_v39  ;;  %1580 = vmatprep.mubr.bf16.mxu0 %v2669_v33 }
  0xe0   : > { %1620 = vmatprep.mubr.bf16.mxu1 %v2669_v33 }
  0xe6   : > { %1581 = vmatmul.mubr.bf16.gmra.mxu0 %v2626_v40 }
  0xe7   : > { %1621 = vmatmul.mubr.bf16.gmra.mxu1 %v2627_v41 }
 0x14e   : > { %v2975_v42 = vpop.f32.mrf.mxu0 }
 0x14f   : > { %v2977_v43 = vpop.f32.mrf.mxu1 }
 0x150   : > { %v2979_v44 = vpop.f32.mrf.mxu0 }
 0x151   : > { %v2981_v45 = vpop.f32.mrf.mxu1 }
 0x152   : > { %v2983_v46 = vpop.f32.mrf.mxu0 }
 0x153   : > { %v2985_v47 = vpop.f32.mrf.mxu1 }
 0x154   : > { %v2987_v48 = vpop.f32.mrf.mxu0 }
 0x155   : > { %v2989_v49 = vpop.f32.mrf.mxu1 }
 0x156   : > { %v2991_v50 = vpop.f32.mrf.mxu0 }
 0x157   : > { %v2993_v51 = vpop.f32.mrf.mxu1 }
 0x158   : > { %v2995_v52 = vpop.f32.mrf.mxu0 }
 0x159   : > { %v2997_v53 = vpop.f32.mrf.mxu1 }
 0x15a   : > { %v2999_v54 = vpop.f32.mrf.mxu0 }
 0x15b   : > { %v3001_v55 = vpop.f32.mrf.mxu1 }
 0x15c   : > { %v3003_v56 = vpop.f32.mrf.mxu0 }
 0x15d   : > { %v3005_v57 = vpop.f32.mrf.mxu1 }
 0x15e   : > { %v3007_v58 = vpop.f32.mrf.mxu0 }
 0x15f   : > { %v3009_v59 = vpop.f32.mrf.mxu1 }
 0x160   : > { %v3011_v60 = vpop.f32.mrf.mxu0 }
 0x161   : > { %v3013_v61 = vpop.f32.mrf.mxu1 }
 0x162   : > { %v3015_v62 = vpop.f32.mrf.mxu0 }
 0x163   : > { %v3017_v63 = vpop.f32.mrf.mxu1 }
 0x164   : > { %v3019_v0 = vpop.f32.mrf.mxu0 }
 0x165   : > { %v3021_v1 = vpop.f32.mrf.mxu1 }
 0x166   : > { %v3023_v2 = vpop.f32.mrf.mxu0 }
 0x167   : > { %3325 = vst [vmem:[#allocation4_spill] sm:$0xff] %v3023_v2  ;;  %v3025_v3 = vpop.f32.mrf.mxu1 }
 0x168   : > { %3326 = vst [vmem:[#allocation5_spill] sm:$0xff] %v3025_v3  ;;  %v3027_v4 = vpop.f32.mrf.mxu0  ;;  %v541_v3 = vld [vmem:[#allocation2 + $0x58] sm:$0xff] }
 0x169   : > { %3327 = vst [vmem:[#allocation6_spill] sm:$0xff] %v3027_v4  ;;  %v3029_v5 = vpop.f32.mrf.mxu1 }
 0x16a   : > { %3328 = vst [vmem:[#allocation7_spill] sm:$0xff] %v3029_v5  ;;  %v3031_v6 = vpop.f32.mrf.mxu0  ;;  %v540_v5 = vld [vmem:[#allocation2 + $0x38] sm:$0xff] }
 0x16b   : > { %3329 = vst [vmem:[#allocation8_spill] sm:$0xff] %v3031_v6  ;;  %v3033_v7 = vpop.f32.mrf.mxu1 }
 0x16c   : > { %3330 = vst [vmem:[#allocation9_spill] sm:$0xff] %v3033_v7  ;;  %v3035_v8 = vpop.f32.mrf.mxu0  ;;  %v524_v7 = vld [vmem:[#allocation2 + $0xb0] sm:$0xff] }
 0x16d   : > { %3331 = vst [vmem:[#allocation10_spill] sm:$0xff] %v3035_v8  ;;  %v3037_v9 = vpop.f32.mrf.mxu1 }
 0x16e   : > { %3332 = vst [vmem:[#allocation11_spill] sm:$0xff] %v3037_v9  ;;  %v1366_v10 = vpop.f32.mrf.mxu0  ;;  %v1440_v9 = vadd.f32 %v2977_v43, %v2975_v42 }
 0x16f   : > { %v1479_v11 = vpop.f32.mrf.mxu1 }
 0x170   : > { %v1368_v12 = vpop.f32.mrf.mxu0  ;;  %v1480_v8 = vadd.f32 %v1479_v11, %v1366_v10 }
 0x171   : > { %v1481_v13 = vpop.f32.mrf.mxu1 }
 0x172   : > { %v1370_v14 = vpop.f32.mrf.mxu0 }
 0x173   : > { %v1483_v15 = vpop.f32.mrf.mxu1 }
 0x174   : > { %v1372_v16 = vpop.f32.mrf.mxu0 }
 0x175   : > { %v1485_v17 = vpop.f32.mrf.mxu1 }
 0x176   : > { %v1376_v18 = vpop.f32.mrf.mxu0 }
 0x177   : > { %v1489_v19 = vpop.f32.mrf.mxu1 }
 0x178   : > { %v3039_v20 = vpop.f32.mrf.mxu0 }
 0x179   : > { %v3041_v21 = vpop.f32.mrf.mxu1 }
 0x17a   : > { %v3043_v22 = vpop.f32.mrf.mxu0 }
 0x17b   : > { %v3045_v23 = vpop.f32.mrf.mxu1 }
 0x17c   : > { %v3047_v24 = vpop.f32.mrf.mxu0 }
 0x17d   : > { %v3049_v25 = vpop.f32.mrf.mxu1 }
 0x17e   : > { %v3051_v26 = vpop.f32.mrf.mxu0 }
 0x17f   : > { %v3053_v27 = vpop.f32.mrf.mxu1 }
 0x180   : > { %v3055_v28 = vpop.f32.mrf.mxu0 }
 0x181   : > { %v3057_v29 = vpop.f32.mrf.mxu1 }
 0x182   : > { %v3059_v30 = vpop.f32.mrf.mxu0 }
 0x183   : > { %v3061_v31 = vpop.f32.mrf.mxu1 }
 0x184   : > { %v3063_v32 = vpop.f32.mrf.mxu0 }
 0x185   : > { %3333 = vst [vmem:[#allocation12_spill] sm:$0xff] %v3063_v32  ;;  %v3065_v33 = vpop.f32.mrf.mxu1  ;;  %v1486_v32 = vadd.f32 %v1485_v17, %v1372_v16  ;;  %v1452_v17 = vadd.f32 %v2997_v53, %v2995_v52  ;;  %v529_v52 = vld [vmem:[#allocation2 + $0x68] sm:$0xff] }
 0x186   : > { %3334 = vst [vmem:[#allocation13_spill] sm:$0xff] %v3065_v33  ;;  %v3067_v34 = vpop.f32.mrf.mxu0  ;;  %v1446_v33 = vadd.f32 %v2989_v49, %v2987_v48 }
 0x187   : > { %3335 = vst [vmem:[#allocation14_spill] sm:$0xff] %v3067_v34  ;;  %v3069_v35 = vpop.f32.mrf.mxu1  ;;  %v525_v34 = vld [vmem:[#allocation2] sm:$0xff] }
 0x188   : > { %3336 = vst [vmem:[#allocation15_spill] sm:$0xff] %v3069_v35  ;;  %v3071_v36 = vpop.f32.mrf.mxu0 }
 0x189   : > { %3337 = vst [vmem:[#allocation16_spill] sm:$0xff] %v3071_v36  ;;  %v3073_v37 = vpop.f32.mrf.mxu1  ;;  %v1442_v36 = vadd.f32 %v2981_v45, %v2979_v44  ;;  %v526_v44 = vld [vmem:[#allocation2 + $0xd8] sm:$0xff] }
 0x18a   : > { %3338 = vst [vmem:[#allocation17_spill] sm:$0xff] %v3073_v37  ;;  %v3075_v38 = vpop.f32.mrf.mxu0  ;;  %v1482_v37 = vadd.f32 %v1481_v13, %v1368_v12  ;;  %v527_v12 = vld [vmem:[#allocation2 + $0x18] sm:$0xff]  ;;  %v543_v13 = vld [vmem:[#allocation2 + $0xc8] sm:$0xff] }
 0x18b   : > { %3339 = vst [vmem:[#allocation18_spill] sm:$0xff] %v3075_v38  ;;  %v3077_v39 = vpop.f32.mrf.mxu1 }
 0x18c   : > { %3340 = vst [vmem:[#allocation19_spill] sm:$0xff] %v3077_v39  ;;  %v3079_v40 = vpop.f32.mrf.mxu0  ;;  %v1444_v39 = vadd.f32 %v2985_v47, %v2983_v46 }
 0x18d   : > { %3341 = vst [vmem:[#allocation20_spill] sm:$0xff] %v3079_v40  ;;  %v3081_v41 = vpop.f32.mrf.mxu1  ;;  %v1484_v40 = vadd.f32 %v1483_v15, %v1370_v14 }
 0x18e   : > { %3342 = vst [vmem:[#allocation21_spill] sm:$0xff] %v3081_v41  ;;  %v1552_v6 = vpop.f32.mrf.mxu0 }
 0x18f   : > { %v1592_v4 = vpop.f32.mrf.mxu1  ;;  %v1553_v35 = vadd.f32 %v1552_v6, %v1440_v9  ;;  %v542_v6 = vld [vmem:[#allocation2 + $0x40] sm:$0xff] }
 0x190   : > { %v1593_v38 = vadd.f32 %v1592_v4, %v1480_v8  ;;  %v1554_v41 = vpop.f32.mrf.mxu0 }
 0x191   : > { %v1594_v2 = vpop.f32.mrf.mxu1  ;;  %v1631_v42 = vadd.f32 %v1553_v35, %v524_v7  ;;  %v1555_v10 = vadd.f32 %v1554_v41, %v1442_v36  ;;  %v1450_v7 = vadd.f32 %v2993_v51, %v2991_v50  ;;  %v544_v50 = vld [vmem:[#allocation2 + $0xe0] sm:$0xff] }
 0x192   : > { %v1647_v43 = vadd.f32 %v1593_v38, %v540_v5  ;;  %v1595_v11 = vadd.f32 %v1594_v2, %v1482_v37  ;;  %v1556_v45 = vpop.f32.mrf.mxu0  ;;  %v1490_v5 = vadd.f32 %v1489_v19, %v1376_v18  ;;  %v545_v38 = vld [vmem:[#allocation2 + $0x90] sm:$0xff] }
 0x193   : > { %v1596_v4 = vpop.f32.mrf.mxu1  ;;  %1663 = vst [vmem:[#allocation2 + $0xb0] sm:$0xff] %v1631_v42  ;;  %v1632_v46 = vadd.f32 %v1555_v10, %v525_v34  ;;  %v1557_v8 = vadd.f32 %v1556_v45, %v1444_v39  ;;  %v528_v34 = vld [vmem:[#allocation2 + $0x50] sm:$0xff]  ;;  %v1456_v42 = vadd.f32 %v3005_v57, %v3003_v56  ;;  %v531_v56 = vld [vmem:[#allocation2 + $0x48] sm:$0xff] }
 0x194   : > { %1679 = vst [vmem:[#allocation2 + $0x38] sm:$0xff] %v1647_v43  ;;  %v1648_v47 = vadd.f32 %v1595_v11, %v541_v3  ;;  %v1597_v9 = vadd.f32 %v1596_v4, %v1484_v40  ;;  %v1558_v2 = vpop.f32.mrf.mxu0  ;;  %v1492_v3 = vadd.f32 %v3041_v21, %v3039_v20  ;;  %v1496_v43 = vadd.f32 %v3049_v25, %v3047_v24  ;;  %v546_v10 = vld [vmem:[#allocation2 + $0x70] sm:$0xff] }
 0x195   : > { %v1598_v14 = vpop.f32.mrf.mxu1  ;;  %1664 = vst [vmem:[#allocation2] sm:$0xff] %v1632_v46  ;;  %v1633_v48 = vadd.f32 %v1557_v8, %v526_v44  ;;  %v1559_v15 = vadd.f32 %v1558_v2, %v1446_v33  ;;  %v1454_v33 = vadd.f32 %v3001_v55, %v2999_v54  ;;  %v530_v54 = vld [vmem:[#allocation2 + $0x30] sm:$0xff]  ;;  %v1500_v4 = vadd.f32 %v3053_v27, %v3051_v26  ;;  %v547_v46 = vld [vmem:[#allocation2 + $0xc0] sm:$0xff] }
 0x196   : > { %1680 = vst [vmem:[#allocation2 + $0x58] sm:$0xff] %v1648_v47  ;;  %v1649_v49 = vadd.f32 %v1597_v9, %v542_v6  ;;  %v1599_v16 = vadd.f32 %v1598_v14, %v1486_v32  ;;  %v1562_v35 = vpop.f32.mrf.mxu0  ;;  %v1494_v32 = vadd.f32 %v3045_v23, %v3043_v22  ;;  %v1460_v6 = vadd.f32 %v3009_v59, %v3007_v58  ;;  %v532_v58 = vld [vmem:[#allocation2 + $0x80] sm:$0xff] }
 0x197   : > { %v1602_v51 = vpop.f32.mrf.mxu1  ;;  %1665 = vst [vmem:[#allocation2 + $0xd8] sm:$0xff] %v1633_v48  ;;  %v1634_v18 = vadd.f32 %v1559_v15, %v527_v12  ;;  %v1563_v36 = vadd.f32 %v1562_v35, %v1450_v7  ;;  %v1462_v7 = vadd.f32 %v3013_v61, %v3011_v60  ;;  %v548_v12 = vld [vmem:[#allocation2 + $0xa8] sm:$0xff]  ;;  %v1464_v48 = vadd.f32 %v3017_v63, %v3015_v62  ;;  %v549_v15 = vld [vmem:[#allocation2 + $0xd0] sm:$0xff]  ;;  %v3343_v35 = vld [vmem:[#allocation12_spill] sm:$0xff] }
 0x198   : > { %1681 = vst [vmem:[#allocation2 + $0x40] sm:$0xff] %v1649_v49  ;;  %v1650_v19 = vadd.f32 %v1599_v16, %v543_v13  ;;  %v1603_v37 = vadd.f32 %v1602_v51, %v1490_v5  ;;  %v1564_v53 = vpop.f32.mrf.mxu0  ;;  %v1502_v5 = vadd.f32 %v3057_v29, %v3055_v28  ;;  %v1504_v49 = vadd.f32 %v3061_v31, %v3059_v30  ;;  %v533_v60 = vld [vmem:[#allocation2 + $0x88] sm:$0xff] }
 0x199   : > { %v1604_v20 = vpop.f32.mrf.mxu1  ;;  %1666 = vst [vmem:[#allocation2 + $0x18] sm:$0xff] %v1634_v18  ;;  %v1635_v21 = vadd.f32 %v1563_v36, %v528_v34  ;;  %v1565_v40 = vadd.f32 %v1564_v53, %v1452_v17  ;;  %v1466_v34 = vadd.f32 %v3021_v1, %v3019_v0  ;;  %v534_v62 = vld [vmem:[#allocation2 + $0xe8] sm:$0xff]  ;;  %v550_v18 = vld [vmem:[#allocation2 + $0x10] sm:$0xff]  ;;  %v535_v0 = vld [vmem:[#allocation2 + $0xb8] sm:$0xff] }
 0x19a   : > { %1682 = vst [vmem:[#allocation2 + $0xc8] sm:$0xff] %v1650_v19  ;;  %v1651_v39 = vadd.f32 %v1603_v37, %v544_v50  ;;  %v1605_v41 = vadd.f32 %v1604_v20, %v1492_v3  ;;  %v1566_v55 = vpop.f32.mrf.mxu0  ;;  %v3344_v50 = vld [vmem:[#allocation13_spill] sm:$0xff]  ;;  %v3347_v53 = vld [vmem:[#allocation14_spill] sm:$0xff] }
 0x19b   : > { %v1606_v22 = vpop.f32.mrf.mxu1  ;;  %1667 = vst [vmem:[#allocation2 + $0x50] sm:$0xff] %v1635_v21  ;;  %v1636_v23 = vadd.f32 %v1565_v40, %v529_v52  ;;  %v1567_v44 = vadd.f32 %v1566_v55, %v1454_v33  ;;  %v1506_v51 = vadd.f32 %v3344_v50, %v3343_v35  ;;  %v3345_v33 = vld [vmem:[#allocation4_spill] sm:$0xff]  ;;  %v551_v21 = vld [vmem:[#allocation2 + $0x28] sm:$0xff]  ;;  %v3350_v55 = vld [vmem:[#allocation7_spill] sm:$0xff] }
 0x19c   : > { %1683 = vst [vmem:[#allocation2 + $0xe0] sm:$0xff] %v1651_v39  ;;  %v1652_v11 = vadd.f32 %v1605_v41, %v545_v38  ;;  %v1607_v45 = vadd.f32 %v1606_v22, %v1494_v32  ;;  %v1568_v57 = vpop.f32.mrf.mxu0  ;;  %v3346_v32 = vld [vmem:[#allocation5_spill] sm:$0xff]  ;;  %v3348_v38 = vld [vmem:[#allocation15_spill] sm:$0xff]  ;;  %v3351_v22 = vld [vmem:[#allocation16_spill] sm:$0xff] }
 0x19d   : > { %v1608_v24 = vpop.f32.mrf.mxu1  ;;  %1668 = vst [vmem:[#allocation2 + $0x68] sm:$0xff] %v1636_v23  ;;  %v1637_v25 = vadd.f32 %v1567_v44, %v530_v54  ;;  %v1569_v8 = vadd.f32 %v1568_v57, %v1456_v42  ;;  %v1470_v52 = vadd.f32 %v3346_v32, %v3345_v33  ;;  %v1510_v20 = vadd.f32 %v3348_v38, %v3347_v53  ;;  %v3349_v54 = vld [vmem:[#allocation6_spill] sm:$0xff]  ;;  %v3352_v23 = vld [vmem:[#allocation17_spill] sm:$0xff]  ;;  %v536_v44 = vld [vmem:[#allocation2 + $0x60] sm:$0xff] }
 0x19e   : > { %1684 = vst [vmem:[#allocation2 + $0x90] sm:$0xff] %v1652_v11  ;;  %v1653_v47 = vadd.f32 %v1607_v45, %v546_v10  ;;  %v1609_v9 = vadd.f32 %v1608_v24, %v1496_v43  ;;  %v1572_v59 = vpop.f32.mrf.mxu0  ;;  %v1472_v10 = vadd.f32 %v3350_v55, %v3349_v54  ;;  %v1512_v11 = vadd.f32 %v3352_v23, %v3351_v22 }
 0x19f   : > { %v1612_v26 = vpop.f32.mrf.mxu1  ;;  %1669 = vst [vmem:[#allocation2 + $0x30] sm:$0xff] %v1637_v25  ;;  %v1638_v27 = vadd.f32 %v1569_v8, %v531_v56  ;;  %v1573_v13 = vadd.f32 %v1572_v59, %v1460_v6  ;;  %v552_v6 = vld [vmem:[#allocation2 + $0xa0] sm:$0xff] }
 0x1a0   : > { %1685 = vst [vmem:[#allocation2 + $0x70] sm:$0xff] %v1653_v47  ;;  %v1654_v2 = vadd.f32 %v1609_v9, %v547_v46  ;;  %v1613_v14 = vadd.f32 %v1612_v26, %v1500_v4  ;;  %v1574_v61 = vpop.f32.mrf.mxu0  ;;  %v3353_v25 = vld [vmem:[#allocation8_spill] sm:$0xff]  ;;  %v3354_v47 = vld [vmem:[#allocation9_spill] sm:$0xff]  ;;  %v3355_v9 = vld [vmem:[#allocation18_spill] sm:$0xff] }
 0x1a1   : > { %v1614_v28 = vpop.f32.mrf.mxu1  ;;  %1670 = vst [vmem:[#allocation2 + $0x48] sm:$0xff] %v1638_v27  ;;  %v1639_v29 = vadd.f32 %v1573_v13, %v532_v58  ;;  %v1575_v17 = vadd.f32 %v1574_v61, %v1462_v7  ;;  %v1474_v8 = vadd.f32 %v3354_v47, %v3353_v25  ;;  %v3356_v7 = vld [vmem:[#allocation19_spill] sm:$0xff]  ;;  %v537_v58 = vld [vmem:[#allocation2 + $0xf0] sm:$0xff]  ;;  %v3359_v61 = vld [vmem:[#allocation20_spill] sm:$0xff] }
 0x1a2   : > { %1686 = vst [vmem:[#allocation2 + $0xc0] sm:$0xff] %v1654_v2  ;;  %v1655_v16 = vadd.f32 %v1613_v14, %v548_v12  ;;  %v1615_v3 = vadd.f32 %v1614_v28, %v1502_v5  ;;  %v1576_v63 = vpop.f32.mrf.mxu0  ;;  %v1514_v5 = vadd.f32 %v3356_v7, %v3355_v9  ;;  %v553_v12 = vld [vmem:[#allocation2 + $0xf8] sm:$0xff] }
 0x1a3   : > { %v1616_v30 = vpop.f32.mrf.mxu1  ;;  %1671 = vst [vmem:[#allocation2 + $0x80] sm:$0xff] %v1639_v29  ;;  %v1640_v31 = vadd.f32 %v1575_v17, %v533_v60  ;;  %v1577_v36 = vadd.f32 %v1576_v63, %v1464_v48  ;;  %v3357_v48 = vld [vmem:[#allocation10_spill] sm:$0xff]  ;;  %v538_v29 = vld [vmem:[#allocation2 + $0x8] sm:$0xff]  ;;  %v554_v17 = vld [vmem:[#allocation2 + $0x20] sm:$0xff] }
 0x1a4   : > { %1687 = vst [vmem:[#allocation2 + $0xa8] sm:$0xff] %v1655_v16  ;;  %v1656_v19 = vadd.f32 %v1615_v3, %v549_v15  ;;  %v1617_v37 = vadd.f32 %v1616_v30, %v1504_v49  ;;  %v1578_v1 = vpop.f32.mrf.mxu0  ;;  %v3358_v49 = vld [vmem:[#allocation11_spill] sm:$0xff]  ;;  %v3360_v15 = vld [vmem:[#allocation21_spill] sm:$0xff] }
 0x1a5   : > { %v1618_v39 = vpop.f32.mrf.mxu1  ;;  %1672 = vst [vmem:[#allocation2 + $0x88] sm:$0xff] %v1640_v31  ;;  %v1641_v40 = vadd.f32 %v1577_v36, %v534_v62  ;;  %v1579_v42 = vadd.f32 %v1578_v1, %v1466_v34  ;;  %v1476_v60 = vadd.f32 %v3358_v49, %v3357_v48  ;;  %v1516_v28 = vadd.f32 %v3360_v15, %v3359_v61  ;;  %v539_v62 = vld [vmem:[#allocation2 + $0x78] sm:$0xff] }
 0x1a6   : > { %1688 = vst [vmem:[#allocation2 + $0xd0] sm:$0xff] %v1656_v19  ;;  %v1657_v41 = vadd.f32 %v1617_v37, %v550_v18  ;;  %v1619_v43 = vadd.f32 %v1618_v39, %v1506_v51  ;;  %v1582_v45 = vpop.f32.mrf.mxu0  ;;  %v555_v18 = vld [vmem:[#allocation2 + $0x98] sm:$0xff] }
 0x1a7   : > { %v1622_v4 = vpop.f32.mrf.mxu1  ;;  %1673 = vst [vmem:[#allocation2 + $0xe8] sm:$0xff] %v1641_v40  ;;  %v1642_v56 = vadd.f32 %v1579_v42, %v535_v0  ;;  %v1583_v46 = vadd.f32 %v1582_v45, %v1470_v52 }
 0x1a8   : > { %1689 = vst [vmem:[#allocation2 + $0x10] sm:$0xff] %v1657_v41  ;;  %v1658_v57 = vadd.f32 %v1619_v43, %v551_v21  ;;  %v1623_v24 = vadd.f32 %v1622_v4, %v1510_v20  ;;  %v1584_v59 = vpop.f32.mrf.mxu0 }
 0x1a9   : > { %v1624_v26 = vpop.f32.mrf.mxu1  ;;  %1674 = vst [vmem:[#allocation2 + $0xb8] sm:$0xff] %v1642_v56  ;;  %v1643_v27 = vadd.f32 %v1583_v46, %v536_v44  ;;  %v1585_v13 = vadd.f32 %v1584_v59, %v1472_v10 }
 0x1aa   : > { %1690 = vst [vmem:[#allocation2 + $0x28] sm:$0xff] %v1658_v57  ;;  %v1659_v2 = vadd.f32 %v1623_v24, %v552_v6  ;;  %v1625_v14 = vadd.f32 %v1624_v26, %v1512_v11  ;;  %v1586_v16 = vpop.f32.mrf.mxu0 }
 0x1ab   : > { %v1626_v3 = vpop.f32.mrf.mxu1  ;;  %1675 = vst [vmem:[#allocation2 + $0x60] sm:$0xff] %v1643_v27  ;;  %v1644_v34 = vadd.f32 %v1585_v13, %v537_v58  ;;  %v1587_v50 = vadd.f32 %v1586_v16, %v1474_v8 }
 0x1ac   : > { %1691 = vst [vmem:[#allocation2 + $0xa0] sm:$0xff] %v1659_v2  ;;  %v1660_v35 = vadd.f32 %v1625_v14, %v553_v12  ;;  %v1627_v51 = vadd.f32 %v1626_v3, %v1514_v5  ;;  %v1588_v63 = vpop.f32.mrf.mxu0 }
 0x1ad   : > { %v1628_v30 = vpop.f32.mrf.mxu1  ;;  %1676 = vst [vmem:[#allocation2 + $0xf0] sm:$0xff] %v1644_v34  ;;  %v1645_v31 = vadd.f32 %v1587_v50, %v538_v29  ;;  %v1589_v36 = vadd.f32 %v1588_v63, %v1476_v60 }
 0x1ae   : > { %1692 = vst [vmem:[#allocation2 + $0xf8] sm:$0xff] %v1660_v35  ;;  %v1661_v19 = vadd.f32 %v1627_v51, %v554_v17  ;;  %v1629_v37 = vadd.f32 %v1628_v30, %v1516_v28  ;;  %1698 = sbr.rel (%p2353_p11) target bundleno = 493 (0x1ed), region = 74 }
 0x1af   : > { %1677 = vst [vmem:[#allocation2 + $0x8] sm:$0xff] %v1645_v31  ;;  %v1646_v33 = vadd.f32 %v1589_v36, %v539_v62 }
 0x1b0   : > { %1693 = vst [vmem:[#allocation2 + $0x20] sm:$0xff] %v1661_v19  ;;  %v1662_v32 = vadd.f32 %v1629_v37, %v555_v18 }
 0x1b1   : > { %1678 = vst [vmem:[#allocation2 + $0x78] sm:$0xff] %v1646_v33 }
 0x1b2   : > { %1694 = vst [vmem:[#allocation2 + $0x98] sm:$0xff] %v1662_v32 }
 0x1b3   : > { %v1733_v52 = vlaneseq  ;;  %v1731_v38 = vld [vmem:[%s3321_s2] sm:$0x3]  ;;  %v1699_v0 = vld [vmem:[#allocation2 + $0xb0] sm:$0xff]  ;;  %v1701_v41 = vld [vmem:[#allocation2 + $0xd8] sm:$0xff] }
 0x1b4   : > { %v1775_v20 = vld [vmem:[%s3322_s3] sm:$0x3]  ;;  %v1702_v42 = vld [vmem:[#allocation2 + $0x18] sm:$0xff]  ;;  %v1703_v43 = vld [vmem:[#allocation2 + $0x50] sm:$0xff] }
 0x1b5   : > { %v1734_v53 = vshrl.u32 %v1733_v52, 7  ;;  %v1700_v1 = vld [vmem:[#allocation2] sm:$0xff]  ;;  %v1704_v23 = vld [vmem:[#allocation2 + $0x68] sm:$0xff]  ;;  %v1705_v11 = vld [vmem:[#allocation2 + $0x30] sm:$0xff] }
 0x1b6   : > { %v1851_v40 = vld [vmem:[%s3323_s4] sm:$0x3]  ;;  %v1706_v44 = vld [vmem:[#allocation2 + $0x48] sm:$0xff]  ;;  %v1710_v34 = vld [vmem:[#allocation2 + $0xb8] sm:$0xff] }
 0x1b7   : > { %v1735_v21 = vsub.s32 0, %v1734_v53  ;;  %v1739_v39 = vsub.s32 1, %v1734_v53  ;;  %v1707_v61 = vld [vmem:[#allocation2 + $0x80] sm:$0xff]  ;;  %v1708_v17 = vld [vmem:[#allocation2 + $0x88] sm:$0xff]  ;;  %v1712_v33 = vld [vmem:[#allocation2 + $0xf0] sm:$0xff] }
 0x1b8   : > { %v1709_v3 = vld [vmem:[#allocation2 + $0xe8] sm:$0xff]  ;;  %v1711_v37 = vld [vmem:[#allocation2 + $0x60] sm:$0xff] }
 0x1b9   : > { %v3147_v54 = vrot.slane %v1731_v38, %v1735_v21  ;;  %v3149_v55 = vrot.slane %v1731_v38, %v1739_v39  ;;  %v3151_v10 = vrot.slane %v1775_v20, %v1735_v21  ;;  %v3153_v22 = vrot.slane %v1775_v20, %v1739_v39 }
 0x1ba   : > { %v3155_v45 = vrot.slane %v1851_v40, %v1735_v21  ;;  %v3157_v6 = vrot.slane %v1851_v40, %v1739_v39 }
 0x1bb   : > { %v1743_v4 = vmul.f32 %v3147_v54, %v1699_v0  ;;  %v1744_v56 = vmul.f32 %v3149_v55, %v1700_v1  ;;  %v1745_v57 = vmul.f32 %v3147_v54, %v1701_v41  ;;  %v1746_v46 = vmul.f32 %v3149_v55, %v1702_v42  ;;  %v1713_v42 = vld [vmem:[#allocation2 + $0x8] sm:$0xff] }
 0x1bc   : > { %v1747_v24 = vmul.f32 %v3147_v54, %v1703_v43  ;;  %v1748_v25 = vmul.f32 %v3149_v55, %v1704_v23  ;;  %v1749_v47 = vmul.f32 %v3147_v54, %v1705_v11  ;;  %v1750_v8 = vmul.f32 %v3149_v55, %v1706_v44  ;;  %v1714_v43 = vld [vmem:[#allocation2 + $0x78] sm:$0xff] }
 0x1bd   : > { %v1787_v9 = vadd.f32 %v3151_v10, %v1743_v4  ;;  %v1788_v7 = vadd.f32 %v3153_v22, %v1744_v56  ;;  %v1789_v5 = vadd.f32 %v3151_v10, %v1745_v57  ;;  %v1790_v58 = vadd.f32 %v3153_v22, %v1746_v46 }
 0x1be   : > { %v1791_v59 = vadd.f32 %v3151_v10, %v1747_v24  ;;  %v1792_v12 = vadd.f32 %v3153_v22, %v1748_v25  ;;  %v1793_v26 = vadd.f32 %v3151_v10, %v1749_v47  ;;  %v1794_v27 = vadd.f32 %v3153_v22, %v1750_v8  ;;  %v1715_v47 = vld [vmem:[#allocation2 + $0x38] sm:$0xff] }
 0x1bf   : > { %vm1819_vm0 = vcmp.ge.f32.partialorder %v1787_v9, 0.0  ;;  %vm1820_vm1 = vcmp.ge.f32.partialorder %v1788_v7, 0.0  ;;  %v1863_v2 = vmul.f32 %v3155_v45, %v1787_v9  ;;  %v1864_v13 = vmul.f32 %v3157_v6, %v1788_v7  ;;  %v1716_v8 = vld [vmem:[#allocation2 + $0x58] sm:$0xff] }
 0x1c0   : > { %vm1821_vm2 = vcmp.ge.f32.partialorder %v1789_v5, 0.0  ;;  %vm1822_vm3 = vcmp.ge.f32.partialorder %v1790_v58, 0.0  ;;  %v1865_v14 = vmul.f32 %v3155_v45, %v1789_v5  ;;  %v1866_v48 = vmul.f32 %v3157_v6, %v1790_v58 }
 0x1c1   : > { %v1895_v49 = vsel %vm1819_vm0, %v1787_v9, %v1863_v2  ;;  %v1896_v60 = vsel %vm1820_vm1, %v1788_v7, %v1864_v13  ;;  %vm1823_vm4 = vcmp.ge.f32.partialorder %v1791_v59, 0.0  ;;  %vm1824_vm5 = vcmp.ge.f32.partialorder %v1792_v12, 0.0 }
 0x1c2   : > { %v2376_v15 = vpack.c.bf16 %v1896_v60, %v1895_v49  ;;  %v1897_v28 = vsel %vm1821_vm2, %v1789_v5, %v1865_v14  ;;  %v1898_v29 = vsel %vm1822_vm3, %v1790_v58, %v1866_v48  ;;  %v1867_v16 = vmul.f32 %v3155_v45, %v1791_v59  ;;  %v1717_v58 = vld [vmem:[#allocation2 + $0x40] sm:$0xff] }
 0x1c3   : > { %v2377_v35 = vpack.c.bf16 %v1898_v29, %v1897_v28  ;;  %v1868_v50 = vmul.f32 %v3157_v6, %v1792_v12  ;;  %vm1825_vm6 = vcmp.ge.f32.partialorder %v1793_v26, 0.0  ;;  %vm1826_vm7 = vcmp.ge.f32.partialorder %v1794_v27, 0.0  ;;  %v1719_v28 = vld [vmem:[#allocation2 + $0xe0] sm:$0xff]  ;;  %v1720_v29 = vld [vmem:[#allocation2 + $0x90] sm:$0xff] }
 0x1c4   : > { %2023 = vst [vmem:[%s3324_s5] sm:$0xff] %v2376_v15  ;;  %v1899_v51 = vsel %vm1823_vm4, %v1791_v59, %v1867_v16  ;;  %v1869_v62 = vmul.f32 %v3155_v45, %v1793_v26  ;;  %v1870_v63 = vmul.f32 %v3157_v6, %v1794_v27  ;;  %v1751_v18 = vmul.f32 %v3147_v54, %v1707_v61  ;;  %v1718_v59 = vld [vmem:[#allocation2 + $0xc8] sm:$0xff] }
 0x1c5   : > { %2024 = vst [vmem:[%s3324_s5 + $0x8] sm:$0xff] %v2377_v35  ;;  %v1900_v30 = vsel %vm1824_vm5, %v1792_v12, %v1868_v50  ;;  %v1752_v31 = vmul.f32 %v3149_v55, %v1708_v17  ;;  %v1753_v19 = vmul.f32 %v3147_v54, %v1709_v3  ;;  %v1754_v36 = vmul.f32 %v3149_v55, %v1710_v34 }
 0x1c6   : > { %v2378_v32 = vpack.c.bf16 %v1900_v30, %v1899_v51  ;;  %v1901_v52 = vsel %vm1825_vm6, %v1793_v26, %v1869_v62  ;;  %v1902_v53 = vsel %vm1826_vm7, %v1794_v27, %v1870_v63  ;;  %v1795_v38 = vadd.f32 %v3151_v10, %v1751_v18 }
 0x1c7   : > { %v2379_v20 = vpack.c.bf16 %v1902_v53, %v1901_v52  ;;  %v1796_v0 = vadd.f32 %v3153_v22, %v1752_v31  ;;  %v1797_v1 = vadd.f32 %v3151_v10, %v1753_v19  ;;  %v1798_v21 = vadd.f32 %v3153_v22, %v1754_v36  ;;  %v1721_v19 = vld [vmem:[#allocation2 + $0x70] sm:$0xff]  ;;  %v1722_v36 = vld [vmem:[#allocation2 + $0xc0] sm:$0xff] }
 0x1c8   : > { %2025 = vst [vmem:[%s3324_s5 + $0x10] sm:$0xff] %v2378_v32  ;;  %vm1827_vm8 = vcmp.ge.f32.partialorder %v1795_v38, 0.0  ;;  %v1871_v39 = vmul.f32 %v3155_v45, %v1795_v38  ;;  %v1755_v40 = vmul.f32 %v3147_v54, %v1711_v37  ;;  %v1756_v41 = vmul.f32 %v3149_v55, %v1712_v33 }
 0x1c9   : > { %2026 = vst [vmem:[%s3324_s5 + $0x18] sm:$0xff] %v2379_v20  ;;  %vm1828_vm9 = vcmp.ge.f32.partialorder %v1796_v0, 0.0  ;;  %v1872_v23 = vmul.f32 %v3157_v6, %v1796_v0  ;;  %vm1829_vm10 = vcmp.ge.f32.partialorder %v1797_v1, 0.0  ;;  %vm1830_vm11 = vcmp.ge.f32.partialorder %v1798_v21, 0.0 }
 0x1ca   : > { %v1903_v11 = vsel %vm1827_vm8, %v1795_v38, %v1871_v39  ;;  %v1873_v44 = vmul.f32 %v3155_v45, %v1797_v1  ;;  %v1874_v4 = vmul.f32 %v3157_v6, %v1798_v21  ;;  %v1799_v56 = vadd.f32 %v3151_v10, %v1755_v40  ;;  %v1723_v39 = vld [vmem:[#allocation2 + $0xa8] sm:$0xff]  ;;  %v1724_v40 = vld [vmem:[#allocation2 + $0xd0] sm:$0xff] }
 0x1cb   : > { %v1904_v57 = vsel %vm1828_vm9, %v1796_v0, %v1872_v23  ;;  %v1800_v46 = vadd.f32 %v3153_v22, %v1756_v41  ;;  %v1757_v24 = vmul.f32 %v3147_v54, %v1713_v42  ;;  %v1758_v25 = vmul.f32 %v3149_v55, %v1714_v43  ;;  %v1725_v23 = vld [vmem:[#allocation2 + $0x10] sm:$0xff] }
 0x1cc   : > { %v2380_v9 = vpack.c.bf16 %v1904_v57, %v1903_v11  ;;  %v1905_v7 = vsel %vm1829_vm10, %v1797_v1, %v1873_v44  ;;  %v1906_v5 = vsel %vm1830_vm11, %v1798_v21, %v1874_v4  ;;  %vm1831_vm12 = vcmp.ge.f32.partialorder %v1799_v56, 0.0  ;;  %v1726_v11 = vld [vmem:[#allocation2 + $0x28] sm:$0xff] }
 0x1cd   : > { %v2381_v12 = vpack.c.bf16 %v1906_v5, %v1905_v7  ;;  %vm1832_vm13 = vcmp.ge.f32.partialorder %v1800_v46, 0.0  ;;  %v1875_v26 = vmul.f32 %v3155_v45, %v1799_v56  ;;  %v1876_v27 = vmul.f32 %v3157_v6, %v1800_v46  ;;  %v1727_v5 = vld [vmem:[#allocation2 + $0xa0] sm:$0xff] }
 0x1ce   : > { %2027 = vst [vmem:[%s3324_s5 + $0x20] sm:$0xff] %v2380_v9  ;;  %v1801_v2 = vadd.f32 %v3151_v10, %v1757_v24  ;;  %v1802_v13 = vadd.f32 %v3153_v22, %v1758_v25  ;;  %v1759_v14 = vmul.f32 %v3147_v54, %v1715_v47  ;;  %v1760_v48 = vmul.f32 %v3149_v55, %v1716_v8 }
 0x1cf   : > { %2028 = vst [vmem:[%s3324_s5 + $0x28] sm:$0xff] %v2381_v12  ;;  %v1907_v49 = vsel %vm1831_vm12, %v1799_v56, %v1875_v26  ;;  %v1908_v60 = vsel %vm1832_vm13, %v1800_v46, %v1876_v27  ;;  %v1761_v61 = vmul.f32 %v3147_v54, %v1717_v58  ;;  %v1762_v15 = vmul.f32 %v3149_v55, %v1718_v59  ;;  %v1728_v58 = vld [vmem:[#allocation2 + $0xf8] sm:$0xff] }
 0x1d0   : > { %v2382_v16 = vpack.c.bf16 %v1908_v60, %v1907_v49  ;;  %vm1833_vm14 = vcmp.ge.f32.partialorder %v1801_v2, 0.0  ;;  %vm1834_vm15 = vcmp.ge.f32.partialorder %v1802_v13, 0.0  ;;  %v1877_v17 = vmul.f32 %v3155_v45, %v1801_v2 }
 0x1d1   : > { %v1878_v3 = vmul.f32 %v3157_v6, %v1802_v13  ;;  %v1803_v34 = vadd.f32 %v3151_v10, %v1759_v14  ;;  %v1804_v35 = vadd.f32 %v3153_v22, %v1760_v48  ;;  %v1805_v50 = vadd.f32 %v3151_v10, %v1761_v61 }
 0x1d2   : > { %2029 = vst [vmem:[%s3324_s5 + $0x30] sm:$0xff] %v2382_v16  ;;  %v1909_v51 = vsel %vm1833_vm14, %v1801_v2, %v1877_v17  ;;  %v1806_v62 = vadd.f32 %v3153_v22, %v1762_v15  ;;  %v1763_v63 = vmul.f32 %v3147_v54, %v1719_v28  ;;  %v1764_v18 = vmul.f32 %v3149_v55, %v1720_v29  ;;  %v1729_v28 = vld [vmem:[#allocation2 + $0x20] sm:$0xff]  ;;  %v1730_v29 = vld [vmem:[#allocation2 + $0x98] sm:$0xff] }
 0x1d3   : > { %v1910_v30 = vsel %vm1834_vm15, %v1802_v13, %v1878_v3  ;;  %vm1835_vm0 = vcmp.ge.f32.partialorder %v1803_v34, 0.0  ;;  %vm1836_vm1 = vcmp.ge.f32.partialorder %v1804_v35, 0.0  ;;  %v1879_v31 = vmul.f32 %v3155_v45, %v1803_v34 }
 0x1d4   : > { %v2383_v37 = vpack.c.bf16 %v1910_v30, %v1909_v51  ;;  %v1880_v33 = vmul.f32 %v3157_v6, %v1804_v35  ;;  %vm1837_vm2 = vcmp.ge.f32.partialorder %v1805_v50, 0.0  ;;  %vm1838_vm3 = vcmp.ge.f32.partialorder %v1806_v62, 0.0 }
 0x1d5   : > { %v1911_v32 = vsel %vm1835_vm0, %v1803_v34, %v1879_v31  ;;  %v1881_v52 = vmul.f32 %v3155_v45, %v1805_v50  ;;  %v1882_v53 = vmul.f32 %v3157_v6, %v1806_v62  ;;  %v1807_v38 = vadd.f32 %v3151_v10, %v1763_v63 }
 0x1d6   : > { %2030 = vst [vmem:[%s3324_s5 + $0x38] sm:$0xff] %v2383_v37  ;;  %v1912_v20 = vsel %vm1836_vm1, %v1804_v35, %v1880_v33  ;;  %v1808_v0 = vadd.f32 %v3153_v22, %v1764_v18  ;;  %v1765_v1 = vmul.f32 %v3147_v54, %v1721_v19  ;;  %v1766_v21 = vmul.f32 %v3149_v55, %v1722_v36 }
 0x1d7   : > { %v2384_v41 = vpack.c.bf16 %v1912_v20, %v1911_v32  ;;  %v1913_v42 = vsel %vm1837_vm2, %v1805_v50, %v1881_v52  ;;  %v1914_v43 = vsel %vm1838_vm3, %v1806_v62, %v1882_v53  ;;  %vm1839_vm4 = vcmp.ge.f32.partialorder %v1807_v38, 0.0 }
 0x1d8   : > { %v2385_v44 = vpack.c.bf16 %v1914_v43, %v1913_v42  ;;  %vm1840_vm5 = vcmp.ge.f32.partialorder %v1808_v0, 0.0  ;;  %v1883_v4 = vmul.f32 %v3155_v45, %v1807_v38  ;;  %v1884_v56 = vmul.f32 %v3157_v6, %v1808_v0 }
 0x1d9   : > { %2031 = vst [vmem:[%s3324_s5 + $0x40] sm:$0xff] %v2384_v41  ;;  %v1809_v57 = vadd.f32 %v3151_v10, %v1765_v1  ;;  %v1810_v46 = vadd.f32 %v3153_v22, %v1766_v21  ;;  %v1767_v24 = vmul.f32 %v3147_v54, %v1723_v39  ;;  %v1768_v25 = vmul.f32 %v3149_v55, %v1724_v40 }
 0x1da   : > { %2032 = vst [vmem:[%s3324_s5 + $0x48] sm:$0xff] %v2385_v44  ;;  %v1915_v47 = vsel %vm1839_vm4, %v1807_v38, %v1883_v4  ;;  %v1916_v8 = vsel %vm1840_vm5, %v1808_v0, %v1884_v56  ;;  %v1769_v9 = vmul.f32 %v3147_v54, %v1725_v23  ;;  %v1770_v7 = vmul.f32 %v3149_v55, %v1726_v11 }
 0x1db   : > { %v2386_v59 = vpack.c.bf16 %v1916_v8, %v1915_v47  ;;  %vm1841_vm6 = vcmp.ge.f32.partialorder %v1809_v57, 0.0  ;;  %vm1842_vm7 = vcmp.ge.f32.partialorder %v1810_v46, 0.0  ;;  %v1885_v12 = vmul.f32 %v3155_v45, %v1809_v57 }
 0x1dc   : > { %v1886_v26 = vmul.f32 %v3157_v6, %v1810_v46  ;;  %v1811_v27 = vadd.f32 %v3151_v10, %v1767_v24  ;;  %v1812_v2 = vadd.f32 %v3153_v22, %v1768_v25  ;;  %v1813_v13 = vadd.f32 %v3151_v10, %v1769_v9 }
 0x1dd   : > { %2033 = vst [vmem:[%s3324_s5 + $0x50] sm:$0xff] %v2386_v59  ;;  %v1917_v14 = vsel %vm1841_vm6, %v1809_v57, %v1885_v12  ;;  %v1814_v48 = vadd.f32 %v3153_v22, %v1770_v7  ;;  %v1771_v49 = vmul.f32 %v3147_v54, %v1727_v5  ;;  %v1772_v60 = vmul.f32 %v3149_v55, %v1728_v58 }
 0x1de   : > { %v1918_v61 = vsel %vm1842_vm7, %v1810_v46, %v1886_v26  ;;  %vm1843_vm8 = vcmp.ge.f32.partialorder %v1811_v27, 0.0  ;;  %vm1844_vm9 = vcmp.ge.f32.partialorder %v1812_v2, 0.0  ;;  %v1887_v15 = vmul.f32 %v3155_v45, %v1811_v27 }
 0x1df   : > { %v2387_v16 = vpack.c.bf16 %v1918_v61, %v1917_v14  ;;  %v1888_v17 = vmul.f32 %v3157_v6, %v1812_v2  ;;  %vm1845_vm10 = vcmp.ge.f32.partialorder %v1813_v13, 0.0  ;;  %vm1846_vm11 = vcmp.ge.f32.partialorder %v1814_v48, 0.0 }
 0x1e0   : > { %v1919_v3 = vsel %vm1843_vm8, %v1811_v27, %v1887_v15  ;;  %v1889_v34 = vmul.f32 %v3155_v45, %v1813_v13  ;;  %v1890_v35 = vmul.f32 %v3157_v6, %v1814_v48  ;;  %v1815_v50 = vadd.f32 %v3151_v10, %v1771_v49 }
 0x1e1   : > { %2034 = vst [vmem:[%s3324_s5 + $0x58] sm:$0xff] %v2387_v16  ;;  %v1920_v51 = vsel %vm1844_vm9, %v1812_v2, %v1888_v17  ;;  %v1816_v62 = vadd.f32 %v3153_v22, %v1772_v60  ;;  %v1773_v63 = vmul.f32 %v3147_v54, %v1729_v28  ;;  %v1774_v18 = vmul.f32 %v3149_v55, %v1730_v29 }
 0x1e2   : > { %v2388_v30 = vpack.c.bf16 %v1920_v51, %v1919_v3  ;;  %v1921_v31 = vsel %vm1845_vm10, %v1813_v13, %v1889_v34  ;;  %v1922_v19 = vsel %vm1846_vm11, %v1814_v48, %v1890_v35  ;;  %vm1847_vm12 = vcmp.ge.f32.partialorder %v1815_v50, 0.0 }
 0x1e3   : > { %v2389_v36 = vpack.c.bf16 %v1922_v19, %v1921_v31  ;;  %vm1848_vm13 = vcmp.ge.f32.partialorder %v1816_v62, 0.0  ;;  %v1891_v37 = vmul.f32 %v3155_v45, %v1815_v50  ;;  %v1892_v33 = vmul.f32 %v3157_v6, %v1816_v62 }
 0x1e4   : > { %2035 = vst [vmem:[%s3324_s5 + $0x60] sm:$0xff] %v2388_v30  ;;  %v1817_v32 = vadd.f32 %v3151_v10, %v1773_v63  ;;  %v1818_v54 = vadd.f32 %v3153_v22, %v1774_v18 }
 0x1e5   : > { %2036 = vst [vmem:[%s3324_s5 + $0x68] sm:$0xff] %v2389_v36  ;;  %v1923_v55 = vsel %vm1847_vm12, %v1815_v50, %v1891_v37  ;;  %v1924_v52 = vsel %vm1848_vm13, %v1816_v62, %v1892_v33 }
 0x1e6   : > { %v2390_v53 = vpack.c.bf16 %v1924_v52, %v1923_v55  ;;  %vm1849_vm14 = vcmp.ge.f32.partialorder %v1817_v32, 0.0  ;;  %vm1850_vm15 = vcmp.ge.f32.partialorder %v1818_v54, 0.0  ;;  %v1893_v38 = vmul.f32 %v3155_v45, %v1817_v32 }
 0x1e7   : > { %v1894_v20 = vmul.f32 %v3157_v6, %v1818_v54 }
 0x1e8   : > { %2037 = vst [vmem:[%s3324_s5 + $0x70] sm:$0xff] %v2390_v53  ;;  %v1925_v10 = vsel %vm1849_vm14, %v1817_v32, %v1893_v38 }
 0x1e9   : > { %v1926_v0 = vsel %vm1850_vm15, %v1818_v54, %v1894_v20 }
 0x1ea   : > { %v2391_v22 = vpack.c.bf16 %v1926_v0, %v1925_v10 }
 0x1ec   : > { %2038 = vst [vmem:[%s3324_s5 + $0x78] sm:$0xff] %v2391_v22 }
 0x1ed PF: > { %s15_s22 = sadd.s32 1, %s2666_s22   ;;  %s3361_s18 = smov %s2654_s19 }
 0x1ee   : > { %p12_p12 = scmp.ge.s32.totalorder %s15_s22, 4   ;;  %s3362_s19 = smov %s2735_s26 }
 0x1ef   : > { %s3363_s20 = smov %s2662_s21  ;;  %s3364_s21 = smov %s3366_s23 }
 0x1f0   :  { %14 = sbr.rel (!%p12_p12) target bundleno = 3 (0x3), region = 127 }

// kernel: espnet_encoder_forward.45
= control target key start
LH: loop header
LB: loop body
LE: loop exit
PB: predicated region body
PF: predicated region fallthrough
CT: control target
= control target key end

     0   :  { %s1497_s18 = smov 0   ;;  %s1499_s19 = smov 0   ;;  %s1633_s0 = inlined_call_operand.vmem [shape: bf16[32,1280], index: 0, kind: input, shape index: {}]   ;;  %s1634_s1 = inlined_call_operand.vmem [shape: bf16[1280,128], index: 1, kind: input, shape index: {}]   ;;  %s1635_s2 = inlined_call_operand.vmem [shape: f32[1,128], index: 2, kind: input, shape index: {}, may-alias: {2,4}]   ;;  %s1636_s3 = inlined_call_operand.vmem [shape: f32[1,128], index: 3, kind: input, shape index: {}]   ;;  %s1637_s4 = inlined_call_operand.vmem [shape: f32[1,128], index: 4, kind: input, shape index: {}, may-alias: {2,4}]   ;;  %s1638_s5 = inlined_call_operand.vmem [shape: bf16[32,128], index: 5, kind: output, shape index: {}]  }
   0x1   :  { %s1501_s20 = smov 0   ;;  %s1503_s21 = smov 0  }
   0x2   :  { %s1505_s22 = smov 0  }
   0x3 LB: > { %s27_s23 = sadd.s32 1, %s1460_s21  ;;  %p50_p1 = scmp.ne.s32.totalorder %s1452_s19, %s1448_s18  ;;  %s1464_s22 = sphi %s1505_s22, %s15_s22   ;;  %s1460_s21 = sphi %s1503_s21, %s1642_s21   ;;  %s1456_s20 = sphi %s1501_s20, %s1641_s20   ;;  %s1452_s19 = sphi %s1499_s19, %s1640_s19   ;;  %s1448_s18 = sphi %s1497_s18, %s1639_s18  }
   0x4   : > { %p28_p0 = scmp.ge.s32.totalorder %s27_s23, 2  ;;  %p51_p2 = scmp.eq.s32.totalorder %s1464_s22, 0 }
   0x5   : > { %s43_s25 = sadd.s32 1, %s1452_s19  ;;  %p1152_p5 = scmp.ge.s32.totalorder %s1464_s22, 2 }
   0x6   : > { %s1644_s23 = smov (%p28_p0, %s27_s23), 0  ;;  %p52_p3 = por %p51_p2, %p50_p1 }
   0x7   : > { %s39_s24 = ssub.s32 %s1460_s21, %s1644_s23  ;;  %228 = sbr.rel (%p1152_p5) target bundleno = 23 (0x17), region = 28 }
   0x8   : > { %p41_p4 = scmp.eq.s32.totalorder %s39_s24, 0 }
   0xa   : > { %s1532_s26 = scalar_select %p41_p4, %s1452_s19, %s43_s25  }
   0xc   : > { %231 = sbr.rel (!%p52_p3) target bundleno = 23 (0x17), region = 32  ;;  %s233_s27 = sand.u32 (%p52_p3), 1, %s1452_s19  }
   0xd   : > { %s1227_s28 = smul.u32 (%p52_p3), 20, %s1460_s21 }
   0xe   : > { %s1329_s29 = smul.u32 (%p52_p3), 80, %s233_s27 }
   0xf   : > { %s241_s7 = scalar_lea.vmem (%p52_p3), %s1633_s0, %s1227_s28 }
  0x10   : > { %v256_v0 = vld [vmem:[%s241_s7] sm:$0xff] (%p52_p3)  ;;  %v258_v1 = vld [vmem:[%s241_s7 + $0x8] sm:$0xff] (%p52_p3)  ;;  %s235_s8 = scalar_lea.vmem (%p52_p3), [#allocation3], %s1329_s29  ;;  %v262_v3 = vld [vmem:[%s241_s7 + $0x30] sm:$0xff] (%p52_p3) }
  0x11   : > { %v260_v2 = vld [vmem:[%s241_s7 + $0x28] sm:$0xff]  ;;  %257 = vst [vmem:[%s235_s8] sm:$0xff] %v256_v0  ;;  %259 = vst [vmem:[%s235_s8 + $0x8] sm:$0xff] %v258_v1  ;;  %v264_v4 = vld [vmem:[%s241_s7 + $0x50] sm:$0xff] }
  0x12   : > { %261 = vst [vmem:[%s235_s8 + $0x14] sm:$0xff] %v260_v2  ;;  %v266_v5 = vld [vmem:[%s241_s7 + $0x58] sm:$0xff]  ;;  %263 = vst [vmem:[%s235_s8 + $0x1c] sm:$0xff] %v262_v3  ;;  %v270_v7 = vld [vmem:[%s241_s7 + $0x80] sm:$0xff] }
  0x13   : > { %265 = vst [vmem:[%s235_s8 + $0x28] sm:$0xff] %v264_v4  ;;  %267 = vst [vmem:[%s235_s8 + $0x30] sm:$0xff] %v266_v5  ;;  %v268_v6 = vld [vmem:[%s241_s7 + $0x78] sm:$0xff]  ;;  %v1154_v8 = vld [vmem:[%s241_s7 + $0x10] sm:$0xf] }
  0x14   : > { %269 = vst [vmem:[%s235_s8 + $0x3c] sm:$0xff] %v268_v6  ;;  %271 = vst [vmem:[%s235_s8 + $0x44] sm:$0xff] %v270_v7  ;;  %v1156_v9 = vld [vmem:[%s241_s7 + $0x38] sm:$0xf]  ;;  %v1158_v10 = vld [vmem:[%s241_s7 + $0x60] sm:$0xf] }
  0x15   : > { %1155 = vst [vmem:[%s235_s8 + $0x10] sm:$0xf] %v1154_v8  ;;  %v1160_v11 = vld [vmem:[%s241_s7 + $0x88] sm:$0xf]  ;;  %1157 = vst [vmem:[%s235_s8 + $0x24] sm:$0xf] %v1156_v9 }
  0x16   : > { %1159 = vst [vmem:[%s235_s8 + $0x38] sm:$0xf] %v1158_v10  ;;  %1161 = vst [vmem:[%s235_s8 + $0x4c] sm:$0xf] %v1160_v11 }
  0x17 PF: > { %p1162_p6 = scmp.ge.s32.totalorder %s1464_s22, 1  ;;  %p304_p7 = scmp.lt.s32.totalorder %s1464_s22, 3 }
  0x19   : > { %p305_p8 = pnand %p1162_p6, %p304_p7 }
  0x1a   : > { %s311_s9 = sand.u32 (!%p305_p8), 1, %s1448_s18   ;;  %s360_s10 = smul.u32 (!%p305_p8), 80, %s1456_s20 }
  0x1b   : > { %308 = sbr.rel (%p305_p8) target bundleno = 327 (0x147), region = 62  ;;  %p1164_p10 = scmp.ne.s32.totalorder (!%p305_p8), %s1456_s20, 0 }
  0x1c   : > { %s1330_s11 = smul.u32 (!%p305_p8), 80, %s311_s9  ;;  %p361_p9 = scmp.lt.s32.totalorder (!%p305_p8), %s360_s10, 159 }
  0x1e   : > { %s1549_s16 = scalar_lea.vmem (!%p305_p8), [#allocation3], %s1330_s11 }
  0x20   : > { %s1646_s10 = smov (!%p361_p9, %s360_s10), 159  ;;  %391 = sbr.rel (%p1164_p10) target bundleno = 40 (0x28), region = 70 }
  0x21   : > { %s1163_s12 = sshll.u32 %s1646_s10, 2 }
  0x22   : > { %s1547_s15 = scalar_lea.vmem %s1634_s1, %s1163_s12 }
  0x25   : > { %v1466_v12 = vmov 0.0  }
  0x26   : > { %392 = vst [vmem:[#allocation2 + $0x10] sm:$0xff] %v1466_v12  ;;  %393 = vst [vmem:[#allocation2] sm:$0xff] %v1466_v12 }
  0x27   : > { %394 = vst [vmem:[#allocation2 + $0x18] sm:$0xff] %v1466_v12  ;;  %395 = vst [vmem:[#allocation2 + $0x8] sm:$0xff] %v1466_v12 }
  0x28 PF: > { %v1372_v13 = vld [vmem:[%s1547_s15 + $0x78] sm:$0xff]   ;;  %v1376_v17 = vld [vmem:[%s1547_s15 + $0x70] sm:$0xff]   ;;  %v1380_v21 = vld [vmem:[%s1547_s15 + $0x68] sm:$0xff]   ;;  %p1215_p11 = scmp.ne.s32.totalorder %s1456_s20, 1 }
  0x29   : > { %v1373_v14 = vld [vmem:[%s1547_s15 + $0xf8] sm:$0xff]   ;;  %1243 = vmatprep.subr.bf16.mxu0 %v1372_v13  ;;  %v1377_v18 = vld [vmem:[%s1547_s15 + $0xf0] sm:$0xff]   ;;  %v1381_v22 = vld [vmem:[%s1547_s15 + $0xe8] sm:$0xff]  }
  0x2a   : > { %v1374_v15 = vld [vmem:[%s1547_s15 + $0x38] sm:$0xff]   ;;  %1271 = vmatprep.subr.bf16.mxu1 %v1373_v14  ;;  %v1378_v19 = vld [vmem:[%s1547_s15 + $0x30] sm:$0xff]   ;;  %v1382_v23 = vld [vmem:[%s1547_s15 + $0x28] sm:$0xff]  }
  0x2b   : > { %v1375_v16 = vld [vmem:[%s1547_s15 + $0xb8] sm:$0xff]   ;;  %1244 = vmatpush3.bf16.msra.mxu0 %v1374_v15  ;;  %v1379_v20 = vld [vmem:[%s1547_s15 + $0xb0] sm:$0xff]   ;;  %v1383_v24 = vld [vmem:[%s1547_s15 + $0xa8] sm:$0xff]  }
  0x2c   : > { %1272 = vmatpush3.bf16.msra.mxu1 %v1375_v16  ;;  %1245 = vmatprep.subr.bf16.mxu0 %v1376_v17  ;;  %v1384_v25 = vld [vmem:[%s1547_s15 + $0x60] sm:$0xff]   ;;  %v1388_v29 = vld [vmem:[%s1547_s15 + $0x58] sm:$0xff]   ;;  %v1392_v33 = vld [vmem:[%s1547_s15 + $0x50] sm:$0xff]  }
  0x2d   : > { %1273 = vmatprep.subr.bf16.mxu1 %v1377_v18  ;;  %v1385_v26 = vld [vmem:[%s1547_s15 + $0xe0] sm:$0xff]   ;;  %v1389_v30 = vld [vmem:[%s1547_s15 + $0xd8] sm:$0xff]   ;;  %v1393_v34 = vld [vmem:[%s1547_s15 + $0xd0] sm:$0xff]  }
  0x2e   : > { %v1386_v27 = vld [vmem:[%s1547_s15 + $0x20] sm:$0xff]   ;;  %v1390_v31 = vld [vmem:[%s1547_s15 + $0x18] sm:$0xff]   ;;  %v1394_v35 = vld [vmem:[%s1547_s15 + $0x10] sm:$0xff]  }
  0x2f   : > { %1246 = vmatpush3.bf16.msra.mxu0 %v1378_v19  ;;  %v1387_v28 = vld [vmem:[%s1547_s15 + $0xa0] sm:$0xff]   ;;  %v1391_v32 = vld [vmem:[%s1547_s15 + $0x98] sm:$0xff]   ;;  %v1395_v36 = vld [vmem:[%s1547_s15 + $0x90] sm:$0xff]  }
  0x30   : > { %1274 = vmatpush3.bf16.msra.mxu1 %v1379_v20  ;;  %1247 = vmatprep.subr.bf16.mxu0 %v1380_v21  ;;  %v1396_v37 = vld [vmem:[%s1547_s15 + $0x48] sm:$0xff]   ;;  %v1400_v41 = vld [vmem:[%s1547_s15 + $0x40] sm:$0xff]   ;;  %v1410_v49 = vld [vmem:[%s1547_s15 + $0x138] sm:$0xff]  }
  0x31   : > { %1275 = vmatprep.subr.bf16.mxu1 %v1381_v22  ;;  %v1397_v38 = vld [vmem:[%s1547_s15 + $0xc8] sm:$0xff]   ;;  %v1401_v42 = vld [vmem:[%s1547_s15 + $0xc0] sm:$0xff]   ;;  %v1411_v50 = vld [vmem:[%s1547_s15 + $0x130] sm:$0xff]  }
  0x32   : > { %v1398_v39 = vld [vmem:[%s1547_s15 + $0x8] sm:$0xff]   ;;  %v1402_v43 = vld [vmem:[%s1547_s15] sm:$0xff]   ;;  %v1414_v58 = vld [vmem:[%s1547_s15 + $0x118] sm:$0xff]  }
  0x33   : > { %1248 = vmatpush3.bf16.msra.mxu0 %v1382_v23  ;;  %v1399_v40 = vld [vmem:[%s1547_s15 + $0x88] sm:$0xff]   ;;  %v1403_v44 = vld [vmem:[%s1547_s15 + $0x80] sm:$0xff]   ;;  %v1421_v59 = vld [vmem:[%s1547_s15 + $0x110] sm:$0xff]  }
  0x34   : > { %1276 = vmatpush3.bf16.msra.mxu1 %v1383_v24  ;;  %1249 = vmatprep.subr.bf16.mxu0 %v1384_v25  ;;  %v1404_v45 = vld [vmem:[%s1549_s16] ss:$20 sps:$4 sm:$0xff]   ;;  %v1406_v46 = vld [vmem:[%s1549_s16 + $0x4] ss:$20 sps:$4 sm:$0xff]   ;;  %v1407_v47 = vld [vmem:[%s1549_s16 + $0x8] ss:$20 sps:$4 sm:$0xff]  }
  0x35   : > { %1277 = vmatprep.subr.bf16.mxu1 %v1385_v26  ;;  %v1409_v48 = vld [vmem:[%s1549_s16 + $0xc] ss:$20 sps:$4 sm:$0xff]   ;;  %816 = vmatprep.mubr.bf16.mxu0 %v1406_v46  ;;  %v1417_v53 = vld [vmem:[%s1549_s16 + $0x34] ss:$20 sps:$4 sm:$0xff]   ;;  %v1420_v55 = vld [vmem:[%s1549_s16 + $0x30] ss:$20 sps:$4 sm:$0xff]  }
  0x36   : > { %865 = vmatprep.mubr.bf16.mxu1 %v1409_v48  ;;  %v1412_v51 = vld [vmem:[%s1547_s15 + $0x128] sm:$0xff]   ;;  %v1413_v56 = vld [vmem:[%s1547_s15 + $0x120] sm:$0xff]   ;;  %v398_v22 = vld [vmem:[#allocation2 + $0x18] sm:$0xff] }
  0x37   : > { %1250 = vmatpush3.bf16.msra.mxu0 %v1386_v27  ;;  %v1415_v52 = vld [vmem:[%s1549_s16 + $0x2c] ss:$20 sps:$4 sm:$0xff]   ;;  %v1419_v54 = vld [vmem:[%s1549_s16 + $0x28] ss:$20 sps:$4 sm:$0xff]   ;;  %v1424_v57 = vld [vmem:[%s1549_s16 + $0x10] ss:$20 sps:$4 sm:$0xff]  }
  0x38   : > { %1278 = vmatpush3.bf16.msra.mxu1 %v1387_v28  ;;  %1251 = vmatprep.subr.bf16.mxu0 %v1388_v29  ;;  %v1422_v60 = vld [vmem:[%s1547_s15 + $0x108] sm:$0xff]   ;;  %v1423_v61 = vld [vmem:[%s1547_s15 + $0x100] sm:$0xff]   ;;  %v396_v28 = vld [vmem:[#allocation2 + $0x10] sm:$0xff] }
  0x39   : > { %1279 = vmatprep.subr.bf16.mxu1 %v1389_v30  ;;  %v1425_v62 = vld [vmem:[%s1549_s16 + $0x38] ss:$20 sps:$4 sm:$0xff]  }
  0x3b   : > { %1252 = vmatpush3.bf16.msra.mxu0 %v1390_v31 }
  0x3c   : > { %1280 = vmatpush3.bf16.msra.mxu1 %v1391_v32  ;;  %1253 = vmatprep.subr.bf16.mxu0 %v1392_v33  ;;  %v399_v33 = vld [vmem:[#allocation2 + $0x8] sm:$0xff] }
  0x3d   : > { %1281 = vmatprep.subr.bf16.mxu1 %v1393_v34 }
  0x3f   : > { %1254 = vmatpush3.bf16.msra.mxu0 %v1394_v35 }
  0x40   : > { %1282 = vmatpush3.bf16.msra.mxu1 %v1395_v36  ;;  %1255 = vmatprep.subr.bf16.mxu0 %v1396_v37 }
  0x41   : > { %1283 = vmatprep.subr.bf16.mxu1 %v1397_v38  ;;  %v397_v38 = vld [vmem:[#allocation2] sm:$0xff] }
  0x43   : > { %1256 = vmatpush3.bf16.msra.mxu0 %v1398_v39 }
  0x44   : > { %1284 = vmatpush3.bf16.msra.mxu1 %v1399_v40  ;;  %1257 = vmatprep.subr.bf16.mxu0 %v1400_v41 }
  0x45   : > { %1285 = vmatprep.subr.bf16.mxu1 %v1401_v42 }
  0x47   : > { %1258 = vmatpush3.bf16.msra.mxu0 %v1402_v43 }
  0x48   : > { %1286 = vmatpush3.bf16.msra.mxu1 %v1403_v44  ;;  %1309 = vmatprep.subr.bf16.mxu0 %v1410_v49 }
  0x4a   : > { %817 = vmatmul.mubr.bf16.vlgmr.msra.gmra.mxu0 %v1404_v45 }
  0x4b   : > { %866 = vmatmul.mubr.bf16.vlgmr.msra.gmra.mxu1 %v1407_v47  ;;  %1310 = vmatpush3.bf16.msra.mxu0 %v1410_v49 }
  0x4c   : > { %1311 = vmatprep.subr.bf16.mxu0 %v1411_v50  ;;  %824 = vmatprep.mubr.bf16.mxu0 %v1415_v52 }
  0x4d   : > { %873 = vmatprep.mubr.bf16.mxu1 %v1417_v53 }
  0x4f   : > { %1312 = vmatpush3.bf16.msra.mxu0 %v1411_v50 }
  0x50   : > { %1313 = vmatprep.subr.bf16.mxu0 %v1412_v51 }
  0x52   : > { %825 = vmatmul.mubr.bf16.gmra.mxu0 %v1419_v54 }
  0x53   : > { %874 = vmatmul.mubr.bf16.gmra.mxu1 %v1420_v55  ;;  %1314 = vmatpush3.bf16.msra.mxu0 %v1412_v51 }
  0x54   : > { %1315 = vmatprep.subr.bf16.mxu0 %v1413_v56  ;;  %1325 = vmatprep.mubr.bf16.mxu0 %v1424_v57 }
  0x57   : > { %1316 = vmatpush3.bf16.msra.mxu0 %v1413_v56 }
  0x58   : > { %1317 = vmatprep.subr.bf16.mxu0 %v1414_v58 }
  0x5b   : > { %1318 = vmatpush3.bf16.msra.mxu0 %v1414_v58 }
  0x5c   : > { %1319 = vmatprep.subr.bf16.mxu0 %v1421_v59 }
  0x5f   : > { %1320 = vmatpush3.bf16.msra.mxu0 %v1421_v59 }
  0x60   : > { %1321 = vmatprep.subr.bf16.mxu0 %v1422_v60 }
  0x63   : > { %1322 = vmatpush3.bf16.msra.mxu0 %v1422_v60 }
  0x64   : > { %1323 = vmatprep.subr.bf16.mxu0 %v1423_v61 }
  0x67   : > { %1324 = vmatpush3.bf16.msra.mxu0 %v1423_v61 }
  0x6a   : > { %1326 = vmatmul.mubr.bf16.vlgmr.msra.gmra.mxu0 %v1425_v62 }
 0x10a   : > { %v1259_v63 = vpop.f32.mrf.mxu0 }
 0x10b   : > { %v1287_v0 = vpop.f32.mrf.mxu1 }
 0x10c   : > { %v1260_v1 = vpop.f32.mrf.mxu0 }
 0x10d   : > { %v1288_v2 = vpop.f32.mrf.mxu1  ;;  %v1261_v17 = vadd.f32 %v1260_v1, %v1259_v63 }
 0x10e   : > { %v1262_v3 = vpop.f32.mrf.mxu0  ;;  %v1289_v18 = vadd.f32 %v1288_v2, %v1287_v0 }
 0x10f   : > { %v1290_v4 = vpop.f32.mrf.mxu1 }
 0x110   : > { %v1263_v5 = vpop.f32.mrf.mxu0  ;;  %v868_v27 = vadd.f32 %v1289_v18, %v1261_v17 }
 0x111   : > { %v1291_v6 = vpop.f32.mrf.mxu1  ;;  %v1264_v24 = vadd.f32 %v1263_v5, %v1262_v3 }
 0x112   : > { %v1265_v7 = vpop.f32.mrf.mxu0  ;;  %v1292_v25 = vadd.f32 %v1291_v6, %v1290_v4 }
 0x113   : > { %v1293_v8 = vpop.f32.mrf.mxu1 }
 0x114   : > { %v1266_v9 = vpop.f32.mrf.mxu0  ;;  %v871_v37 = vadd.f32 %v1292_v25, %v1264_v24 }
 0x115   : > { %v1294_v10 = vpop.f32.mrf.mxu1  ;;  %v1267_v13 = vadd.f32 %v1266_v9, %v1265_v7 }
 0x116   : > { %v1268_v11 = vpop.f32.mrf.mxu0  ;;  %v1295_v14 = vadd.f32 %v1294_v10, %v1293_v8 }
 0x117   : > { %v1296_v12 = vpop.f32.mrf.mxu1 }
 0x118   : > { %v1269_v15 = vpop.f32.mrf.mxu0  ;;  %v876_v21 = vadd.f32 %v1295_v14, %v1267_v13 }
 0x119   : > { %v1297_v16 = vpop.f32.mrf.mxu1  ;;  %v1270_v19 = vadd.f32 %v1269_v15, %v1268_v11 }
 0x11a   : > { %v1298_v20 = vadd.f32 %v1297_v16, %v1296_v12 }
 0x11c   : > { %v879_v32 = vadd.f32 %v1298_v20, %v1270_v19 }
 0x12a   : > { %v1327_v23 = vpop.f32.mrf.mxu0 }
 0x12b   : > { %v925_v26 = vadd.f32 %v1327_v23, %v876_v21 }
 0x12c   : > { %v916_v29 = vpop.f32.mrf.mxu0 }
 0x12d   : > { %v933_v30 = vadd.f32 %v925_v26, %v398_v22  ;;  %v917_v31 = vadd.f32 %v916_v29, %v868_v27 }
 0x12e   : > { %v1328_v34 = vpop.f32.mrf.mxu0 }
 0x12f   : > { %937 = vst [vmem:[#allocation2 + $0x18] sm:$0xff] %v933_v30  ;;  %v931_v35 = vadd.f32 %v917_v31, %v396_v28  ;;  %v928_v36 = vadd.f32 %v1328_v34, %v879_v32 }
 0x130   : > { %v919_v39 = vpop.f32.mrf.mxu0 }
 0x131   : > { %935 = vst [vmem:[#allocation2 + $0x10] sm:$0xff] %v931_v35  ;;  %v934_v40 = vadd.f32 %v928_v36, %v399_v33  ;;  %v920_v41 = vadd.f32 %v919_v39, %v871_v37  ;;  %942 = sbr.rel (%p1215_p11) target bundleno = 327 (0x147), region = 74 }
 0x133   : > { %938 = vst [vmem:[#allocation2 + $0x8] sm:$0xff] %v934_v40  ;;  %v932_v42 = vadd.f32 %v920_v41, %v397_v38 }
 0x135   : > { %936 = vst [vmem:[#allocation2] sm:$0xff] %v932_v42 }
 0x136   : > { %v1216_v45 = vld [vmem:[%s1635_s2] ss:$0 sm:$0xff]  ;;  %v945_v49 = vld [vmem:[#allocation2 + $0x18] sm:$0xff] }
 0x137   : > { %v1217_v48 = vld [vmem:[%s1636_s3] ss:$0 sm:$0xff]  ;;  %v956_v52 = vmul.f32 %v1216_v45, %v945_v49 }
 0x138   : > { %v943_v43 = vld [vmem:[#allocation2 + $0x10] sm:$0xff]  ;;  %v1218_v50 = vld [vmem:[%s1637_s4] ss:$0 sm:$0xff] }
 0x139   : > { %v954_v46 = vmul.f32 %v1216_v45, %v943_v43  ;;  %v967_v56 = vadd.f32 %v1217_v48, %v956_v52 }
 0x13a   : > { %v946_v51 = vld [vmem:[#allocation2 + $0x8] sm:$0xff] }
 0x13b   : > { %v965_v53 = vadd.f32 %v1217_v48, %v954_v46  ;;  %v957_v55 = vmul.f32 %v1216_v45, %v946_v51  ;;  %vm971_vm2 = vcmp.ge.f32.partialorder %v967_v56, 0.0  ;;  %v982_v60 = vmul.f32 %v1218_v50, %v967_v56 }
 0x13c   : > { %v944_v44 = vld [vmem:[#allocation2] sm:$0xff] }
 0x13d   : > { %v955_v47 = vmul.f32 %v1216_v45, %v944_v44  ;;  %vm969_vm0 = vcmp.ge.f32.partialorder %v965_v53, 0.0  ;;  %v980_v57 = vmul.f32 %v1218_v50, %v965_v53  ;;  %v968_v59 = vadd.f32 %v1217_v48, %v957_v55 }
 0x13e   : > { %v986_v1 = vsel %vm971_vm2, %v967_v56, %v982_v60 }
 0x13f   : > { %v966_v54 = vadd.f32 %v1217_v48, %v955_v47  ;;  %v984_v61 = vsel %vm969_vm0, %v965_v53, %v980_v57  ;;  %vm972_vm3 = vcmp.ge.f32.partialorder %v968_v59, 0.0  ;;  %v983_v0 = vmul.f32 %v1218_v50, %v968_v59 }
 0x141   : > { %vm970_vm1 = vcmp.ge.f32.partialorder %v966_v54, 0.0  ;;  %v981_v58 = vmul.f32 %v1218_v50, %v966_v54  ;;  %v987_v2 = vsel %vm972_vm3, %v968_v59, %v983_v0 }
 0x142   : > { %v1240_v3 = vpack.c.bf16 %v987_v2, %v986_v1 }
 0x143   : > { %v985_v62 = vsel %vm970_vm1, %v966_v54, %v981_v58 }
 0x144   : > { %v1235_v63 = vpack.c.bf16 %v985_v62, %v984_v61  ;;  %1242 = vst [vmem:[%s1638_s5 + $0x8] sm:$0xff] %v1240_v3  }
 0x146   : > { %1236 = vst [vmem:[%s1638_s5] sm:$0xff] %v1235_v63  }
 0x147 PF: > { %s15_s22 = sadd.s32 1, %s1464_s22   ;;  %s1639_s18 = smov %s1452_s19 }
 0x148   : > { %p12_p12 = scmp.ge.s32.totalorder %s15_s22, 4   ;;  %s1640_s19 = smov %s1532_s26 }
 0x149   : > { %s1641_s20 = smov %s1460_s21  ;;  %s1642_s21 = smov %s1644_s23 }
 0x14a   :  { %14 = sbr.rel (!%p12_p12) target bundleno = 3 (0x3), region = 127 }

// kernel: espnet_encoder_forward.46
= control target key start
LH: loop header
LB: loop body
LE: loop exit
PB: predicated region body
PF: predicated region fallthrough
CT: control target
= control target key end

     0   :  { %s1218_s18 = smov 0   ;;  %s1220_s19 = smov 0   ;;  %s1334_s0 = inlined_call_operand.vmem [shape: bf16[32,1152], index: 0, kind: input, shape index: {}]   ;;  %s1335_s1 = inlined_call_operand.vmem [shape: bf16[1152,128], index: 1, kind: input, shape index: {}]   ;;  %s1336_s2 = inlined_call_operand.vmem [shape: f32[1,128], index: 2, kind: input, shape index: {}]   ;;  %s1337_s3 = inlined_call_operand.vmem [shape: f32[1,128], index: 3, kind: input, shape index: {}]   ;;  %s1338_s4 = inlined_call_operand.vmem [shape: f32[1,128], index: 4, kind: input, shape index: {}]   ;;  %s1339_s5 = inlined_call_operand.vmem [shape: bf16[32,128], index: 5, kind: output, shape index: {}]  }
   0x1   :  { %s1222_s20 = smov 0   ;;  %s1224_s21 = smov 0  }
   0x2   :  { %s1226_s22 = smov 0  }
   0x3 LB: > { %s27_s23 = sadd.s32 1, %s1181_s21  ;;  %p50_p1 = scmp.ne.s32.totalorder %s1173_s19, %s1169_s18  ;;  %s1185_s22 = sphi %s1226_s22, %s15_s22   ;;  %s1181_s21 = sphi %s1224_s21, %s1343_s21   ;;  %s1177_s20 = sphi %s1222_s20, %s1342_s20   ;;  %s1173_s19 = sphi %s1220_s19, %s1341_s19   ;;  %s1169_s18 = sphi %s1218_s18, %s1340_s18  }
   0x4   : > { %p28_p0 = scmp.ge.s32.totalorder %s27_s23, 3  ;;  %p51_p2 = scmp.eq.s32.totalorder %s1185_s22, 0 }
   0x5   : > { %s43_s25 = sadd.s32 1, %s1173_s19  ;;  %p943_p5 = scmp.ge.s32.totalorder %s1185_s22, 3 }
   0x6   : > { %s1345_s23 = smov (%p28_p0, %s27_s23), 0  ;;  %p52_p3 = por %p51_p2, %p50_p1 }
   0x7   : > { %s39_s24 = ssub.s32 %s1181_s21, %s1345_s23  ;;  %228 = sbr.rel (%p943_p5) target bundleno = 21 (0x15), region = 28 }
   0x8   : > { %p41_p4 = scmp.eq.s32.totalorder %s39_s24, 0 }
   0xa   : > { %s1253_s26 = scalar_select %p41_p4, %s1173_s19, %s43_s25  }
   0xc   : > { %231 = sbr.rel (!%p52_p3) target bundleno = 21 (0x15), region = 32  ;;  %s233_s27 = sand.u32 (%p52_p3), 1, %s1173_s19  }
   0xd   : > { %s998_s28 = smul.u32 (%p52_p3), 12, %s1181_s21 }
   0xe   : > { %s1072_s29 = smul.u32 (%p52_p3), 48, %s233_s27 }
   0xf   : > { %s241_s7 = scalar_lea.vmem (%p52_p3), %s1334_s0, %s998_s28 }
  0x10   : > { %v256_v0 = vld [vmem:[%s241_s7] sm:$0xff] (%p52_p3)  ;;  %v260_v2 = vld [vmem:[%s241_s7 + $0x48] sm:$0xff] (%p52_p3)  ;;  %s235_s8 = scalar_lea.vmem (%p52_p3), [#allocation3], %s1072_s29  ;;  %v949_v6 = vld [vmem:[%s241_s7 + $0x50] sm:$0xf] (%p52_p3) }
  0x11   : > { %v258_v1 = vld [vmem:[%s241_s7 + $0x24] sm:$0xff]  ;;  %257 = vst [vmem:[%s235_s8] sm:$0xff] %v256_v0  ;;  %261 = vst [vmem:[%s235_s8 + $0x18] sm:$0xff] %v260_v2  ;;  %v262_v3 = vld [vmem:[%s241_s7 + $0x6c] sm:$0xff] }
  0x12   : > { %259 = vst [vmem:[%s235_s8 + $0xc] sm:$0xff] %v258_v1  ;;  %v945_v4 = vld [vmem:[%s241_s7 + $0x8] sm:$0xf]  ;;  %v947_v5 = vld [vmem:[%s241_s7 + $0x2c] sm:$0xf]  ;;  %263 = vst [vmem:[%s235_s8 + $0x24] sm:$0xff] %v262_v3 }
  0x13   : > { %946 = vst [vmem:[%s235_s8 + $0x8] sm:$0xf] %v945_v4  ;;  %948 = vst [vmem:[%s235_s8 + $0x14] sm:$0xf] %v947_v5  ;;  %v951_v7 = vld [vmem:[%s241_s7 + $0x74] sm:$0xf] }
  0x14   : > { %950 = vst [vmem:[%s235_s8 + $0x20] sm:$0xf] %v949_v6  ;;  %952 = vst [vmem:[%s235_s8 + $0x2c] sm:$0xf] %v951_v7 }
  0x15 PF: > { %p953_p6 = scmp.ge.s32.totalorder %s1185_s22, 1  ;;  %p296_p7 = scmp.lt.s32.totalorder %s1185_s22, 4 }
  0x17   : > { %p297_p8 = pnand %p953_p6, %p296_p7 }
  0x18   : > { %s303_s9 = sand.u32 (!%p297_p8), 1, %s1169_s18   ;;  %s352_s10 = smul.u32 (!%p297_p8), 48, %s1177_s20 }
  0x19   : > { %300 = sbr.rel (%p297_p8) target bundleno = 302 (0x12e), region = 62  ;;  %p955_p10 = scmp.ne.s32.totalorder (!%p297_p8), %s1177_s20, 0 }
  0x1a   : > { %s1073_s11 = smul.u32 (!%p297_p8), 48, %s303_s9  ;;  %p353_p9 = scmp.lt.s32.totalorder (!%p297_p8), %s352_s10, 143 }
  0x1c   : > { %s1270_s16 = scalar_lea.vmem (!%p297_p8), [#allocation3], %s1073_s11 }
  0x1e   : > { %s1347_s10 = smov (!%p353_p9, %s352_s10), 143  ;;  %383 = sbr.rel (%p955_p10) target bundleno = 38 (0x26), region = 70 }
  0x1f   : > { %s954_s12 = sshll.u32 %s1347_s10, 2 }
  0x20   : > { %s1268_s15 = scalar_lea.vmem %s1335_s1, %s954_s12 }
  0x23   : > { %v1187_v8 = vmov 0.0  }
  0x24   : > { %384 = vst [vmem:[#allocation2 + $0x10] sm:$0xff] %v1187_v8  ;;  %385 = vst [vmem:[#allocation2] sm:$0xff] %v1187_v8 }
  0x25   : > { %386 = vst [vmem:[#allocation2 + $0x18] sm:$0xff] %v1187_v8  ;;  %387 = vst [vmem:[#allocation2 + $0x8] sm:$0xff] %v1187_v8 }
  0x26 PF: > { %v1115_v9 = vld [vmem:[%s1268_s15 + $0x78] sm:$0xff]   ;;  %v1118_v12 = vld [vmem:[%s1268_s15 + $0x70] sm:$0xff]   ;;  %v1121_v15 = vld [vmem:[%s1268_s15 + $0x68] sm:$0xff]   ;;  %p986_p11 = scmp.ne.s32.totalorder %s1177_s20, 2 }
  0x27   : > { %v1116_v10 = vld [vmem:[%s1268_s15 + $0x38] sm:$0xff]   ;;  %1014 = vmatprep.subr.bf16.mxu0 %v1115_v9  ;;  %v1119_v13 = vld [vmem:[%s1268_s15 + $0x30] sm:$0xff]   ;;  %v1122_v16 = vld [vmem:[%s1268_s15 + $0x28] sm:$0xff]  }
  0x28   : > { %v1117_v11 = vld [vmem:[%s1268_s15 + $0xb8] sm:$0xff]   ;;  %1015 = vmatpush3.bf16.msra.mxu0 %v1116_v10  ;;  %v1120_v14 = vld [vmem:[%s1268_s15 + $0xb0] sm:$0xff]   ;;  %v1123_v17 = vld [vmem:[%s1268_s15 + $0xa8] sm:$0xff]  }
  0x29   : > { %1052 = vmatprep.subr.bf16.mxu1 %v1117_v11  ;;  %1016 = vmatprep.subr.bf16.mxu0 %v1118_v12  ;;  %v1124_v18 = vld [vmem:[%s1268_s15 + $0x60] sm:$0xff]   ;;  %v1127_v21 = vld [vmem:[%s1268_s15 + $0x58] sm:$0xff]   ;;  %v1130_v24 = vld [vmem:[%s1268_s15 + $0x50] sm:$0xff]  }
  0x2a   : > { %1053 = vmatpush3.bf16.msra.mxu1 %v1117_v11  ;;  %v1125_v19 = vld [vmem:[%s1268_s15 + $0x20] sm:$0xff]   ;;  %v1129_v22 = vld [vmem:[%s1268_s15 + $0x98] sm:$0xff]   ;;  %v1132_v25 = vld [vmem:[%s1268_s15 + $0x90] sm:$0xff]  }
  0x2b   : > { %1054 = vmatprep.subr.bf16.mxu1 %v1120_v14  ;;  %v1126_v20 = vld [vmem:[%s1268_s15 + $0xa0] sm:$0xff]   ;;  %v1128_v23 = vld [vmem:[%s1268_s15 + $0x18] sm:$0xff]   ;;  %v1131_v26 = vld [vmem:[%s1268_s15 + $0x10] sm:$0xff]  }
  0x2c   : > { %1017 = vmatpush3.bf16.msra.mxu0 %v1119_v13  ;;  %v1133_v27 = vld [vmem:[%s1268_s15 + $0x48] sm:$0xff]   ;;  %v1136_v30 = vld [vmem:[%s1268_s15 + $0x40] sm:$0xff]   ;;  %v388_v44 = vld [vmem:[#allocation2 + $0x10] sm:$0xff] }
  0x2d   : > { %1018 = vmatprep.subr.bf16.mxu0 %v1121_v15  ;;  %v1134_v28 = vld [vmem:[%s1268_s15 + $0x8] sm:$0xff]   ;;  %v1138_v31 = vld [vmem:[%s1268_s15 + $0x80] sm:$0xff]   ;;  %v390_v58 = vld [vmem:[#allocation2 + $0x18] sm:$0xff] }
  0x2e   : > { %1055 = vmatpush3.bf16.msra.mxu1 %v1120_v14  ;;  %v1135_v29 = vld [vmem:[%s1268_s15 + $0x88] sm:$0xff]   ;;  %v1141_v32 = vld [vmem:[%s1270_s16 + $0x4] ss:$12 sps:$4 sm:$0xff]  }
  0x2f   : > { %1056 = vmatprep.subr.bf16.mxu1 %v1123_v17  ;;  %v1142_v33 = vld [vmem:[%s1270_s16 + $0x8] ss:$12 sps:$4 sm:$0xff]   ;;  %656 = vmatprep.mubr.bf16.mxu0 %v1141_v32  ;;  %v1139_v35 = vld [vmem:[%s1270_s16] ss:$12 sps:$4 sm:$0xff]   ;;  %v1146_v38 = vld [vmem:[%s1270_s16 + $0x18] ss:$12 sps:$4 sm:$0xff]  }
  0x30   : > { %1019 = vmatpush3.bf16.msra.mxu0 %v1122_v16  ;;  %v1137_v34 = vld [vmem:[%s1268_s15] sm:$0xff]   ;;  %1068 = vmatprep.mubr.bf16.mxu1 %v1142_v33  ;;  %v1144_v36 = vld [vmem:[%s1270_s16 + $0x1c] ss:$12 sps:$4 sm:$0xff]  }
  0x31   : > { %1020 = vmatprep.subr.bf16.mxu0 %v1124_v18  ;;  %v1143_v37 = vld [vmem:[%s1270_s16 + $0x20] ss:$12 sps:$4 sm:$0xff]  }
  0x32   : > { %1057 = vmatpush3.bf16.msra.mxu1 %v1123_v17  ;;  %v389_v52 = vld [vmem:[#allocation2] sm:$0xff]  ;;  %v391_v0 = vld [vmem:[#allocation2 + $0x8] sm:$0xff] }
  0x33   : > { %1058 = vmatprep.subr.bf16.mxu1 %v1126_v20 }
  0x34   : > { %1021 = vmatpush3.bf16.msra.mxu0 %v1125_v19 }
  0x35   : > { %1022 = vmatprep.subr.bf16.mxu0 %v1127_v21 }
  0x36   : > { %1059 = vmatpush3.bf16.msra.mxu1 %v1126_v20 }
  0x37   : > { %1060 = vmatprep.subr.bf16.mxu1 %v1129_v22 }
  0x38   : > { %1023 = vmatpush3.bf16.msra.mxu0 %v1128_v23 }
  0x39   : > { %1024 = vmatprep.subr.bf16.mxu0 %v1130_v24 }
  0x3a   : > { %1061 = vmatpush3.bf16.msra.mxu1 %v1129_v22 }
  0x3b   : > { %1062 = vmatprep.subr.bf16.mxu1 %v1132_v25 }
  0x3c   : > { %1025 = vmatpush3.bf16.msra.mxu0 %v1131_v26 }
  0x3d   : > { %1026 = vmatprep.subr.bf16.mxu0 %v1133_v27 }
  0x3e   : > { %1063 = vmatpush3.bf16.msra.mxu1 %v1132_v25 }
  0x3f   : > { %1064 = vmatprep.subr.bf16.mxu1 %v1135_v29 }
  0x40   : > { %1027 = vmatpush3.bf16.msra.mxu0 %v1134_v28 }
  0x41   : > { %1028 = vmatprep.subr.bf16.mxu0 %v1136_v30 }
  0x42   : > { %1065 = vmatpush3.bf16.msra.mxu1 %v1135_v29 }
  0x43   : > { %1066 = vmatprep.subr.bf16.mxu1 %v1138_v31 }
  0x44   : > { %1029 = vmatpush3.bf16.msra.mxu0 %v1137_v34 }
  0x46   : > { %1067 = vmatpush3.bf16.msra.mxu1 %v1138_v31 }
  0x47   : > { %657 = vmatmul.mubr.bf16.vlgmr.msra.gmra.mxu0 %v1139_v35 }
  0x48   : > { %664 = vmatprep.mubr.bf16.mxu0 %v1144_v36 }
  0x49   : > { %1069 = vmatmul.mubr.bf16.vlgmr.msra.gmra.mxu1 %v1143_v37 }
  0x4f   : > { %665 = vmatmul.mubr.bf16.gmra.mxu0 %v1146_v38 }
 0x107   : > { %v1030_v39 = vpop.f32.mrf.mxu0 }
 0x109   : > { %v1031_v40 = vpop.f32.mrf.mxu0  ;;  %v1070_v41 = vpop.f32.mrf.mxu1 }
 0x10a   : > { %v1032_v42 = vadd.f32 %v1031_v40, %v1030_v39 }
 0x10b   : > { %v1033_v43 = vpop.f32.mrf.mxu0  ;;  %v707_v45 = vpop.f32.mrf.mxu1 }
 0x10c   : > { %v708_v46 = vadd.f32 %v1032_v42, %v707_v45 }
 0x10d   : > { %v1034_v47 = vpop.f32.mrf.mxu0  ;;  %v1071_v48 = vpop.f32.mrf.mxu1 }
 0x10e   : > { %v722_v49 = vadd.f32 %v708_v46, %v388_v44  ;;  %v1035_v50 = vadd.f32 %v1034_v47, %v1033_v43 }
 0x10f   : > { %v1036_v51 = vpop.f32.mrf.mxu0  ;;  %v710_v53 = vpop.f32.mrf.mxu1 }
 0x110   : > { %726 = vst [vmem:[#allocation2 + $0x10] sm:$0xff] %v722_v49  ;;  %v711_v54 = vadd.f32 %v1035_v50, %v710_v53 }
 0x111   : > { %v1037_v55 = vpop.f32.mrf.mxu0 }
 0x112   : > { %v723_v56 = vadd.f32 %v711_v54, %v389_v52  ;;  %v1038_v57 = vadd.f32 %v1037_v55, %v1036_v51 }
 0x113   : > { %v1039_v59 = vpop.f32.mrf.mxu0 }
 0x114   : > { %727 = vst [vmem:[#allocation2] sm:$0xff] %v723_v56  ;;  %v716_v60 = vadd.f32 %v1070_v41, %v1038_v57 }
 0x115   : > { %v1040_v61 = vpop.f32.mrf.mxu0 }
 0x116   : > { %v724_v62 = vadd.f32 %v716_v60, %v390_v58  ;;  %v1041_v63 = vadd.f32 %v1040_v61, %v1039_v59 }
 0x118   : > { %728 = vst [vmem:[#allocation2 + $0x18] sm:$0xff] %v724_v62  ;;  %v719_v1 = vadd.f32 %v1071_v48, %v1041_v63  ;;  %733 = sbr.rel (%p986_p11) target bundleno = 302 (0x12e), region = 74 }
 0x11a   : > { %v725_v2 = vadd.f32 %v719_v1, %v391_v0 }
 0x11c   : > { %729 = vst [vmem:[#allocation2 + $0x8] sm:$0xff] %v725_v2 }
 0x11d   : > { %v734_v3 = vld [vmem:[#allocation2 + $0x10] sm:$0xff]  ;;  %v735_v4 = vld [vmem:[#allocation2] sm:$0xff] }
 0x11e   : > { %v987_v5 = vld [vmem:[%s1336_s2] ss:$0 sm:$0xff] }
 0x11f   : > { %v745_v6 = vmul.f32 %v987_v5, %v734_v3  ;;  %v746_v7 = vmul.f32 %v987_v5, %v735_v4  ;;  %v988_v8 = vld [vmem:[%s1337_s3] ss:$0 sm:$0xff]  ;;  %v736_v9 = vld [vmem:[#allocation2 + $0x18] sm:$0xff] }
 0x120   : > { %v989_v10 = vld [vmem:[%s1338_s4] ss:$0 sm:$0xff]  ;;  %v747_v12 = vmul.f32 %v987_v5, %v736_v9 }
 0x121   : > { %v756_v13 = vadd.f32 %v988_v8, %v745_v6  ;;  %v757_v14 = vadd.f32 %v988_v8, %v746_v7 }
 0x122   : > { %v758_v16 = vadd.f32 %v988_v8, %v747_v12 }
 0x123   : > { %v737_v11 = vld [vmem:[#allocation2 + $0x8] sm:$0xff]  ;;  %vm760_vm0 = vcmp.ge.f32.partialorder %v756_v13, 0.0  ;;  %vm761_vm1 = vcmp.ge.f32.partialorder %v757_v14, 0.0  ;;  %v771_v17 = vmul.f32 %v989_v10, %v756_v13  ;;  %v772_v18 = vmul.f32 %v989_v10, %v757_v14 }
 0x124   : > { %v748_v15 = vmul.f32 %v987_v5, %v737_v11  ;;  %vm762_vm2 = vcmp.ge.f32.partialorder %v758_v16, 0.0  ;;  %v773_v20 = vmul.f32 %v989_v10, %v758_v16 }
 0x125   : > { %v775_v21 = vsel %vm760_vm0, %v756_v13, %v771_v17  ;;  %v776_v22 = vsel %vm761_vm1, %v757_v14, %v772_v18 }
 0x126   : > { %v759_v19 = vadd.f32 %v988_v8, %v748_v15  ;;  %v1006_v23 = vpack.c.bf16 %v776_v22, %v775_v21  ;;  %v777_v25 = vsel %vm762_vm2, %v758_v16, %v773_v20 }
 0x128   : > { %vm763_vm3 = vcmp.ge.f32.partialorder %v759_v19, 0.0  ;;  %v774_v24 = vmul.f32 %v989_v10, %v759_v19  ;;  %1007 = vst [vmem:[%s1339_s5] sm:$0xff] %v1006_v23  }
 0x12a   : > { %v778_v26 = vsel %vm763_vm3, %v759_v19, %v774_v24 }
 0x12b   : > { %v1011_v27 = vpack.c.bf16 %v778_v26, %v777_v25 }
 0x12d   : > { %1013 = vst [vmem:[%s1339_s5 + $0x8] sm:$0xff] %v1011_v27  }
 0x12e PF: > { %s15_s22 = sadd.s32 1, %s1185_s22   ;;  %s1340_s18 = smov %s1173_s19 }
 0x12f   : > { %p12_p12 = scmp.ge.s32.totalorder %s15_s22, 5   ;;  %s1341_s19 = smov %s1253_s26 }
 0x130   : > { %s1342_s20 = smov %s1181_s21  ;;  %s1343_s21 = smov %s1345_s23 }
 0x131   :  { %14 = sbr.rel (!%p12_p12) target bundleno = 3 (0x3), region = 127 }

// kernel: espnet_encoder_forward.47
= control target key start
LH: loop header
LB: loop body
LE: loop exit
PB: predicated region body
PF: predicated region fallthrough
CT: control target
= control target key end

     0   :  { %s389_s1 = inlined_call_operand.vmem [shape: bf16[128,128], index: 1, kind: input, shape index: {}]   ;;  %s390_s0 = inlined_call_operand.vmem [shape: bf16[32,128], index: 0, kind: input, shape index: {}]   ;;  %s391_s2 = inlined_call_operand.vmem [shape: f32[1,128], index: 2, kind: input, shape index: {}, may-alias: {2,4}]   ;;  %s392_s3 = inlined_call_operand.vmem [shape: f32[1,128], index: 3, kind: input, shape index: {}]   ;;  %s393_s4 = inlined_call_operand.vmem [shape: f32[1,128], index: 4, kind: input, shape index: {}, may-alias: {2,4}]   ;;  %s394_s5 = inlined_call_operand.vmem [shape: bf16[32,128], index: 5, kind: output, shape index: {}]  }
   0x1   :  { %v304_v0 = vld [vmem:[%s389_s1 + $0x38] sm:$0xff]   ;;  %v305_v1 = vld [vmem:[%s389_s1 + $0x30] sm:$0xff]   ;;  %v306_v2 = vld [vmem:[%s389_s1 + $0x28] sm:$0xff]  }
   0x2   :  { %284 = vmatprep.subr.bf16.mxu0 %v304_v0  ;;  %v307_v3 = vld [vmem:[%s389_s1 + $0x20] sm:$0xff]   ;;  %v308_v5 = vld [vmem:[%s389_s1 + $0x18] sm:$0xff]   ;;  %v309_v6 = vld [vmem:[%s389_s1 + $0x10] sm:$0xff]  }
   0x3   :  { %285 = vmatpush3.bf16.msra.mxu0 %v304_v0  ;;  %v312_v4 = vld [vmem:[%s390_s0] sm:$0xff]   ;;  %v310_v7 = vld [vmem:[%s389_s1 + $0x8] sm:$0xff]  }
   0x4   :  { %286 = vmatprep.subr.bf16.mxu0 %v305_v1  ;;  %300 = vmatprep.mubr.bf16.mxu0 %v312_v4  ;;  %v311_v8 = vld [vmem:[%s389_s1] sm:$0xff]   ;;  %v313_v9 = vld [vmem:[%s390_s0 + $0x8] sm:$0xff]  }
   0x5   :  { %v252_v10 = vld [vmem:[%s391_s2] ss:$0 sm:$0xff] }
   0x6   :  { %v253_v12 = vld [vmem:[%s392_s3] ss:$0 sm:$0xff] }
   0x7   :  { %287 = vmatpush3.bf16.msra.mxu0 %v305_v1  ;;  %v254_v17 = vld [vmem:[%s393_s4] ss:$0 sm:$0xff] }
   0x8   :  { %288 = vmatprep.subr.bf16.mxu0 %v306_v2 }
   0xb   :  { %289 = vmatpush3.bf16.msra.mxu0 %v306_v2 }
   0xc   :  { %290 = vmatprep.subr.bf16.mxu0 %v307_v3 }
   0xf   :  { %291 = vmatpush3.bf16.msra.mxu0 %v307_v3 }
  0x10   :  { %292 = vmatprep.subr.bf16.mxu0 %v308_v5 }
  0x13   :  { %293 = vmatpush3.bf16.msra.mxu0 %v308_v5 }
  0x14   :  { %294 = vmatprep.subr.bf16.mxu0 %v309_v6 }
  0x17   :  { %295 = vmatpush3.bf16.msra.mxu0 %v309_v6 }
  0x18   :  { %296 = vmatprep.subr.bf16.mxu0 %v310_v7 }
  0x1b   :  { %297 = vmatpush3.bf16.msra.mxu0 %v310_v7 }
  0x1c   :  { %298 = vmatprep.subr.bf16.mxu0 %v311_v8 }
  0x1f   :  { %299 = vmatpush3.bf16.msra.mxu0 %v311_v8 }
  0x22   :  { %301 = vmatmul.mubr.bf16.vlgmr.msra.gmra.mxu0 %v313_v9 }
  0xe2   :  { %v302_v11 = vpop.f32.mrf.mxu0 }
  0xe3   :  { %v186_v13 = vmul.f32 %v302_v11, %v252_v10 }
  0xe4   :  { %v147_v14 = vpop.f32.mrf.mxu0 }
  0xe5   :  { %v197_v15 = vadd.f32 %v253_v12, %v186_v13  ;;  %v184_v16 = vmul.f32 %v252_v10, %v147_v14 }
  0xe6   :  { %v303_v18 = vpop.f32.mrf.mxu0 }
  0xe7   :  { %v187_v19 = vmul.f32 %v303_v18, %v252_v10  ;;  %v195_v20 = vadd.f32 %v253_v12, %v184_v16  ;;  %v212_v22 = vmul.f32 %v254_v17, %v197_v15  ;;  %vm201_vm0 = vcmp.ge.f32.partialorder %v197_v15, 0.0 }
  0xe8   :  { %v150_v21 = vpop.f32.mrf.mxu0 }
  0xe9   :  { %v198_v23 = vadd.f32 %v253_v12, %v187_v19  ;;  %v185_v24 = vmul.f32 %v252_v10, %v150_v21  ;;  %v210_v26 = vmul.f32 %v254_v17, %v195_v20  ;;  %v216_v28 = vsel %vm201_vm0, %v197_v15, %v212_v22 }
  0xea   :  { %vm199_vm2 = vcmp.ge.f32.partialorder %v195_v20, 0.0 }
  0xeb   :  { %vm202_vm1 = vcmp.ge.f32.partialorder %v198_v23, 0.0  ;;  %v213_v25 = vmul.f32 %v254_v17, %v198_v23  ;;  %v196_v27 = vadd.f32 %v253_v12, %v185_v24  ;;  %v214_v32 = vsel %vm199_vm2, %v195_v20, %v210_v26 }
  0xed   :  { %v217_v29 = vsel %vm202_vm1, %v198_v23, %v213_v25  ;;  %vm200_vm3 = vcmp.ge.f32.partialorder %v196_v27, 0.0  ;;  %v211_v31 = vmul.f32 %v254_v17, %v196_v27 }
  0xee   :  { %v271_v30 = vpack.c.bf16 %v217_v29, %v216_v28 }
  0xef   :  { %v215_v33 = vsel %vm200_vm3, %v196_v27, %v211_v31 }
  0xf0   :  { %273 = vst [vmem:[%s394_s5 + $0x8] sm:$0xff] %v271_v30   ;;  %v266_v34 = vpack.c.bf16 %v215_v33, %v214_v32 }
  0xf2   :  { %267 = vst [vmem:[%s394_s5] sm:$0xff] %v266_v34  }

// kernel: espnet_encoder_forward.48
= control target key start
LH: loop header
LB: loop body
LE: loop exit
PB: predicated region body
PF: predicated region fallthrough
CT: control target
= control target key end

     0   :  { %s1323_s21 = smov 0   ;;  %s1325_s22 = smov 0   ;;  %s1445_s0 = inlined_call_operand.vmem [shape: bf16[32,1152], index: 0, kind: input, shape index: {}]   ;;  %s1446_s1 = inlined_call_operand.vmem [shape: bf16[1152,128], index: 1, kind: input, shape index: {}]   ;;  %s1447_s2 = inlined_call_operand.vmem [shape: bf16[32,128], index: 2, kind: input, shape index: {}]   ;;  %s1448_s3 = inlined_call_operand.vmem [shape: f32[1,128], index: 3, kind: input, shape index: {}]   ;;  %s1449_s4 = inlined_call_operand.vmem [shape: f32[1,128], index: 4, kind: input, shape index: {}]   ;;  %s1450_s5 = inlined_call_operand.vmem [shape: f32[1,128], index: 5, kind: input, shape index: {}]   ;;  %s1451_s6 = inlined_call_operand.vmem [shape: bf16[32,128], index: 6, kind: output, shape index: {}]  }
   0x1   :  { %s1327_s23 = smov 0   ;;  %s1329_s24 = smov 0  }
   0x2   :  { %s1331_s25 = smov 0  }
   0x3 LB: > { %s28_s26 = sadd.s32 1, %s1281_s24  ;;  %p51_p1 = scmp.ne.s32.totalorder %s1273_s22, %s1269_s21  ;;  %s1285_s25 = sphi %s1331_s25, %s16_s25   ;;  %s1281_s24 = sphi %s1329_s24, %s1455_s24   ;;  %s1277_s23 = sphi %s1327_s23, %s1454_s23   ;;  %s1273_s22 = sphi %s1325_s22, %s1453_s22   ;;  %s1269_s21 = sphi %s1323_s21, %s1452_s21  }
   0x4   : > { %p29_p0 = scmp.ge.s32.totalorder %s28_s26, 3  ;;  %p52_p2 = scmp.eq.s32.totalorder %s1285_s25, 0 }
   0x5   : > { %s44_s28 = sadd.s32 1, %s1273_s22  ;;  %p1034_p5 = scmp.ge.s32.totalorder %s1285_s25, 3 }
   0x6   : > { %s1457_s26 = smov (%p29_p0, %s28_s26), 0  ;;  %p53_p3 = por %p52_p2, %p51_p1 }
   0x7   : > { %s40_s27 = ssub.s32 %s1281_s24, %s1457_s26  ;;  %269 = sbr.rel (%p1034_p5) target bundleno = 21 (0x15), region = 32 }
   0x8   : > { %p42_p4 = scmp.eq.s32.totalorder %s40_s27, 0 }
   0xa   : > { %s1358_s29 = scalar_select %p42_p4, %s1273_s22, %s44_s28  }
   0xc   : > { %272 = sbr.rel (!%p53_p3) target bundleno = 21 (0x15), region = 36  ;;  %s274_s30 = sand.u32 (%p53_p3), 1, %s1273_s22  }
   0xd   : > { %s1089_s7 = smul.u32 (%p53_p3), 12, %s1281_s24 }
   0xe   : > { %s1172_s8 = smul.u32 (%p53_p3), 48, %s274_s30 }
   0xf   : > { %s282_s11 = scalar_lea.vmem (%p53_p3), %s1445_s0, %s1089_s7 }
  0x10   : > { %v297_v0 = vld [vmem:[%s282_s11] sm:$0xff] (%p53_p3)  ;;  %v301_v2 = vld [vmem:[%s282_s11 + $0x48] sm:$0xff] (%p53_p3)  ;;  %s276_s12 = scalar_lea.vmem (%p53_p3), [#allocation3], %s1172_s8  ;;  %v1040_v6 = vld [vmem:[%s282_s11 + $0x50] sm:$0xf] (%p53_p3) }
  0x11   : > { %v299_v1 = vld [vmem:[%s282_s11 + $0x24] sm:$0xff]  ;;  %298 = vst [vmem:[%s276_s12] sm:$0xff] %v297_v0  ;;  %302 = vst [vmem:[%s276_s12 + $0x18] sm:$0xff] %v301_v2  ;;  %v303_v3 = vld [vmem:[%s282_s11 + $0x6c] sm:$0xff] }
  0x12   : > { %300 = vst [vmem:[%s276_s12 + $0xc] sm:$0xff] %v299_v1  ;;  %v1036_v4 = vld [vmem:[%s282_s11 + $0x8] sm:$0xf]  ;;  %v1038_v5 = vld [vmem:[%s282_s11 + $0x2c] sm:$0xf]  ;;  %304 = vst [vmem:[%s276_s12 + $0x24] sm:$0xff] %v303_v3 }
  0x13   : > { %1037 = vst [vmem:[%s276_s12 + $0x8] sm:$0xf] %v1036_v4  ;;  %1039 = vst [vmem:[%s276_s12 + $0x14] sm:$0xf] %v1038_v5  ;;  %v1042_v7 = vld [vmem:[%s282_s11 + $0x74] sm:$0xf] }
  0x14   : > { %1041 = vst [vmem:[%s276_s12 + $0x20] sm:$0xf] %v1040_v6  ;;  %1043 = vst [vmem:[%s276_s12 + $0x2c] sm:$0xf] %v1042_v7 }
  0x15 PF: > { %p1044_p6 = scmp.ge.s32.totalorder %s1285_s25, 1  ;;  %p337_p7 = scmp.lt.s32.totalorder %s1285_s25, 4 }
  0x17   : > { %p338_p8 = pnand %p1044_p6, %p337_p7 }
  0x18   : > { %s344_s13 = sand.u32 (!%p338_p8), 1, %s1269_s21   ;;  %s403_s14 = smul.u32 (!%p338_p8), 48, %s1277_s23 }
  0x19   : > { %341 = sbr.rel (%p338_p8) target bundleno = 304 (0x130), region = 66  ;;  %p1046_p10 = scmp.ne.s32.totalorder (!%p338_p8), %s1277_s23, 0 }
  0x1a   : > { %s1173_s15 = smul.u32 (!%p338_p8), 48, %s344_s13  ;;  %p404_p9 = scmp.lt.s32.totalorder (!%p338_p8), %s403_s14, 143 }
  0x1c   : > { %s1375_s20 = scalar_lea.vmem (!%p338_p8), [#allocation3], %s1173_s15 }
  0x1e   : > { %s1459_s14 = smov (!%p404_p9, %s403_s14), 143  ;;  %443 = sbr.rel (%p1046_p10) target bundleno = 38 (0x26), region = 74 }
  0x1f   : > { %s1045_s16 = sshll.u32 %s1459_s14, 2 }
  0x20   : > { %s1373_s19 = scalar_lea.vmem %s1446_s1, %s1045_s16 }
  0x23   : > { %v1287_v8 = vmov 0.0  }
  0x24   : > { %444 = vst [vmem:[#allocation2 + $0x10] sm:$0xff] %v1287_v8  ;;  %445 = vst [vmem:[#allocation2] sm:$0xff] %v1287_v8 }
  0x25   : > { %446 = vst [vmem:[#allocation2 + $0x18] sm:$0xff] %v1287_v8  ;;  %447 = vst [vmem:[#allocation2 + $0x8] sm:$0xff] %v1287_v8 }
  0x26 PF: > { %v1215_v9 = vld [vmem:[%s1373_s19 + $0x78] sm:$0xff]   ;;  %v1218_v12 = vld [vmem:[%s1373_s19 + $0x70] sm:$0xff]   ;;  %v1221_v15 = vld [vmem:[%s1373_s19 + $0x68] sm:$0xff]   ;;  %p1077_p11 = scmp.ne.s32.totalorder %s1277_s23, 2 }
  0x27   : > { %v1216_v10 = vld [vmem:[%s1373_s19 + $0x38] sm:$0xff]   ;;  %1114 = vmatprep.subr.bf16.mxu0 %v1215_v9  ;;  %v1219_v13 = vld [vmem:[%s1373_s19 + $0x30] sm:$0xff]   ;;  %v1222_v16 = vld [vmem:[%s1373_s19 + $0x28] sm:$0xff]  }
  0x28   : > { %v1217_v11 = vld [vmem:[%s1373_s19 + $0xb8] sm:$0xff]   ;;  %1115 = vmatpush3.bf16.msra.mxu0 %v1216_v10  ;;  %v1220_v14 = vld [vmem:[%s1373_s19 + $0xb0] sm:$0xff]   ;;  %v1223_v17 = vld [vmem:[%s1373_s19 + $0xa8] sm:$0xff]  }
  0x29   : > { %1152 = vmatprep.subr.bf16.mxu1 %v1217_v11  ;;  %1116 = vmatprep.subr.bf16.mxu0 %v1218_v12  ;;  %v1224_v18 = vld [vmem:[%s1373_s19 + $0x60] sm:$0xff]   ;;  %v1227_v21 = vld [vmem:[%s1373_s19 + $0x58] sm:$0xff]   ;;  %v1230_v24 = vld [vmem:[%s1373_s19 + $0x50] sm:$0xff]  }
  0x2a   : > { %1153 = vmatpush3.bf16.msra.mxu1 %v1217_v11  ;;  %v1225_v19 = vld [vmem:[%s1373_s19 + $0x20] sm:$0xff]   ;;  %v1229_v22 = vld [vmem:[%s1373_s19 + $0x98] sm:$0xff]   ;;  %v1232_v25 = vld [vmem:[%s1373_s19 + $0x90] sm:$0xff]  }
  0x2b   : > { %1154 = vmatprep.subr.bf16.mxu1 %v1220_v14  ;;  %v1226_v20 = vld [vmem:[%s1373_s19 + $0xa0] sm:$0xff]   ;;  %v1228_v23 = vld [vmem:[%s1373_s19 + $0x18] sm:$0xff]   ;;  %v1231_v26 = vld [vmem:[%s1373_s19 + $0x10] sm:$0xff]  }
  0x2c   : > { %1117 = vmatpush3.bf16.msra.mxu0 %v1219_v13  ;;  %v1233_v27 = vld [vmem:[%s1373_s19 + $0x48] sm:$0xff]   ;;  %v1236_v30 = vld [vmem:[%s1373_s19 + $0x40] sm:$0xff]   ;;  %v448_v44 = vld [vmem:[#allocation2 + $0x10] sm:$0xff] }
  0x2d   : > { %1118 = vmatprep.subr.bf16.mxu0 %v1221_v15  ;;  %v1234_v28 = vld [vmem:[%s1373_s19 + $0x8] sm:$0xff]   ;;  %v1238_v31 = vld [vmem:[%s1373_s19 + $0x80] sm:$0xff]   ;;  %v450_v58 = vld [vmem:[#allocation2 + $0x18] sm:$0xff] }
  0x2e   : > { %1155 = vmatpush3.bf16.msra.mxu1 %v1220_v14  ;;  %v1235_v29 = vld [vmem:[%s1373_s19 + $0x88] sm:$0xff]   ;;  %v1241_v32 = vld [vmem:[%s1375_s20 + $0x4] ss:$12 sps:$4 sm:$0xff]  }
  0x2f   : > { %1156 = vmatprep.subr.bf16.mxu1 %v1223_v17  ;;  %v1242_v33 = vld [vmem:[%s1375_s20 + $0x8] ss:$12 sps:$4 sm:$0xff]   ;;  %716 = vmatprep.mubr.bf16.mxu0 %v1241_v32  ;;  %v1239_v35 = vld [vmem:[%s1375_s20] ss:$12 sps:$4 sm:$0xff]   ;;  %v1246_v38 = vld [vmem:[%s1375_s20 + $0x18] ss:$12 sps:$4 sm:$0xff]  }
  0x30   : > { %1119 = vmatpush3.bf16.msra.mxu0 %v1222_v16  ;;  %v1237_v34 = vld [vmem:[%s1373_s19] sm:$0xff]   ;;  %1168 = vmatprep.mubr.bf16.mxu1 %v1242_v33  ;;  %v1244_v36 = vld [vmem:[%s1375_s20 + $0x1c] ss:$12 sps:$4 sm:$0xff]  }
  0x31   : > { %1120 = vmatprep.subr.bf16.mxu0 %v1224_v18  ;;  %v1243_v37 = vld [vmem:[%s1375_s20 + $0x20] ss:$12 sps:$4 sm:$0xff]  }
  0x32   : > { %1157 = vmatpush3.bf16.msra.mxu1 %v1223_v17  ;;  %v449_v52 = vld [vmem:[#allocation2] sm:$0xff]  ;;  %v451_v0 = vld [vmem:[#allocation2 + $0x8] sm:$0xff] }
  0x33   : > { %1158 = vmatprep.subr.bf16.mxu1 %v1226_v20 }
  0x34   : > { %1121 = vmatpush3.bf16.msra.mxu0 %v1225_v19 }
  0x35   : > { %1122 = vmatprep.subr.bf16.mxu0 %v1227_v21 }
  0x36   : > { %1159 = vmatpush3.bf16.msra.mxu1 %v1226_v20 }
  0x37   : > { %1160 = vmatprep.subr.bf16.mxu1 %v1229_v22 }
  0x38   : > { %1123 = vmatpush3.bf16.msra.mxu0 %v1228_v23 }
  0x39   : > { %1124 = vmatprep.subr.bf16.mxu0 %v1230_v24 }
  0x3a   : > { %1161 = vmatpush3.bf16.msra.mxu1 %v1229_v22 }
  0x3b   : > { %1162 = vmatprep.subr.bf16.mxu1 %v1232_v25 }
  0x3c   : > { %1125 = vmatpush3.bf16.msra.mxu0 %v1231_v26 }
  0x3d   : > { %1126 = vmatprep.subr.bf16.mxu0 %v1233_v27 }
  0x3e   : > { %1163 = vmatpush3.bf16.msra.mxu1 %v1232_v25 }
  0x3f   : > { %1164 = vmatprep.subr.bf16.mxu1 %v1235_v29 }
  0x40   : > { %1127 = vmatpush3.bf16.msra.mxu0 %v1234_v28 }
  0x41   : > { %1128 = vmatprep.subr.bf16.mxu0 %v1236_v30 }
  0x42   : > { %1165 = vmatpush3.bf16.msra.mxu1 %v1235_v29 }
  0x43   : > { %1166 = vmatprep.subr.bf16.mxu1 %v1238_v31 }
  0x44   : > { %1129 = vmatpush3.bf16.msra.mxu0 %v1237_v34 }
  0x46   : > { %1167 = vmatpush3.bf16.msra.mxu1 %v1238_v31 }
  0x47   : > { %717 = vmatmul.mubr.bf16.vlgmr.msra.gmra.mxu0 %v1239_v35 }
  0x48   : > { %724 = vmatprep.mubr.bf16.mxu0 %v1244_v36 }
  0x49   : > { %1169 = vmatmul.mubr.bf16.vlgmr.msra.gmra.mxu1 %v1243_v37 }
  0x4f   : > { %725 = vmatmul.mubr.bf16.gmra.mxu0 %v1246_v38 }
 0x107   : > { %v1130_v39 = vpop.f32.mrf.mxu0 }
 0x109   : > { %v1131_v40 = vpop.f32.mrf.mxu0  ;;  %v1170_v41 = vpop.f32.mrf.mxu1 }
 0x10a   : > { %v1132_v42 = vadd.f32 %v1131_v40, %v1130_v39 }
 0x10b   : > { %v1133_v43 = vpop.f32.mrf.mxu0  ;;  %v767_v45 = vpop.f32.mrf.mxu1 }
 0x10c   : > { %v768_v46 = vadd.f32 %v1132_v42, %v767_v45 }
 0x10d   : > { %v1134_v47 = vpop.f32.mrf.mxu0  ;;  %v1171_v48 = vpop.f32.mrf.mxu1 }
 0x10e   : > { %v782_v49 = vadd.f32 %v768_v46, %v448_v44  ;;  %v1135_v50 = vadd.f32 %v1134_v47, %v1133_v43 }
 0x10f   : > { %v1136_v51 = vpop.f32.mrf.mxu0  ;;  %v770_v53 = vpop.f32.mrf.mxu1 }
 0x110   : > { %786 = vst [vmem:[#allocation2 + $0x10] sm:$0xff] %v782_v49  ;;  %v771_v54 = vadd.f32 %v1135_v50, %v770_v53 }
 0x111   : > { %v1137_v55 = vpop.f32.mrf.mxu0 }
 0x112   : > { %v783_v56 = vadd.f32 %v771_v54, %v449_v52  ;;  %v1138_v57 = vadd.f32 %v1137_v55, %v1136_v51 }
 0x113   : > { %v1139_v59 = vpop.f32.mrf.mxu0 }
 0x114   : > { %787 = vst [vmem:[#allocation2] sm:$0xff] %v783_v56  ;;  %v776_v60 = vadd.f32 %v1170_v41, %v1138_v57 }
 0x115   : > { %v1140_v61 = vpop.f32.mrf.mxu0 }
 0x116   : > { %v784_v62 = vadd.f32 %v776_v60, %v450_v58  ;;  %v1141_v63 = vadd.f32 %v1140_v61, %v1139_v59 }
 0x118   : > { %788 = vst [vmem:[#allocation2 + $0x18] sm:$0xff] %v784_v62  ;;  %v779_v1 = vadd.f32 %v1171_v48, %v1141_v63  ;;  %793 = sbr.rel (%p1077_p11) target bundleno = 304 (0x130), region = 78 }
 0x11a   : > { %v785_v2 = vadd.f32 %v779_v1, %v451_v0 }
 0x11c   : > { %789 = vst [vmem:[#allocation2 + $0x8] sm:$0xff] %v785_v2 }
 0x11d   : > { %v794_v3 = vld [vmem:[#allocation2 + $0x10] sm:$0xff]  ;;  %v795_v4 = vld [vmem:[#allocation2] sm:$0xff]  ;;  %v1112_v11 = vld [vmem:[%s1447_s2 + $0x8] sm:$0xff]  }
 0x11e   : > { %v1095_v5 = vld [vmem:[%s1447_s2] sm:$0xff]   ;;  %v1100_v14 = vunpack.c.l.bf16 %v1112_v11  ;;  %v1101_v15 = vunpack.c.h.bf16 %v1112_v11 }
 0x11f   : > { %v1096_v6 = vunpack.c.l.bf16 %v1095_v5  ;;  %v1097_v7 = vunpack.c.h.bf16 %v1095_v5  ;;  %v1078_v8 = vld [vmem:[%s1448_s3] ss:$0 sm:$0xff]  ;;  %v796_v9 = vld [vmem:[#allocation2 + $0x18] sm:$0xff] }
 0x120   : > { %v1079_v16 = vld [vmem:[%s1449_s4] ss:$0 sm:$0xff]  ;;  %v808_v19 = vadd.f32 %v1100_v14, %v796_v9 }
 0x121   : > { %v806_v12 = vadd.f32 %v1096_v6, %v794_v3  ;;  %v807_v13 = vadd.f32 %v1097_v7, %v795_v4  ;;  %v1080_v21 = vld [vmem:[%s1450_s5] ss:$0 sm:$0xff] }
 0x122   : > { %v819_v24 = vmul.f32 %v1078_v8, %v808_v19 }
 0x123   : > { %v797_v10 = vld [vmem:[#allocation2 + $0x8] sm:$0xff]  ;;  %v817_v17 = vmul.f32 %v1078_v8, %v806_v12  ;;  %v818_v18 = vmul.f32 %v1078_v8, %v807_v13 }
 0x124   : > { %v809_v20 = vadd.f32 %v1101_v15, %v797_v10  ;;  %v830_v28 = vadd.f32 %v1079_v16, %v819_v24 }
 0x125   : > { %v828_v22 = vadd.f32 %v1079_v16, %v817_v17  ;;  %v829_v23 = vadd.f32 %v1079_v16, %v818_v18 }
 0x126   : > { %v820_v25 = vmul.f32 %v1078_v8, %v809_v20  ;;  %vm834_vm2 = vcmp.ge.f32.partialorder %v830_v28, 0.0  ;;  %v845_v33 = vmul.f32 %v1080_v21, %v830_v28 }
 0x127   : > { %vm832_vm0 = vcmp.ge.f32.partialorder %v828_v22, 0.0  ;;  %vm833_vm1 = vcmp.ge.f32.partialorder %v829_v23, 0.0  ;;  %v843_v26 = vmul.f32 %v1080_v21, %v828_v22  ;;  %v844_v27 = vmul.f32 %v1080_v21, %v829_v23 }
 0x128   : > { %v831_v29 = vadd.f32 %v1079_v16, %v820_v25  ;;  %v849_v35 = vsel %vm834_vm2, %v830_v28, %v845_v33 }
 0x129   : > { %v847_v30 = vsel %vm832_vm0, %v828_v22, %v843_v26  ;;  %v848_v31 = vsel %vm833_vm1, %v829_v23, %v844_v27 }
 0x12a   : > { %v1105_v32 = vpack.c.bf16 %v848_v31, %v847_v30  ;;  %vm835_vm3 = vcmp.ge.f32.partialorder %v831_v29, 0.0  ;;  %v846_v34 = vmul.f32 %v1080_v21, %v831_v29 }
 0x12c   : > { %1106 = vst [vmem:[%s1451_s6] sm:$0xff] %v1105_v32   ;;  %v850_v36 = vsel %vm835_vm3, %v831_v29, %v846_v34 }
 0x12d   : > { %v1110_v37 = vpack.c.bf16 %v850_v36, %v849_v35 }
 0x12f   : > { %1113 = vst [vmem:[%s1451_s6 + $0x8] sm:$0xff] %v1110_v37  }
 0x130 PF: > { %s16_s25 = sadd.s32 1, %s1285_s25   ;;  %s1452_s21 = smov %s1273_s22 }
 0x131   : > { %p13_p12 = scmp.ge.s32.totalorder %s16_s25, 5   ;;  %s1453_s22 = smov %s1358_s29 }
 0x132   : > { %s1454_s23 = smov %s1281_s24  ;;  %s1455_s24 = smov %s1457_s26 }
 0x133   :  { %15 = sbr.rel (!%p13_p12) target bundleno = 3 (0x3), region = 134 }

// kernel: espnet_encoder_forward.57
= control target key start
LH: loop header
LB: loop body
LE: loop exit
PB: predicated region body
PF: predicated region fallthrough
CT: control target
= control target key end

     0   :  { %s453_s11 = smov 0   ;;  %s509_s0 = inlined_call_operand.<no memory space> [shape: f32[1,1], index: 0, kind: input, shape index: {}]   ;;  %s510_s1 = inlined_call_operand.vmem [shape: f32[2,32,16], index: 1, kind: input, shape index: {}]   ;;  %s511_s2 = inlined_call_operand.vmem [shape: f32[2,32,16], index: 2, kind: output, shape index: {}]  }
   0x1   :  { %v7_v0 = vstv %s509_s0 }
   0x2   :  { %8 = vst [vmem:[#allocation2] sm:$0x1] %v7_v0 }
   0x3 LB: > { %s372_s12 = sadd.s32 4294967295, %s432_s11   ;;  %p376_p0 = scmp.ge.s32.totalorder %s432_s11, 1  ;;  %s432_s11 = sphi %s453_s11, %s14_s11  }
   0x4   : > { %p114_p1 = scmp.lt.s32.totalorder %s432_s11, 3 }
   0x6   : > { %p115_p2 = pnand %p376_p0, %p114_p1 }
   0x7   : > { %p136_p3 = scmp.lt.s32.totalorder (!%p115_p2), %s372_s12, 1 }
   0x8   : > { %118 = sbr.rel (%p115_p2) target bundleno = 585 (0x249), region = 28 }
   0xd   : > { %s513_s12 = smov (!%p136_p3, %s372_s12), 1  ;;  %vm153_vm0 = vcmask 130048   ;;  %vm209_vm1 = vcmask 261120   ;;  %v434_v17 = vmov 0   ;;  %v385_v18 = vld [vmem:[#allocation2] ss:$0 sm:$0xff] }
   0xe   : > { %s388_s0 = sshll.u32 %s513_s12, 5  ;;  %425 = vset.pattern.permute.xlu0 %v434_v17 }
   0xf   : > { %s140_s15 = scalar_lea.vmem %s510_s1, %s388_s0  ;;  %s145_s18 = scalar_lea.vmem %s511_s2, %s388_s0 }
  0x10   : > { %v469_v1 = vld [vmem:[%s140_s15 + $0x10] sm:$0xff]  ;;  %v471_v2 = vld [vmem:[%s140_s15 + $0x18] sm:$0xff]  ;;  %v473_v3 = vld [vmem:[%s140_s15] sm:$0xff] }
  0x11   : > { %v152_v4 = vpack.c.bf16 %v471_v2, %v469_v1  ;;  %v477_v5 = vld [vmem:[%s140_s15 + $0x8] sm:$0xff] }
  0x12   : > { %v151_v6 = vpack.c.bf16 %v477_v5, %v473_v3 }
  0x13   : > { %414 = vmatprep.subr.msk.bf16.mxu0 %vm153_vm0, %v152_v4  ;;  %v158_v7 = vsel %vm153_vm0, %v152_v4, 0  ;;  %406 = vmatprep.subr.bf16.mxu1 %v152_v4 }
  0x14   : > { %399 = vmatpush3.bf16.xpose.msra.mxu0 %v158_v7  ;;  %402 = vmatprep.mubr.msk.bf16.mxu0 %vm153_vm0, %v151_v6  ;;  %v155_v8 = vsel %vm153_vm0, %v151_v6, 0 }
  0x15   : > { %415 = vmatprep.subr.msk.bf16.mxu0 %vm153_vm0, %v151_v6  ;;  %407 = vmatpush3.bf16.msra.mxu1 %v152_v4 }
  0x16   : > { %408 = vmatprep.subr.bf16.mxu1 %v151_v6 }
  0x19   : > { %409 = vmatpush3.bf16.msra.mxu1 %v151_v6 }
  0x1c   : > { %401 = vmatpush3.bf16.xpose.msra.mxu0 %v155_v8 }
  0x23   : > { %403 = vmatmul.mubr.msk.bf16.vlgmr.msra.gmra.mxu0 %vm153_vm0, %v152_v4 }
  0xe3   : > { %v404_v9 = vpop.f32.mrf.mxu0 }
  0xe4   : > { %v216_v10 = vsel %vm209_vm1, %v404_v9, -inf }
  0xe5   : > { %217 = vmax.xlane.f32.xlu1 %v216_v10  ;;  %v194_v11 = vpop.f32.mrf.mxu0 }
  0xe6   : > { %v210_v12 = vsel %vm209_vm1, %v194_v11, -inf }
  0xe7   : > { %211 = vmax.xlane.f32.xlu0 %v210_v12  ;;  %v405_v13 = vpop.f32.mrf.mxu0 }
  0xe8   : > { %v219_v14 = vsel %vm209_vm1, %v405_v13, -inf }
  0xe9   : > { %220 = vmax.xlane.f32.xlu1 %v219_v14  ;;  %v197_v15 = vpop.f32.mrf.mxu0 }
  0xea   : > { %v213_v16 = vsel %vm209_vm1, %v197_v15, -inf }
  0xeb   : > { %214 = vmax.xlane.f32.xlu0 %v213_v16 }
 0x101   : > { %302 = vperm.xlu0 %425, %v385_v18  }
 0x16e   : > { %v218_v19 = vpop.xlane.xlu1 %217 }
 0x16f   : > { %v224_v22 = vsub.f32 %v218_v19, %v404_v9 }
 0x170   : > { %v212_v20 = vpop.xlane.xlu0 %211 }
 0x171   : > { %v222_v21 = vsub.f32 %v212_v20, %v194_v11  ;;  %v232_v29 = vmul.f32 0.01, %v224_v22  ;;  %vm228_vm4 = vcmp.ge.f32.partialorder %v224_v22, 0.0 }
 0x172   : > { %v221_v23 = vpop.xlane.xlu1 %220 }
 0x173   : > { %v225_v24 = vsub.f32 %v221_v23, %v405_v13  ;;  %v230_v26 = vmul.f32 0.01, %v222_v21  ;;  %vm226_vm3 = vcmp.ge.f32.partialorder %v222_v21, 0.0  ;;  %v236_v34 = vsel %vm228_vm4, %v224_v22, %v232_v29 }
 0x174   : > { %v215_v25 = vpop.xlane.xlu0 %214 }
 0x175   : > { %vm229_vm2 = vcmp.ge.f32.partialorder %v225_v24, 0.0  ;;  %v233_v27 = vmul.f32 0.01, %v225_v24  ;;  %v223_v28 = vsub.f32 %v215_v25, %v197_v15  ;;  %v234_v32 = vsel %vm226_vm3, %v222_v21, %v230_v26 }
 0x177   : > { %v231_v30 = vmul.f32 0.01, %v223_v28  ;;  %vm227_vm5 = vcmp.ge.f32.partialorder %v223_v28, 0.0  ;;  %v237_v31 = vsel %vm229_vm2, %v225_v24, %v233_v27 }
 0x178   : > { %v239_v36 = vpack.c.bf16 %v237_v31, %v236_v34 }
 0x179   : > { %v235_v33 = vsel %vm227_vm5, %v223_v28, %v231_v30 }
 0x17a   : > { %v238_v35 = vpack.c.bf16 %v235_v33, %v234_v32 }
 0x17c   : > { %410 = vmatprep.mubr.msk.bf16.mxu1 %vm209_vm1, %v238_v35  ;;  %v303_v37 = vpop.permute.xlu0 %302 }
 0x17d   : > { %411 = vmatmul.mubr.msk.bf16.vlgmr.msra.gmra.mxu1 %vm209_vm1, %v239_v36 }
 0x23d   : > { %v412_v38 = vpop.f32.mrf.mxu1 }
 0x23e   : > { %v307_v39 = vmul.f32 %v412_v38, %v303_v37 }
 0x23f   : > { %v280_v40 = vpop.f32.mrf.mxu1 }
 0x240   : > { %v311_v41 = vadd.f32 %v307_v39, %v469_v1  ;;  %v305_v42 = vmul.f32 %v303_v37, %v280_v40 }
 0x241   : > { %v413_v43 = vpop.f32.mrf.mxu1 }
 0x242   : > { %315 = vst.msk [vmem:[%s145_s18 + $0x10] sm:$0xff] %vm153_vm0, %v311_v41  ;;  %v309_v44 = vadd.f32 %v305_v42, %v473_v3  ;;  %v308_v45 = vmul.f32 %v413_v43, %v303_v37 }
 0x243   : > { %v283_v46 = vpop.f32.mrf.mxu1 }
 0x244   : > { %313 = vst.msk [vmem:[%s145_s18] sm:$0xff] %vm153_vm0, %v309_v44  ;;  %v312_v47 = vadd.f32 %v308_v45, %v471_v2  ;;  %v306_v48 = vmul.f32 %v303_v37, %v283_v46 }
 0x246   : > { %316 = vst.msk [vmem:[%s145_s18 + $0x18] sm:$0xff] %vm153_vm0, %v312_v47  ;;  %v310_v49 = vadd.f32 %v306_v48, %v477_v5 }
 0x248   : > { %314 = vst.msk [vmem:[%s145_s18 + $0x8] sm:$0xff] %vm153_vm0, %v310_v49 }
 0x249 PF: > { %s14_s11 = sadd.s32 1, %s432_s11  }
 0x24a   : > { %p11_p4 = scmp.ge.s32.totalorder %s14_s11, 4  }
 0x24c   :  { %13 = sbr.rel (!%p11_p4) target bundleno = 3 (0x3), region = 58 }

// kernel: espnet_encoder_forward.53
= control target key start
LH: loop header
LB: loop body
LE: loop exit
PB: predicated region body
PF: predicated region fallthrough
CT: control target
= control target key end

     0   :  { %s1583_s18 = smov 0   ;;  %s1585_s19 = smov 0   ;;  %s1729_s0 = inlined_call_operand.vmem [shape: bf16[32,2304], index: 0, kind: input, shape index: {}]   ;;  %s1730_s1 = inlined_call_operand.vmem [shape: bf16[2304,128], index: 1, kind: input, shape index: {}]   ;;  %s1731_s2 = inlined_call_operand.vmem [shape: f32[1,128], index: 2, kind: input, shape index: {}]   ;;  %s1732_s3 = inlined_call_operand.vmem [shape: f32[1,128], index: 3, kind: input, shape index: {}]   ;;  %s1733_s4 = inlined_call_operand.vmem [shape: f32[1,128], index: 4, kind: input, shape index: {}]   ;;  %s1734_s5 = inlined_call_operand.vmem [shape: bf16[32,128], index: 5, kind: output, shape index: {}]  }
   0x1   :  { %s1587_s20 = smov 0   ;;  %s1589_s21 = smov 0  }
   0x2   :  { %s1591_s22 = smov 0  }
   0x3 LB: > { %s27_s23 = sadd.s32 1, %s1546_s21  ;;  %p50_p1 = scmp.ne.s32.totalorder %s1538_s19, %s1534_s18  ;;  %s1550_s22 = sphi %s1591_s22, %s15_s22   ;;  %s1546_s21 = sphi %s1589_s21, %s1738_s21   ;;  %s1542_s20 = sphi %s1587_s20, %s1737_s20   ;;  %s1538_s19 = sphi %s1585_s19, %s1736_s19   ;;  %s1534_s18 = sphi %s1583_s18, %s1735_s18  }
   0x4   : > { %p28_p0 = scmp.ge.s32.totalorder %s27_s23, 3  ;;  %p51_p2 = scmp.eq.s32.totalorder %s1550_s22, 0 }
   0x5   : > { %s43_s25 = sadd.s32 1, %s1538_s19  ;;  %p1210_p5 = scmp.ge.s32.totalorder %s1550_s22, 3 }
   0x6   : > { %s1740_s23 = smov (%p28_p0, %s27_s23), 0  ;;  %p52_p3 = por %p51_p2, %p50_p1 }
   0x7   : > { %s39_s24 = ssub.s32 %s1546_s21, %s1740_s23  ;;  %228 = sbr.rel (%p1210_p5) target bundleno = 23 (0x17), region = 28 }
   0x8   : > { %p41_p4 = scmp.eq.s32.totalorder %s39_s24, 0 }
   0xa   : > { %s1618_s26 = scalar_select %p41_p4, %s1538_s19, %s43_s25  }
   0xc   : > { %231 = sbr.rel (!%p52_p3) target bundleno = 23 (0x17), region = 32  ;;  %s233_s27 = sand.u32 (%p52_p3), 1, %s1538_s19  }
   0xd   : > { %s1287_s28 = smul.u32 (%p52_p3), 24, %s1546_s21 }
   0xe   : > { %s1403_s29 = smul.u32 (%p52_p3), 96, %s233_s27 }
   0xf   : > { %s241_s7 = scalar_lea.vmem (%p52_p3), %s1729_s0, %s1287_s28 }
  0x10   : > { %v254_v0 = vld [vmem:[%s241_s7] sm:$0xff] (%p52_p3)  ;;  %v256_v1 = vld [vmem:[%s241_s7 + $0x8] sm:$0xff] (%p52_p3)  ;;  %v258_v2 = vld [vmem:[%s241_s7 + $0x10] sm:$0xff] (%p52_p3)  ;;  %s235_s8 = scalar_lea.vmem (%p52_p3), [#allocation3], %s1403_s29 }
  0x11   : > { %255 = vst [vmem:[%s235_s8] sm:$0xff] %v254_v0  ;;  %257 = vst [vmem:[%s235_s8 + $0x8] sm:$0xff] %v256_v1  ;;  %v260_v3 = vld [vmem:[%s241_s7 + $0x48] sm:$0xff]  ;;  %v262_v4 = vld [vmem:[%s241_s7 + $0x50] sm:$0xff] }
  0x12   : > { %259 = vst [vmem:[%s235_s8 + $0x10] sm:$0xff] %v258_v2  ;;  %v264_v5 = vld [vmem:[%s241_s7 + $0x58] sm:$0xff]  ;;  %261 = vst [vmem:[%s235_s8 + $0x18] sm:$0xff] %v260_v3  ;;  %v266_v6 = vld [vmem:[%s241_s7 + $0x90] sm:$0xff] }
  0x13   : > { %263 = vst [vmem:[%s235_s8 + $0x20] sm:$0xff] %v262_v4  ;;  %265 = vst [vmem:[%s235_s8 + $0x28] sm:$0xff] %v264_v5  ;;  %v268_v7 = vld [vmem:[%s241_s7 + $0x98] sm:$0xff]  ;;  %v270_v8 = vld [vmem:[%s241_s7 + $0xa0] sm:$0xff] }
  0x14   : > { %267 = vst [vmem:[%s235_s8 + $0x30] sm:$0xff] %v266_v6  ;;  %269 = vst [vmem:[%s235_s8 + $0x38] sm:$0xff] %v268_v7  ;;  %v272_v9 = vld [vmem:[%s241_s7 + $0xd8] sm:$0xff]  ;;  %v274_v10 = vld [vmem:[%s241_s7 + $0xe0] sm:$0xff] }
  0x15   : > { %271 = vst [vmem:[%s235_s8 + $0x40] sm:$0xff] %v270_v8  ;;  %v276_v11 = vld [vmem:[%s241_s7 + $0xe8] sm:$0xff]  ;;  %273 = vst [vmem:[%s235_s8 + $0x48] sm:$0xff] %v272_v9 }
  0x16   : > { %275 = vst [vmem:[%s235_s8 + $0x50] sm:$0xff] %v274_v10  ;;  %277 = vst [vmem:[%s235_s8 + $0x58] sm:$0xff] %v276_v11 }
  0x17 PF: > { %p1212_p6 = scmp.ge.s32.totalorder %s1550_s22, 1  ;;  %p294_p7 = scmp.lt.s32.totalorder %s1550_s22, 4 }
  0x19   : > { %p295_p8 = pnand %p1212_p6, %p294_p7 }
  0x1a   : > { %s301_s9 = sand.u32 (!%p295_p8), 1, %s1534_s18   ;;  %s350_s10 = smul.u32 (!%p295_p8), 96, %s1542_s20 }
  0x1b   : > { %298 = sbr.rel (%p295_p8) target bundleno = 330 (0x14a), region = 59  ;;  %p1214_p10 = scmp.ne.s32.totalorder (!%p295_p8), %s1542_s20, 0 }
  0x1c   : > { %s1404_s11 = smul.u32 (!%p295_p8), 96, %s301_s9  ;;  %p351_p9 = scmp.lt.s32.totalorder (!%p295_p8), %s350_s10, 287 }
  0x1e   : > { %s1635_s16 = scalar_lea.vmem (!%p295_p8), [#allocation3], %s1404_s11 }
  0x20   : > { %s1742_s10 = smov (!%p351_p9, %s350_s10), 287  ;;  %381 = sbr.rel (%p1214_p10) target bundleno = 40 (0x28), region = 67 }
  0x21   : > { %s1213_s12 = sshll.u32 %s1742_s10, 2 }
  0x22   : > { %s1633_s15 = scalar_lea.vmem %s1730_s1, %s1213_s12 }
  0x25   : > { %v1552_v12 = vmov 0.0  }
  0x26   : > { %382 = vst [vmem:[#allocation2 + $0x10] sm:$0xff] %v1552_v12  ;;  %383 = vst [vmem:[#allocation2] sm:$0xff] %v1552_v12 }
  0x27   : > { %384 = vst [vmem:[#allocation2 + $0x18] sm:$0xff] %v1552_v12  ;;  %385 = vst [vmem:[#allocation2 + $0x8] sm:$0xff] %v1552_v12 }
  0x28 PF: > { %v1446_v13 = vld [vmem:[%s1633_s15 + $0x78] sm:$0xff]   ;;  %v1450_v17 = vld [vmem:[%s1633_s15 + $0x70] sm:$0xff]   ;;  %v1454_v21 = vld [vmem:[%s1633_s15 + $0x68] sm:$0xff]   ;;  %p1275_p11 = scmp.ne.s32.totalorder %s1542_s20, 2 }
  0x29   : > { %v1447_v14 = vld [vmem:[%s1633_s15 + $0xf8] sm:$0xff]   ;;  %1303 = vmatprep.subr.bf16.mxu0 %v1446_v13  ;;  %v1451_v18 = vld [vmem:[%s1633_s15 + $0xf0] sm:$0xff]   ;;  %v1455_v22 = vld [vmem:[%s1633_s15 + $0xe8] sm:$0xff]  }
  0x2a   : > { %v1448_v15 = vld [vmem:[%s1633_s15 + $0x38] sm:$0xff]   ;;  %1331 = vmatprep.subr.bf16.mxu1 %v1447_v14  ;;  %v1452_v19 = vld [vmem:[%s1633_s15 + $0x30] sm:$0xff]   ;;  %v1456_v23 = vld [vmem:[%s1633_s15 + $0x28] sm:$0xff]  }
  0x2b   : > { %v1449_v16 = vld [vmem:[%s1633_s15 + $0xb8] sm:$0xff]   ;;  %1304 = vmatpush3.bf16.msra.mxu0 %v1448_v15  ;;  %v1453_v20 = vld [vmem:[%s1633_s15 + $0xb0] sm:$0xff]   ;;  %v1457_v24 = vld [vmem:[%s1633_s15 + $0xa8] sm:$0xff]  }
  0x2c   : > { %1332 = vmatpush3.bf16.msra.mxu1 %v1449_v16  ;;  %1305 = vmatprep.subr.bf16.mxu0 %v1450_v17  ;;  %v1458_v25 = vld [vmem:[%s1633_s15 + $0x60] sm:$0xff]   ;;  %v1462_v29 = vld [vmem:[%s1633_s15 + $0x58] sm:$0xff]   ;;  %v1466_v33 = vld [vmem:[%s1633_s15 + $0x50] sm:$0xff]  }
  0x2d   : > { %1333 = vmatprep.subr.bf16.mxu1 %v1451_v18  ;;  %v1459_v26 = vld [vmem:[%s1633_s15 + $0xe0] sm:$0xff]   ;;  %v1463_v30 = vld [vmem:[%s1633_s15 + $0xd8] sm:$0xff]   ;;  %v1467_v34 = vld [vmem:[%s1633_s15 + $0xd0] sm:$0xff]  }
  0x2e   : > { %v1460_v27 = vld [vmem:[%s1633_s15 + $0x20] sm:$0xff]   ;;  %v1464_v31 = vld [vmem:[%s1633_s15 + $0x18] sm:$0xff]   ;;  %v1468_v35 = vld [vmem:[%s1633_s15 + $0x10] sm:$0xff]  }
  0x2f   : > { %1306 = vmatpush3.bf16.msra.mxu0 %v1452_v19  ;;  %v1461_v28 = vld [vmem:[%s1633_s15 + $0xa0] sm:$0xff]   ;;  %v1465_v32 = vld [vmem:[%s1633_s15 + $0x98] sm:$0xff]   ;;  %v1469_v36 = vld [vmem:[%s1633_s15 + $0x90] sm:$0xff]  }
  0x30   : > { %1334 = vmatpush3.bf16.msra.mxu1 %v1453_v20  ;;  %1307 = vmatprep.subr.bf16.mxu0 %v1454_v21  ;;  %v1470_v37 = vld [vmem:[%s1633_s15 + $0x48] sm:$0xff]   ;;  %v1474_v41 = vld [vmem:[%s1633_s15 + $0x40] sm:$0xff]   ;;  %v1484_v49 = vld [vmem:[%s1633_s15 + $0x178] sm:$0xff]  }
  0x31   : > { %1335 = vmatprep.subr.bf16.mxu1 %v1455_v22  ;;  %v1471_v38 = vld [vmem:[%s1633_s15 + $0xc8] sm:$0xff]   ;;  %v1475_v42 = vld [vmem:[%s1633_s15 + $0xc0] sm:$0xff]   ;;  %v1485_v50 = vld [vmem:[%s1633_s15 + $0x138] sm:$0xff]  }
  0x32   : > { %v1472_v39 = vld [vmem:[%s1633_s15 + $0x8] sm:$0xff]   ;;  %v1476_v43 = vld [vmem:[%s1633_s15] sm:$0xff]   ;;  %v1486_v51 = vld [vmem:[%s1633_s15 + $0x170] sm:$0xff]  }
  0x33   : > { %1308 = vmatpush3.bf16.msra.mxu0 %v1456_v23  ;;  %v1473_v40 = vld [vmem:[%s1633_s15 + $0x88] sm:$0xff]   ;;  %v1477_v44 = vld [vmem:[%s1633_s15 + $0x80] sm:$0xff]   ;;  %v1487_v52 = vld [vmem:[%s1633_s15 + $0x130] sm:$0xff]  }
  0x34   : > { %1336 = vmatpush3.bf16.msra.mxu1 %v1457_v24  ;;  %1309 = vmatprep.subr.bf16.mxu0 %v1458_v25  ;;  %v1478_v45 = vld [vmem:[%s1635_s16] ss:$24 sps:$4 sm:$0xff]   ;;  %v1480_v46 = vld [vmem:[%s1635_s16 + $0x4] ss:$24 sps:$4 sm:$0xff]   ;;  %v1488_v53 = vld [vmem:[%s1633_s15 + $0x168] sm:$0xff]  }
  0x35   : > { %1337 = vmatprep.subr.bf16.mxu1 %v1459_v26  ;;  %v1481_v47 = vld [vmem:[%s1635_s16 + $0x8] ss:$24 sps:$4 sm:$0xff]   ;;  %v1483_v48 = vld [vmem:[%s1635_s16 + $0xc] ss:$24 sps:$4 sm:$0xff]   ;;  %878 = vmatprep.mubr.bf16.mxu0 %v1480_v46  ;;  %v1495_v58 = vld [vmem:[%s1635_s16 + $0x3c] ss:$24 sps:$4 sm:$0xff]  }
  0x36   : > { %927 = vmatprep.mubr.bf16.mxu1 %v1483_v48  ;;  %v1489_v54 = vld [vmem:[%s1633_s15 + $0x128] sm:$0xff]   ;;  %v1490_v55 = vld [vmem:[%s1633_s15 + $0x160] sm:$0xff]   ;;  %v1492_v59 = vld [vmem:[%s1633_s15 + $0x158] sm:$0xff]  }
  0x37   : > { %1310 = vmatpush3.bf16.msra.mxu0 %v1460_v27  ;;  %v1491_v56 = vld [vmem:[%s1633_s15 + $0x120] sm:$0xff]   ;;  %v1493_v57 = vld [vmem:[%s1635_s16 + $0x34] ss:$24 sps:$4 sm:$0xff]   ;;  %v1498_v60 = vld [vmem:[%s1635_s16 + $0x30] ss:$24 sps:$4 sm:$0xff]  }
  0x38   : > { %1338 = vmatpush3.bf16.msra.mxu1 %v1461_v28  ;;  %1311 = vmatprep.subr.bf16.mxu0 %v1462_v29  ;;  %v1499_v61 = vld [vmem:[%s1635_s16 + $0x38] ss:$24 sps:$4 sm:$0xff]   ;;  %v1508_v1 = vld [vmem:[%s1635_s16 + $0x14] ss:$24 sps:$4 sm:$0xff]   ;;  %v1511_v3 = vld [vmem:[%s1635_s16 + $0x44] ss:$24 sps:$4 sm:$0xff]  }
  0x39   : > { %1339 = vmatprep.subr.bf16.mxu1 %v1463_v30  ;;  %v1497_v62 = vld [vmem:[%s1633_s15 + $0x118] sm:$0xff]   ;;  %v1500_v63 = vld [vmem:[%s1633_s15 + $0x150] sm:$0xff]   ;;  %v1502_v2 = vld [vmem:[%s1633_s15 + $0x148] sm:$0xff]  }
  0x3a   : > { %v1501_v0 = vld [vmem:[%s1633_s15 + $0x110] sm:$0xff]   ;;  %v1503_v4 = vld [vmem:[%s1633_s15 + $0x108] sm:$0xff]   ;;  %v1504_v5 = vld [vmem:[%s1633_s15 + $0x140] sm:$0xff]  }
  0x3b   : > { %1312 = vmatpush3.bf16.msra.mxu0 %v1464_v31  ;;  %v1505_v6 = vld [vmem:[%s1633_s15 + $0x100] sm:$0xff]   ;;  %v1506_v7 = vld [vmem:[%s1635_s16 + $0x10] ss:$24 sps:$4 sm:$0xff]  }
  0x3c   : > { %1340 = vmatpush3.bf16.msra.mxu1 %v1465_v32  ;;  %1313 = vmatprep.subr.bf16.mxu0 %v1466_v33  ;;  %v1509_v8 = vld [vmem:[%s1635_s16 + $0x40] ss:$24 sps:$4 sm:$0xff]  }
  0x3d   : > { %1341 = vmatprep.subr.bf16.mxu1 %v1467_v34 }
  0x3f   : > { %1314 = vmatpush3.bf16.msra.mxu0 %v1468_v35 }
  0x40   : > { %1342 = vmatpush3.bf16.msra.mxu1 %v1469_v36  ;;  %1315 = vmatprep.subr.bf16.mxu0 %v1470_v37 }
  0x41   : > { %1343 = vmatprep.subr.bf16.mxu1 %v1471_v38 }
  0x43   : > { %1316 = vmatpush3.bf16.msra.mxu0 %v1472_v39 }
  0x44   : > { %1344 = vmatpush3.bf16.msra.mxu1 %v1473_v40  ;;  %1317 = vmatprep.subr.bf16.mxu0 %v1474_v41  ;;  %v386_v40 = vld [vmem:[#allocation2 + $0x10] sm:$0xff] }
  0x45   : > { %1345 = vmatprep.subr.bf16.mxu1 %v1475_v42 }
  0x47   : > { %1318 = vmatpush3.bf16.msra.mxu0 %v1476_v43 }
  0x48   : > { %1346 = vmatpush3.bf16.msra.mxu1 %v1477_v44  ;;  %1359 = vmatprep.subr.bf16.mxu0 %v1484_v49  ;;  %v388_v44 = vld [vmem:[#allocation2 + $0x18] sm:$0xff] }
  0x49   : > { %1387 = vmatprep.subr.bf16.mxu1 %v1484_v49 }
  0x4a   : > { %879 = vmatmul.mubr.bf16.vlgmr.msra.gmra.mxu0 %v1478_v45 }
  0x4b   : > { %928 = vmatmul.mubr.bf16.vlgmr.msra.gmra.mxu1 %v1481_v47  ;;  %1360 = vmatpush3.bf16.msra.mxu0 %v1485_v50 }
  0x4c   : > { %1395 = vmatpush3.bf16.msra.mxu1 %v1485_v50  ;;  %1361 = vmatprep.subr.bf16.mxu0 %v1486_v51 }
  0x4d   : > { %1388 = vmatprep.subr.bf16.mxu1 %v1486_v51  ;;  %886 = vmatprep.mubr.bf16.mxu0 %v1493_v57  ;;  %v389_v57 = vld [vmem:[#allocation2 + $0x8] sm:$0xff] }
  0x4e   : > { %935 = vmatprep.mubr.bf16.mxu1 %v1495_v58 }
  0x4f   : > { %1362 = vmatpush3.bf16.msra.mxu0 %v1487_v52 }
  0x50   : > { %1396 = vmatpush3.bf16.msra.mxu1 %v1487_v52  ;;  %1363 = vmatprep.subr.bf16.mxu0 %v1488_v53 }
  0x51   : > { %1389 = vmatprep.subr.bf16.mxu1 %v1488_v53 }
  0x52   : > { %887 = vmatmul.mubr.bf16.gmra.mxu0 %v1498_v60 }
  0x53   : > { %1364 = vmatpush3.bf16.msra.mxu0 %v1489_v54  ;;  %936 = vmatmul.mubr.bf16.gmra.mxu1 %v1499_v61 }
  0x54   : > { %1397 = vmatpush3.bf16.msra.mxu1 %v1489_v54  ;;  %1365 = vmatprep.subr.bf16.mxu0 %v1490_v55  ;;  %v387_v54 = vld [vmem:[#allocation2] sm:$0xff] }
  0x55   : > { %1390 = vmatprep.subr.bf16.mxu1 %v1490_v55  ;;  %976 = vmatprep.mubr.bf16.mxu0 %v1508_v1 }
  0x56   : > { %984 = vmatprep.mubr.bf16.mxu1 %v1511_v3 }
  0x57   : > { %1366 = vmatpush3.bf16.msra.mxu0 %v1491_v56 }
  0x58   : > { %1398 = vmatpush3.bf16.msra.mxu1 %v1491_v56  ;;  %1367 = vmatprep.subr.bf16.mxu0 %v1492_v59 }
  0x59   : > { %1391 = vmatprep.subr.bf16.mxu1 %v1492_v59 }
  0x5b   : > { %1368 = vmatpush3.bf16.msra.mxu0 %v1497_v62 }
  0x5c   : > { %1399 = vmatpush3.bf16.msra.mxu1 %v1497_v62  ;;  %1369 = vmatprep.subr.bf16.mxu0 %v1500_v63 }
  0x5d   : > { %1392 = vmatprep.subr.bf16.mxu1 %v1500_v63 }
  0x5f   : > { %1370 = vmatpush3.bf16.msra.mxu0 %v1501_v0 }
  0x60   : > { %1400 = vmatpush3.bf16.msra.mxu1 %v1501_v0  ;;  %1371 = vmatprep.subr.bf16.mxu0 %v1502_v2 }
  0x61   : > { %1393 = vmatprep.subr.bf16.mxu1 %v1502_v2 }
  0x63   : > { %1372 = vmatpush3.bf16.msra.mxu0 %v1503_v4 }
  0x64   : > { %1401 = vmatpush3.bf16.msra.mxu1 %v1503_v4  ;;  %1373 = vmatprep.subr.bf16.mxu0 %v1504_v5 }
  0x65   : > { %1394 = vmatprep.subr.bf16.mxu1 %v1504_v5 }
  0x67   : > { %1374 = vmatpush3.bf16.msra.mxu0 %v1505_v6 }
  0x68   : > { %1402 = vmatpush3.bf16.msra.mxu1 %v1505_v6 }
  0x6a   : > { %977 = vmatmul.mubr.bf16.vlgmr.msra.gmra.mxu0 %v1506_v7 }
  0x6b   : > { %985 = vmatmul.mubr.bf16.vlgmr.msra.gmra.mxu1 %v1509_v8 }
 0x10a   : > { %v1319_v9 = vpop.f32.mrf.mxu0 }
 0x10b   : > { %v1347_v10 = vpop.f32.mrf.mxu1 }
 0x10c   : > { %v1320_v11 = vpop.f32.mrf.mxu0 }
 0x10d   : > { %v1348_v12 = vpop.f32.mrf.mxu1  ;;  %v1321_v24 = vadd.f32 %v1320_v11, %v1319_v9 }
 0x10e   : > { %v1322_v13 = vpop.f32.mrf.mxu0  ;;  %v1349_v25 = vadd.f32 %v1348_v12, %v1347_v10 }
 0x10f   : > { %v1350_v14 = vpop.f32.mrf.mxu1 }
 0x110   : > { %v1323_v15 = vpop.f32.mrf.mxu0  ;;  %v930_v32 = vadd.f32 %v1349_v25, %v1321_v24 }
 0x111   : > { %v1351_v16 = vpop.f32.mrf.mxu1  ;;  %v1324_v33 = vadd.f32 %v1323_v15, %v1322_v13 }
 0x112   : > { %v1325_v17 = vpop.f32.mrf.mxu0  ;;  %v1352_v34 = vadd.f32 %v1351_v16, %v1350_v14 }
 0x113   : > { %v1353_v18 = vpop.f32.mrf.mxu1 }
 0x114   : > { %v1326_v19 = vpop.f32.mrf.mxu0  ;;  %v933_v48 = vadd.f32 %v1352_v34, %v1324_v33 }
 0x115   : > { %v1354_v20 = vpop.f32.mrf.mxu1  ;;  %v1327_v27 = vadd.f32 %v1326_v19, %v1325_v17 }
 0x116   : > { %v1328_v21 = vpop.f32.mrf.mxu0  ;;  %v1355_v28 = vadd.f32 %v1354_v20, %v1353_v18 }
 0x117   : > { %v1356_v22 = vpop.f32.mrf.mxu1 }
 0x118   : > { %v1329_v23 = vpop.f32.mrf.mxu0  ;;  %v938_v37 = vadd.f32 %v1355_v28, %v1327_v27 }
 0x119   : > { %v1357_v26 = vpop.f32.mrf.mxu1  ;;  %v1330_v38 = vadd.f32 %v1329_v23, %v1328_v21 }
 0x11a   : > { %v1358_v39 = vadd.f32 %v1357_v26, %v1356_v22 }
 0x11c   : > { %v941_v52 = vadd.f32 %v1358_v39, %v1330_v38 }
 0x12a   : > { %v1375_v29 = vpop.f32.mrf.mxu0 }
 0x12b   : > { %v1381_v30 = vpop.f32.mrf.mxu1 }
 0x12c   : > { %v1376_v31 = vpop.f32.mrf.mxu0 }
 0x12d   : > { %v1377_v35 = vadd.f32 %v1376_v31, %v1375_v29  ;;  %v1382_v36 = vpop.f32.mrf.mxu1 }
 0x12e   : > { %v1383_v41 = vadd.f32 %v1382_v36, %v1381_v30  ;;  %v1378_v42 = vpop.f32.mrf.mxu0 }
 0x12f   : > { %v979_v43 = vadd.f32 %v1377_v35, %v930_v32  ;;  %v1384_v45 = vpop.f32.mrf.mxu1 }
 0x130   : > { %v987_v46 = vadd.f32 %v1383_v41, %v938_v37  ;;  %v1379_v47 = vpop.f32.mrf.mxu0 }
 0x131   : > { %v993_v49 = vadd.f32 %v979_v43, %v386_v40  ;;  %v1380_v50 = vadd.f32 %v1379_v47, %v1378_v42  ;;  %v1385_v51 = vpop.f32.mrf.mxu1 }
 0x132   : > { %v995_v53 = vadd.f32 %v987_v46, %v388_v44  ;;  %v1386_v55 = vadd.f32 %v1385_v51, %v1384_v45 }
 0x133   : > { %997 = vst [vmem:[#allocation2 + $0x10] sm:$0xff] %v993_v49  ;;  %v982_v56 = vadd.f32 %v1380_v50, %v933_v48 }
 0x134   : > { %999 = vst [vmem:[#allocation2 + $0x18] sm:$0xff] %v995_v53  ;;  %v990_v58 = vadd.f32 %v1386_v55, %v941_v52  ;;  %1004 = sbr.rel (%p1275_p11) target bundleno = 330 (0x14a), region = 71 }
 0x135   : > { %v994_v59 = vadd.f32 %v982_v56, %v387_v54 }
 0x136   : > { %v996_v60 = vadd.f32 %v990_v58, %v389_v57 }
 0x137   : > { %998 = vst [vmem:[#allocation2] sm:$0xff] %v994_v59 }
 0x138   : > { %1000 = vst [vmem:[#allocation2 + $0x8] sm:$0xff] %v996_v60 }
 0x139   : > { %v1276_v63 = vld [vmem:[%s1731_s2] ss:$0 sm:$0xff] }
 0x13a   : > { %v1005_v61 = vld [vmem:[#allocation2 + $0x10] sm:$0xff]  ;;  %v1277_v2 = vld [vmem:[%s1732_s3] ss:$0 sm:$0xff] }
 0x13b   : > { %v1016_v0 = vmul.f32 %v1276_v63, %v1005_v61  ;;  %v1007_v3 = vld [vmem:[#allocation2 + $0x18] sm:$0xff]  ;;  %v1278_v4 = vld [vmem:[%s1733_s4] ss:$0 sm:$0xff] }
 0x13c   : > { %v1018_v6 = vmul.f32 %v1276_v63, %v1007_v3 }
 0x13d   : > { %v1027_v7 = vadd.f32 %v1277_v2, %v1016_v0 }
 0x13e   : > { %v1006_v62 = vld [vmem:[#allocation2] sm:$0xff]  ;;  %v1029_v10 = vadd.f32 %v1277_v2, %v1018_v6 }
 0x13f   : > { %v1017_v1 = vmul.f32 %v1276_v63, %v1006_v62  ;;  %v1008_v5 = vld [vmem:[#allocation2 + $0x8] sm:$0xff]  ;;  %vm1031_vm0 = vcmp.ge.f32.partialorder %v1027_v7, 0.0  ;;  %v1042_v11 = vmul.f32 %v1278_v4, %v1027_v7 }
 0x140   : > { %v1019_v9 = vmul.f32 %v1276_v63, %v1008_v5  ;;  %vm1033_vm2 = vcmp.ge.f32.partialorder %v1029_v10, 0.0  ;;  %v1044_v14 = vmul.f32 %v1278_v4, %v1029_v10 }
 0x141   : > { %v1028_v8 = vadd.f32 %v1277_v2, %v1017_v1  ;;  %v1046_v15 = vsel %vm1031_vm0, %v1027_v7, %v1042_v11 }
 0x142   : > { %v1030_v13 = vadd.f32 %v1277_v2, %v1019_v9  ;;  %v1048_v19 = vsel %vm1033_vm2, %v1029_v10, %v1044_v14 }
 0x143   : > { %vm1032_vm1 = vcmp.ge.f32.partialorder %v1028_v8, 0.0  ;;  %v1043_v12 = vmul.f32 %v1278_v4, %v1028_v8 }
 0x144   : > { %vm1034_vm3 = vcmp.ge.f32.partialorder %v1030_v13, 0.0  ;;  %v1045_v18 = vmul.f32 %v1278_v4, %v1030_v13 }
 0x145   : > { %v1047_v16 = vsel %vm1032_vm1, %v1028_v8, %v1043_v12 }
 0x146   : > { %v1295_v17 = vpack.c.bf16 %v1047_v16, %v1046_v15  ;;  %v1049_v20 = vsel %vm1034_vm3, %v1030_v13, %v1045_v18 }
 0x147   : > { %v1300_v21 = vpack.c.bf16 %v1049_v20, %v1048_v19 }
 0x148   : > { %1296 = vst [vmem:[%s1734_s5] sm:$0xff] %v1295_v17  }
 0x149   : > { %1302 = vst [vmem:[%s1734_s5 + $0x8] sm:$0xff] %v1300_v21  }
 0x14a PF: > { %s15_s22 = sadd.s32 1, %s1550_s22   ;;  %s1735_s18 = smov %s1538_s19 }
 0x14b   : > { %p12_p12 = scmp.ge.s32.totalorder %s15_s22, 5   ;;  %s1736_s19 = smov %s1618_s26 }
 0x14c   : > { %s1737_s20 = smov %s1546_s21  ;;  %s1738_s21 = smov %s1740_s23 }
 0x14d   :  { %14 = sbr.rel (!%p12_p12) target bundleno = 3 (0x3), region = 118 }

// kernel: espnet_encoder_forward.58
= control target key start
LH: loop header
LB: loop body
LE: loop exit
PB: predicated region body
PF: predicated region fallthrough
CT: control target
= control target key end

     0   :  { %s720_s1 = inlined_call_operand.vmem [shape: bf16[384,128], index: 1, kind: input, shape index: {}]   ;;  %s721_s0 = inlined_call_operand.vmem [shape: bf16[32,384], index: 0, kind: input, shape index: {}]   ;;  %s722_s2 = inlined_call_operand.vmem [shape: f32[1,128], index: 2, kind: input, shape index: {}]   ;;  %s723_s3 = inlined_call_operand.vmem [shape: f32[1,128], index: 3, kind: input, shape index: {}]   ;;  %s724_s4 = inlined_call_operand.vmem [shape: f32[1,128], index: 4, kind: input, shape index: {}]   ;;  %s725_s5 = inlined_call_operand.vmem [shape: bf16[32,128], index: 5, kind: output, shape index: {}]  }
   0x1   :  { %v553_v0 = vld [vmem:[%s720_s1 + $0x78] sm:$0xff]   ;;  %v556_v3 = vld [vmem:[%s720_s1 + $0x70] sm:$0xff]   ;;  %v559_v6 = vld [vmem:[%s720_s1 + $0x68] sm:$0xff]  }
   0x2   :  { %v554_v1 = vld [vmem:[%s720_s1 + $0x38] sm:$0xff]   ;;  %495 = vmatprep.subr.bf16.mxu0 %v553_v0  ;;  %v557_v4 = vld [vmem:[%s720_s1 + $0x30] sm:$0xff]   ;;  %v560_v7 = vld [vmem:[%s720_s1 + $0x28] sm:$0xff]  }
   0x3   :  { %v555_v2 = vld [vmem:[%s720_s1 + $0xb8] sm:$0xff]   ;;  %496 = vmatpush3.bf16.msra.mxu0 %v554_v1  ;;  %v558_v5 = vld [vmem:[%s720_s1 + $0xb0] sm:$0xff]   ;;  %v561_v8 = vld [vmem:[%s720_s1 + $0xa8] sm:$0xff]  }
   0x4   :  { %533 = vmatprep.subr.bf16.mxu1 %v555_v2  ;;  %497 = vmatprep.subr.bf16.mxu0 %v556_v3  ;;  %v562_v9 = vld [vmem:[%s720_s1 + $0x60] sm:$0xff]   ;;  %v565_v12 = vld [vmem:[%s720_s1 + $0x58] sm:$0xff]   ;;  %v568_v15 = vld [vmem:[%s720_s1 + $0x50] sm:$0xff]  }
   0x5   :  { %534 = vmatpush3.bf16.msra.mxu1 %v555_v2  ;;  %v563_v10 = vld [vmem:[%s720_s1 + $0x20] sm:$0xff]   ;;  %v567_v13 = vld [vmem:[%s720_s1 + $0x98] sm:$0xff]   ;;  %v570_v16 = vld [vmem:[%s720_s1 + $0x90] sm:$0xff]  }
   0x6   :  { %535 = vmatprep.subr.bf16.mxu1 %v558_v5  ;;  %v564_v11 = vld [vmem:[%s720_s1 + $0xa0] sm:$0xff]   ;;  %v566_v14 = vld [vmem:[%s720_s1 + $0x18] sm:$0xff]   ;;  %v569_v17 = vld [vmem:[%s720_s1 + $0x10] sm:$0xff]  }
   0x7   :  { %498 = vmatpush3.bf16.msra.mxu0 %v557_v4  ;;  %v571_v18 = vld [vmem:[%s720_s1 + $0x48] sm:$0xff]   ;;  %v574_v21 = vld [vmem:[%s720_s1 + $0x40] sm:$0xff]  }
   0x8   :  { %499 = vmatprep.subr.bf16.mxu0 %v559_v6  ;;  %v572_v19 = vld [vmem:[%s720_s1 + $0x8] sm:$0xff]   ;;  %v576_v22 = vld [vmem:[%s720_s1 + $0x80] sm:$0xff]  }
   0x9   :  { %536 = vmatpush3.bf16.msra.mxu1 %v558_v5  ;;  %v573_v20 = vld [vmem:[%s720_s1 + $0x88] sm:$0xff]   ;;  %v579_v23 = vld [vmem:[%s721_s0 + $0x4] ss:$12 sps:$4 sm:$0xff]   ;;  %v473_v36 = vld [vmem:[%s722_s2] ss:$0 sm:$0xff] }
   0xa   :  { %537 = vmatprep.subr.bf16.mxu1 %v561_v8  ;;  %v580_v24 = vld [vmem:[%s721_s0 + $0x8] ss:$12 sps:$4 sm:$0xff]   ;;  %v575_v25 = vld [vmem:[%s720_s1] sm:$0xff]   ;;  %297 = vmatprep.mubr.bf16.mxu0 %v579_v23 }
   0xb   :  { %500 = vmatpush3.bf16.msra.mxu0 %v560_v7  ;;  %549 = vmatprep.mubr.bf16.mxu1 %v580_v24  ;;  %v577_v26 = vld [vmem:[%s721_s0] ss:$12 sps:$4 sm:$0xff]   ;;  %v582_v27 = vld [vmem:[%s721_s0 + $0x1c] ss:$12 sps:$4 sm:$0xff]   ;;  %v584_v29 = vld [vmem:[%s721_s0 + $0x18] ss:$12 sps:$4 sm:$0xff]  }
   0xc   :  { %501 = vmatprep.subr.bf16.mxu0 %v562_v9  ;;  %v581_v28 = vld [vmem:[%s721_s0 + $0x20] ss:$12 sps:$4 sm:$0xff]  }
   0xd   :  { %538 = vmatpush3.bf16.msra.mxu1 %v561_v8  ;;  %v474_v38 = vld [vmem:[%s723_s3] ss:$0 sm:$0xff] }
   0xe   :  { %539 = vmatprep.subr.bf16.mxu1 %v564_v11  ;;  %v475_v47 = vld [vmem:[%s724_s4] ss:$0 sm:$0xff] }
   0xf   :  { %502 = vmatpush3.bf16.msra.mxu0 %v563_v10 }
  0x10   :  { %503 = vmatprep.subr.bf16.mxu0 %v565_v12 }
  0x11   :  { %540 = vmatpush3.bf16.msra.mxu1 %v564_v11 }
  0x12   :  { %541 = vmatprep.subr.bf16.mxu1 %v567_v13 }
  0x13   :  { %504 = vmatpush3.bf16.msra.mxu0 %v566_v14 }
  0x14   :  { %505 = vmatprep.subr.bf16.mxu0 %v568_v15 }
  0x15   :  { %542 = vmatpush3.bf16.msra.mxu1 %v567_v13 }
  0x16   :  { %543 = vmatprep.subr.bf16.mxu1 %v570_v16 }
  0x17   :  { %506 = vmatpush3.bf16.msra.mxu0 %v569_v17 }
  0x18   :  { %507 = vmatprep.subr.bf16.mxu0 %v571_v18 }
  0x19   :  { %544 = vmatpush3.bf16.msra.mxu1 %v570_v16 }
  0x1a   :  { %545 = vmatprep.subr.bf16.mxu1 %v573_v20 }
  0x1b   :  { %508 = vmatpush3.bf16.msra.mxu0 %v572_v19 }
  0x1c   :  { %509 = vmatprep.subr.bf16.mxu0 %v574_v21 }
  0x1d   :  { %546 = vmatpush3.bf16.msra.mxu1 %v573_v20 }
  0x1e   :  { %547 = vmatprep.subr.bf16.mxu1 %v576_v22 }
  0x1f   :  { %510 = vmatpush3.bf16.msra.mxu0 %v575_v25 }
  0x21   :  { %548 = vmatpush3.bf16.msra.mxu1 %v576_v22 }
  0x22   :  { %298 = vmatmul.mubr.bf16.vlgmr.msra.gmra.mxu0 %v577_v26 }
  0x23   :  { %305 = vmatprep.mubr.bf16.mxu0 %v582_v27 }
  0x24   :  { %550 = vmatmul.mubr.bf16.vlgmr.msra.gmra.mxu1 %v581_v28 }
  0x2a   :  { %306 = vmatmul.mubr.bf16.gmra.mxu0 %v584_v29 }
  0xe2   :  { %v511_v30 = vpop.f32.mrf.mxu0 }
  0xe4   :  { %v512_v31 = vpop.f32.mrf.mxu0  ;;  %v551_v32 = vpop.f32.mrf.mxu1 }
  0xe5   :  { %v513_v33 = vadd.f32 %v512_v31, %v511_v30 }
  0xe6   :  { %v514_v34 = vpop.f32.mrf.mxu0  ;;  %v348_v35 = vpop.f32.mrf.mxu1 }
  0xe7   :  { %v349_v37 = vadd.f32 %v513_v33, %v348_v35 }
  0xe8   :  { %v515_v39 = vpop.f32.mrf.mxu0  ;;  %v552_v40 = vpop.f32.mrf.mxu1 }
  0xe9   :  { %v385_v41 = vmul.f32 %v473_v36, %v349_v37  ;;  %v516_v42 = vadd.f32 %v515_v39, %v514_v34 }
  0xea   :  { %v517_v43 = vpop.f32.mrf.mxu0  ;;  %v351_v44 = vpop.f32.mrf.mxu1 }
  0xeb   :  { %v396_v45 = vadd.f32 %v474_v38, %v385_v41  ;;  %v352_v46 = vadd.f32 %v516_v42, %v351_v44 }
  0xec   :  { %v518_v48 = vpop.f32.mrf.mxu0 }
  0xed   :  { %v386_v49 = vmul.f32 %v473_v36, %v352_v46  ;;  %v519_v50 = vadd.f32 %v518_v48, %v517_v43  ;;  %v411_v52 = vmul.f32 %v475_v47, %v396_v45  ;;  %vm400_vm0 = vcmp.ge.f32.partialorder %v396_v45, 0.0 }
  0xee   :  { %v520_v51 = vpop.f32.mrf.mxu0 }
  0xef   :  { %v397_v53 = vadd.f32 %v474_v38, %v386_v49  ;;  %v357_v54 = vadd.f32 %v551_v32, %v519_v50  ;;  %v415_v59 = vsel %vm400_vm0, %v396_v45, %v411_v52 }
  0xf0   :  { %v521_v55 = vpop.f32.mrf.mxu0 }
  0xf1   :  { %vm401_vm1 = vcmp.ge.f32.partialorder %v397_v53, 0.0  ;;  %v412_v56 = vmul.f32 %v475_v47, %v397_v53  ;;  %v387_v57 = vmul.f32 %v473_v36, %v357_v54  ;;  %v522_v58 = vadd.f32 %v521_v55, %v520_v51 }
  0xf3   :  { %v416_v60 = vsel %vm401_vm1, %v397_v53, %v412_v56  ;;  %v398_v61 = vadd.f32 %v474_v38, %v387_v57  ;;  %v360_v62 = vadd.f32 %v552_v40, %v522_v58 }
  0xf4   :  { %v487_v63 = vpack.c.bf16 %v416_v60, %v415_v59 }
  0xf5   :  { %v388_v0 = vmul.f32 %v473_v36, %v360_v62  ;;  %v413_v1 = vmul.f32 %v475_v47, %v398_v61  ;;  %vm402_vm2 = vcmp.ge.f32.partialorder %v398_v61, 0.0 }
  0xf6   :  { %488 = vst [vmem:[%s725_s5] sm:$0xff] %v487_v63  }
  0xf7   :  { %v399_v2 = vadd.f32 %v474_v38, %v388_v0  ;;  %v417_v4 = vsel %vm402_vm2, %v398_v61, %v413_v1 }
  0xf9   :  { %vm403_vm3 = vcmp.ge.f32.partialorder %v399_v2, 0.0  ;;  %v414_v3 = vmul.f32 %v475_v47, %v399_v2 }
  0xfb   :  { %v418_v5 = vsel %vm403_vm3, %v399_v2, %v414_v3 }
  0xfc   :  { %v492_v6 = vpack.c.bf16 %v418_v5, %v417_v4 }
  0xfe   :  { %494 = vst [vmem:[%s725_s5 + $0x8] sm:$0xff] %v492_v6  }

// kernel: espnet_encoder_forward.55
= control target key start
LH: loop header
LB: loop body
LE: loop exit
PB: predicated region body
PF: predicated region fallthrough
CT: control target
= control target key end

     0   :  { %s756_s26 = smov 0   ;;  %s811_s0 = inlined_call_operand.<no memory space> [shape: f32[1,1], index: 0, kind: input, shape index: {}]   ;;  %s812_s1 = inlined_call_operand.vmem [shape: f32[2,16,4], index: 1, kind: input, shape index: {}]   ;;  %s813_s2 = inlined_call_operand.vmem [shape: f32[2,4,16], index: 2, kind: input, shape index: {}]   ;;  %s814_s3 = inlined_call_operand.vmem [shape: f32[2,32,16], index: 3, kind: input, shape index: {}]   ;;  %s815_s4 = inlined_call_operand.vmem [shape: f32[16,16], index: 4, kind: input, shape index: {}]   ;;  %s816_s5 = inlined_call_operand.vmem [shape: f32[16,1], index: 5, kind: input, shape index: {}]   ;;  %s817_s6 = inlined_call_operand.vmem [shape: f32[2,32,16], index: 6, kind: input, shape index: {}]   ;;  %s818_s7 = inlined_call_operand.vmem [shape: f32[2,32,16], index: 7, kind: output, shape index: {}]  }
   0x1   :  { %v12_v0 = vstv %s811_s0 }
   0x2   :  { %13 = vst [vmem:[#allocation2] sm:$0x1] %v12_v0 }
   0x3 LB: > { %s639_s27 = sadd.s32 4294967295, %s708_s26   ;;  %p643_p0 = scmp.ge.s32.totalorder %s708_s26, 1  ;;  %s708_s26 = sphi %s756_s26, %s19_s26  }
   0x4   : > { %p268_p1 = scmp.lt.s32.totalorder %s708_s26, 3 }
   0x6   : > { %p269_p2 = pnand %p643_p0, %p268_p1 }
   0x7   : > { %p314_p3 = scmp.lt.s32.totalorder (!%p269_p2), %s639_s27, 1 }
   0x8   : > { %272 = sbr.rel (%p269_p2) target bundleno = 637 (0x27d), region = 48 }
   0xd   : > { %v710_v1 = vmov 0.0   ;;  %vm711_vm0 = vmmov 0   ;;  %s820_s27 = smov (!%p314_p3, %s639_s27), 1  ;;  %vm358_vm1 = vcmask 1041408   ;;  %vm354_vm2 = vcmask 31744   ;;  %v413_v8 = vld [vmem:[%s816_s5] sm:$0xff] }
   0xe   : > { %671 = vmatprep.subr.bf16.mxu0 %v710_v1  ;;  %673 = vmatprep.mubr.msk.bf16.mxu0 %vm711_vm0, %v710_v1  ;;  %s646_s0 = sshll.u32 %s820_s27, 2  ;;  %s660_s8 = sshll.u32 %s820_s27, 4  ;;  %v712_v9 = vmov 0   ;;  %v414_v10 = vld [vmem:[%s816_s5 + $0x8] sm:$0xff]  ;;  %v409_v17 = vld [vmem:[%s815_s4] sm:$0xff]  ;;  %vm425_vm5 = vcmask 130048  }
   0xf   : > { %677 = vmatprep.subr.bf16.mxu1 %v710_v1  ;;  %679 = vmatprep.mubr.msk.bf16.mxu1 %vm711_vm0, %v710_v1  ;;  %s322_s30 = scalar_lea.vmem %s813_s2, %s646_s0  ;;  %s318_s11 = scalar_lea.vmem %s812_s1, %s660_s8  ;;  %v410_v18 = vld [vmem:[%s815_s4 + $0x8] sm:$0xff]  ;;  %v657_v26 = vld [vmem:[#allocation2] ss:$0 sm:$0xff] }
  0x10   : > { %v342_v2 = vld [vmem:[%s322_s30] sm:$0xf]  ;;  %v340_v5 = vld [vmem:[%s318_s11 + $0x8] sm:$0xff]  ;;  %700 = vset.pattern.permute.xlu0 %v712_v9  ;;  %701 = vset.pattern.permute.xlu1 %v712_v9  ;;  %v411_v22 = vpack.c.bf16 %v410_v18, %v409_v17  ;;  %s788_s20 = sshll.u32 %s820_s27, 5 }
  0x11   : > { %v343_v3 = vpack.c.bf16 %v342_v2, %v342_v2  ;;  %v339_v4 = vld [vmem:[%s318_s11] sm:$0xff]  ;;  %417 = vperm.xlu0 %700, %v413_v8   ;;  %s327_s23 = scalar_lea.vmem %s814_s3, %s788_s20  ;;  %533 = vperm.xlu1 %701, %v657_v26   ;;  %s332_s27 = scalar_lea.vmem %s817_s6, %s788_s20 }
  0x12   : > { %v341_v7 = vpack.c.bf16 %v340_v5, %v339_v4  ;;  %v344_v23 = vld [vmem:[%s327_s23] sm:$0xff]  ;;  %v345_v24 = vld [vmem:[%s327_s23 + $0x8] sm:$0xff]  ;;  %v346_v35 = vld [vmem:[%s327_s23 + $0x10] sm:$0xff]  ;;  %s337_s29 = scalar_lea.vmem %s818_s7, %s788_s20 }
  0x13   : > { %v360_v6 = vsel %vm358_vm1, %v343_v3, 0  ;;  %v348_v25 = vpack.c.bf16 %v345_v24, %v344_v23  ;;  %v347_v36 = vld [vmem:[%s327_s23 + $0x18] sm:$0xff]  ;;  %v352_v41 = vld [vmem:[%s332_s27 + $0x10] sm:$0xff]  ;;  %v350_v44 = vld [vmem:[%s332_s27] sm:$0xff] }
  0x14   : > { %672 = vmatpush3.bf16.msra.mxu0 %v360_v6  ;;  %v349_v38 = vpack.c.bf16 %v347_v36, %v346_v35  ;;  %v353_v48 = vld [vmem:[%s332_s27 + $0x18] sm:$0xff]  ;;  %v351_v51 = vld [vmem:[%s332_s27 + $0x8] sm:$0xff] }
  0x15   : > { %422 = vperm.xlu0 %700, %v414_v10  }
  0x17   : > { %674 = vmatmul.mubr.msk.bf16.vlgmr.msra.gmra.mxu0 %vm354_vm2, %v341_v7 }
  0x18   : > { %685 = vmatprep.mubr.msk.bf16.mxu0 %vm425_vm5, %v348_v25 }
  0x8c   : > { %v418_v27 = vpop.permute.xlu0 %417  ;;  %v534_v39 = vpop.permute.xlu1 %533 }
  0x90   : > { %v423_v30 = vpop.permute.xlu0 %422 }
  0xd7   : > { %v396_v11 = vpop.f32.mrf.mxu0 }
  0xd8   : > { %v405_v13 = vmul.f32 0.01, %v396_v11  ;;  %vm403_vm3 = vcmp.ge.f32.partialorder %v396_v11, 0.0 }
  0xd9   : > { %v675_v12 = vpop.f32.mrf.mxu0 }
  0xda   : > { %v407_v19 = vsel %vm403_vm3, %v396_v11, %v405_v13 }
  0xdb   : > { %v399_v14 = vpop.f32.mrf.mxu0 }
  0xdc   : > { %vm404_vm4 = vcmp.ge.f32.partialorder %v399_v14, 0.0  ;;  %v406_v15 = vmul.f32 0.01, %v399_v14 }
  0xdd   : > { %v676_v16 = vpop.f32.mrf.mxu0 }
  0xde   : > { %v408_v20 = vsel %vm404_vm4, %v399_v14, %v406_v15 }
  0xdf   : > { %v412_v21 = vpack.c.bf16 %v408_v20, %v407_v19 }
  0xe1   : > { %678 = vmatpush3.bf16.msra.mxu1 %v412_v21 }
  0xe4   : > { %680 = vmatmul.mubr.msk.bf16.vlgmr.msra.gmra.mxu1 %vm425_vm5, %v411_v22 }
 0x1a4   : > { %v463_v28 = vpop.f32.mrf.mxu1 }
 0x1a5   : > { %v464_v32 = vadd.f32 %v463_v28, %v418_v27 }
 0x1a6   : > { %v681_v29 = vpop.f32.mrf.mxu1 }
 0x1a8   : > { %v466_v31 = vpop.f32.mrf.mxu1 }
 0x1a9   : > { %v467_v33 = vadd.f32 %v466_v31, %v423_v30 }
 0x1aa   : > { %v682_v34 = vpop.f32.mrf.mxu1 }
 0x1ab   : > { %v470_v37 = vpack.c.bf16 %v467_v33, %v464_v32 }
 0x1ad   : > { %683 = vmatprep.subr.bf16.mxu0 %v470_v37 }
 0x1ae   : > { %684 = vmatpush3.bf16.msra.mxu0 %v470_v37 }
 0x1b1   : > { %686 = vmatmul.mubr.msk.bf16.vlgmr.msra.gmra.mxu0 %vm425_vm5, %v349_v38 }
 0x271   : > { %v687_v40 = vpop.f32.mrf.mxu0 }
 0x272   : > { %v538_v42 = vmul.f32 %v687_v40, %v534_v39 }
 0x273   : > { %v511_v43 = vpop.f32.mrf.mxu0 }
 0x274   : > { %v536_v45 = vmul.f32 %v534_v39, %v511_v43  ;;  %v542_v46 = vadd.f32 %v538_v42, %v352_v41 }
 0x275   : > { %v688_v47 = vpop.f32.mrf.mxu0 }
 0x276   : > { %v539_v49 = vmul.f32 %v688_v47, %v534_v39  ;;  %v540_v50 = vadd.f32 %v536_v45, %v350_v44  ;;  %546 = vst.msk [vmem:[%s337_s29 + $0x10] sm:$0xff] %vm425_vm5, %v542_v46 }
 0x277   : > { %v514_v52 = vpop.f32.mrf.mxu0 }
 0x278   : > { %v543_v53 = vadd.f32 %v539_v49, %v353_v48  ;;  %544 = vst.msk [vmem:[%s337_s29] sm:$0xff] %vm425_vm5, %v540_v50  ;;  %v537_v54 = vmul.f32 %v534_v39, %v514_v52 }
 0x27a   : > { %547 = vst.msk [vmem:[%s337_s29 + $0x18] sm:$0xff] %vm425_vm5, %v543_v53  ;;  %v541_v55 = vadd.f32 %v537_v54, %v351_v51 }
 0x27c   : > { %545 = vst.msk [vmem:[%s337_s29 + $0x8] sm:$0xff] %vm425_vm5, %v541_v55 }
 0x27d PF: > { %s19_s26 = sadd.s32 1, %s708_s26  }
 0x27e   : > { %p16_p4 = scmp.ge.s32.totalorder %s19_s26, 4  }
 0x280   :  { %18 = sbr.rel (!%p16_p4) target bundleno = 3 (0x3), region = 87 }

</bundles_post_ra>
